<compile_context>
chip_gen: v6e
topology: v6e:2x2x1
jax: 0.10.0
libtpu: 0.0.40
codegen_flags: <defaults>
</compile_context>

<pallas_src>
import jax
import jax.numpy as jnp
from jax.experimental import pallas as pl
from jax.experimental.pallas import tpu as pltpu

_BN_EPS = 1e-5


# ----------------------------------------------------------------------------
# Kernels
# ----------------------------------------------------------------------------
def upsample_kernel(x_ref, w_ref, b_ref, o_ref):
    """ConvTranspose2d(k=2, s=2): stride == kernel, so a pure per-pixel matmul.

    x_ref: (1, TM, Cin)   rows = flattened (h, w) pixels of one batch element
    w_ref: (Cin, 4*Cout)  columns ordered (a, b, cout)
    b_ref: (1, 4*Cout)
    o_ref: (1, TM, 4*Cout)
    """
    y = jnp.dot(x_ref[0].astype(jnp.float32), w_ref[...],
                preferred_element_type=jnp.float32) + b_ref[...]
    o_ref[0] = y.astype(o_ref.dtype)


def _im2col_conv3x3(pad_ref, w_ref, Ho, Wo):
    """Single im2col dot: patches (Ho*Wo, 9*Cin) @ w (9*Cin, Cout)."""
    Cin = pad_ref.shape[-1]
    pieces = [
        pad_ref[kh:kh + Ho, kw:kw + Wo, :].reshape(Ho * Wo, Cin)
        for kh in range(3) for kw in range(3)
    ]
    patches = jnp.concatenate(pieces, axis=1)            # (Ho*Wo, 9*Cin)
    return jnp.dot(patches, w_ref[...], preferred_element_type=jnp.float32)


def _make_block_kernel(use_att):
    """Fused ConvBlock for one batch element.

    concat(up, skip) -> Conv3x3+BN+ReLU -> Conv3x3+BN+ReLU
    -> (optional) channel attention: GAP -> FC -> ReLU -> FC -> sigmoid -> scale.

    The intermediate activation (y1), the padded images and the attention
    vector all live only in VMEM.
    """

    def kernel(up_ref, skip_ref, w1_ref, s1_ref, h1_ref,
               w2_ref, s2_ref, h2_ref, *rest):
        if use_att:
            (aw1_ref, ab1_ref, aw2_ref, ab2_ref,
             o_ref, pad1_ref, pad2_ref) = rest
        else:
            o_ref, pad1_ref, pad2_ref = rest
        _, Ho, Wo, Cout = o_ref.shape
        C = up_ref.shape[-1]

        # concat(up, skip) with a 1-px zero halo, built directly in VMEM.
        pad1_ref[...] = jnp.zeros_like(pad1_ref)
        pad1_ref[1:Ho + 1, 1:Wo + 1, :C] = up_ref[0].astype(jnp.float32)
        pad1_ref[1:Ho + 1, 1:Wo + 1, C:] = skip_ref[0].astype(jnp.float32)
        y1 = _im2col_conv3x3(pad1_ref, w1_ref, Ho, Wo)       # (Ho*Wo, Cout)
        y1 = jnp.maximum(y1 * s1_ref[...] + h1_ref[...], 0.0)

        # second conv: y1 never leaves VMEM.
        pad2_ref[...] = jnp.zeros_like(pad2_ref)
        pad2_ref[1:Ho + 1, 1:Wo + 1, :] = y1.reshape(Ho, Wo, Cout)
        y2 = _im2col_conv3x3(pad2_ref, w2_ref, Ho, Wo)       # (Ho*Wo, Cout)
        y2 = jnp.maximum(y2 * s2_ref[...] + h2_ref[...], 0.0)

        if use_att:
            # Channel attention on the already-resident y2: zero extra HBM
            # traffic.  The GAP row is broadcast to a full sublane tile (M=8)
            # so the tiny FCs are plain well-formed MXU matmuls.
            gap = jnp.mean(y2, axis=0, keepdims=True)        # (1, Cout)
            g8 = jnp.broadcast_to(gap, (8, Cout))
            h = jnp.maximum(
                jnp.dot(g8, aw1_ref[...], preferred_element_type=jnp.float32)
                + ab1_ref[...], 0.0)
            z = (jnp.dot(h, aw2_ref[...], preferred_element_type=jnp.float32)
                 + ab2_ref[...])
            att = 1.0 / (1.0 + jnp.exp(-z[0:1, :]))          # (1, Cout)
            y2 = y2 * att

        o_ref[...] = y2.reshape(1, Ho, Wo, Cout).astype(o_ref.dtype)

    return kernel


# ----------------------------------------------------------------------------
# Wrappers
# ----------------------------------------------------------------------------
def _pick_row_tile(total, cap=512):
    for t in (cap, 256, 128, 64, 32, 16, 8):
        if t <= total and total % t == 0:
            return t
    return total


def conv_transpose_2x2(x, w, b):
    """x: (N, H, W, Cin), w: (Cin, 2, 2, Cout), b: (Cout,) -> (N, 2H, 2W, Cout)."""
    N, H, W, Cin = x.shape
    Cout = w.shape[-1]
    HW = H * W
    tm = _pick_row_tile(HW)
    x_flat = x.reshape(N, HW, Cin)
    w_flat = w.reshape(Cin, 4 * Cout)                 # columns (a, b, cout)
    b_flat = jnp.tile(b, 4).reshape(1, 4 * Cout)
    y = pl.pallas_call(
        upsample_kernel,
        out_shape=jax.ShapeDtypeStruct((N, HW, 4 * Cout), x.dtype),
        grid=(N, HW // tm),
        in_specs=[
            pl.BlockSpec((1, tm, Cin), lambda n, m: (n, m, 0)),
            pl.BlockSpec((Cin, 4 * Cout), lambda n, m: (0, 0)),
            pl.BlockSpec((1, 4 * Cout), lambda n, m: (0, 0)),
        ],
        out_specs=pl.BlockSpec((1, tm, 4 * Cout), lambda n, m: (n, m, 0)),
        compiler_params=pltpu.CompilerParams(
            dimension_semantics=("parallel", "parallel")),
    )(x_flat, w_flat, b_flat)
    # 2x2 sub-pixel interleave (one small XLA relayout per level, see TODO).
    y = y.reshape(N, H, W, 2, 2, Cout)
    y = jnp.transpose(y, (0, 1, 3, 2, 4, 5)).reshape(N, 2 * H, 2 * W, Cout)
    return y


def decoder_block(up, skip, w1_flat, s1, h1, w2_flat, s2, h2, att_params=None):
    """Fused ConvBlock (+ optional channel attention).  up/skip: (N, Ho, Wo, C)."""
    N, Ho, Wo, C = up.shape
    Cout = w1_flat.shape[-1]
    use_att = att_params is not None
    in_specs = [
        pl.BlockSpec((1, Ho, Wo, C), lambda n: (n, 0, 0, 0)),
        pl.BlockSpec((1, Ho, Wo, C), lambda n: (n, 0, 0, 0)),
        pl.BlockSpec(w1_flat.shape, lambda n: (0, 0)),
        pl.BlockSpec((1, Cout), lambda n: (0, 0)),
        pl.BlockSpec((1, Cout), lambda n: (0, 0)),
        pl.BlockSpec(w2_flat.shape, lambda n: (0, 0)),
        pl.BlockSpec((1, Cout), lambda n: (0, 0)),
        pl.BlockSpec((1, Cout), lambda n: (0, 0)),
    ]
    args = [up, skip, w1_flat, s1, h1, w2_flat, s2, h2]
    if use_att:
        aw1, ab1, aw2, ab2 = att_params
        in_specs += [
            pl.BlockSpec(aw1.shape, lambda n: (0, 0)),
            pl.BlockSpec(ab1.shape, lambda n: (0, 0)),
            pl.BlockSpec(aw2.shape, lambda n: (0, 0)),
            pl.BlockSpec(ab2.shape, lambda n: (0, 0)),
        ]
        args += [aw1, ab1, aw2, ab2]
    return pl.pallas_call(
        _make_block_kernel(use_att),
        out_shape=jax.ShapeDtypeStruct((N, Ho, Wo, Cout), up.dtype),
        grid=(N,),
        in_specs=in_specs,
        out_specs=pl.BlockSpec((1, Ho, Wo, Cout), lambda n: (n, 0, 0, 0)),
        scratch_shapes=[pltpu.VMEM((Ho + 2, Wo + 2, 2 * C), jnp.float32),
                        pltpu.VMEM((Ho + 2, Wo + 2, Cout), jnp.float32)],
        compiler_params=pltpu.CompilerParams(
            dimension_semantics=("parallel",)),
    )(*args)


# ----------------------------------------------------------------------------
# Decoder parameters & forward
# ----------------------------------------------------------------------------
def _fold_bn(conv_b, gamma, beta, mean, var):
    scale = gamma * jax.lax.rsqrt(var + _BN_EPS)
    shift = beta + (conv_b - mean) * scale
    return scale.reshape(1, -1), shift.reshape(1, -1)


def init_decoder_params(key, in_channels, skip_channels, depth, use_att=True):
    params = []
    c_in = in_channels
    for i in reversed(range(depth)):
        c_out = skip_channels[i]
        key, *ks = jax.random.split(key, 20)
        ks = iter(ks)
        p = dict(
            up_w=0.1 * jax.random.normal(next(ks), (c_in, 2, 2, c_out), jnp.float32),
            up_b=0.01 * jax.random.normal(next(ks), (c_out,), jnp.float32),
            conv1_w=0.1 * jax.random.normal(next(ks), (3, 3, 2 * c_out, c_out), jnp.float32),
            conv1_b=0.01 * jax.random.normal(next(ks), (c_out,), jnp.float32),
            bn1_gamma=1.0 + 0.1 * jax.random.normal(next(ks), (c_out,), jnp.float32),
            bn1_beta=0.1 * jax.random.normal(next(ks), (c_out,), jnp.float32),
            bn1_mean=jnp.zeros((c_out,), jnp.float32),
            bn1_var=jnp.ones((c_out,), jnp.float32),
            conv2_w=0.1 * jax.random.normal(next(ks), (3, 3, c_out, c_out), jnp.float32),
            conv2_b=0.01 * jax.random.normal(next(ks), (c_out,), jnp.float32),
            bn2_gamma=1.0 + 0.1 * jax.random.normal(next(ks), (c_out,), jnp.float32),
            bn2_beta=0.1 * jax.random.normal(next(ks), (c_out,), jnp.float32),
            bn2_mean=jnp.zeros((c_out,), jnp.float32),
            bn2_var=jnp.ones((c_out,), jnp.float32),
        )
        if use_att:
            p.update(
                att_w1=0.1 * jax.random.normal(next(ks), (c_out, c_out), jnp.float32),
                att_b1=0.01 * jax.random.normal(next(ks), (1, c_out), jnp.float32),
                att_w2=0.1 * jax.random.normal(next(ks), (c_out, c_out), jnp.float32),
                att_b2=0.01 * jax.random.normal(next(ks), (1, c_out), jnp.float32),
            )
        params.append(p)
        c_in = c_out
    return params


def decoder_forward(params, x_nchw, skips_nchw):
    # NCHW at the boundary (PyTorch convention), NHWC inside.
    x = jnp.transpose(x_nchw, (0, 2, 3, 1))
    skips = [jnp.transpose(s, (0, 2, 3, 1)) for s in skips_nchw]
    for p, skip in zip(params, reversed(skips)):
        Cout = p['up_w'].shape[-1]
        up = conv_transpose_2x2(x, p['up_w'], p['up_b'])

        s1, h1 = _fold_bn(p['conv1_b'], p['bn1_gamma'], p['bn1_beta'],
                          p['bn1_mean'], p['bn1_var'])
        s2, h2 = _fold_bn(p['conv2_b'], p['bn2_gamma'], p['bn2_beta'],
                          p['bn2_mean'], p['bn2_var'])
        w1_flat = p['conv1_w'].reshape(9 * 2 * Cout, Cout)   # rows (kh, kw, cin)
        w2_flat = p['conv2_w'].reshape(9 * Cout, Cout)

        att_params = None
        if 'att_w1' in p:
            att_params = (p['att_w1'], p['att_b1'], p['att_w2'], p['att_b2'])
        x = decoder_block(up, skip, w1_flat, s1, h1, w2_flat, s2, h2,
                          att_params)
    return jnp.transpose(x, (0, 3, 1, 2))


# ----------------------------------------------------------------------------
# Pure-JAX reference (XLA convs) for a correctness check
# ----------------------------------------------------------------------------
def _reference_forward(params, x_nchw, skips_nchw):
    x = jnp.transpose(x_nchw, (0, 2, 3, 1))
    skips = [jnp.transpose(s, (0, 2, 3, 1)) for s in skips_nchw]
    for p, skip in zip(params, reversed(skips)):
        N, H, W, _ = x.shape
        Cout = p['up_w'].shape[-1]
        up = jnp.einsum('nhwc,cabo->nhawbo', x, p['up_w'],
                        precision=jax.lax.Precision.HIGHEST)
        up = up.reshape(N, 2 * H, 2 * W, Cout) + p['up_b']
        z = jnp.concatenate([up, skip], axis=-1)

        def conv_bn_relu(z, w, b, gamma, beta, mean, var):
            y = jax.lax.conv_general_dilated(
                z, w, (1, 1), ((1, 1), (1, 1)),
                dimension_numbers=('NHWC', 'HWIO', 'NHWC'),
                precision=jax.lax.Precision.HIGHEST) + b
            y = (y - mean) * jax.lax.rsqrt(var + _BN_EPS) * gamma + beta
            return jnp.maximum(y, 0.0)

        z = conv_bn_relu(z, p['conv1_w'], p['conv1_b'], p['bn1_gamma'],
                         p['bn1_beta'], p['bn1_mean'], p['bn1_var'])
        z = conv_bn_relu(z, p['conv2_w'], p['conv2_b'], p['bn2_gamma'],
                         p['bn2_beta'], p['bn2_mean'], p['bn2_var'])
        if 'att_w1' in p:
            g = jnp.mean(z, axis=(1, 2))
            h = jnp.maximum(jnp.dot(g, p['att_w1'],
                                    precision=jax.lax.Precision.HIGHEST)
                            + p['att_b1'], 0.0)
            a = jax.nn.sigmoid(jnp.dot(h, p['att_w2'],
                                       precision=jax.lax.Precision.HIGHEST)
                               + p['att_b2'])
            z = z * a[:, None, None, :]
        x = z
    return jnp.transpose(x, (0, 3, 1, 2))


# ----------------------------------------------------------------------------
if __name__ == "__main__":
    key = jax.random.PRNGKey(0)

    # Small Decoder config: depth=2, skip_channels=[8, 16], in_channels=32.
    batch = 2
    in_channels = 32
    skip_channels = [8, 16]
    depth = 2

    k_x, k_s0, k_s1, k_p = jax.random.split(key, 4)
    x = jax.random.normal(k_x, (batch, in_channels, 4, 4), jnp.float32)
    skips = [
        jax.random.normal(k_s0, (batch, skip_channels[0], 16, 16), jnp.float32),
        jax.random.normal(k_s1, (batch, skip_channels[1], 8, 8), jnp.float32),
    ]
    params = init_decoder_params(k_p, in_channels, skip_channels, depth,
                                 use_att=True)

    fwd = jax.jit(decoder_forward)
    out = jax.block_until_ready(fwd(params, x, skips))
    assert out.shape == (batch, skip_channels[0], 16, 16), out.shape

    ref = jax.block_until_ready(_reference_forward(params, x, skips))
    err = float(jnp.max(jnp.abs(out - ref)))
    assert jnp.allclose(out, ref, rtol=1e-2, atol=1e-2), err

    print("KERNEL_OK")
</pallas_src>

<mosaic_0001>
module attributes {stable_mosaic.version = 11 : i64} {
  func.func @upsample_kernel(%arg0: i32, %arg1: i32, %arg2: memref<1x16x32xf32, #tpu.memory_space<vmem>>, %arg3: memref<32x64xf32, #tpu.memory_space<vmem>>, %arg4: memref<1x64xf32, #tpu.memory_space<vmem>>, %arg5: memref<1x16x64xf32, #tpu.memory_space<vmem>>) attributes {dimension_semantics = [#tpu.dimension_semantics<parallel>, #tpu.dimension_semantics<parallel>], iteration_bounds = array<i64: 2, 1>, scalar_prefetch = 0 : i64, scratch_operands = 0 : i64, tpu.core_type = #tpu.core_type<tc>, window_params = [{transform_indices = @transform_0, window_bounds = array<i64: 1, 16, 32>}, {pipeline_mode = #tpu.pipeline_mode<synchronous>, transform_indices = @transform_1, window_bounds = array<i64: 32, 64>}, {pipeline_mode = #tpu.pipeline_mode<synchronous>, transform_indices = @transform_2, window_bounds = array<i64: 1, 64>}, {transform_indices = @transform_3, window_bounds = array<i64: 1, 16, 64>}]} {
    %c0 = arith.constant 0 : index
    %c0_0 = arith.constant 0 : index
    %c0_1 = arith.constant 0 : index
    %0 = vector.load %arg2[%c0, %c0_0, %c0_1] : memref<1x16x32xf32, #tpu.memory_space<vmem>>, vector<1x16x32xf32>
    %1 = vector.shape_cast %0 : vector<1x16x32xf32> to vector<16x32xf32>
    %c0_2 = arith.constant 0 : index
    %c0_3 = arith.constant 0 : index
    %2 = vector.load %arg3[%c0_2, %c0_3] : memref<32x64xf32, #tpu.memory_space<vmem>>, vector<32x64xf32>
    %cst = arith.constant dense<0.000000e+00> : vector<16x64xf32>
    %3 = tpu.matmul %1, %2, %cst {dimension_numbers = #tpu.dot_dimension_numbers<[1], [0], [0], [1], [0, 0, 1, 1], [], []>} : vector<16x32xf32>, vector<32x64xf32>, vector<16x64xf32> -> vector<16x64xf32>
    %c0_4 = arith.constant 0 : index
    %c0_5 = arith.constant 0 : index
    %4 = vector.load %arg4[%c0_4, %c0_5] : memref<1x64xf32, #tpu.memory_space<vmem>>, vector<1x64xf32>
    %5 = vector.broadcast %4 : vector<1x64xf32> to vector<16x64xf32>
    %6 = arith.addf %3, %5 : vector<16x64xf32>
    %c0_6 = arith.constant 0 : index
    %c0_7 = arith.constant 0 : index
    %c0_8 = arith.constant 0 : index
    %7 = vector.load %arg5[%c0_6, %c0_7, %c0_8] : memref<1x16x64xf32, #tpu.memory_space<vmem>>, vector<1x16x64xf32>
    %8 = vector.shape_cast %7 : vector<1x16x64xf32> to vector<16x64xf32>
    %9 = vector.shape_cast %6 : vector<16x64xf32> to vector<1x16x64xf32>
    tpu.vector_store %arg5[%c0_6, %c0_7, %c0_8], %9 {strides = array<i32>} : memref<1x16x64xf32, #tpu.memory_space<vmem>>, vector<1x16x64xf32>,
    return
  }
  func.func @transform_0(%arg0: i32, %arg1: i32) -> (i32, i32, i32) {
    %c0_i32 = arith.constant 0 : i32
    %c0_i32_0 = arith.constant 0 : i32
    return %arg0, %arg1, %c0_i32 : i32, i32, i32
  }
  func.func @transform_1(%arg0: i32, %arg1: i32) -> (i32, i32) {
    %c0_i32 = arith.constant 0 : i32
    %c0_i32_0 = arith.constant 0 : i32
    %c0_i32_1 = arith.constant 0 : i32
    return %c0_i32, %c0_i32_0 : i32, i32
  }
  func.func @transform_2(%arg0: i32, %arg1: i32) -> (i32, i32) {
    %c0_i32 = arith.constant 0 : i32
    %c0_i32_0 = arith.constant 0 : i32
    %c0_i32_1 = arith.constant 0 : i32
    return %c0_i32, %c0_i32_0 : i32, i32
  }
  func.func @transform_3(%arg0: i32, %arg1: i32) -> (i32, i32, i32) {
    %c0_i32 = arith.constant 0 : i32
    %c0_i32_0 = arith.constant 0 : i32
    return %arg0, %arg1, %c0_i32 : i32, i32, i32
  }
}

module attributes {stable_mosaic.version = 11 : i64} {
  func.func @upsample_kernel(%arg0: i32, %arg1: i32, %arg2: memref<1x64x16xf32, #tpu.memory_space<vmem>>, %arg3: memref<16x32xf32, #tpu.memory_space<vmem>>, %arg4: memref<1x32xf32, #tpu.memory_space<vmem>>, %arg5: memref<1x64x32xf32, #tpu.memory_space<vmem>>) attributes {dimension_semantics = [#tpu.dimension_semantics<parallel>, #tpu.dimension_semantics<parallel>], iteration_bounds = array<i64: 2, 1>, scalar_prefetch = 0 : i64, scratch_operands = 0 : i64, tpu.core_type = #tpu.core_type<tc>, window_params = [{transform_indices = @transform_0, window_bounds = array<i64: 1, 64, 16>}, {pipeline_mode = #tpu.pipeline_mode<synchronous>, transform_indices = @transform_1, window_bounds = array<i64: 16, 32>}, {pipeline_mode = #tpu.pipeline_mode<synchronous>, transform_indices = @transform_2, window_bounds = array<i64: 1, 32>}, {transform_indices = @transform_3, window_bounds = array<i64: 1, 64, 32>}]} {
    %c0 = arith.constant 0 : index
    %c0_0 = arith.constant 0 : index
    %c0_1 = arith.constant 0 : index
    %0 = vector.load %arg2[%c0, %c0_0, %c0_1] : memref<1x64x16xf32, #tpu.memory_space<vmem>>, vector<1x64x16xf32>
    %1 = vector.shape_cast %0 : vector<1x64x16xf32> to vector<64x16xf32>
    %c0_2 = arith.constant 0 : index
    %c0_3 = arith.constant 0 : index
    %2 = vector.load %arg3[%c0_2, %c0_3] : memref<16x32xf32, #tpu.memory_space<vmem>>, vector<16x32xf32>
    %cst = arith.constant dense<0.000000e+00> : vector<64x32xf32>
    %3 = tpu.matmul %1, %2, %cst {dimension_numbers = #tpu.dot_dimension_numbers<[1], [0], [0], [1], [0, 0, 1, 1], [], []>} : vector<64x16xf32>, vector<16x32xf32>, vector<64x32xf32> -> vector<64x32xf32>
    %c0_4 = arith.constant 0 : index
    %c0_5 = arith.constant 0 : index
    %4 = vector.load %arg4[%c0_4, %c0_5] : memref<1x32xf32, #tpu.memory_space<vmem>>, vector<1x32xf32>
    %5 = vector.broadcast %4 : vector<1x32xf32> to vector<64x32xf32>
    %6 = arith.addf %3, %5 : vector<64x32xf32>
    %c0_6 = arith.constant 0 : index
    %c0_7 = arith.constant 0 : index
    %c0_8 = arith.constant 0 : index
    %7 = vector.load %arg5[%c0_6, %c0_7, %c0_8] : memref<1x64x32xf32, #tpu.memory_space<vmem>>, vector<1x64x32xf32>
    %8 = vector.shape_cast %7 : vector<1x64x32xf32> to vector<64x32xf32>
    %9 = vector.shape_cast %6 : vector<64x32xf32> to vector<1x64x32xf32>
    tpu.vector_store %arg5[%c0_6, %c0_7, %c0_8], %9 {strides = array<i32>} : memref<1x64x32xf32, #tpu.memory_space<vmem>>, vector<1x64x32xf32>,
    return
  }
  func.func @transform_0(%arg0: i32, %arg1: i32) -> (i32, i32, i32) {
    %c0_i32 = arith.constant 0 : i32
    %c0_i32_0 = arith.constant 0 : i32
    return %arg0, %arg1, %c0_i32 : i32, i32, i32
  }
  func.func @transform_1(%arg0: i32, %arg1: i32) -> (i32, i32) {
    %c0_i32 = arith.constant 0 : i32
    %c0_i32_0 = arith.constant 0 : i32
    %c0_i32_1 = arith.constant 0 : i32
    return %c0_i32, %c0_i32_0 : i32, i32
  }
  func.func @transform_2(%arg0: i32, %arg1: i32) -> (i32, i32) {
    %c0_i32 = arith.constant 0 : i32
    %c0_i32_0 = arith.constant 0 : i32
    %c0_i32_1 = arith.constant 0 : i32
    return %c0_i32, %c0_i32_0 : i32, i32
  }
  func.func @transform_3(%arg0: i32, %arg1: i32) -> (i32, i32, i32) {
    %c0_i32 = arith.constant 0 : i32
    %c0_i32_0 = arith.constant 0 : i32
    return %arg0, %arg1, %c0_i32 : i32, i32, i32
  }
}

module attributes {stable_mosaic.version = 11 : i64} {
  func.func @kernel(%arg0: i32, %arg1: memref<1x8x8x16xf32, #tpu.memory_space<vmem>>, %arg2: memref<1x8x8x16xf32, #tpu.memory_space<vmem>>, %arg3: memref<288x16xf32, #tpu.memory_space<vmem>>, %arg4: memref<1x16xf32, #tpu.memory_space<vmem>>, %arg5: memref<1x16xf32, #tpu.memory_space<vmem>>, %arg6: memref<144x16xf32, #tpu.memory_space<vmem>>, %arg7: memref<1x16xf32, #tpu.memory_space<vmem>>, %arg8: memref<1x16xf32, #tpu.memory_space<vmem>>, %arg9: memref<16x16xf32, #tpu.memory_space<vmem>>, %arg10: memref<1x16xf32, #tpu.memory_space<vmem>>, %arg11: memref<16x16xf32, #tpu.memory_space<vmem>>, %arg12: memref<1x16xf32, #tpu.memory_space<vmem>>, %arg13: memref<1x8x8x16xf32, #tpu.memory_space<vmem>>, %arg14: memref<10x10x32xf32, #tpu.memory_space<vmem>>, %arg15: memref<10x10x16xf32, #tpu.memory_space<vmem>>) attributes {dimension_semantics = [#tpu.dimension_semantics<parallel>], iteration_bounds = array<i64: 2>, scalar_prefetch = 0 : i64, scratch_operands = 2 : i64, tpu.core_type = #tpu.core_type<tc>, window_params = [{transform_indices = @transform_0, window_bounds = array<i64: 1, 8, 8, 16>}, {transform_indices = @transform_1, window_bounds = array<i64: 1, 8, 8, 16>}, {pipeline_mode = #tpu.pipeline_mode<synchronous>, transform_indices = @transform_2, window_bounds = array<i64: 288, 16>}, {pipeline_mode = #tpu.pipeline_mode<synchronous>, transform_indices = @transform_3, window_bounds = array<i64: 1, 16>}, {pipeline_mode = #tpu.pipeline_mode<synchronous>, transform_indices = @transform_4, window_bounds = array<i64: 1, 16>}, {pipeline_mode = #tpu.pipeline_mode<synchronous>, transform_indices = @transform_5, window_bounds = array<i64: 144, 16>}, {pipeline_mode = #tpu.pipeline_mode<synchronous>, transform_indices = @transform_6, window_bounds = array<i64: 1, 16>}, {pipeline_mode = #tpu.pipeline_mode<synchronous>, transform_indices = @transform_7, window_bounds = array<i64: 1, 16>}, {pipeline_mode = #tpu.pipeline_mode<synchronous>, transform_indices = @transform_8, window_bounds = array<i64: 16, 16>}, {pipeline_mode = #tpu.pipeline_mode<synchronous>, transform_indices = @transform_9, window_bounds = array<i64: 1, 16>}, {pipeline_mode = #tpu.pipeline_mode<synchronous>, transform_indices = @transform_10, window_bounds = array<i64: 16, 16>}, {pipeline_mode = #tpu.pipeline_mode<synchronous>, transform_indices = @transform_11, window_bounds = array<i64: 1, 16>}, {transform_indices = @transform_12, window_bounds = array<i64: 1, 8, 8, 16>}]} {
    %cst = arith.constant 0.000000e+00 : f32
    %0 = vector.broadcast %cst : f32 to vector<10x10x32xf32>
    %c0 = arith.constant 0 : index
    %c0_0 = arith.constant 0 : index
    %c0_1 = arith.constant 0 : index
    %1 = vector.load %arg14[%c0, %c0_0, %c0_1] : memref<10x10x32xf32, #tpu.memory_space<vmem>>, vector<10x10x32xf32>
    tpu.vector_store %arg14[%c0, %c0_0, %c0_1], %0 {strides = array<i32>} : memref<10x10x32xf32, #tpu.memory_space<vmem>>, vector<10x10x32xf32>,
    %c0_2 = arith.constant 0 : index
    %c0_3 = arith.constant 0 : index
    %c0_4 = arith.constant 0 : index
    %c0_5 = arith.constant 0 : index
    %2 = vector.load %arg1[%c0_2, %c0_3, %c0_4, %c0_5] : memref<1x8x8x16xf32, #tpu.memory_space<vmem>>, vector<1x8x8x16xf32>
    %3 = vector.shape_cast %2 : vector<1x8x8x16xf32> to vector<8x8x16xf32>
    %c1 = arith.constant 1 : index
    %c1_6 = arith.constant 1 : index
    %c0_7 = arith.constant 0 : index
    %4 = vector.load %arg14[%c1, %c1_6, %c0_7] : memref<10x10x32xf32, #tpu.memory_space<vmem>>, vector<8x8x16xf32>
    tpu.vector_store %arg14[%c1, %c1_6, %c0_7], %3 {strides = array<i32>} : memref<10x10x32xf32, #tpu.memory_space<vmem>>, vector<8x8x16xf32>,
    %c0_8 = arith.constant 0 : index
    %c0_9 = arith.constant 0 : index
    %c0_10 = arith.constant 0 : index
    %c0_11 = arith.constant 0 : index
    %5 = vector.load %arg2[%c0_8, %c0_9, %c0_10, %c0_11] : memref<1x8x8x16xf32, #tpu.memory_space<vmem>>, vector<1x8x8x16xf32>
    %6 = vector.shape_cast %5 : vector<1x8x8x16xf32> to vector<8x8x16xf32>
    %c1_12 = arith.constant 1 : index
    %c1_13 = arith.constant 1 : index
    %c16 = arith.constant 16 : index
    %7 = vector.load %arg14[%c1_12, %c1_13, %c16] : memref<10x10x32xf32, #tpu.memory_space<vmem>>, vector<8x8x16xf32>
    tpu.vector_store %arg14[%c1_12, %c1_13, %c16], %6 {strides = array<i32>} : memref<10x10x32xf32, #tpu.memory_space<vmem>>, vector<8x8x16xf32>,
    %c0_14 = arith.constant 0 : index
    %c0_15 = arith.constant 0 : index
    %c0_16 = arith.constant 0 : index
    %8 = vector.load %arg14[%c0_14, %c0_15, %c0_16] : memref<10x10x32xf32, #tpu.memory_space<vmem>>, vector<8x8x32xf32>
    %9 = vector.shape_cast %8 : vector<8x8x32xf32> to vector<64x32xf32>
    %c0_17 = arith.constant 0 : index
    %c1_18 = arith.constant 1 : index
    %c0_19 = arith.constant 0 : index
    %10 = vector.load %arg14[%c0_17, %c1_18, %c0_19] : memref<10x10x32xf32, #tpu.memory_space<vmem>>, vector<8x8x32xf32>
    %11 = vector.shape_cast %10 : vector<8x8x32xf32> to vector<64x32xf32>
    %c0_20 = arith.constant 0 : index
    %c2 = arith.constant 2 : index
    %c0_21 = arith.constant 0 : index
    %12 = vector.load %arg14[%c0_20, %c2, %c0_21] : memref<10x10x32xf32, #tpu.memory_space<vmem>>, vector<8x8x32xf32>
    %13 = vector.shape_cast %12 : vector<8x8x32xf32> to vector<64x32xf32>
    %c1_22 = arith.constant 1 : index
    %c0_23 = arith.constant 0 : index
    %c0_24 = arith.constant 0 : index
    %14 = vector.load %arg14[%c1_22, %c0_23, %c0_24] : memref<10x10x32xf32, #tpu.memory_space<vmem>>, vector<8x8x32xf32>
    %15 = vector.shape_cast %14 : vector<8x8x32xf32> to vector<64x32xf32>
    %c1_25 = arith.constant 1 : index
    %c1_26 = arith.constant 1 : index
    %c0_27 = arith.constant 0 : index
    %16 = vector.load %arg14[%c1_25, %c1_26, %c0_27] : memref<10x10x32xf32, #tpu.memory_space<vmem>>, vector<8x8x32xf32>
    %17 = vector.shape_cast %16 : vector<8x8x32xf32> to vector<64x32xf32>
    %c1_28 = arith.constant 1 : index
    %c2_29 = arith.constant 2 : index
    %c0_30 = arith.constant 0 : index
    %18 = vector.load %arg14[%c1_28, %c2_29, %c0_30] : memref<10x10x32xf32, #tpu.memory_space<vmem>>, vector<8x8x32xf32>
    %19 = vector.shape_cast %18 : vector<8x8x32xf32> to vector<64x32xf32>
    %c2_31 = arith.constant 2 : index
    %c0_32 = arith.constant 0 : index
    %c0_33 = arith.constant 0 : index
    %20 = vector.load %arg14[%c2_31, %c0_32, %c0_33] : memref<10x10x32xf32, #tpu.memory_space<vmem>>, vector<8x8x32xf32>
    %21 = vector.shape_cast %20 : vector<8x8x32xf32> to vector<64x32xf32>
    %c2_34 = arith.constant 2 : index
    %c1_35 = arith.constant 1 : index
    %c0_36 = arith.constant 0 : index
    %22 = vector.load %arg14[%c2_34, %c1_35, %c0_36] : memref<10x10x32xf32, #tpu.memory_space<vmem>>, vector<8x8x32xf32>
    %23 = vector.shape_cast %22 : vector<8x8x32xf32> to vector<64x32xf32>
    %c2_37 = arith.constant 2 : index
    %c2_38 = arith.constant 2 : index
    %c0_39 = arith.constant 0 : index
    %24 = vector.load %arg14[%c2_37, %c2_38, %c0_39] : memref<10x10x32xf32, #tpu.memory_space<vmem>>, vector<8x8x32xf32>
    %25 = vector.shape_cast %24 : vector<8x8x32xf32> to vector<64x32xf32>
    %26 = tpu.concatenate %9, %11, %13, %15, %17, %19, %21, %23, %25 in 1 : vector<64x32xf32>, vector<64x32xf32>, vector<64x32xf32>, vector<64x32xf32>, vector<64x32xf32>, vector<64x32xf32>, vector<64x32xf32>, vector<64x32xf32>, vector<64x32xf32> -> vector<64x288xf32>
    %c0_40 = arith.constant 0 : index
    %c0_41 = arith.constant 0 : index
    %27 = vector.load %arg3[%c0_40, %c0_41] : memref<288x16xf32, #tpu.memory_space<vmem>>, vector<288x16xf32>
    %cst_42 = arith.constant dense<0.000000e+00> : vector<64x16xf32>
    %28 = tpu.matmul %26, %27, %cst_42 {dimension_numbers = #tpu.dot_dimension_numbers<[1], [0], [0], [1], [0, 0, 1, 1], [], []>} : vector<64x288xf32>, vector<288x16xf32>, vector<64x16xf32> -> vector<64x16xf32>
    %c0_43 = arith.constant 0 : index
    %c0_44 = arith.constant 0 : index
    %29 = vector.load %arg4[%c0_43, %c0_44] : memref<1x16xf32, #tpu.memory_space<vmem>>, vector<1x16xf32>
    %30 = vector.broadcast %29 : vector<1x16xf32> to vector<64x16xf32>
    %31 = arith.mulf %28, %30 : vector<64x16xf32>
    %c0_45 = arith.constant 0 : index
    %c0_46 = arith.constant 0 : index
    %32 = vector.load %arg5[%c0_45, %c0_46] : memref<1x16xf32, #tpu.memory_space<vmem>>, vector<1x16xf32>
    %33 = vector.broadcast %32 : vector<1x16xf32> to vector<64x16xf32>
    %34 = arith.addf %31, %33 : vector<64x16xf32>
    %cst_47 = arith.constant 0.000000e+00 : f32
    %35 = vector.broadcast %cst_47 : f32 to vector<64x16xf32>
    %36 = arith.maximumf %34, %35 : vector<64x16xf32>
    %cst_48 = arith.constant 0.000000e+00 : f32
    %37 = vector.broadcast %cst_48 : f32 to vector<10x10x16xf32>
    %c0_49 = arith.constant 0 : index
    %c0_50 = arith.constant 0 : index
    %c0_51 = arith.constant 0 : index
    %38 = vector.load %arg15[%c0_49, %c0_50, %c0_51] : memref<10x10x16xf32, #tpu.memory_space<vmem>>, vector<10x10x16xf32>
    tpu.vector_store %arg15[%c0_49, %c0_50, %c0_51], %37 {strides = array<i32>} : memref<10x10x16xf32, #tpu.memory_space<vmem>>, vector<10x10x16xf32>,
    %39 = vector.shape_cast %36 : vector<64x16xf32> to vector<8x8x16xf32>
    %c1_52 = arith.constant 1 : index
    %c1_53 = arith.constant 1 : index
    %c0_54 = arith.constant 0 : index
    %40 = vector.load %arg15[%c1_52, %c1_53, %c0_54] : memref<10x10x16xf32, #tpu.memory_space<vmem>>, vector<8x8x16xf32>
    tpu.vector_store %arg15[%c1_52, %c1_53, %c0_54], %39 {strides = array<i32>} : memref<10x10x16xf32, #tpu.memory_space<vmem>>, vector<8x8x16xf32>,
    %c0_55 = arith.constant 0 : index
    %c0_56 = arith.constant 0 : index
    %c0_57 = arith.constant 0 : index
    %41 = vector.load %arg15[%c0_55, %c0_56, %c0_57] : memref<10x10x16xf32, #tpu.memory_space<vmem>>, vector<8x8x16xf32>
    %42 = vector.shape_cast %41 : vector<8x8x16xf32> to vector<64x16xf32>
    %c0_58 = arith.constant 0 : index
    %c1_59 = arith.constant 1 : index
    %c0_60 = arith.constant 0 : index
    %43 = vector.load %arg15[%c0_58, %c1_59, %c0_60] : memref<10x10x16xf32, #tpu.memory_space<vmem>>, vector<8x8x16xf32>
    %44 = vector.shape_cast %43 : vector<8x8x16xf32> to vector<64x16xf32>
    %c0_61 = arith.constant 0 : index
    %c2_62 = arith.constant 2 : index
    %c0_63 = arith.constant 0 : index
    %45 = vector.load %arg15[%c0_61, %c2_62, %c0_63] : memref<10x10x16xf32, #tpu.memory_space<vmem>>, vector<8x8x16xf32>
    %46 = vector.shape_cast %45 : vector<8x8x16xf32> to vector<64x16xf32>
    %c1_64 = arith.constant 1 : index
    %c0_65 = arith.constant 0 : index
    %c0_66 = arith.constant 0 : index
    %47 = vector.load %arg15[%c1_64, %c0_65, %c0_66] : memref<10x10x16xf32, #tpu.memory_space<vmem>>, vector<8x8x16xf32>
    %48 = vector.shape_cast %47 : vector<8x8x16xf32> to vector<64x16xf32>
    %c1_67 = arith.constant 1 : index
    %c1_68 = arith.constant 1 : index
    %c0_69 = arith.constant 0 : index
    %49 = vector.load %arg15[%c1_67, %c1_68, %c0_69] : memref<10x10x16xf32, #tpu.memory_space<vmem>>, vector<8x8x16xf32>
    %50 = vector.shape_cast %49 : vector<8x8x16xf32> to vector<64x16xf32>
    %c1_70 = arith.constant 1 : index
    %c2_71 = arith.constant 2 : index
    %c0_72 = arith.constant 0 : index
    %51 = vector.load %arg15[%c1_70, %c2_71, %c0_72] : memref<10x10x16xf32, #tpu.memory_space<vmem>>, vector<8x8x16xf32>
    %52 = vector.shape_cast %51 : vector<8x8x16xf32> to vector<64x16xf32>
    %c2_73 = arith.constant 2 : index
    %c0_74 = arith.constant 0 : index
    %c0_75 = arith.constant 0 : index
    %53 = vector.load %arg15[%c2_73, %c0_74, %c0_75] : memref<10x10x16xf32, #tpu.memory_space<vmem>>, vector<8x8x16xf32>
    %54 = vector.shape_cast %53 : vector<8x8x16xf32> to vector<64x16xf32>
    %c2_76 = arith.constant 2 : index
    %c1_77 = arith.constant 1 : index
    %c0_78 = arith.constant 0 : index
    %55 = vector.load %arg15[%c2_76, %c1_77, %c0_78] : memref<10x10x16xf32, #tpu.memory_space<vmem>>, vector<8x8x16xf32>
    %56 = vector.shape_cast %55 : vector<8x8x16xf32> to vector<64x16xf32>
    %c2_79 = arith.constant 2 : index
    %c2_80 = arith.constant 2 : index
    %c0_81 = arith.constant 0 : index
    %57 = vector.load %arg15[%c2_79, %c2_80, %c0_81] : memref<10x10x16xf32, #tpu.memory_space<vmem>>, vector<8x8x16xf32>
    %58 = vector.shape_cast %57 : vector<8x8x16xf32> to vector<64x16xf32>
    %59 = tpu.concatenate %42, %44, %46, %48, %50, %52, %54, %56, %58 in 1 : vector<64x16xf32>, vector<64x16xf32>, vector<64x16xf32>, vector<64x16xf32>, vector<64x16xf32>, vector<64x16xf32>, vector<64x16xf32>, vector<64x16xf32>, vector<64x16xf32> -> vector<64x144xf32>
    %c0_82 = arith.constant 0 : index
    %c0_83 = arith.constant 0 : index
    %60 = vector.load %arg6[%c0_82, %c0_83] : memref<144x16xf32, #tpu.memory_space<vmem>>, vector<144x16xf32>
    %cst_84 = arith.constant dense<0.000000e+00> : vector<64x16xf32>
    %61 = tpu.matmul %59, %60, %cst_84 {dimension_numbers = #tpu.dot_dimension_numbers<[1], [0], [0], [1], [0, 0, 1, 1], [], []>} : vector<64x144xf32>, vector<144x16xf32>, vector<64x16xf32> -> vector<64x16xf32>
    %c0_85 = arith.constant 0 : index
    %c0_86 = arith.constant 0 : index
    %62 = vector.load %arg7[%c0_85, %c0_86] : memref<1x16xf32, #tpu.memory_space<vmem>>, vector<1x16xf32>
    %63 = vector.broadcast %62 : vector<1x16xf32> to vector<64x16xf32>
    %64 = arith.mulf %61, %63 : vector<64x16xf32>
    %c0_87 = arith.constant 0 : index
    %c0_88 = arith.constant 0 : index
    %65 = vector.load %arg8[%c0_87, %c0_88] : memref<1x16xf32, #tpu.memory_space<vmem>>, vector<1x16xf32>
    %66 = vector.broadcast %65 : vector<1x16xf32> to vector<64x16xf32>
    %67 = arith.addf %64, %66 : vector<64x16xf32>
    %cst_89 = arith.constant 0.000000e+00 : f32
    %68 = vector.broadcast %cst_89 : f32 to vector<64x16xf32>
    %69 = arith.maximumf %67, %68 : vector<64x16xf32>
    %cst_90 = arith.constant dense<0.000000e+00> : vector<16xf32>
    %70 = vector.multi_reduction <add>, %69, %cst_90 [0] : vector<64x16xf32> to vector<16xf32>
    %71 = vector.shape_cast %70 : vector<16xf32> to vector<1x16xf32>
    %cst_91 = arith.constant 6.400000e+01 : f32
    %72 = vector.broadcast %cst_91 : f32 to vector<1x16xf32>
    %73 = arith.divf %71, %72 : vector<1x16xf32>
    %74 = vector.shape_cast %73 : vector<1x16xf32> to vector<1x16xf32>
    %75 = vector.broadcast %74 : vector<1x16xf32> to vector<8x16xf32>
    %c0_92 = arith.constant 0 : index
    %c0_93 = arith.constant 0 : index
    %76 = vector.load %arg9[%c0_92, %c0_93] : memref<16x16xf32, #tpu.memory_space<vmem>>, vector<16x16xf32>
    %cst_94 = arith.constant dense<0.000000e+00> : vector<8x16xf32>
    %77 = tpu.matmul %75, %76, %cst_94 {dimension_numbers = #tpu.dot_dimension_numbers<[1], [0], [0], [1], [0, 0, 1, 1], [], []>} : vector<8x16xf32>, vector<16x16xf32>, vector<8x16xf32> -> vector<8x16xf32>
    %c0_95 = arith.constant 0 : index
    %c0_96 = arith.constant 0 : index
    %78 = vector.load %arg10[%c0_95, %c0_96] : memref<1x16xf32, #tpu.memory_space<vmem>>, vector<1x16xf32>
    %79 = vector.broadcast %78 : vector<1x16xf32> to vector<8x16xf32>
    %80 = arith.addf %77, %79 : vector<8x16xf32>
    %cst_97 = arith.constant 0.000000e+00 : f32
    %81 = vector.broadcast %cst_97 : f32 to vector<8x16xf32>
    %82 = arith.maximumf %80, %81 : vector<8x16xf32>
    %c0_98 = arith.constant 0 : index
    %c0_99 = arith.constant 0 : index
    %83 = vector.load %arg11[%c0_98, %c0_99] : memref<16x16xf32, #tpu.memory_space<vmem>>, vector<16x16xf32>
    %cst_100 = arith.constant dense<0.000000e+00> : vector<8x16xf32>
    %84 = tpu.matmul %82, %83, %cst_100 {dimension_numbers = #tpu.dot_dimension_numbers<[1], [0], [0], [1], [0, 0, 1, 1], [], []>} : vector<8x16xf32>, vector<16x16xf32>, vector<8x16xf32> -> vector<8x16xf32>
    %c0_101 = arith.constant 0 : index
    %c0_102 = arith.constant 0 : index
    %85 = vector.load %arg12[%c0_101, %c0_102] : memref<1x16xf32, #tpu.memory_space<vmem>>, vector<1x16xf32>
    %86 = vector.broadcast %85 : vector<1x16xf32> to vector<8x16xf32>
    %87 = arith.addf %84, %86 : vector<8x16xf32>
    %88 = vector.extract_strided_slice %87 {offsets = [0, 0], sizes = [1, 16], strides = [1, 1]} : vector<8x16xf32> to vector<1x16xf32>
    %cst_103 = arith.constant 0.000000e+00 : f32
    %89 = vector.broadcast %cst_103 : f32 to vector<1x16xf32>
    %90 = arith.subf %89, %88 : vector<1x16xf32>
    %91 = math.exp %90 : vector<1x16xf32>
    %cst_104 = arith.constant 1.000000e+00 : f32
    %92 = vector.broadcast %cst_104 : f32 to vector<1x16xf32>
    %93 = arith.addf %92, %91 : vector<1x16xf32>
    %cst_105 = arith.constant 1.000000e+00 : f32
    %94 = vector.broadcast %cst_105 : f32 to vector<1x16xf32>
    %95 = arith.divf %94, %93 : vector<1x16xf32>
    %96 = vector.broadcast %95 : vector<1x16xf32> to vector<64x16xf32>
    %97 = arith.mulf %69, %96 : vector<64x16xf32>
    %98 = vector.shape_cast %97 : vector<64x16xf32> to vector<1x8x8x16xf32>
    %c0_106 = arith.constant 0 : index
    %c0_107 = arith.constant 0 : index
    %c0_108 = arith.constant 0 : index
    %c0_109 = arith.constant 0 : index
    %99 = vector.load %arg13[%c0_106, %c0_107, %c0_108, %c0_109] : memref<1x8x8x16xf32, #tpu.memory_space<vmem>>, vector<1x8x8x16xf32>
    tpu.vector_store %arg13[%c0_106, %c0_107, %c0_108, %c0_109], %98 {strides = array<i32>} : memref<1x8x8x16xf32, #tpu.memory_space<vmem>>, vector<1x8x8x16xf32>,
    return
  }
  func.func @transform_0(%arg0: i32) -> (i32, i32, i32, i32) {
    %c0_i32 = arith.constant 0 : i32
    %c0_i32_0 = arith.constant 0 : i32
    %c0_i32_1 = arith.constant 0 : i32
    %c0_i32_2 = arith.constant 0 : i32
    return %arg0, %c0_i32, %c0_i32_0, %c0_i32_1 : i32, i32, i32, i32
  }
  func.func @transform_1(%arg0: i32) -> (i32, i32, i32, i32) {
    %c0_i32 = arith.constant 0 : i32
    %c0_i32_0 = arith.constant 0 : i32
    %c0_i32_1 = arith.constant 0 : i32
    %c0_i32_2 = arith.constant 0 : i32
    return %arg0, %c0_i32, %c0_i32_0, %c0_i32_1 : i32, i32, i32, i32
  }
  func.func @transform_2(%arg0: i32) -> (i32, i32) {
    %c0_i32 = arith.constant 0 : i32
    %c0_i32_0 = arith.constant 0 : i32
    %c0_i32_1 = arith.constant 0 : i32
    return %c0_i32, %c0_i32_0 : i32, i32
  }
  func.func @transform_3(%arg0: i32) -> (i32, i32) {
    %c0_i32 = arith.constant 0 : i32
    %c0_i32_0 = arith.constant 0 : i32
    %c0_i32_1 = arith.constant 0 : i32
    return %c0_i32, %c0_i32_0 : i32, i32
  }
  func.func @transform_4(%arg0: i32) -> (i32, i32) {
    %c0_i32 = arith.constant 0 : i32
    %c0_i32_0 = arith.constant 0 : i32
    %c0_i32_1 = arith.constant 0 : i32
    return %c0_i32, %c0_i32_0 : i32, i32
  }
  func.func @transform_5(%arg0: i32) -> (i32, i32) {
    %c0_i32 = arith.constant 0 : i32
    %c0_i32_0 = arith.constant 0 : i32
    %c0_i32_1 = arith.constant 0 : i32
    return %c0_i32, %c0_i32_0 : i32, i32
  }
  func.func @transform_6(%arg0: i32) -> (i32, i32) {
    %c0_i32 = arith.constant 0 : i32
    %c0_i32_0 = arith.constant 0 : i32
    %c0_i32_1 = arith.constant 0 : i32
    return %c0_i32, %c0_i32_0 : i32, i32
  }
  func.func @transform_7(%arg0: i32) -> (i32, i32) {
    %c0_i32 = arith.constant 0 : i32
    %c0_i32_0 = arith.constant 0 : i32
    %c0_i32_1 = arith.constant 0 : i32
    return %c0_i32, %c0_i32_0 : i32, i32
  }
  func.func @transform_8(%arg0: i32) -> (i32, i32) {
    %c0_i32 = arith.constant 0 : i32
    %c0_i32_0 = arith.constant 0 : i32
    %c0_i32_1 = arith.constant 0 : i32
    return %c0_i32, %c0_i32_0 : i32, i32
  }
  func.func @transform_9(%arg0: i32) -> (i32, i32) {
    %c0_i32 = arith.constant 0 : i32
    %c0_i32_0 = arith.constant 0 : i32
    %c0_i32_1 = arith.constant 0 : i32
    return %c0_i32, %c0_i32_0 : i32, i32
  }
  func.func @transform_10(%arg0: i32) -> (i32, i32) {
    %c0_i32 = arith.constant 0 : i32
    %c0_i32_0 = arith.constant 0 : i32
    %c0_i32_1 = arith.constant 0 : i32
    return %c0_i32, %c0_i32_0 : i32, i32
  }
  func.func @transform_11(%arg0: i32) -> (i32, i32) {
    %c0_i32 = arith.constant 0 : i32
    %c0_i32_0 = arith.constant 0 : i32
    %c0_i32_1 = arith.constant 0 : i32
    return %c0_i32, %c0_i32_0 : i32, i32
  }
  func.func @transform_12(%arg0: i32) -> (i32, i32, i32, i32) {
    %c0_i32 = arith.constant 0 : i32
    %c0_i32_0 = arith.constant 0 : i32
    %c0_i32_1 = arith.constant 0 : i32
    %c0_i32_2 = arith.constant 0 : i32
    return %arg0, %c0_i32, %c0_i32_0, %c0_i32_1 : i32, i32, i32, i32
  }
}

module attributes {stable_mosaic.version = 11 : i64} {
  func.func @kernel(%arg0: i32, %arg1: memref<1x16x16x8xf32, #tpu.memory_space<vmem>>, %arg2: memref<1x16x16x8xf32, #tpu.memory_space<vmem>>, %arg3: memref<144x8xf32, #tpu.memory_space<vmem>>, %arg4: memref<1x8xf32, #tpu.memory_space<vmem>>, %arg5: memref<1x8xf32, #tpu.memory_space<vmem>>, %arg6: memref<72x8xf32, #tpu.memory_space<vmem>>, %arg7: memref<1x8xf32, #tpu.memory_space<vmem>>, %arg8: memref<1x8xf32, #tpu.memory_space<vmem>>, %arg9: memref<8x8xf32, #tpu.memory_space<vmem>>, %arg10: memref<1x8xf32, #tpu.memory_space<vmem>>, %arg11: memref<8x8xf32, #tpu.memory_space<vmem>>, %arg12: memref<1x8xf32, #tpu.memory_space<vmem>>, %arg13: memref<1x16x16x8xf32, #tpu.memory_space<vmem>>, %arg14: memref<18x18x16xf32, #tpu.memory_space<vmem>>, %arg15: memref<18x18x8xf32, #tpu.memory_space<vmem>>) attributes {dimension_semantics = [#tpu.dimension_semantics<parallel>], iteration_bounds = array<i64: 2>, scalar_prefetch = 0 : i64, scratch_operands = 2 : i64, tpu.core_type = #tpu.core_type<tc>, window_params = [{transform_indices = @transform_0, window_bounds = array<i64: 1, 16, 16, 8>}, {transform_indices = @transform_1, window_bounds = array<i64: 1, 16, 16, 8>}, {pipeline_mode = #tpu.pipeline_mode<synchronous>, transform_indices = @transform_2, window_bounds = array<i64: 144, 8>}, {pipeline_mode = #tpu.pipeline_mode<synchronous>, transform_indices = @transform_3, window_bounds = array<i64: 1, 8>}, {pipeline_mode = #tpu.pipeline_mode<synchronous>, transform_indices = @transform_4, window_bounds = array<i64: 1, 8>}, {pipeline_mode = #tpu.pipeline_mode<synchronous>, transform_indices = @transform_5, window_bounds = array<i64: 72, 8>}, {pipeline_mode = #tpu.pipeline_mode<synchronous>, transform_indices = @transform_6, window_bounds = array<i64: 1, 8>}, {pipeline_mode = #tpu.pipeline_mode<synchronous>, transform_indices = @transform_7, window_bounds = array<i64: 1, 8>}, {pipeline_mode = #tpu.pipeline_mode<synchronous>, transform_indices = @transform_8, window_bounds = array<i64: 8, 8>}, {pipeline_mode = #tpu.pipeline_mode<synchronous>, transform_indices = @transform_9, window_bounds = array<i64: 1, 8>}, {pipeline_mode = #tpu.pipeline_mode<synchronous>, transform_indices = @transform_10, window_bounds = array<i64: 8, 8>}, {pipeline_mode = #tpu.pipeline_mode<synchronous>, transform_indices = @transform_11, window_bounds = array<i64: 1, 8>}, {transform_indices = @transform_12, window_bounds = array<i64: 1, 16, 16, 8>}]} {
    %cst = arith.constant 0.000000e+00 : f32
    %0 = vector.broadcast %cst : f32 to vector<18x18x16xf32>
    %c0 = arith.constant 0 : index
    %c0_0 = arith.constant 0 : index
    %c0_1 = arith.constant 0 : index
    %1 = vector.load %arg14[%c0, %c0_0, %c0_1] : memref<18x18x16xf32, #tpu.memory_space<vmem>>, vector<18x18x16xf32>
    tpu.vector_store %arg14[%c0, %c0_0, %c0_1], %0 {strides = array<i32>} : memref<18x18x16xf32, #tpu.memory_space<vmem>>, vector<18x18x16xf32>,
    %c0_2 = arith.constant 0 : index
    %c0_3 = arith.constant 0 : index
    %c0_4 = arith.constant 0 : index
    %c0_5 = arith.constant 0 : index
    %2 = vector.load %arg1[%c0_2, %c0_3, %c0_4, %c0_5] : memref<1x16x16x8xf32, #tpu.memory_space<vmem>>, vector<1x16x16x8xf32>
    %3 = vector.shape_cast %2 : vector<1x16x16x8xf32> to vector<16x16x8xf32>
    %c1 = arith.constant 1 : index
    %c1_6 = arith.constant 1 : index
    %c0_7 = arith.constant 0 : index
    %4 = vector.load %arg14[%c1, %c1_6, %c0_7] : memref<18x18x16xf32, #tpu.memory_space<vmem>>, vector<16x16x8xf32>
    tpu.vector_store %arg14[%c1, %c1_6, %c0_7], %3 {strides = array<i32>} : memref<18x18x16xf32, #tpu.memory_space<vmem>>, vector<16x16x8xf32>,
    %c0_8 = arith.constant 0 : index
    %c0_9 = arith.constant 0 : index
    %c0_10 = arith.constant 0 : index
    %c0_11 = arith.constant 0 : index
    %5 = vector.load %arg2[%c0_8, %c0_9, %c0_10, %c0_11] : memref<1x16x16x8xf32, #tpu.memory_space<vmem>>, vector<1x16x16x8xf32>
    %6 = vector.shape_cast %5 : vector<1x16x16x8xf32> to vector<16x16x8xf32>
    %c1_12 = arith.constant 1 : index
    %c1_13 = arith.constant 1 : index
    %c8 = arith.constant 8 : index
    %7 = vector.load %arg14[%c1_12, %c1_13, %c8] : memref<18x18x16xf32, #tpu.memory_space<vmem>>, vector<16x16x8xf32>
    tpu.vector_store %arg14[%c1_12, %c1_13, %c8], %6 {strides = array<i32>} : memref<18x18x16xf32, #tpu.memory_space<vmem>>, vector<16x16x8xf32>,
    %c0_14 = arith.constant 0 : index
    %c0_15 = arith.constant 0 : index
    %c0_16 = arith.constant 0 : index
    %8 = vector.load %arg14[%c0_14, %c0_15, %c0_16] : memref<18x18x16xf32, #tpu.memory_space<vmem>>, vector<16x16x16xf32>
    %9 = vector.shape_cast %8 : vector<16x16x16xf32> to vector<256x16xf32>
    %c0_17 = arith.constant 0 : index
    %c1_18 = arith.constant 1 : index
    %c0_19 = arith.constant 0 : index
    %10 = vector.load %arg14[%c0_17, %c1_18, %c0_19] : memref<18x18x16xf32, #tpu.memory_space<vmem>>, vector<16x16x16xf32>
    %11 = vector.shape_cast %10 : vector<16x16x16xf32> to vector<256x16xf32>
    %c0_20 = arith.constant 0 : index
    %c2 = arith.constant 2 : index
    %c0_21 = arith.constant 0 : index
    %12 = vector.load %arg14[%c0_20, %c2, %c0_21] : memref<18x18x16xf32, #tpu.memory_space<vmem>>, vector<16x16x16xf32>
    %13 = vector.shape_cast %12 : vector<16x16x16xf32> to vector<256x16xf32>
    %c1_22 = arith.constant 1 : index
    %c0_23 = arith.constant 0 : index
    %c0_24 = arith.constant 0 : index
    %14 = vector.load %arg14[%c1_22, %c0_23, %c0_24] : memref<18x18x16xf32, #tpu.memory_space<vmem>>, vector<16x16x16xf32>
    %15 = vector.shape_cast %14 : vector<16x16x16xf32> to vector<256x16xf32>
    %c1_25 = arith.constant 1 : index
    %c1_26 = arith.constant 1 : index
    %c0_27 = arith.constant 0 : index
    %16 = vector.load %arg14[%c1_25, %c1_26, %c0_27] : memref<18x18x16xf32, #tpu.memory_space<vmem>>, vector<16x16x16xf32>
    %17 = vector.shape_cast %16 : vector<16x16x16xf32> to vector<256x16xf32>
    %c1_28 = arith.constant 1 : index
    %c2_29 = arith.constant 2 : index
    %c0_30 = arith.constant 0 : index
    %18 = vector.load %arg14[%c1_28, %c2_29, %c0_30] : memref<18x18x16xf32, #tpu.memory_space<vmem>>, vector<16x16x16xf32>
    %19 = vector.shape_cast %18 : vector<16x16x16xf32> to vector<256x16xf32>
    %c2_31 = arith.constant 2 : index
    %c0_32 = arith.constant 0 : index
    %c0_33 = arith.constant 0 : index
    %20 = vector.load %arg14[%c2_31, %c0_32, %c0_33] : memref<18x18x16xf32, #tpu.memory_space<vmem>>, vector<16x16x16xf32>
    %21 = vector.shape_cast %20 : vector<16x16x16xf32> to vector<256x16xf32>
    %c2_34 = arith.constant 2 : index
    %c1_35 = arith.constant 1 : index
    %c0_36 = arith.constant 0 : index
    %22 = vector.load %arg14[%c2_34, %c1_35, %c0_36] : memref<18x18x16xf32, #tpu.memory_space<vmem>>, vector<16x16x16xf32>
    %23 = vector.shape_cast %22 : vector<16x16x16xf32> to vector<256x16xf32>
    %c2_37 = arith.constant 2 : index
    %c2_38 = arith.constant 2 : index
    %c0_39 = arith.constant 0 : index
    %24 = vector.load %arg14[%c2_37, %c2_38, %c0_39] : memref<18x18x16xf32, #tpu.memory_space<vmem>>, vector<16x16x16xf32>
    %25 = vector.shape_cast %24 : vector<16x16x16xf32> to vector<256x16xf32>
    %26 = tpu.concatenate %9, %11, %13, %15, %17, %19, %21, %23, %25 in 1 : vector<256x16xf32>, vector<256x16xf32>, vector<256x16xf32>, vector<256x16xf32>, vector<256x16xf32>, vector<256x16xf32>, vector<256x16xf32>, vector<256x16xf32>, vector<256x16xf32> -> vector<256x144xf32>
    %c0_40 = arith.constant 0 : index
    %c0_41 = arith.constant 0 : index
    %27 = vector.load %arg3[%c0_40, %c0_41] : memref<144x8xf32, #tpu.memory_space<vmem>>, vector<144x8xf32>
    %cst_42 = arith.constant dense<0.000000e+00> : vector<256x8xf32>
    %28 = tpu.matmul %26, %27, %cst_42 {dimension_numbers = #tpu.dot_dimension_numbers<[1], [0], [0], [1], [0, 0, 1, 1], [], []>} : vector<256x144xf32>, vector<144x8xf32>, vector<256x8xf32> -> vector<256x8xf32>
    %c0_43 = arith.constant 0 : index
    %c0_44 = arith.constant 0 : index
    %29 = vector.load %arg4[%c0_43, %c0_44] : memref<1x8xf32, #tpu.memory_space<vmem>>, vector<1x8xf32>
    %30 = vector.broadcast %29 : vector<1x8xf32> to vector<256x8xf32>
    %31 = arith.mulf %28, %30 : vector<256x8xf32>
    %c0_45 = arith.constant 0 : index
    %c0_46 = arith.constant 0 : index
    %32 = vector.load %arg5[%c0_45, %c0_46] : memref<1x8xf32, #tpu.memory_space<vmem>>, vector<1x8xf32>
    %33 = vector.broadcast %32 : vector<1x8xf32> to vector<256x8xf32>
    %34 = arith.addf %31, %33 : vector<256x8xf32>
    %cst_47 = arith.constant 0.000000e+00 : f32
    %35 = vector.broadcast %cst_47 : f32 to vector<256x8xf32>
    %36 = arith.maximumf %34, %35 : vector<256x8xf32>
    %cst_48 = arith.constant 0.000000e+00 : f32
    %37 = vector.broadcast %cst_48 : f32 to vector<18x18x8xf32>
    %c0_49 = arith.constant 0 : index
    %c0_50 = arith.constant 0 : index
    %c0_51 = arith.constant 0 : index
    %38 = vector.load %arg15[%c0_49, %c0_50, %c0_51] : memref<18x18x8xf32, #tpu.memory_space<vmem>>, vector<18x18x8xf32>
    tpu.vector_store %arg15[%c0_49, %c0_50, %c0_51], %37 {strides = array<i32>} : memref<18x18x8xf32, #tpu.memory_space<vmem>>, vector<18x18x8xf32>,
    %39 = vector.shape_cast %36 : vector<256x8xf32> to vector<16x16x8xf32>
    %c1_52 = arith.constant 1 : index
    %c1_53 = arith.constant 1 : index
    %c0_54 = arith.constant 0 : index
    %40 = vector.load %arg15[%c1_52, %c1_53, %c0_54] : memref<18x18x8xf32, #tpu.memory_space<vmem>>, vector<16x16x8xf32>
    tpu.vector_store %arg15[%c1_52, %c1_53, %c0_54], %39 {strides = array<i32>} : memref<18x18x8xf32, #tpu.memory_space<vmem>>, vector<16x16x8xf32>,
    %c0_55 = arith.constant 0 : index
    %c0_56 = arith.constant 0 : index
    %c0_57 = arith.constant 0 : index
    %41 = vector.load %arg15[%c0_55, %c0_56, %c0_57] : memref<18x18x8xf32, #tpu.memory_space<vmem>>, vector<16x16x8xf32>
    %42 = vector.shape_cast %41 : vector<16x16x8xf32> to vector<256x8xf32>
    %c0_58 = arith.constant 0 : index
    %c1_59 = arith.constant 1 : index
    %c0_60 = arith.constant 0 : index
    %43 = vector.load %arg15[%c0_58, %c1_59, %c0_60] : memref<18x18x8xf32, #tpu.memory_space<vmem>>, vector<16x16x8xf32>
    %44 = vector.shape_cast %43 : vector<16x16x8xf32> to vector<256x8xf32>
    %c0_61 = arith.constant 0 : index
    %c2_62 = arith.constant 2 : index
    %c0_63 = arith.constant 0 : index
    %45 = vector.load %arg15[%c0_61, %c2_62, %c0_63] : memref<18x18x8xf32, #tpu.memory_space<vmem>>, vector<16x16x8xf32>
    %46 = vector.shape_cast %45 : vector<16x16x8xf32> to vector<256x8xf32>
    %c1_64 = arith.constant 1 : index
    %c0_65 = arith.constant 0 : index
    %c0_66 = arith.constant 0 : index
    %47 = vector.load %arg15[%c1_64, %c0_65, %c0_66] : memref<18x18x8xf32, #tpu.memory_space<vmem>>, vector<16x16x8xf32>
    %48 = vector.shape_cast %47 : vector<16x16x8xf32> to vector<256x8xf32>
    %c1_67 = arith.constant 1 : index
    %c1_68 = arith.constant 1 : index
    %c0_69 = arith.constant 0 : index
    %49 = vector.load %arg15[%c1_67, %c1_68, %c0_69] : memref<18x18x8xf32, #tpu.memory_space<vmem>>, vector<16x16x8xf32>
    %50 = vector.shape_cast %49 : vector<16x16x8xf32> to vector<256x8xf32>
    %c1_70 = arith.constant 1 : index
    %c2_71 = arith.constant 2 : index
    %c0_72 = arith.constant 0 : index
    %51 = vector.load %arg15[%c1_70, %c2_71, %c0_72] : memref<18x18x8xf32, #tpu.memory_space<vmem>>, vector<16x16x8xf32>
    %52 = vector.shape_cast %51 : vector<16x16x8xf32> to vector<256x8xf32>
    %c2_73 = arith.constant 2 : index
    %c0_74 = arith.constant 0 : index
    %c0_75 = arith.constant 0 : index
    %53 = vector.load %arg15[%c2_73, %c0_74, %c0_75] : memref<18x18x8xf32, #tpu.memory_space<vmem>>, vector<16x16x8xf32>
    %54 = vector.shape_cast %53 : vector<16x16x8xf32> to vector<256x8xf32>
    %c2_76 = arith.constant 2 : index
    %c1_77 = arith.constant 1 : index
    %c0_78 = arith.constant 0 : index
    %55 = vector.load %arg15[%c2_76, %c1_77, %c0_78] : memref<18x18x8xf32, #tpu.memory_space<vmem>>, vector<16x16x8xf32>
    %56 = vector.shape_cast %55 : vector<16x16x8xf32> to vector<256x8xf32>
    %c2_79 = arith.constant 2 : index
    %c2_80 = arith.constant 2 : index
    %c0_81 = arith.constant 0 : index
    %57 = vector.load %arg15[%c2_79, %c2_80, %c0_81] : memref<18x18x8xf32, #tpu.memory_space<vmem>>, vector<16x16x8xf32>
    %58 = vector.shape_cast %57 : vector<16x16x8xf32> to vector<256x8xf32>
    %59 = tpu.concatenate %42, %44, %46, %48, %50, %52, %54, %56, %58 in 1 : vector<256x8xf32>, vector<256x8xf32>, vector<256x8xf32>, vector<256x8xf32>, vector<256x8xf32>, vector<256x8xf32>, vector<256x8xf32>, vector<256x8xf32>, vector<256x8xf32> -> vector<256x72xf32>
    %c0_82 = arith.constant 0 : index
    %c0_83 = arith.constant 0 : index
    %60 = vector.load %arg6[%c0_82, %c0_83] : memref<72x8xf32, #tpu.memory_space<vmem>>, vector<72x8xf32>
    %cst_84 = arith.constant dense<0.000000e+00> : vector<256x8xf32>
    %61 = tpu.matmul %59, %60, %cst_84 {dimension_numbers = #tpu.dot_dimension_numbers<[1], [0], [0], [1], [0, 0, 1, 1], [], []>} : vector<256x72xf32>, vector<72x8xf32>, vector<256x8xf32> -> vector<256x8xf32>
    %c0_85 = arith.constant 0 : index
    %c0_86 = arith.constant 0 : index
    %62 = vector.load %arg7[%c0_85, %c0_86] : memref<1x8xf32, #tpu.memory_space<vmem>>, vector<1x8xf32>
    %63 = vector.broadcast %62 : vector<1x8xf32> to vector<256x8xf32>
    %64 = arith.mulf %61, %63 : vector<256x8xf32>
    %c0_87 = arith.constant 0 : index
    %c0_88 = arith.constant 0 : index
    %65 = vector.load %arg8[%c0_87, %c0_88] : memref<1x8xf32, #tpu.memory_space<vmem>>, vector<1x8xf32>
    %66 = vector.broadcast %65 : vector<1x8xf32> to vector<256x8xf32>
    %67 = arith.addf %64, %66 : vector<256x8xf32>
    %cst_89 = arith.constant 0.000000e+00 : f32
    %68 = vector.broadcast %cst_89 : f32 to vector<256x8xf32>
    %69 = arith.maximumf %67, %68 : vector<256x8xf32>
    %cst_90 = arith.constant dense<0.000000e+00> : vector<8xf32>
    %70 = vector.multi_reduction <add>, %69, %cst_90 [0] : vector<256x8xf32> to vector<8xf32>
    %71 = vector.shape_cast %70 : vector<8xf32> to vector<1x8xf32>
    %cst_91 = arith.constant 2.560000e+02 : f32
    %72 = vector.broadcast %cst_91 : f32 to vector<1x8xf32>
    %73 = arith.divf %71, %72 : vector<1x8xf32>
    %74 = vector.shape_cast %73 : vector<1x8xf32> to vector<1x8xf32>
    %75 = vector.broadcast %74 : vector<1x8xf32> to vector<8x8xf32>
    %c0_92 = arith.constant 0 : index
    %c0_93 = arith.constant 0 : index
    %76 = vector.load %arg9[%c0_92, %c0_93] : memref<8x8xf32, #tpu.memory_space<vmem>>, vector<8x8xf32>
    %cst_94 = arith.constant dense<0.000000e+00> : vector<8x8xf32>
    %77 = tpu.matmul %75, %76, %cst_94 {dimension_numbers = #tpu.dot_dimension_numbers<[1], [0], [0], [1], [0, 0, 1, 1], [], []>} : vector<8x8xf32>, vector<8x8xf32>, vector<8x8xf32> -> vector<8x8xf32>
    %c0_95 = arith.constant 0 : index
    %c0_96 = arith.constant 0 : index
    %78 = vector.load %arg10[%c0_95, %c0_96] : memref<1x8xf32, #tpu.memory_space<vmem>>, vector<1x8xf32>
    %79 = vector.broadcast %78 : vector<1x8xf32> to vector<8x8xf32>
    %80 = arith.addf %77, %79 : vector<8x8xf32>
    %cst_97 = arith.constant 0.000000e+00 : f32
    %81 = vector.broadcast %cst_97 : f32 to vector<8x8xf32>
    %82 = arith.maximumf %80, %81 : vector<8x8xf32>
    %c0_98 = arith.constant 0 : index
    %c0_99 = arith.constant 0 : index
    %83 = vector.load %arg11[%c0_98, %c0_99] : memref<8x8xf32, #tpu.memory_space<vmem>>, vector<8x8xf32>
    %cst_100 = arith.constant dense<0.000000e+00> : vector<8x8xf32>
    %84 = tpu.matmul %82, %83, %cst_100 {dimension_numbers = #tpu.dot_dimension_numbers<[1], [0], [0], [1], [0, 0, 1, 1], [], []>} : vector<8x8xf32>, vector<8x8xf32>, vector<8x8xf32> -> vector<8x8xf32>
    %c0_101 = arith.constant 0 : index
    %c0_102 = arith.constant 0 : index
    %85 = vector.load %arg12[%c0_101, %c0_102] : memref<1x8xf32, #tpu.memory_space<vmem>>, vector<1x8xf32>
    %86 = vector.broadcast %85 : vector<1x8xf32> to vector<8x8xf32>
    %87 = arith.addf %84, %86 : vector<8x8xf32>
    %88 = vector.extract_strided_slice %87 {offsets = [0, 0], sizes = [1, 8], strides = [1, 1]} : vector<8x8xf32> to vector<1x8xf32>
    %cst_103 = arith.constant 0.000000e+00 : f32
    %89 = vector.broadcast %cst_103 : f32 to vector<1x8xf32>
    %90 = arith.subf %89, %88 : vector<1x8xf32>
    %91 = math.exp %90 : vector<1x8xf32>
    %cst_104 = arith.constant 1.000000e+00 : f32
    %92 = vector.broadcast %cst_104 : f32 to vector<1x8xf32>
    %93 = arith.addf %92, %91 : vector<1x8xf32>
    %cst_105 = arith.constant 1.000000e+00 : f32
    %94 = vector.broadcast %cst_105 : f32 to vector<1x8xf32>
    %95 = arith.divf %94, %93 : vector<1x8xf32>
    %96 = vector.broadcast %95 : vector<1x8xf32> to vector<256x8xf32>
    %97 = arith.mulf %69, %96 : vector<256x8xf32>
    %98 = vector.shape_cast %97 : vector<256x8xf32> to vector<1x16x16x8xf32>
    %c0_106 = arith.constant 0 : index
    %c0_107 = arith.constant 0 : index
    %c0_108 = arith.constant 0 : index
    %c0_109 = arith.constant 0 : index
    %99 = vector.load %arg13[%c0_106, %c0_107, %c0_108, %c0_109] : memref<1x16x16x8xf32, #tpu.memory_space<vmem>>, vector<1x16x16x8xf32>
    tpu.vector_store %arg13[%c0_106, %c0_107, %c0_108, %c0_109], %98 {strides = array<i32>} : memref<1x16x16x8xf32, #tpu.memory_space<vmem>>, vector<1x16x16x8xf32>,
    return
  }
  func.func @transform_0(%arg0: i32) -> (i32, i32, i32, i32) {
    %c0_i32 = arith.constant 0 : i32
    %c0_i32_0 = arith.constant 0 : i32
    %c0_i32_1 = arith.constant 0 : i32
    %c0_i32_2 = arith.constant 0 : i32
    return %arg0, %c0_i32, %c0_i32_0, %c0_i32_1 : i32, i32, i32, i32
  }
  func.func @transform_1(%arg0: i32) -> (i32, i32, i32, i32) {
    %c0_i32 = arith.constant 0 : i32
    %c0_i32_0 = arith.constant 0 : i32
    %c0_i32_1 = arith.constant 0 : i32
    %c0_i32_2 = arith.constant 0 : i32
    return %arg0, %c0_i32, %c0_i32_0, %c0_i32_1 : i32, i32, i32, i32
  }
  func.func @transform_2(%arg0: i32) -> (i32, i32) {
    %c0_i32 = arith.constant 0 : i32
    %c0_i32_0 = arith.constant 0 : i32
    %c0_i32_1 = arith.constant 0 : i32
    return %c0_i32, %c0_i32_0 : i32, i32
  }
  func.func @transform_3(%arg0: i32) -> (i32, i32) {
    %c0_i32 = arith.constant 0 : i32
    %c0_i32_0 = arith.constant 0 : i32
    %c0_i32_1 = arith.constant 0 : i32
    return %c0_i32, %c0_i32_0 : i32, i32
  }
  func.func @transform_4(%arg0: i32) -> (i32, i32) {
    %c0_i32 = arith.constant 0 : i32
    %c0_i32_0 = arith.constant 0 : i32
    %c0_i32_1 = arith.constant 0 : i32
    return %c0_i32, %c0_i32_0 : i32, i32
  }
  func.func @transform_5(%arg0: i32) -> (i32, i32) {
    %c0_i32 = arith.constant 0 : i32
    %c0_i32_0 = arith.constant 0 : i32
    %c0_i32_1 = arith.constant 0 : i32
    return %c0_i32, %c0_i32_0 : i32, i32
  }
  func.func @transform_6(%arg0: i32) -> (i32, i32) {
    %c0_i32 = arith.constant 0 : i32
    %c0_i32_0 = arith.constant 0 : i32
    %c0_i32_1 = arith.constant 0 : i32
    return %c0_i32, %c0_i32_0 : i32, i32
  }
  func.func @transform_7(%arg0: i32) -> (i32, i32) {
    %c0_i32 = arith.constant 0 : i32
    %c0_i32_0 = arith.constant 0 : i32
    %c0_i32_1 = arith.constant 0 : i32
    return %c0_i32, %c0_i32_0 : i32, i32
  }
  func.func @transform_8(%arg0: i32) -> (i32, i32) {
    %c0_i32 = arith.constant 0 : i32
    %c0_i32_0 = arith.constant 0 : i32
    %c0_i32_1 = arith.constant 0 : i32
    return %c0_i32, %c0_i32_0 : i32, i32
  }
  func.func @transform_9(%arg0: i32) -> (i32, i32) {
    %c0_i32 = arith.constant 0 : i32
    %c0_i32_0 = arith.constant 0 : i32
    %c0_i32_1 = arith.constant 0 : i32
    return %c0_i32, %c0_i32_0 : i32, i32
  }
  func.func @transform_10(%arg0: i32) -> (i32, i32) {
    %c0_i32 = arith.constant 0 : i32
    %c0_i32_0 = arith.constant 0 : i32
    %c0_i32_1 = arith.constant 0 : i32
    return %c0_i32, %c0_i32_0 : i32, i32
  }
  func.func @transform_11(%arg0: i32) -> (i32, i32) {
    %c0_i32 = arith.constant 0 : i32
    %c0_i32_0 = arith.constant 0 : i32
    %c0_i32_1 = arith.constant 0 : i32
    return %c0_i32, %c0_i32_0 : i32, i32
  }
  func.func @transform_12(%arg0: i32) -> (i32, i32, i32, i32) {
    %c0_i32 = arith.constant 0 : i32
    %c0_i32_0 = arith.constant 0 : i32
    %c0_i32_1 = arith.constant 0 : i32
    %c0_i32_2 = arith.constant 0 : i32
    return %arg0, %c0_i32, %c0_i32_0, %c0_i32_1 : i32, i32, i32, i32
  }
}

</mosaic_0001>

<bundles_post_ra>
// kernel: tile.13
= control target key start
LH: loop header
LB: loop body
LE: loop exit
PB: predicated region body
PF: predicated region fallthrough
CT: control target
= control target key end

     0   :  { %s22_s0 = inlined_call_operand.vmem [shape: f32[16], index: 0, kind: input, shape index: {}]   ;;  %s23_s1 = inlined_call_operand.vmem [shape: f32[4,16], index: 1, kind: output, shape index: {}]  }
   0x1   :  { %v4_v0 = vld [vmem:[%s22_s0] ss:$0 sm:$0xff] }
   0x2   :  { %5 = vst [vmem:[%s23_s1] sm:$0xf] %v4_v0 }

// kernel: tile.18
= control target key start
LH: loop header
LB: loop body
LE: loop exit
PB: predicated region body
PF: predicated region fallthrough
CT: control target
= control target key end

     0   :  { %s22_s0 = inlined_call_operand.vmem [shape: f32[8], index: 0, kind: input, shape index: {}]   ;;  %s23_s1 = inlined_call_operand.vmem [shape: f32[4,8], index: 1, kind: output, shape index: {}]  }
   0x1   :  { %v4_v0 = vld [vmem:[%s22_s0] ss:$0 sm:$0xff] }
   0x2   :  { %5 = vst [vmem:[%s23_s1] sm:$0xf] %v4_v0 }

// kernel: tile.14
= control target key start
LH: loop header
LB: loop body
LE: loop exit
PB: predicated region body
PF: predicated region fallthrough
CT: control target
= control target key end

     0   :  { %vm8_vm0 = vcmask 130048   ;;  %s40_s8 = smov 16   ;;  %s41_s9 = smov 32   ;;  %vm14_vm1 = vcmask 523648   ;;  %vm20_vm2 = vcmask 392448   ;;  %vm26_vm3 = vcmask 261248   ;;  %s58_s0 = inlined_call_operand.vmem [shape: f32[4,16], index: 0, kind: input, shape index: {}]   ;;  %s59_s1 = inlined_call_operand.vmem [shape: f32[1,64], index: 1, kind: output, shape index: {}]  }
   0x1   :  { %v5_v0 = vld [vmem:[%s58_s0] sm:$0xf]  ;;  %s39_s0 = smov 48  }
   0x2   :  { %6 = vst [vmem:[#allocation1] sm:$0xf] %v5_v0 }
   0x9   :  { %v11_v1 = vld [vmem:[#allocation1 + $0x3] sm:$0x1]   ;;  %v23_v2 = vld [vmem:[#allocation1 + $0x1] sm:$0x1]   ;;  %v7_v3 = vld [vmem:[#allocation1] sm:$0x1]  }
   0xa   :  { %12 = vrot.lane.b32.xlu0 %v11_v1, %s39_s0  ;;  %24 = vrot.lane.b32.xlu1 %v23_v2, %s40_s8  ;;  %v17_v4 = vld [vmem:[#allocation1 + $0x2] sm:$0x1]   ;;  %9 = vst.msk [vmem:[#allocation0] sm:$0x1] %vm8_vm0, %v7_v3  }
   0xe   :  { %18 = vrot.lane.b32.xlu0 %v17_v4, %s41_s9 }
  0x7c   :  { %v13_v5 = vpop.permute.xlu0 %12   ;;  %v25_v6 = vpop.permute.xlu1 %24  }
  0x7d   :  { %15 = vst.msk [vmem:[#allocation0] sm:$0x1] %vm14_vm1, %v13_v5  }
  0x80   :  { %v19_v7 = vpop.permute.xlu0 %18  }
  0x81   :  { %21 = vst.msk [vmem:[#allocation0] sm:$0x1] %vm20_vm2, %v19_v7  }
  0x82   :  { %27 = vst.msk [vmem:[#allocation0] sm:$0x1] %vm26_vm3, %v25_v6  }
  0x89   :  { %v32_v8 = vld [vmem:[#allocation0] sm:$0x1] }
  0x8a   :  { %35 = vst [vmem:[%s59_s1] sm:$0x1] %v32_v8 }

// kernel: tile.19
= control target key start
LH: loop header
LB: loop body
LE: loop exit
PB: predicated region body
PF: predicated region fallthrough
CT: control target
= control target key end

     0   :  { %vm8_vm0 = vcmask 64512   ;;  %s40_s8 = smov 8   ;;  %s41_s9 = smov 16   ;;  %vm14_vm1 = vcmask 261312   ;;  %vm20_vm2 = vcmask 195712   ;;  %vm26_vm3 = vcmask 130112   ;;  %s58_s0 = inlined_call_operand.vmem [shape: f32[4,8], index: 0, kind: input, shape index: {}]   ;;  %s59_s1 = inlined_call_operand.vmem [shape: f32[1,32], index: 1, kind: output, shape index: {}]  }
   0x1   :  { %v5_v0 = vld [vmem:[%s58_s0] sm:$0xf]  ;;  %s39_s0 = smov 24  }
   0x2   :  { %6 = vst [vmem:[#allocation1] sm:$0xf] %v5_v0 }
   0x9   :  { %v11_v1 = vld [vmem:[#allocation1 + $0x3] sm:$0x1]   ;;  %v23_v2 = vld [vmem:[#allocation1 + $0x1] sm:$0x1]   ;;  %v7_v3 = vld [vmem:[#allocation1] sm:$0x1]  }
   0xa   :  { %12 = vrot.lane.b32.xlu0 %v11_v1, %s39_s0  ;;  %24 = vrot.lane.b32.xlu1 %v23_v2, %s40_s8  ;;  %v17_v4 = vld [vmem:[#allocation1 + $0x2] sm:$0x1]   ;;  %9 = vst.msk [vmem:[#allocation0] sm:$0x1] %vm8_vm0, %v7_v3  }
   0xe   :  { %18 = vrot.lane.b32.xlu0 %v17_v4, %s41_s9 }
  0x7c   :  { %v13_v5 = vpop.permute.xlu0 %12   ;;  %v25_v6 = vpop.permute.xlu1 %24  }
  0x7d   :  { %15 = vst.msk [vmem:[#allocation0] sm:$0x1] %vm14_vm1, %v13_v5  }
  0x80   :  { %v19_v7 = vpop.permute.xlu0 %18  }
  0x81   :  { %21 = vst.msk [vmem:[#allocation0] sm:$0x1] %vm20_vm2, %v19_v7  }
  0x82   :  { %27 = vst.msk [vmem:[#allocation0] sm:$0x1] %vm26_vm3, %v25_v6  }
  0x89   :  { %v32_v8 = vld [vmem:[#allocation0] sm:$0x1] }
  0x8a   :  { %35 = vst [vmem:[%s59_s1] sm:$0x1] %v32_v8 }

// kernel: decoder_forward.4
= control target key start
LH: loop header
LB: loop body
LE: loop exit
PB: predicated region body
PF: predicated region fallthrough
CT: control target
= control target key end

     0   :  { %s496_s12 = smov 0   ;;  %s498_s13 = smov 0   ;;  %s544_s0 = inlined_call_operand.vmem [shape: f32[2,16,32], index: 0, kind: input, shape index: {}]   ;;  %s545_s1 = inlined_call_operand.vmem [shape: f32[32,64], index: 1, kind: input, shape index: {}]   ;;  %s546_s2 = inlined_call_operand.vmem [shape: f32[1,64], index: 2, kind: input, shape index: {}]   ;;  %s547_s3 = inlined_call_operand.vmem [shape: f32[2,16,64], index: 3, kind: output, shape index: {}]  }
   0x1   :  { %s500_s14 = smov 0  }
   0x2 LB: > { %s25_s15 = sadd.s32 1, %s470_s13  ;;  %p399_p0 = scmp.ge.s32.totalorder %s474_s14, 1  ;;  %s474_s14 = sphi %s500_s14, %s13_s14   ;;  %s470_s13 = sphi %s498_s13, %s549_s13   ;;  %s466_s12 = sphi %s496_s12, %s548_s12  }
   0x3   : > { %p27_p1 = scmp.ge.s32.totalorder %s25_s15, 2  ;;  %p158_p2 = scmp.lt.s32.totalorder %s474_s14, 3 }
   0x5   : > { %s551_s15 = smov (%p27_p1, %s25_s15), 0  ;;  %p159_p3 = pnand %p399_p0, %p158_p2 }
   0x6   : > { %p191_p4 = scmp.lt.s32.totalorder (!%p159_p3), %s466_s12, 1 }
   0x7   : > { %162 = sbr.rel (%p159_p3) target bundleno = 219 (0xdb), region = 32 }
   0xc   : > { %v215_v0 = vld [vmem:[%s545_s1 + $0x18] sm:$0xff]  ;;  %v214_v1 = vld [vmem:[%s545_s1 + $0x10] sm:$0xff]  ;;  %v213_v2 = vld [vmem:[%s545_s1 + $0x8] sm:$0xff]  ;;  %s553_s12 = smov (!%p191_p4, %s466_s12), 1  ;;  %vm223_vm0 = vcmask 261120   ;;  %vm305_vm1 = vcmask 523264  }
   0xd   : > { %417 = vmatprep.subr.mxu0 %v215_v0  ;;  %v212_v3 = vld [vmem:[%s545_s1] sm:$0xff]  ;;  %s409_s24 = sshll.u32 %s553_s12, 4 }
   0xe   : > { %418 = vmatpush3.msra.mxu0 %v215_v0  ;;  %s198_s27 = scalar_lea.vmem %s544_s0, %s409_s24  ;;  %v404_v6 = vld [vmem:[%s546_s2] ss:$0 sm:$0xff]  ;;  %s208_s5 = scalar_lea.vmem %s547_s3, %s409_s24 }
   0xf   : > { %419 = vmatprep.subr.mxu0 %v214_v1  ;;  %v210_v4 = vld [vmem:[%s198_s27] sm:$0xff]  ;;  %v211_v5 = vld [vmem:[%s198_s27 + $0x8] sm:$0xff] }
  0x10   : > { %420 = vmatpush3.msra.mxu0 %v214_v1  ;;  %425 = vmatprep.mubr.msk.f32.mxu0 %vm223_vm0, %v210_v4 }
  0x11   : > { %421 = vmatprep.subr.mxu0 %v213_v2 }
  0x12   : > { %422 = vmatpush3.msra.mxu0 %v213_v2 }
  0x13   : > { %423 = vmatprep.subr.mxu0 %v212_v3 }
  0x14   : > { %424 = vmatpush3.msra.mxu0 %v212_v3 }
  0x15   : > { %426 = vmatmul.mubr.msk.f32.vlgmr.msra.gmra.mxu0 %vm223_vm0, %v211_v5 }
  0xd5   : > { %v427_v7 = vpop.f32.mrf.mxu0 }
  0xd6   : > { %v302_v8 = vadd.f32 %v427_v7, %v404_v6 }
  0xd7   : > { %v296_v9 = vpop.f32.mrf.mxu0 }
  0xd8   : > { %307 = vst.msk [vmem:[%s208_s5 + $0x8] sm:$0xff] %vm305_vm1, %v302_v8  ;;  %v297_v10 = vadd.f32 %v404_v6, %v296_v9 }
  0xda   : > { %306 = vst.msk [vmem:[%s208_s5] sm:$0xff] %vm305_vm1, %v297_v10 }
  0xdb PF: > { %s13_s14 = sadd.s32 1, %s474_s14   ;;  %s548_s12 = smov %s470_s13 }
  0xdc   : > { %p10_p5 = scmp.ge.s32.totalorder %s13_s14, 4   ;;  %s549_s13 = smov %s551_s15 }
  0xde   :  { %12 = sbr.rel (!%p10_p5) target bundleno = 2 (0x2), region = 62 }

// kernel: decoder_forward.6
= control target key start
LH: loop header
LB: loop body
LE: loop exit
PB: predicated region body
PF: predicated region fallthrough
CT: control target
= control target key end

     0   :  { %s573_s12 = smov 0   ;;  %s575_s13 = smov 0   ;;  %s631_s0 = inlined_call_operand.vmem [shape: f32[2,64,16], index: 0, kind: input, shape index: {}]   ;;  %s632_s1 = inlined_call_operand.vmem [shape: f32[16,32], index: 1, kind: input, shape index: {}]   ;;  %s633_s2 = inlined_call_operand.vmem [shape: f32[1,32], index: 2, kind: input, shape index: {}]   ;;  %s634_s3 = inlined_call_operand.vmem [shape: f32[2,64,32], index: 3, kind: output, shape index: {}]  }
   0x1   :  { %s577_s14 = smov 0  }
   0x2 LB: > { %s25_s15 = sadd.s32 1, %s547_s13  ;;  %p457_p0 = scmp.ge.s32.totalorder %s551_s14, 1  ;;  %s551_s14 = sphi %s577_s14, %s13_s14   ;;  %s547_s13 = sphi %s575_s13, %s636_s13   ;;  %s543_s12 = sphi %s573_s12, %s635_s12  }
   0x3   : > { %p27_p1 = scmp.ge.s32.totalorder %s25_s15, 2  ;;  %p158_p2 = scmp.lt.s32.totalorder %s551_s14, 3 }
   0x5   : > { %s638_s15 = smov (%p27_p1, %s25_s15), 0  ;;  %p159_p3 = pnand %p457_p0, %p158_p2 }
   0x6   : > { %p191_p4 = scmp.lt.s32.totalorder (!%p159_p3), %s543_s12, 1 }
   0x7   : > { %162 = sbr.rel (%p159_p3) target bundleno = 220 (0xdc), region = 32 }
   0xc   : > { %v219_v0 = vld [vmem:[%s632_s1 + $0x8] sm:$0xff]  ;;  %v218_v1 = vld [vmem:[%s632_s1] sm:$0xff]  ;;  %s640_s12 = smov (!%p191_p4, %s543_s12), 1  ;;  %vm227_vm0 = vcmask 130048   ;;  %vm357_vm1 = vcmask 261120  }
   0xd   : > { %485 = vmatprep.subr.mxu0 %v219_v0  ;;  %501 = vmatprep.subr.mxu1 %v219_v0  ;;  %s473_s20 = sshll.u32 %s640_s12, 6  ;;  %v462_v10 = vld [vmem:[%s633_s2] ss:$0 sm:$0xff] }
   0xe   : > { %486 = vmatpush3.msra.mxu0 %v219_v0  ;;  %503 = vmatpush3.msra.mxu1 %v219_v0  ;;  %s198_s23 = scalar_lea.vmem %s631_s0, %s473_s20  ;;  %s208_s28 = scalar_lea.vmem %s634_s3, %s473_s20 }
   0xf   : > { %487 = vmatprep.subr.mxu0 %v218_v1  ;;  %502 = vmatprep.subr.mxu1 %v218_v1  ;;  %v210_v2 = vld [vmem:[%s198_s23] sm:$0xff]  ;;  %v211_v4 = vld [vmem:[%s198_s23 + $0x8] sm:$0xff]  ;;  %v212_v6 = vld [vmem:[%s198_s23 + $0x10] sm:$0xff] }
  0x10   : > { %488 = vmatpush3.msra.mxu0 %v218_v1  ;;  %504 = vmatpush3.msra.mxu1 %v218_v1  ;;  %v214_v3 = vld [vmem:[%s198_s23 + $0x20] sm:$0xff]  ;;  %v215_v5 = vld [vmem:[%s198_s23 + $0x28] sm:$0xff]  ;;  %v216_v7 = vld [vmem:[%s198_s23 + $0x30] sm:$0xff] }
  0x11   : > { %489 = vmatprep.mubr.msk.f32.mxu0 %vm227_vm0, %v210_v2  ;;  %495 = vmatprep.mubr.msk.f32.mxu1 %vm227_vm0, %v214_v3  ;;  %v213_v8 = vld [vmem:[%s198_s23 + $0x18] sm:$0xff] }
  0x12   : > { %490 = vmatmul.mubr.msk.f32.vlgmr.msra.gmra.mxu0 %vm227_vm0, %v211_v4  ;;  %496 = vmatmul.mubr.msk.f32.vlgmr.msra.gmra.mxu1 %vm227_vm0, %v215_v5  ;;  %v217_v9 = vld [vmem:[%s198_s23 + $0x38] sm:$0xff] }
  0x13   : > { %492 = vmatprep.mubr.msk.f32.mxu0 %vm227_vm0, %v212_v6  ;;  %498 = vmatprep.mubr.msk.f32.mxu1 %vm227_vm0, %v216_v7 }
  0x16   : > { %493 = vmatmul.mubr.msk.f32.gmra.mxu0 %vm227_vm0, %v213_v8  ;;  %499 = vmatmul.mubr.msk.f32.gmra.mxu1 %vm227_vm0, %v217_v9 }
  0xd2   : > { %v491_v11 = vpop.f32.mrf.mxu0  ;;  %v497_v12 = vpop.f32.mrf.mxu1 }
  0xd3   : > { %v324_v13 = vadd.f32 %v491_v11, %v462_v10  ;;  %v344_v14 = vadd.f32 %v497_v12, %v462_v10 }
  0xd4   : > { %v318_v15 = vpop.f32.mrf.mxu0  ;;  %v338_v16 = vpop.f32.mrf.mxu1 }
  0xd5   : > { %359 = vst.msk [vmem:[%s208_s28 + $0x8] sm:$0xff] %vm357_vm1, %v324_v13  ;;  %363 = vst.msk [vmem:[%s208_s28 + $0x28] sm:$0xff] %vm357_vm1, %v344_v14  ;;  %v319_v17 = vadd.f32 %v462_v10, %v318_v15  ;;  %v339_v18 = vadd.f32 %v462_v10, %v338_v16 }
  0xd6   : > { %v494_v19 = vpop.f32.mrf.mxu0  ;;  %v500_v20 = vpop.f32.mrf.mxu1 }
  0xd7   : > { %358 = vst.msk [vmem:[%s208_s28] sm:$0xff] %vm357_vm1, %v319_v17  ;;  %362 = vst.msk [vmem:[%s208_s28 + $0x20] sm:$0xff] %vm357_vm1, %v339_v18  ;;  %v334_v21 = vadd.f32 %v494_v19, %v462_v10  ;;  %v354_v22 = vadd.f32 %v500_v20, %v462_v10 }
  0xd8   : > { %v328_v23 = vpop.f32.mrf.mxu0  ;;  %v348_v24 = vpop.f32.mrf.mxu1 }
  0xd9   : > { %361 = vst.msk [vmem:[%s208_s28 + $0x18] sm:$0xff] %vm357_vm1, %v334_v21  ;;  %365 = vst.msk [vmem:[%s208_s28 + $0x38] sm:$0xff] %vm357_vm1, %v354_v22  ;;  %v329_v25 = vadd.f32 %v462_v10, %v328_v23  ;;  %v349_v26 = vadd.f32 %v462_v10, %v348_v24 }
  0xdb   : > { %360 = vst.msk [vmem:[%s208_s28 + $0x10] sm:$0xff] %vm357_vm1, %v329_v25  ;;  %364 = vst.msk [vmem:[%s208_s28 + $0x30] sm:$0xff] %vm357_vm1, %v349_v26 }
  0xdc PF: > { %s13_s14 = sadd.s32 1, %s551_s14   ;;  %s635_s12 = smov %s547_s13 }
  0xdd   : > { %p10_p5 = scmp.ge.s32.totalorder %s13_s14, 4   ;;  %s636_s13 = smov %s638_s15 }
  0xdf   :  { %12 = sbr.rel (!%p10_p5) target bundleno = 2 (0x2), region = 62 }

// kernel: decoder_forward.5
= control target key start
LH: loop header
LB: loop body
LE: loop exit
PB: predicated region body
PF: predicated region fallthrough
CT: control target
= control target key end

     0   :  { %s2494_s21 = smov 0   ;;  %s3255_s0 = inlined_call_operand.vmem [shape: f32[2,8,8,16], index: 0, kind: input, shape index: {}]   ;;  %s3256_s1 = inlined_call_operand.vmem [shape: f32[2,8,8,16], index: 1, kind: input, shape index: {}]   ;;  %s3257_s2 = inlined_call_operand.vmem [shape: f32[288,16], index: 2, kind: input, shape index: {}]   ;;  %s3258_s3 = inlined_call_operand.vmem [shape: f32[1,16], index: 3, kind: input, shape index: {}]   ;;  %s3259_s4 = inlined_call_operand.vmem [shape: f32[1,16], index: 4, kind: input, shape index: {}]   ;;  %s3260_s5 = inlined_call_operand.vmem [shape: f32[144,16], index: 5, kind: input, shape index: {}]   ;;  %s3261_s6 = inlined_call_operand.vmem [shape: f32[1,16], index: 6, kind: input, shape index: {}]   ;;  %s3262_s7 = inlined_call_operand.vmem [shape: f32[1,16], index: 7, kind: input, shape index: {}]   ;;  %s3263_s8 = inlined_call_operand.vmem [shape: f32[16,16], index: 8, kind: input, shape index: {}]   ;;  %s3264_s9 = inlined_call_operand.vmem [shape: f32[1,16], index: 9, kind: input, shape index: {}]   ;;  %s3265_s10 = inlined_call_operand.vmem [shape: f32[16,16], index: 10, kind: input, shape index: {}]   ;;  %s3266_s11 = inlined_call_operand.vmem [shape: f32[1,16], index: 11, kind: input, shape index: {}]   ;;  %s3267_s12 = inlined_call_operand.vmem [shape: f32[2,8,8,16], index: 12, kind: output, shape index: {}]  }
   0x1 LB: > { %s1998_s22 = sadd.s32 4294967295, %s2418_s21   ;;  %p2002_p0 = scmp.ge.s32.totalorder %s2418_s21, 1  ;;  %s2418_s21 = sphi %s2494_s21, %s22_s21  }
   0x2   : > { %p372_p1 = scmp.lt.s32.totalorder %s2418_s21, 3 }
   0x4   : > { %p373_p2 = pnand %p2002_p0, %p372_p1 }
   0x5   : > { %p2504_p3 = scmp.lt.s32.totalorder (!%p373_p2), %s1998_s22, 1  ;;  %s2421_s19 = smov (!%p373_p2), 16  }
   0x6   : > { %376 = sbr.rel (%p373_p2) target bundleno = 1312 (0x520), region = 68  ;;  %s2422_s27 = smov (!%p373_p2), 32  }
   0x7   : > { %s2423_s29 = smov (!%p373_p2), 64   ;;  %s2424_s30 = smov (!%p373_p2), 96  }
   0x8   : > { %s2425_s17 = smov (!%p373_p2), 48   ;;  %s2427_s20 = smov (!%p373_p2), 112  }
   0xb   : > { %vm434_vm0 = vcmask 261120   ;;  %vm436_vm1 = vcmask 254976   ;;  %vm465_vm2 = vcmask 130048   ;;  %v2420_v0 = vmov 0.0   ;;  %v873_v1 = vld [vmem:[%s3257_s2 + $0x118] sm:$0xff]  ;;  %s3270_s22 = smov (!%p2504_p3, %s1998_s22), 1 }
   0xc   : > { %442 = vst.msk [vmem:[#allocation2 + $0x30] sm:$0xff] %vm434_vm0, %v2420_v0  ;;  %435 = vst.msk [vmem:[#allocation2] sm:$0xff] %vm434_vm0, %v2420_v0  ;;  %2112 = vmatprep.subr.mxu1 %v873_v1  ;;  %v872_v2 = vld [vmem:[%s3257_s2 + $0x110] sm:$0xff]  ;;  %s2578_s28 = sshll.u32 %s3270_s22, 6  ;;  %v871_v3 = vld [vmem:[%s3257_s2 + $0x108] sm:$0xff]  ;;  %vm514_vm3 = vcmask 261248  }
   0xd   : > { %443 = vst.msk [vmem:[#allocation2 + $0x38] sm:$0x3] %vm436_vm1, %v2420_v0  ;;  %437 = vst.msk [vmem:[#allocation2 + $0x8] sm:$0x3] %vm436_vm1, %v2420_v0  ;;  %2113 = vmatpush3.msra.mxu1 %v873_v1  ;;  %s2587_s15 = scalar_lea.vmem %s3256_s1, %s2578_s28  ;;  %s2594_s18 = scalar_lea.vmem %s3255_s0, %s2578_s28  ;;  %v870_v13 = vld [vmem:[%s3257_s2 + $0x100] sm:$0xff]  ;;  %v869_v21 = vld [vmem:[%s3257_s2 + $0xf8] sm:$0xff] }
   0xe   : > { %438 = vst.msk [vmem:[#allocation2 + $0x10] sm:$0xff] %vm434_vm0, %v2420_v0  ;;  %440 = vst.msk [vmem:[#allocation2 + $0x20] sm:$0xff] %vm434_vm0, %v2420_v0  ;;  %2114 = vmatprep.subr.mxu1 %v872_v2  ;;  %v476_v4 = vld [vmem:[%s2587_s15 + $0x10] sm:$0xff]  ;;  %v474_v5 = vld [vmem:[%s2587_s15] sm:$0xff]  ;;  %2038 = vmatprep.subr.mxu0 %v869_v21  ;;  %vm796_vm4 = vcmask 523264   ;;  %vm805_vm5 = vcmask 785408  }
   0xf   : > { %439 = vst.msk [vmem:[#allocation2 + $0x18] sm:$0x3] %vm436_vm1, %v2420_v0  ;;  %441 = vst.msk [vmem:[#allocation2 + $0x28] sm:$0x3] %vm436_vm1, %v2420_v0  ;;  %2115 = vmatpush3.msra.mxu1 %v872_v2  ;;  %494 = vrot.lane.b32.xlu1 %v476_v4, %s2421_s19  ;;  %v477_v6 = vld [vmem:[%s2587_s15 + $0x18] sm:$0xff]  ;;  %v475_v7 = vld [vmem:[%s2587_s15 + $0x8] sm:$0xff] }
  0x10   : > { %444 = vst.msk [vmem:[#allocation2 + $0x40] sm:$0xff] %vm434_vm0, %v2420_v0  ;;  %446 = vst.msk [vmem:[#allocation2 + $0x50] sm:$0xff] %vm434_vm0, %v2420_v0  ;;  %2116 = vmatprep.subr.mxu1 %v871_v3  ;;  %490 = vrot.lane.b32.xlu0 %v474_v5, %s2421_s19  ;;  %v458_v8 = vld [vmem:[%s2594_s18 + $0x10] sm:$0xff]  ;;  %v456_v9 = vld [vmem:[%s2594_s18] sm:$0xff]  ;;  %vm1147_vm6 = vcmask 123904   ;;  %vm1489_vm7 = vcmask 392192  }
  0x11   : > { %445 = vst.msk [vmem:[#allocation2 + $0x48] sm:$0x3] %vm436_vm1, %v2420_v0  ;;  %447 = vst.msk [vmem:[#allocation2 + $0x58] sm:$0x3] %vm436_vm1, %v2420_v0  ;;  %2117 = vmatpush3.msra.mxu1 %v871_v3  ;;  %v459_v10 = vld [vmem:[%s2594_s18 + $0x18] sm:$0xff]  ;;  %v457_v11 = vld [vmem:[%s2594_s18 + $0x8] sm:$0xff] }
  0x12   : > { %448 = vst.msk [vmem:[#allocation2 + $0x60] sm:$0xff] %vm434_vm0, %v2420_v0  ;;  %450 = vst.msk [vmem:[#allocation2 + $0x70] sm:$0xff] %vm434_vm0, %v2420_v0  ;;  %v460_v12 = vld [vmem:[%s2594_s18 + $0x20] sm:$0xff]  ;;  %v461_v14 = vld [vmem:[%s2594_s18 + $0x28] sm:$0xff]  ;;  %2118 = vmatprep.subr.mxu1 %v870_v13  ;;  %vm1506_vm8 = vcmask 654336   ;;  %vm1523_vm9 = vcmask 916480  }
  0x13   : > { %449 = vst.msk [vmem:[#allocation2 + $0x68] sm:$0x3] %vm436_vm1, %v2420_v0  ;;  %451 = vst.msk [vmem:[#allocation2 + $0x78] sm:$0x3] %vm436_vm1, %v2420_v0  ;;  %496 = vrot.lane.b32.xlu1 %v477_v6, %s2421_s19  ;;  %v478_v15 = vld [vmem:[%s2587_s15 + $0x20] sm:$0xff]  ;;  %v479_v16 = vld [vmem:[%s2587_s15 + $0x28] sm:$0xff]  ;;  %2119 = vmatpush3.msra.mxu1 %v870_v13 }
  0x14   : > { %452 = vst.msk [vmem:[#allocation2 + $0x80] sm:$0xff] %vm434_vm0, %v2420_v0  ;;  %454 = vst.msk [vmem:[#allocation2 + $0x90] sm:$0xff] %vm434_vm0, %v2420_v0  ;;  %492 = vrot.lane.b32.xlu0 %v475_v7, %s2421_s19  ;;  %1574 = vmatprep.subr.mxu1 %v2420_v0  ;;  %v480_v17 = vld [vmem:[%s2587_s15 + $0x30] sm:$0xff]  ;;  %v481_v18 = vld [vmem:[%s2587_s15 + $0x38] sm:$0xff]  ;;  %vm2428_vm10 = vmmov 0  }
  0x15   : > { %453 = vst.msk [vmem:[#allocation2 + $0x88] sm:$0x3] %vm436_vm1, %v2420_v0  ;;  %455 = vst.msk [vmem:[#allocation2 + $0x98] sm:$0x3] %vm436_vm1, %v2420_v0  ;;  %v462_v19 = vld [vmem:[%s2594_s18 + $0x30] sm:$0xff]  ;;  %v463_v20 = vld [vmem:[%s2594_s18 + $0x38] sm:$0xff] }
  0x16   : > { %1146 = vst.msk [vmem:[#allocation3] sm:$0xff] %vm465_vm2, %v2420_v0  ;;  %1149 = vst.msk [vmem:[#allocation3 + $0x10] sm:$0xff] %vm465_vm2, %v2420_v0  ;;  %v853_v22 = vld [vmem:[%s3257_s2 + $0x78] sm:$0xff]  ;;  %v868_v23 = vld [vmem:[%s3257_s2 + $0xf0] sm:$0xff]  ;;  %s2426_s18 = smov 80  }
  0x17   : > { %1151 = vst.msk [vmem:[#allocation3 + $0x20] sm:$0xff] %vm465_vm2, %v2420_v0  ;;  %1153 = vst.msk [vmem:[#allocation3 + $0x30] sm:$0xff] %vm465_vm2, %v2420_v0  ;;  %500 = vrot.lane.b32.xlu1 %v479_v16, %s2421_s19  ;;  %v852_v24 = vld [vmem:[%s3257_s2 + $0x70] sm:$0xff]  ;;  %2039 = vmatpush3.msra.mxu0 %v853_v22  ;;  %v867_v25 = vld [vmem:[%s3257_s2 + $0xe8] sm:$0xff] }
  0x18   : > { %1155 = vst.msk [vmem:[#allocation3 + $0x40] sm:$0xff] %vm465_vm2, %v2420_v0  ;;  %1157 = vst.msk [vmem:[#allocation3 + $0x50] sm:$0xff] %vm465_vm2, %v2420_v0  ;;  %498 = vrot.lane.b32.xlu0 %v478_v15, %s2421_s19  ;;  %2040 = vmatprep.subr.mxu0 %v868_v23  ;;  %v851_v26 = vld [vmem:[%s3257_s2 + $0x68] sm:$0xff]  ;;  %v866_v27 = vld [vmem:[%s3257_s2 + $0xe0] sm:$0xff] }
  0x19   : > { %1159 = vst.msk [vmem:[#allocation3 + $0x60] sm:$0xff] %vm465_vm2, %v2420_v0  ;;  %1161 = vst.msk [vmem:[#allocation3 + $0x70] sm:$0xff] %vm465_vm2, %v2420_v0  ;;  %2041 = vmatpush3.msra.mxu0 %v852_v24  ;;  %v850_v28 = vld [vmem:[%s3257_s2 + $0x60] sm:$0xff]  ;;  %v865_v29 = vld [vmem:[%s3257_s2 + $0xd8] sm:$0xff] }
  0x1a   : > { %1163 = vst.msk [vmem:[#allocation3 + $0x80] sm:$0xff] %vm465_vm2, %v2420_v0  ;;  %1165 = vst.msk [vmem:[#allocation3 + $0x90] sm:$0xff] %vm465_vm2, %v2420_v0  ;;  %2042 = vmatprep.subr.mxu0 %v867_v25  ;;  %v849_v30 = vld [vmem:[%s3257_s2 + $0x58] sm:$0xff]  ;;  %v864_v31 = vld [vmem:[%s3257_s2 + $0xd0] sm:$0xff] }
  0x1b   : > { %468 = vst.msk [vmem:[#allocation2 + $0x31] sm:$0xff] %vm465_vm2, %v458_v8  ;;  %466 = vst.msk [vmem:[#allocation2 + $0x11] sm:$0xff] %vm465_vm2, %v456_v9  ;;  %504 = vrot.lane.b32.xlu1 %v481_v18, %s2421_s19  ;;  %2043 = vmatpush3.msra.mxu0 %v851_v26  ;;  %v848_v32 = vld [vmem:[%s3257_s2 + $0x50] sm:$0xff]  ;;  %v863_v33 = vld [vmem:[%s3257_s2 + $0xc8] sm:$0xff] }
  0x1c   : > { %469 = vst.msk [vmem:[#allocation2 + $0x41] sm:$0xff] %vm465_vm2, %v459_v10  ;;  %467 = vst.msk [vmem:[#allocation2 + $0x21] sm:$0xff] %vm465_vm2, %v457_v11  ;;  %502 = vrot.lane.b32.xlu0 %v480_v17, %s2421_s19  ;;  %2044 = vmatprep.subr.mxu0 %v866_v27  ;;  %v847_v34 = vld [vmem:[%s3257_s2 + $0x48] sm:$0xff]  ;;  %v862_v35 = vld [vmem:[%s3257_s2 + $0xc0] sm:$0xff] }
  0x1d   : > { %470 = vst.msk [vmem:[#allocation2 + $0x51] sm:$0xff] %vm465_vm2, %v460_v12  ;;  %471 = vst.msk [vmem:[#allocation2 + $0x61] sm:$0xff] %vm465_vm2, %v461_v14  ;;  %2045 = vmatpush3.msra.mxu0 %v850_v28  ;;  %v846_v36 = vld [vmem:[%s3257_s2 + $0x40] sm:$0xff]  ;;  %v861_v37 = vld [vmem:[%s3257_s2 + $0xb8] sm:$0xff] }
  0x1e   : > { %472 = vst.msk [vmem:[#allocation2 + $0x71] sm:$0xff] %vm465_vm2, %v462_v19  ;;  %473 = vst.msk [vmem:[#allocation2 + $0x81] sm:$0xff] %vm465_vm2, %v463_v20  ;;  %2046 = vmatprep.subr.mxu0 %v865_v29  ;;  %v845_v38 = vld [vmem:[%s3257_s2 + $0x38] sm:$0xff]  ;;  %v860_v39 = vld [vmem:[%s3257_s2 + $0xb0] sm:$0xff] }
  0x1f   : > { %2047 = vmatpush3.msra.mxu0 %v849_v30  ;;  %v844_v40 = vld [vmem:[%s3257_s2 + $0x30] sm:$0xff]  ;;  %v859_v41 = vld [vmem:[%s3257_s2 + $0xa8] sm:$0xff]  ;;  %v858_v43 = vld [vmem:[%s3257_s2 + $0xa0] sm:$0xff]  ;;  %1150 = vst.msk [vmem:[#allocation3 + $0x18] sm:$0x3] %vm1147_vm6, %v2420_v0 }
  0x20   : > { %2048 = vmatprep.subr.mxu0 %v864_v31  ;;  %v843_v42 = vld [vmem:[%s3257_s2 + $0x28] sm:$0xff]  ;;  %v842_v44 = vld [vmem:[%s3257_s2 + $0x20] sm:$0xff]  ;;  %v857_v45 = vld [vmem:[%s3257_s2 + $0x98] sm:$0xff]  ;;  %1148 = vst.msk [vmem:[#allocation3 + $0x8] sm:$0x3] %vm1147_vm6, %v2420_v0 }
  0x21   : > { %2049 = vmatpush3.msra.mxu0 %v848_v32  ;;  %v841_v46 = vld [vmem:[%s3257_s2 + $0x18] sm:$0xff]  ;;  %v856_v47 = vld [vmem:[%s3257_s2 + $0x90] sm:$0xff]  ;;  %v855_v51 = vld [vmem:[%s3257_s2 + $0x88] sm:$0xff]  ;;  %1152 = vst.msk [vmem:[#allocation3 + $0x28] sm:$0x3] %vm1147_vm6, %v2420_v0 }
  0x22   : > { %2050 = vmatprep.subr.mxu0 %v863_v33  ;;  %v840_v50 = vld [vmem:[%s3257_s2 + $0x10] sm:$0xff]  ;;  %v839_v52 = vld [vmem:[%s3257_s2 + $0x8] sm:$0xff]  ;;  %v854_v53 = vld [vmem:[%s3257_s2 + $0x80] sm:$0xff]  ;;  %1154 = vst.msk [vmem:[#allocation3 + $0x38] sm:$0x3] %vm1147_vm6, %v2420_v0 }
  0x23   : > { %2051 = vmatpush3.msra.mxu0 %v847_v34  ;;  %v531_v56 = vld [vmem:[#allocation2 + $0x1] sm:$0xff]  ;;  %1156 = vst.msk [vmem:[#allocation3 + $0x48] sm:$0x3] %vm1147_vm6, %v2420_v0  ;;  %1158 = vst.msk [vmem:[#allocation3 + $0x58] sm:$0x3] %vm1147_vm6, %v2420_v0 }
  0x24   : > { %2052 = vmatprep.subr.mxu0 %v862_v35  ;;  %v838_v57 = vld [vmem:[%s3257_s2] sm:$0xff]  ;;  %1160 = vst.msk [vmem:[#allocation3 + $0x68] sm:$0x3] %vm1147_vm6, %v2420_v0  ;;  %1162 = vst.msk [vmem:[#allocation3 + $0x78] sm:$0x3] %vm1147_vm6, %v2420_v0 }
  0x25   : > { %2053 = vmatpush3.msra.mxu0 %v846_v36  ;;  %v539_v62 = vld [vmem:[#allocation2 + $0x2] sm:$0xff]  ;;  %1164 = vst.msk [vmem:[#allocation3 + $0x88] sm:$0x3] %vm1147_vm6, %v2420_v0  ;;  %1166 = vst.msk [vmem:[#allocation3 + $0x98] sm:$0x3] %vm1147_vm6, %v2420_v0 }
  0x26   : > { %2054 = vmatprep.subr.mxu0 %v861_v37 }
  0x27   : > { %2055 = vmatpush3.msra.mxu0 %v845_v38 }
  0x28   : > { %2056 = vmatprep.subr.mxu0 %v860_v39  ;;  %v595_v39 = vld [vmem:[#allocation2 + $0x92] sm:$0xff] }
  0x29   : > { %2057 = vmatpush3.msra.mxu0 %v844_v40 }
  0x2a   : > { %2058 = vmatprep.subr.mxu0 %v859_v41 }
  0x2b   : > { %2059 = vmatpush3.msra.mxu0 %v843_v42 }
  0x2c   : > { %2060 = vmatprep.subr.mxu0 %v858_v43 }
  0x2d   : > { %2061 = vmatpush3.msra.mxu0 %v842_v44 }
  0x2e   : > { %2062 = vmatprep.subr.mxu0 %v857_v45 }
  0x2f   : > { %2063 = vmatpush3.msra.mxu0 %v841_v46  ;;  %v579_v46 = vld [vmem:[#allocation2 + $0x90] sm:$0xff] }
  0x30   : > { %2064 = vmatprep.subr.mxu0 %v856_v47 }
  0x31   : > { %2065 = vmatpush3.msra.mxu0 %v840_v50 }
  0x32   : > { %2066 = vmatprep.subr.mxu0 %v855_v51 }
  0x33   : > { %2067 = vmatpush3.msra.mxu0 %v839_v52 }
  0x34   : > { %2068 = vmatprep.subr.mxu0 %v854_v53 }
  0x35   : > { %2069 = vmatpush3.msra.mxu0 %v838_v57 }
  0x36   : > { %2132 = vmatprep.subr.mxu0 %v2420_v0 }
  0x81   : > { %v495_v48 = vpop.permute.xlu1 %494 }
  0x82   : > { %v491_v49 = vpop.permute.xlu0 %490  ;;  %517 = vst.msk [vmem:[#allocation2 + $0x31] sm:$0xff] %vm514_vm3, %v495_v48 }
  0x83   : > { %515 = vst.msk [vmem:[#allocation2 + $0x11] sm:$0xff] %vm514_vm3, %v491_v49  ;;  %v587_v49 = vld [vmem:[#allocation2 + $0x91] sm:$0xff] }
  0x85   : > { %v497_v54 = vpop.permute.xlu1 %496 }
  0x86   : > { %v493_v55 = vpop.permute.xlu0 %492  ;;  %518 = vst.msk [vmem:[#allocation2 + $0x41] sm:$0xff] %vm514_vm3, %v497_v54  ;;  %v523_v54 = vld [vmem:[#allocation2] sm:$0xff] }
  0x87   : > { %516 = vst.msk [vmem:[#allocation2 + $0x21] sm:$0xff] %vm514_vm3, %v493_v55 }
  0x89   : > { %v501_v60 = vpop.permute.xlu1 %500  ;;  %v589_v8 = vld [vmem:[#allocation2 + $0x32] sm:$0xff] }
  0x8a   : > { %v499_v58 = vpop.permute.xlu0 %498  ;;  %v563_v59 = vld [vmem:[#allocation2 + $0x12] sm:$0xff]  ;;  %520 = vst.msk [vmem:[#allocation2 + $0x61] sm:$0xff] %vm514_vm3, %v501_v60 }
  0x8b   : > { %519 = vst.msk [vmem:[#allocation2 + $0x51] sm:$0xff] %vm514_vm3, %v499_v58  ;;  %v2163_v61 = vpack.i.bf16 %v531_v56, %v563_v59  ;;  %v2735_v63 = vld [vmem:[#allocation2 + $0x10] sm:$0xff] }
  0x8c   : > { %v2748_v9 = vld [vmem:[#allocation2 + $0x30] sm:$0xff] }
  0x8d   : > { %2164 = vrot.lane.b32.xlu0 %v2163_v61, %s2422_s27  ;;  %v505_v5 = vpop.permute.xlu1 %504  ;;  %v590_v10 = vld [vmem:[#allocation2 + $0x42] sm:$0xff]  ;;  %v2752_v11 = vld [vmem:[#allocation2 + $0x11] sm:$0xff]  ;;  %v2183_v12 = vpack.i.bf16 %v563_v59, %v2748_v9 }
  0x8e   : > { %v588_v1 = vld [vmem:[#allocation2 + $0x22] sm:$0xff]  ;;  %v503_v4 = vpop.permute.xlu0 %502  ;;  %522 = vst.msk [vmem:[#allocation2 + $0x81] sm:$0xff] %vm514_vm3, %v505_v5  ;;  %v2757_v15 = vld [vmem:[#allocation2 + $0x31] sm:$0xff] }
  0x8f   : > { %v2737_v2 = vld [vmem:[#allocation2 + $0x20] sm:$0xff]  ;;  %2120 = vmatprep.mubr.msk.f32.mxu1 %vm434_vm0, %v588_v1  ;;  %521 = vst.msk [vmem:[#allocation2 + $0x71] sm:$0xff] %vm514_vm3, %v503_v4  ;;  %v2178_v13 = vpack.i.bf16 %v2752_v11, %v588_v1  ;;  %v2208_v27 = vpack.i.bf16 %v2757_v15, %v590_v10 }
  0x90   : > { %v2739_v3 = vld [vmem:[#allocation2 + $0x21] sm:$0xff]  ;;  %v2168_v6 = vpack.i.bf16 %v539_v62, %v2737_v2  ;;  %2121 = vmatmul.mubr.msk.f32.vlgmr.msra.gmra.mxu1 %vm434_vm0, %v589_v8  ;;  %v2188_v18 = vpack.i.bf16 %v2737_v2, %v2757_v15 }
  0x91   : > { %v2173_v7 = vpack.i.bf16 %v2735_v63, %v2739_v3  ;;  %2123 = vmatprep.mubr.msk.f32.mxu1 %vm434_vm0, %v590_v10  ;;  %v592_v16 = vld [vmem:[#allocation2 + $0x62] sm:$0xff]  ;;  %v2193_v17 = vpack.i.bf16 %v2739_v3, %v589_v8 }
  0x92   : > { %2169 = vrot.lane.b32.xlu1 %v2168_v6, %s2423_s29  ;;  %v591_v14 = vld [vmem:[#allocation2 + $0x52] sm:$0xff]  ;;  %v2766_v20 = vld [vmem:[#allocation2 + $0x41] sm:$0xff] }
  0x93   : > { %2174 = vrot.lane.b32.xlu0 %v2173_v7, %s2424_s30  ;;  %v2768_v21 = vld [vmem:[#allocation2 + $0x40] sm:$0xff]  ;;  %v2203_v23 = vpack.i.bf16 %v2748_v9, %v2766_v20  ;;  %v2777_v25 = vld [vmem:[#allocation2 + $0x50] sm:$0xff]  ;;  %v2223_v29 = vpack.i.bf16 %v2766_v20, %v591_v14 }
  0x94   : > { %2124 = vmatmul.mubr.msk.f32.gmra.mxu1 %vm434_vm0, %v591_v14  ;;  %v2198_v24 = vpack.i.bf16 %v588_v1, %v2768_v21  ;;  %v2213_v26 = vpack.i.bf16 %v589_v8, %v2777_v25  ;;  %v2783_v28 = vld [vmem:[#allocation2 + $0x51] sm:$0xff]  ;;  %v2790_v31 = vld [vmem:[#allocation2 + $0x61] sm:$0xff] }
  0x95   : > { %2126 = vmatprep.mubr.msk.f32.mxu1 %vm434_vm0, %v592_v16  ;;  %v594_v22 = vld [vmem:[#allocation2 + $0x82] sm:$0xff]  ;;  %v2218_v30 = vpack.i.bf16 %v2768_v21, %v2783_v28  ;;  %v2233_v33 = vpack.i.bf16 %v2777_v25, %v2790_v31  ;;  %v2238_v37 = vpack.i.bf16 %v2783_v28, %v592_v16 }
  0x96   : > { %2179 = vrot.lane.b32.xlu1 %v2178_v13, %s2422_s27  ;;  %v593_v19 = vld [vmem:[#allocation2 + $0x72] sm:$0xff]  ;;  %v2792_v32 = vld [vmem:[#allocation2 + $0x60] sm:$0xff] }
  0x97   : > { %2184 = vrot.lane.b32.xlu0 %v2183_v12, %s2423_s29  ;;  %v2228_v34 = vpack.i.bf16 %v590_v10, %v2792_v32  ;;  %v2799_v35 = vld [vmem:[#allocation2 + $0x70] sm:$0xff]  ;;  %v2253_v40 = vpack.i.bf16 %v2790_v31, %v593_v19  ;;  %v2813_v42 = vld [vmem:[#allocation2 + $0x81] sm:$0xff]  ;;  %v2273_v47 = vpack.i.bf16 %v593_v19, %v579_v46 }
  0x98   : > { %2127 = vmatmul.mubr.msk.f32.gmra.mxu1 %vm434_vm0, %v593_v19  ;;  %v2243_v36 = vpack.i.bf16 %v591_v14, %v2799_v35  ;;  %v2805_v38 = vld [vmem:[#allocation2 + $0x71] sm:$0xff]  ;;  %v578_v43 = vld [vmem:[#allocation2 + $0x80] sm:$0xff]  ;;  %v2263_v44 = vpack.i.bf16 %v2799_v35, %v2813_v42 }
  0x99   : > { %2129 = vmatprep.mubr.msk.f32.mxu1 %vm434_vm0, %v594_v22  ;;  %v2248_v41 = vpack.i.bf16 %v2792_v32, %v2805_v38  ;;  %v2258_v45 = vpack.i.bf16 %v592_v16, %v578_v43  ;;  %v2268_v48 = vpack.i.bf16 %v2805_v38, %v594_v22  ;;  %v2278_v50 = vpack.i.bf16 %v578_v43, %v587_v49 }
  0x9a   : > { %2189 = vrot.lane.b32.xlu1 %v2188_v18, %s2424_s30 }
  0x9b   : > { %2194 = vrot.lane.b32.xlu0 %v2193_v17, %s2422_s27 }
  0x9c   : > { %2130 = vmatmul.mubr.msk.f32.gmra.mxu1 %vm434_vm0, %v595_v39 }
  0x9e   : > { %2199 = vrot.lane.b32.xlu1 %v2198_v24, %s2423_s29 }
  0x9f   : > { %2204 = vrot.lane.b32.xlu0 %v2203_v23, %s2424_s30 }
  0xa2   : > { %2209 = vrot.lane.b32.xlu1 %v2208_v27, %s2422_s27 }
  0xa3   : > { %2214 = vrot.lane.b32.xlu0 %v2213_v26, %s2423_s29 }
  0xa6   : > { %2219 = vrot.lane.b32.xlu1 %v2218_v30, %s2424_s30 }
  0xa7   : > { %2224 = vrot.lane.b32.xlu0 %v2223_v29, %s2422_s27 }
  0xaa   : > { %2229 = vrot.lane.b32.xlu1 %v2228_v34, %s2423_s29 }
  0xab   : > { %2234 = vrot.lane.b32.xlu0 %v2233_v33, %s2424_s30 }
  0xae   : > { %2239 = vrot.lane.b32.xlu1 %v2238_v37, %s2422_s27 }
  0xaf   : > { %2244 = vrot.lane.b32.xlu0 %v2243_v36, %s2423_s29 }
  0xb2   : > { %2249 = vrot.lane.b32.xlu1 %v2248_v41, %s2424_s30 }
  0xb3   : > { %2254 = vrot.lane.b32.xlu0 %v2253_v40, %s2422_s27 }
  0xb6   : > { %2259 = vrot.lane.b32.xlu1 %v2258_v45, %s2423_s29 }
  0xb7   : > { %2264 = vrot.lane.b32.xlu0 %v2263_v44, %s2424_s30 }
  0xba   : > { %2269 = vrot.lane.b32.xlu1 %v2268_v48, %s2422_s27 }
  0xbb   : > { %2274 = vrot.lane.b32.xlu0 %v2273_v47, %s2423_s29 }
  0xbe   : > { %2279 = vrot.lane.b32.xlu1 %v2278_v50, %s2424_s30 }
  0xff   : > { %v2165_v51 = vpop.permute.xlu0 %2164 }
 0x100   : > { %v2167_v52 = vunpack.i.h.bf16 %v2165_v51  ;;  %v2166_v53 = vunpack.i.l.bf16 %v2165_v51 }
 0x102   : > { %v814_v61 = vsel %vm434_vm0, %v2752_v11, %v2166_v53  ;;  %v788_v62 = vsel %vm434_vm0, %v523_v54, %v2167_v52 }
 0x104   : > { %v2170_v55 = vpop.permute.xlu1 %2169 }
 0x105   : > { %v2175_v56 = vpop.permute.xlu0 %2174  ;;  %v2172_v57 = vunpack.i.h.bf16 %v2170_v55  ;;  %v2171_v58 = vunpack.i.l.bf16 %v2170_v55 }
 0x106   : > { %v2177_v59 = vunpack.i.h.bf16 %v2175_v56  ;;  %v2176_v60 = vunpack.i.l.bf16 %v2175_v56 }
 0x107   : > { %v822_v1 = vsel %vm796_vm4, %v814_v61, %v2171_v58  ;;  %v797_v4 = vsel %vm796_vm4, %v788_v62, %v2172_v57 }
 0x108   : > { %v2180_v6 = vpop.permute.xlu1 %2179  ;;  %v830_v7 = vsel %vm805_vm5, %v822_v1, %v2176_v60  ;;  %v806_v8 = vsel %vm805_vm5, %v797_v4, %v2177_v59 }
 0x109   : > { %v2185_v5 = vpop.permute.xlu0 %2184  ;;  %v2182_v10 = vunpack.i.h.bf16 %v2180_v6  ;;  %v2181_v12 = vunpack.i.l.bf16 %v2180_v6  ;;  %962 = vmatprep.mubr.f32.mxu0 %v830_v7 }
 0x10a   : > { %v2187_v13 = vunpack.i.h.bf16 %v2185_v5  ;;  %v2186_v14 = vunpack.i.l.bf16 %v2185_v5  ;;  %963 = vmatmul.mubr.f32.vlgmr.msra.gmra.mxu0 %v806_v8 }
 0x10b   : > { %v815_v11 = vsel %vm434_vm0, %v2739_v3, %v2181_v12  ;;  %v789_v16 = vsel %vm434_vm0, %v2735_v63, %v2182_v10 }
 0x10c   : > { %v2190_v18 = vpop.permute.xlu1 %2189  ;;  %v823_v26 = vsel %vm796_vm4, %v815_v11, %v2186_v14  ;;  %v798_v27 = vsel %vm796_vm4, %v789_v16, %v2187_v13 }
 0x10d   : > { %v2195_v17 = vpop.permute.xlu0 %2194  ;;  %v2192_v19 = vunpack.i.h.bf16 %v2190_v18  ;;  %v2191_v22 = vunpack.i.l.bf16 %v2190_v18 }
 0x10e   : > { %v2197_v23 = vunpack.i.h.bf16 %v2195_v17  ;;  %v2196_v24 = vunpack.i.l.bf16 %v2195_v17 }
 0x10f   : > { %v831_v29 = vsel %vm805_vm5, %v823_v26, %v2191_v22  ;;  %v807_v30 = vsel %vm805_vm5, %v798_v27, %v2192_v19 }
 0x110   : > { %v2200_v34 = vpop.permute.xlu1 %2199  ;;  %967 = vmatprep.mubr.f32.mxu0 %v831_v29  ;;  %v816_v39 = vsel %vm434_vm0, %v2757_v15, %v2196_v24  ;;  %v790_v40 = vsel %vm434_vm0, %v2737_v2, %v2197_v23 }
 0x111   : > { %v2205_v33 = vpop.permute.xlu0 %2204  ;;  %v2202_v63 = vunpack.i.h.bf16 %v2200_v34  ;;  %v2201_v37 = vunpack.i.l.bf16 %v2200_v34  ;;  %968 = vmatmul.mubr.f32.gmra.mxu0 %v807_v30 }
 0x112   : > { %v2207_v3 = vunpack.i.h.bf16 %v2205_v33  ;;  %v2206_v36 = vunpack.i.l.bf16 %v2205_v33 }
 0x113   : > { %v824_v41 = vsel %vm796_vm4, %v816_v39, %v2201_v37  ;;  %v799_v43 = vsel %vm796_vm4, %v790_v40, %v2202_v63 }
 0x114   : > { %v2210_v45 = vpop.permute.xlu1 %2209  ;;  %v832_v46 = vsel %vm805_vm5, %v824_v41, %v2206_v36  ;;  %v808_v47 = vsel %vm805_vm5, %v799_v43, %v2207_v3 }
 0x115   : > { %v2215_v44 = vpop.permute.xlu0 %2214  ;;  %v2212_v48 = vunpack.i.h.bf16 %v2210_v45  ;;  %v2211_v49 = vunpack.i.l.bf16 %v2210_v45  ;;  %972 = vmatprep.mubr.f32.mxu0 %v832_v46 }
 0x116   : > { %v2217_v50 = vunpack.i.h.bf16 %v2215_v44  ;;  %v2216_v51 = vunpack.i.l.bf16 %v2215_v44  ;;  %973 = vmatmul.mubr.f32.gmra.mxu0 %v808_v47 }
 0x117   : > { %v817_v15 = vsel %vm434_vm0, %v2766_v20, %v2211_v49  ;;  %v791_v2 = vsel %vm434_vm0, %v2748_v9, %v2212_v48 }
 0x118   : > { %v2220_v53 = vpop.permute.xlu1 %2219  ;;  %v825_v58 = vsel %vm796_vm4, %v817_v15, %v2216_v51  ;;  %v800_v59 = vsel %vm796_vm4, %v791_v2, %v2217_v50 }
 0x119   : > { %v2225_v52 = vpop.permute.xlu0 %2224  ;;  %v2222_v54 = vunpack.i.h.bf16 %v2220_v53  ;;  %v2221_v55 = vunpack.i.l.bf16 %v2220_v53 }
 0x11a   : > { %v2227_v56 = vunpack.i.h.bf16 %v2225_v52  ;;  %v2226_v57 = vunpack.i.l.bf16 %v2225_v52 }
 0x11b   : > { %v833_v60 = vsel %vm805_vm5, %v825_v58, %v2221_v55  ;;  %v809_v61 = vsel %vm805_vm5, %v800_v59, %v2222_v54  ;;  %v1545_v58 = vld [vmem:[%s3260_s5 + $0x68] sm:$0xff]  ;;  %v1544_v59 = vld [vmem:[%s3260_s5 + $0x60] sm:$0xff] }
 0x11c   : > { %v2230_v1 = vpop.permute.xlu1 %2229  ;;  %977 = vmatprep.mubr.f32.mxu0 %v833_v60  ;;  %v818_v6 = vsel %vm434_vm0, %v2783_v28, %v2226_v57  ;;  %v792_v7 = vsel %vm434_vm0, %v2768_v21, %v2227_v56  ;;  %v1543_v60 = vld [vmem:[%s3260_s5 + $0x58] sm:$0xff] }
 0x11d   : > { %v2235_v62 = vpop.permute.xlu0 %2234  ;;  %v2232_v9 = vunpack.i.h.bf16 %v2230_v1  ;;  %v2231_v5 = vunpack.i.l.bf16 %v2230_v1  ;;  %978 = vmatmul.mubr.f32.gmra.mxu0 %v809_v61  ;;  %v1542_v61 = vld [vmem:[%s3260_s5 + $0x50] sm:$0xff]  ;;  %v1540_v1 = vld [vmem:[%s3260_s5 + $0x40] sm:$0xff] }
 0x11e   : > { %v2237_v20 = vunpack.i.h.bf16 %v2235_v62  ;;  %v2236_v4 = vunpack.i.l.bf16 %v2235_v62  ;;  %v1541_v62 = vld [vmem:[%s3260_s5 + $0x48] sm:$0xff] }
 0x11f   : > { %v826_v8 = vsel %vm796_vm4, %v818_v6, %v2231_v5  ;;  %v801_v10 = vsel %vm796_vm4, %v792_v7, %v2232_v9 }
 0x120   : > { %v2240_v13 = vpop.permute.xlu1 %2239  ;;  %v834_v14 = vsel %vm805_vm5, %v826_v8, %v2236_v4  ;;  %v810_v11 = vsel %vm805_vm5, %v801_v10, %v2237_v20  ;;  %v1539_v20 = vld [vmem:[%s3260_s5 + $0x38] sm:$0xff]  ;;  %v2937_v8 = vld [vmem:[%s3258_s3] ss:$0 sm:$0xff] }
 0x121   : > { %v2245_v12 = vpop.permute.xlu0 %2244  ;;  %v2242_v16 = vunpack.i.h.bf16 %v2240_v13  ;;  %v2241_v17 = vunpack.i.l.bf16 %v2240_v13  ;;  %982 = vmatprep.mubr.f32.mxu0 %v834_v14 }
 0x122   : > { %v2247_v18 = vunpack.i.h.bf16 %v2245_v12  ;;  %v2246_v19 = vunpack.i.l.bf16 %v2245_v12  ;;  %983 = vmatmul.mubr.f32.gmra.mxu0 %v810_v11  ;;  %v2942_v12 = vld [vmem:[%s3259_s4] ss:$0 sm:$0xff] }
 0x123   : > { %v819_v28 = vsel %vm434_vm0, %v2790_v31, %v2241_v17  ;;  %v793_v21 = vsel %vm434_vm0, %v2777_v25, %v2242_v16 }
 0x124   : > { %v2250_v23 = vpop.permute.xlu1 %2249  ;;  %v827_v30 = vsel %vm796_vm4, %v819_v28, %v2246_v19  ;;  %v802_v33 = vsel %vm796_vm4, %v793_v21, %v2247_v18  ;;  %v1538_v19 = vld [vmem:[%s3260_s5 + $0x30] sm:$0xff] }
 0x125   : > { %v2255_v22 = vpop.permute.xlu0 %2254  ;;  %v2252_v24 = vunpack.i.h.bf16 %v2250_v23  ;;  %v2251_v26 = vunpack.i.l.bf16 %v2250_v23  ;;  %v1537_v23 = vld [vmem:[%s3260_s5 + $0x28] sm:$0xff] }
 0x126   : > { %v2257_v27 = vunpack.i.h.bf16 %v2255_v22  ;;  %v2256_v29 = vunpack.i.l.bf16 %v2255_v22 }
 0x127   : > { %v835_v34 = vsel %vm805_vm5, %v827_v30, %v2251_v26  ;;  %v811_v3 = vsel %vm805_vm5, %v802_v33, %v2252_v24  ;;  %v1536_v24 = vld [vmem:[%s3260_s5 + $0x20] sm:$0xff] }
 0x128   : > { %v2260_v63 = vpop.permute.xlu1 %2259  ;;  %987 = vmatprep.mubr.f32.mxu0 %v835_v34  ;;  %v820_v40 = vsel %vm434_vm0, %v2805_v38, %v2256_v29  ;;  %v794_v41 = vsel %vm434_vm0, %v2792_v32, %v2257_v27 }
 0x129   : > { %v2265_v36 = vpop.permute.xlu0 %2264  ;;  %v2262_v25 = vunpack.i.h.bf16 %v2260_v63  ;;  %v2261_v39 = vunpack.i.l.bf16 %v2260_v63  ;;  %988 = vmatmul.mubr.f32.gmra.mxu0 %v811_v3  ;;  %v1535_v3 = vld [vmem:[%s3260_s5 + $0x18] sm:$0xff]  ;;  %v1184_v63 = vld [vmem:[#allocation3 + $0x1] sm:$0xff] }
 0x12a   : > { %v2267_v31 = vunpack.i.h.bf16 %v2265_v36  ;;  %v2266_v37 = vunpack.i.l.bf16 %v2265_v36 }
 0x12b   : > { %v828_v43 = vsel %vm796_vm4, %v820_v40, %v2261_v39  ;;  %v803_v44 = vsel %vm796_vm4, %v794_v41, %v2262_v25  ;;  %v1534_v39 = vld [vmem:[%s3260_s5 + $0x10] sm:$0xff] }
 0x12c   : > { %v2270_v46 = vpop.permute.xlu1 %2269  ;;  %v836_v47 = vsel %vm805_vm5, %v828_v43, %v2266_v37  ;;  %v812_v48 = vsel %vm805_vm5, %v803_v44, %v2267_v31  ;;  %v1192_v31 = vld [vmem:[#allocation3 + $0x2] sm:$0xff] }
 0x12d   : > { %v2275_v45 = vpop.permute.xlu0 %2274  ;;  %v2272_v49 = vunpack.i.h.bf16 %v2270_v46  ;;  %v2271_v50 = vunpack.i.l.bf16 %v2270_v46  ;;  %992 = vmatprep.mubr.f32.mxu0 %v836_v47  ;;  %v1533_v47 = vld [vmem:[%s3260_s5 + $0x8] sm:$0xff] }
 0x12e   : > { %v2277_v51 = vunpack.i.h.bf16 %v2275_v45  ;;  %v2276_v15 = vunpack.i.l.bf16 %v2275_v45  ;;  %993 = vmatmul.mubr.f32.gmra.mxu0 %v812_v48 }
 0x12f   : > { %v821_v38 = vsel %vm434_vm0, %v2813_v42, %v2271_v50  ;;  %v795_v32 = vsel %vm434_vm0, %v2799_v35, %v2272_v49  ;;  %v1547_v35 = vld [vmem:[%s3260_s5 + $0x78] sm:$0xff]  ;;  %v1546_v42 = vld [vmem:[%s3260_s5 + $0x70] sm:$0xff]  ;;  %v1532_v50 = vld [vmem:[%s3260_s5] sm:$0xff] }
 0x130   : > { %v2280_v2 = vpop.permute.xlu1 %2279  ;;  %v829_v54 = vsel %vm796_vm4, %v821_v38, %v2276_v15  ;;  %v804_v55 = vsel %vm796_vm4, %v795_v32, %v2277_v51  ;;  %1575 = vmatpush1.msra.mxu1 %v1547_v35  ;;  %v1549_v32 = vld [vmem:[%s3260_s5 + $0x88] sm:$0xff] }
 0x131   : > { %v2282_v52 = vunpack.i.h.bf16 %v2280_v2  ;;  %v2281_v53 = vunpack.i.l.bf16 %v2280_v2  ;;  %1576 = vmatprep.subr.mxu1 %v2420_v0 }
 0x132   : > { %1577 = vmatpush1.msra.mxu1 %v1546_v42 }
 0x133   : > { %v837_v56 = vsel %vm805_vm5, %v829_v54, %v2281_v53  ;;  %v813_v57 = vsel %vm805_vm5, %v804_v55, %v2282_v52  ;;  %1578 = vmatprep.subr.mxu1 %v2420_v0 }
 0x134   : > { %997 = vmatprep.mubr.f32.mxu0 %v837_v56  ;;  %1579 = vmatpush1.msra.mxu1 %v1545_v58 }
 0x135   : > { %998 = vmatmul.mubr.f32.gmra.mxu0 %v813_v57  ;;  %1580 = vmatprep.subr.mxu1 %v2420_v0 }
 0x136   : > { %1581 = vmatpush1.msra.mxu1 %v1544_v59  ;;  %2136 = vmatprep.mubr.msk.f32.mxu0 %vm2428_vm10, %v2420_v0 }
 0x137   : > { %1582 = vmatprep.subr.mxu1 %v2420_v0 }
 0x138   : > { %1583 = vmatpush1.msra.mxu1 %v1543_v60  ;;  %v1548_v60 = vld [vmem:[%s3260_s5 + $0x80] sm:$0xff] }
 0x139   : > { %1584 = vmatprep.subr.mxu1 %v2420_v0 }
 0x13a   : > { %1585 = vmatpush1.msra.mxu1 %v1542_v61 }
 0x13b   : > { %1586 = vmatprep.subr.mxu1 %v2420_v0 }
 0x13c   : > { %1587 = vmatpush1.msra.mxu1 %v1541_v62 }
 0x13d   : > { %1588 = vmatprep.subr.mxu1 %v2420_v0 }
 0x13e   : > { %1589 = vmatpush1.msra.mxu1 %v1540_v1 }
 0x13f   : > { %1590 = vmatprep.subr.mxu1 %v2420_v0 }
 0x140   : > { %1591 = vmatpush1.msra.mxu1 %v1539_v20 }
 0x141   : > { %1592 = vmatprep.subr.mxu1 %v2420_v0 }
 0x142   : > { %1593 = vmatpush1.msra.mxu1 %v1538_v19 }
 0x143   : > { %1594 = vmatprep.subr.mxu1 %v2420_v0 }
 0x144   : > { %1595 = vmatpush1.msra.mxu1 %v1537_v23 }
 0x145   : > { %1596 = vmatprep.subr.mxu1 %v2420_v0 }
 0x146   : > { %1597 = vmatpush1.msra.mxu1 %v1536_v24 }
 0x147   : > { %1598 = vmatprep.subr.mxu1 %v2420_v0 }
 0x148   : > { %1599 = vmatpush1.msra.mxu1 %v1535_v3 }
 0x149   : > { %1600 = vmatprep.subr.mxu1 %v2420_v0 }
 0x14a   : > { %1601 = vmatpush1.msra.mxu1 %v1534_v39 }
 0x14b   : > { %1602 = vmatprep.subr.mxu1 %v2420_v0 }
 0x14c   : > { %1603 = vmatpush1.msra.mxu1 %v1533_v47 }
 0x14d   : > { %1604 = vmatprep.subr.mxu1 %v2420_v0 }
 0x14e   : > { %1605 = vmatpush1.msra.mxu1 %v1532_v50 }
 0x14f   : > { %1634 = vmatprep.subr.mxu1 %v2420_v0 }
 0x150   : > { %v2122_v4 = vpop.f32.mrf.mxu1  ;;  %1635 = vmatpush2.msra.mxu1 %v1549_v32 }
 0x151   : > { %1636 = vmatprep.subr.mxu1 %v2420_v0 }
 0x152   : > { %v1069_v7 = vpop.f32.mrf.mxu1  ;;  %1637 = vmatpush2.msra.mxu1 %v1548_v60 }
 0x154   : > { %v2125_v28 = vpop.f32.mrf.mxu1 }
 0x156   : > { %v1079_v30 = vpop.f32.mrf.mxu1 }
 0x158   : > { %v2128_v51 = vpop.f32.mrf.mxu1 }
 0x15a   : > { %v1089_v35 = vpop.f32.mrf.mxu1 }
 0x1ca   : > { %v2070_v9 = vpop.f32.mrf.mxu0 }
 0x1cc   : > { %v2071_v5 = vpop.f32.mrf.mxu0 }
 0x1cd   : > { %v2072_v6 = vadd.f32 %v2071_v5, %v2070_v9 }
 0x1cf   : > { %v1070_v10 = vadd.f32 %v2072_v6, %v1069_v7 }
 0x1d1   : > { %v1115_v13 = vmul.f32 %v2937_v8, %v1070_v10  ;;  %v2073_v14 = vpop.f32.mrf.mxu0 }
 0x1d3   : > { %v1130_v11 = vadd.f32 %v2942_v12, %v1115_v13  ;;  %v2074_v16 = vpop.f32.mrf.mxu0 }
 0x1d4   : > { %v2075_v17 = vadd.f32 %v2074_v16, %v2073_v14  ;;  %v2131_v14 = vpop.f32.mrf.mxu1 }
 0x1d5   : > { %v1138_v18 = vmax.f32 %v1130_v11, 0.0 }
 0x1d6   : > { %v1075_v21 = vadd.f32 %v2122_v4, %v2075_v17  ;;  %v2076_v22 = vpop.f32.mrf.mxu0 }
 0x1d7   : > { %1168 = vst.msk [vmem:[#allocation3 + $0x11] sm:$0xff] %vm465_vm2, %v1138_v18 }
 0x1d8   : > { %v1116_v26 = vmul.f32 %v2937_v8, %v1075_v21  ;;  %v2077_v27 = vpop.f32.mrf.mxu0 }
 0x1d9   : > { %v2078_v29 = vadd.f32 %v2077_v27, %v2076_v22  ;;  %v1099_v22 = vpop.f32.mrf.mxu1 }
 0x1da   : > { %v1131_v33 = vadd.f32 %v2942_v12, %v1116_v26 }
 0x1db   : > { %v1080_v34 = vadd.f32 %v2078_v29, %v1079_v30 }
 0x1dc   : > { %v1139_v36 = vmax.f32 %v1131_v33, 0.0 }
 0x1dd   : > { %v1117_v37 = vmul.f32 %v2937_v8, %v1080_v34  ;;  %v2079_v25 = vpop.f32.mrf.mxu0 }
 0x1de   : > { %1169 = vst.msk [vmem:[#allocation3 + $0x21] sm:$0xff] %vm465_vm2, %v1139_v36  ;;  %v1185_v40 = vld [vmem:[#allocation3 + $0x11] sm:$0xff] }
 0x1df   : > { %v1193_v41 = vld [vmem:[#allocation3 + $0x12] sm:$0xff]  ;;  %v1132_v43 = vadd.f32 %v2942_v12, %v1117_v37  ;;  %v2080_v44 = vpop.f32.mrf.mxu0  ;;  %v2283_v45 = vpack.i.bf16 %v1185_v40, %v1184_v63 }
 0x1e0   : > { %v2288_v46 = vpack.i.bf16 %v1193_v41, %v1192_v31  ;;  %v2081_v48 = vadd.f32 %v2080_v44, %v2079_v25  ;;  %v2986_v53 = vld [vmem:[#allocation3 + $0x10] sm:$0xff] }
 0x1e1   : > { %v1140_v49 = vmax.f32 %v1132_v43, 0.0  ;;  %2284 = vrot.lane.b32.xlu0 %v2283_v45, %s2421_s19 }
 0x1e2   : > { %2289 = vrot.lane.b32.xlu1 %v2288_v46, %s2422_s27  ;;  %v1085_v15 = vadd.f32 %v2125_v28, %v2081_v48  ;;  %v2082_v38 = vpop.f32.mrf.mxu0 }
 0x1e3   : > { %1170 = vst.msk [vmem:[#allocation3 + $0x31] sm:$0xff] %vm465_vm2, %v1140_v49 }
 0x1e4   : > { %v1118_v2 = vmul.f32 %v2937_v8, %v1085_v15  ;;  %v2083_v52 = vpop.f32.mrf.mxu0 }
 0x1e5   : > { %v2084_v54 = vadd.f32 %v2083_v52, %v2082_v38  ;;  %v1241_v55 = vld [vmem:[#allocation3 + $0x22] sm:$0xff] }
 0x1e6   : > { %v1209_v56 = vld [vmem:[#allocation3 + $0x21] sm:$0xff]  ;;  %v1133_v42 = vadd.f32 %v2942_v12, %v1118_v2  ;;  %2019 = vmatprep.mubr.msk.f32.mxu1 %vm465_vm2, %v1241_v55  ;;  %v2303_v4 = vpack.i.bf16 %v1241_v55, %v1193_v41 }
 0x1e7   : > { %v2989_v57 = vld [vmem:[#allocation3 + $0x20] sm:$0xff]  ;;  %v2298_v58 = vpack.i.bf16 %v1209_v56, %v1185_v40  ;;  %v1090_v61 = vadd.f32 %v2084_v54, %v1089_v35 }
 0x1e8   : > { %v2293_v59 = vpack.i.bf16 %v2989_v57, %v2986_v53  ;;  %v1141_v62 = vmax.f32 %v1133_v42, 0.0 }
 0x1e9   : > { %2299 = vrot.lane.b32.xlu1 %v2298_v58, %s2423_s29  ;;  %v1119_v1 = vmul.f32 %v2937_v8, %v1090_v61  ;;  %v2085_v20 = vpop.f32.mrf.mxu0 }
 0x1ea   : > { %2294 = vrot.lane.b32.xlu0 %v2293_v59, %s2425_s17  ;;  %1171 = vst.msk [vmem:[#allocation3 + $0x41] sm:$0xff] %vm465_vm2, %v1141_v62  ;;  %v3003_v9 = vld [vmem:[#allocation3 + $0x30] sm:$0xff] }
 0x1eb   : > { %v1134_v5 = vadd.f32 %v2942_v12, %v1119_v1  ;;  %v2086_v6 = vpop.f32.mrf.mxu0  ;;  %v2308_v7 = vpack.i.bf16 %v3003_v9, %v2989_v57  ;;  %v1234_v10 = vld [vmem:[#allocation3 + $0x31] sm:$0xff] }
 0x1ec   : > { %v2087_v13 = vadd.f32 %v2086_v6, %v2085_v20  ;;  %v2313_v18 = vpack.i.bf16 %v1234_v10, %v1209_v56  ;;  %v3011_v19 = vld [vmem:[#allocation3 + $0x32] sm:$0xff] }
 0x1ed   : > { %v1142_v11 = vmax.f32 %v1134_v5, 0.0  ;;  %2309 = vrot.lane.b32.xlu1 %v2308_v7, %s2424_s30  ;;  %v2323_v27 = vpack.i.bf16 %v3011_v19, %v1241_v55  ;;  %v1232_v1 = vld [vmem:[#allocation3 + $0x90] sm:$0xff] }
 0x1ee   : > { %2304 = vrot.lane.b32.xlu0 %v2303_v4, %s2426_s18  ;;  %v1095_v16 = vadd.f32 %v2128_v51, %v2087_v13  ;;  %v2088_v17 = vpop.f32.mrf.mxu0  ;;  %v1240_v4 = vld [vmem:[#allocation3 + $0x91] sm:$0xff] }
 0x1ef   : > { %1172 = vst.msk [vmem:[#allocation3 + $0x51] sm:$0xff] %vm465_vm2, %v1142_v11 }
 0x1f0   : > { %v1120_v28 = vmul.f32 %v2937_v8, %v1095_v16  ;;  %v2089_v21 = vpop.f32.mrf.mxu0 }
 0x1f1   : > { %v2090_v23 = vadd.f32 %v2089_v21, %v2088_v17  ;;  %2319 = vrot.lane.b32.xlu1 %v2313_v18, %s2421_s19  ;;  %v3016_v24 = vld [vmem:[#allocation3 + $0x40] sm:$0xff] }
 0x1f2   : > { %2314 = vrot.lane.b32.xlu0 %v2313_v18, %s2427_s20  ;;  %v1135_v26 = vadd.f32 %v2942_v12, %v1120_v28  ;;  %v2328_v29 = vpack.i.bf16 %v3016_v24, %v3003_v9  ;;  %v1211_v33 = vld [vmem:[#allocation3 + $0x41] sm:$0xff] }
 0x1f3   : > { %v1100_v30 = vadd.f32 %v2090_v23, %v1099_v22  ;;  %v3023_v3 = vld [vmem:[#allocation3 + $0x42] sm:$0xff]  ;;  %v2333_v31 = vpack.i.bf16 %v1211_v33, %v1234_v10 }
 0x1f4   : > { %v1143_v34 = vmax.f32 %v1135_v26, 0.0  ;;  %v2338_v39 = vpack.i.bf16 %v3023_v3, %v3011_v19  ;;  %v1176_v10 = vld [vmem:[#allocation3] sm:$0xff] }
 0x1f5   : > { %v1121_v36 = vmul.f32 %v2937_v8, %v1100_v30  ;;  %v2091_v63 = vpop.f32.mrf.mxu0  ;;  %2329 = vrot.lane.b32.xlu1 %v2328_v29, %s2425_s17 }
 0x1f6   : > { %2324 = vrot.lane.b32.xlu0 %v2323_v27, %s2422_s27  ;;  %1173 = vst.msk [vmem:[#allocation3 + $0x61] sm:$0xff] %vm465_vm2, %v1143_v34  ;;  %v3031_v40 = vld [vmem:[#allocation3 + $0x50] sm:$0xff] }
 0x1f7   : > { %v1136_v37 = vadd.f32 %v2942_v12, %v1121_v36  ;;  %v2092_v25 = vpop.f32.mrf.mxu0  ;;  %v1236_v43 = vld [vmem:[#allocation3 + $0x51] sm:$0xff]  ;;  %v2343_v46 = vpack.i.bf16 %v3031_v40, %v3016_v24 }
 0x1f8   : > { %v2093_v41 = vadd.f32 %v2092_v25, %v2091_v63  ;;  %v2348_v47 = vpack.i.bf16 %v1236_v43, %v1211_v33  ;;  %v3040_v49 = vld [vmem:[#allocation3 + $0x52] sm:$0xff] }
 0x1f9   : > { %v1144_v44 = vmax.f32 %v1136_v37, 0.0  ;;  %2339 = vrot.lane.b32.xlu1 %v2338_v39, %s2426_s18  ;;  %v2358_v51 = vpack.i.bf16 %v3040_v49, %v3023_v3 }
 0x1fa   : > { %2334 = vrot.lane.b32.xlu0 %v2333_v31, %s2423_s29  ;;  %v1105_v45 = vadd.f32 %v2131_v14, %v2093_v41 }
 0x1fb   : > { %1174 = vst.msk [vmem:[#allocation3 + $0x71] sm:$0xff] %vm465_vm2, %v1144_v44 }
 0x1fc   : > { %v1122_v48 = vmul.f32 %v2937_v8, %v1105_v45 }
 0x1fd   : > { %2349 = vrot.lane.b32.xlu1 %v2348_v47, %s2427_s20  ;;  %v3046_v15 = vld [vmem:[#allocation3 + $0x60] sm:$0xff] }
 0x1fe   : > { %2344 = vrot.lane.b32.xlu0 %v2343_v46, %s2424_s30  ;;  %v1137_v50 = vadd.f32 %v2942_v12, %v1122_v48  ;;  %v1213_v32 = vld [vmem:[#allocation3 + $0x61] sm:$0xff]  ;;  %v2363_v8 = vpack.i.bf16 %v3046_v15, %v3031_v40 }
 0x1ff   : > { %v2368_v2 = vpack.i.bf16 %v1213_v32, %v1236_v43  ;;  %v3053_v52 = vld [vmem:[#allocation3 + $0x62] sm:$0xff] }
 0x200   : > { %v1145_v38 = vmax.f32 %v1137_v50, 0.0  ;;  %v2373_v54 = vpack.i.bf16 %v3053_v52, %v3040_v49 }
 0x201   : > { %2359 = vrot.lane.b32.xlu1 %v2358_v51, %s2422_s27 }
 0x202   : > { %2354 = vrot.lane.b32.xlu0 %v2348_v47, %s2421_s19  ;;  %1175 = vst.msk [vmem:[#allocation3 + $0x81] sm:$0xff] %vm465_vm2, %v1145_v38  ;;  %v3056_v12 = vld [vmem:[#allocation3 + $0x70] sm:$0xff] }
 0x203   : > { %v2378_v55 = vpack.i.bf16 %v3056_v12, %v3046_v15  ;;  %v1238_v56 = vld [vmem:[#allocation3 + $0x71] sm:$0xff] }
 0x204   : > { %v2383_v35 = vpack.i.bf16 %v1238_v56, %v1213_v32  ;;  %v3065_v42 = vld [vmem:[#allocation3 + $0x72] sm:$0xff] }
 0x205   : > { %2369 = vrot.lane.b32.xlu1 %v2368_v2, %s2423_s29  ;;  %v2393_v58 = vpack.i.bf16 %v3065_v42, %v3053_v52 }
 0x206   : > { %2364 = vrot.lane.b32.xlu0 %v2363_v8, %s2425_s17 }
 0x209   : > { %2379 = vrot.lane.b32.xlu1 %v2378_v55, %s2424_s30  ;;  %v1215_v59 = vld [vmem:[#allocation3 + $0x81] sm:$0xff] }
 0x20a   : > { %2374 = vrot.lane.b32.xlu0 %v2373_v54, %s2426_s18  ;;  %v1207_v60 = vld [vmem:[#allocation3 + $0x80] sm:$0xff]  ;;  %v2403_v61 = vpack.i.bf16 %v1215_v59, %v1238_v56 }
 0x20b   : > { %v2398_v62 = vpack.i.bf16 %v1207_v60, %v3056_v12  ;;  %v3079_v20 = vld [vmem:[#allocation3 + $0x82] sm:$0xff] }
 0x20d   : > { %2389 = vrot.lane.b32.xlu1 %v2383_v35, %s2421_s19 }
 0x20e   : > { %2384 = vrot.lane.b32.xlu0 %v2383_v35, %s2427_s20 }
 0x211   : > { %1397 = vrot.lane.b32.xlu1 %v3065_v42, %s2426_s18 }
 0x212   : > { %2394 = vrot.lane.b32.xlu0 %v2393_v58, %s2422_s27 }
 0x215   : > { %2399 = vrot.lane.b32.xlu1 %v2398_v62, %s2425_s17 }
 0x216   : > { %2404 = vrot.lane.b32.xlu0 %v2403_v61, %s2423_s29  ;;  %s433_s29 = scalar_lea.vmem %s3267_s12, %s2578_s28 }
 0x219   : > { %1461 = vrot.lane.b32.xlu1 %v1215_v59, %s2427_s20 }
 0x21a   : > { %1429 = vrot.lane.b32.xlu0 %v1207_v60, %s2424_s30 }
 0x21d   : > { %1431 = vrot.lane.b32.xlu1 %v1232_v1, %s2424_s30 }
 0x21e   : > { %1399 = vrot.lane.b32.xlu0 %v3079_v20, %s2426_s18 }
 0x222   : > { %1463 = vrot.lane.b32.xlu0 %v1240_v4, %s2427_s20 }
 0x253   : > { %v2285_v5 = vpop.permute.xlu0 %2284 }
 0x254   : > { %v2286_v6 = vunpack.i.l.bf16 %v2285_v5  ;;  %v2290_v7 = vpop.permute.xlu1 %2289  ;;  %v2287_v14 = vunpack.i.h.bf16 %v2285_v5 }
 0x255   : > { %v2291_v13 = vunpack.i.l.bf16 %v2290_v7  ;;  %v2292_v28 = vunpack.i.h.bf16 %v2290_v7 }
 0x256   : > { %v1473_v11 = vsel %vm465_vm2, %v1176_v10, %v2286_v6  ;;  %v1474_v23 = vsel %vm465_vm2, %v2986_v53, %v2287_v14 }
 0x257   : > { %v1481_v21 = vsel %vm434_vm0, %v1473_v11, %v2291_v13  ;;  %v1482_v34 = vsel %vm434_vm0, %v1474_v23, %v2292_v28 }
 0x25b   : > { %v2300_v16 = vpop.permute.xlu1 %2299 }
 0x25c   : > { %v2295_v17 = vpop.permute.xlu0 %2294  ;;  %v2301_v22 = vunpack.i.l.bf16 %v2300_v16  ;;  %v2302_v36 = vunpack.i.h.bf16 %v2300_v16 }
 0x25d   : > { %v2296_v18 = vunpack.i.l.bf16 %v2295_v17  ;;  %v2297_v26 = vunpack.i.h.bf16 %v2295_v17 }
 0x25f   : > { %v1490_v27 = vsel %vm1489_vm7, %v1481_v21, %v2296_v18  ;;  %v2310_v33 = vpop.permute.xlu1 %2309  ;;  %v1491_v37 = vsel %vm1489_vm7, %v1482_v34, %v2297_v26 }
 0x260   : > { %v2305_v29 = vpop.permute.xlu0 %2304  ;;  %v1498_v63 = vsel %vm796_vm4, %v1490_v27, %v2301_v22  ;;  %v2311_v31 = vunpack.i.l.bf16 %v2310_v33  ;;  %v2312_v44 = vunpack.i.h.bf16 %v2310_v33  ;;  %v1499_v47 = vsel %vm796_vm4, %v1491_v37, %v2302_v36 }
 0x261   : > { %v2306_v30 = vunpack.i.l.bf16 %v2305_v29  ;;  %v2307_v25 = vunpack.i.h.bf16 %v2305_v29 }
 0x263   : > { %v1507_v39 = vsel %vm1506_vm8, %v1498_v63, %v2306_v30  ;;  %v2320_v43 = vpop.permute.xlu1 %2319  ;;  %v1508_v51 = vsel %vm1506_vm8, %v1499_v47, %v2307_v25 }
 0x264   : > { %v2315_v41 = vpop.permute.xlu0 %2314  ;;  %v1515_v45 = vsel %vm805_vm5, %v1507_v39, %v2311_v31  ;;  %v2321_v46 = vunpack.i.l.bf16 %v2320_v43  ;;  %v2322_v38 = vunpack.i.h.bf16 %v2320_v43  ;;  %v1516_v35 = vsel %vm805_vm5, %v1508_v51, %v2312_v44 }
 0x265   : > { %v2316_v53 = vunpack.i.l.bf16 %v2315_v41  ;;  %v2317_v48 = vunpack.i.h.bf16 %v2315_v41 }
 0x266   : > { %v1475_v55 = vsel %vm465_vm2, %v2989_v57, %v2321_v46  ;;  %v1476_v60 = vsel %vm465_vm2, %v3003_v9, %v2322_v38 }
 0x267   : > { %v1524_v50 = vsel %vm1523_vm9, %v1515_v45, %v2316_v53  ;;  %v2330_v54 = vpop.permute.xlu1 %2329  ;;  %v1525_v59 = vsel %vm1523_vm9, %v1516_v35, %v2317_v48 }
 0x268   : > { %1639 = vmatmul.mubr.f32.vlgmr.msra.gmra.mxu1 %v1524_v50  ;;  %v2325_v32 = vpop.permute.xlu0 %2324  ;;  %v2331_v56 = vunpack.i.l.bf16 %v2330_v54  ;;  %v2332_v61 = vunpack.i.h.bf16 %v2330_v54 }
 0x269   : > { %v2327_v8 = vunpack.i.h.bf16 %v2325_v32  ;;  %v2326_v2 = vunpack.i.l.bf16 %v2325_v32  ;;  %2020 = vmatprep.mubr.msk.f32.mxu1 %vm465_vm2, %v3011_v19 }
 0x26b   : > { %v1483_v58 = vsel %vm434_vm0, %v1475_v55, %v2326_v2  ;;  %v1484_v1 = vsel %vm434_vm0, %v1476_v60, %v2327_v8  ;;  %v2340_v57 = vpop.permute.xlu1 %2339 }
 0x26c   : > { %1644 = vmatmul.mubr.f32.gmra.mxu1 %v1525_v59  ;;  %v2335_v62 = vpop.permute.xlu0 %2334  ;;  %v1492_v5 = vsel %vm1489_vm7, %v1483_v58, %v2331_v56  ;;  %v2341_v6 = vunpack.i.l.bf16 %v2340_v57  ;;  %v1493_v10 = vsel %vm1489_vm7, %v1484_v1, %v2332_v61  ;;  %v2342_v13 = vunpack.i.h.bf16 %v2340_v57 }
 0x26d   : > { %v2337_v19 = vunpack.i.h.bf16 %v2335_v62  ;;  %v2336_v4 = vunpack.i.l.bf16 %v2335_v62  ;;  %2021 = vmatprep.mubr.msk.f32.mxu1 %vm465_vm2, %v3023_v3 }
 0x26f   : > { %v1500_v7 = vsel %vm796_vm4, %v1492_v5, %v2336_v4  ;;  %v1501_v14 = vsel %vm796_vm4, %v1493_v10, %v2337_v19  ;;  %v2350_v17 = vpop.permute.xlu1 %2349 }
 0x270   : > { %v2345_v9 = vpop.permute.xlu0 %2344  ;;  %v2351_v18 = vunpack.i.l.bf16 %v2350_v17  ;;  %v1509_v28 = vsel %vm1506_vm8, %v1500_v7, %v2341_v6  ;;  %v2352_v21 = vunpack.i.h.bf16 %v2350_v17  ;;  %v1510_v26 = vsel %vm1506_vm8, %v1501_v14, %v2342_v13 }
 0x271   : > { %v2347_v11 = vunpack.i.h.bf16 %v2345_v9  ;;  %v2346_v16 = vunpack.i.l.bf16 %v2345_v9 }
 0x273   : > { %v1517_v3 = vsel %vm805_vm5, %v1509_v28, %v2346_v16  ;;  %v2360_v29 = vpop.permute.xlu1 %2359  ;;  %v1518_v30 = vsel %vm805_vm5, %v1510_v26, %v2347_v11 }
 0x274   : > { %v2355_v22 = vpop.permute.xlu0 %2354  ;;  %v1526_v23 = vsel %vm1523_vm9, %v1517_v3, %v2351_v18  ;;  %v2361_v33 = vunpack.i.l.bf16 %v2360_v29  ;;  %v1527_v31 = vsel %vm1523_vm9, %v1518_v30, %v2352_v21  ;;  %v2362_v39 = vunpack.i.h.bf16 %v2360_v29 }
 0x275   : > { %v2356_v27 = vunpack.i.l.bf16 %v2355_v22  ;;  %1649 = vmatmul.mubr.f32.gmra.mxu1 %v1526_v23  ;;  %v2357_v34 = vunpack.i.h.bf16 %v2355_v22  ;;  %v1248_v23 = vld [vmem:[#allocation3 + $0x92] sm:$0xff] }
 0x276   : > { %2022 = vmatprep.mubr.msk.f32.mxu1 %vm465_vm2, %v3040_v49 }
 0x277   : > { %v1477_v36 = vsel %vm465_vm2, %v3016_v24, %v2356_v27  ;;  %v2370_v25 = vpop.permute.xlu1 %2369  ;;  %v1478_v49 = vsel %vm465_vm2, %v3031_v40, %v2357_v34 }
 0x278   : > { %v2365_v63 = vpop.permute.xlu0 %2364  ;;  %v1485_v41 = vsel %vm434_vm0, %v1477_v36, %v2361_v33  ;;  %v2371_v53 = vunpack.i.l.bf16 %v2370_v25  ;;  %v1486_v47 = vsel %vm434_vm0, %v1478_v49, %v2362_v39  ;;  %v2372_v48 = vunpack.i.h.bf16 %v2370_v25 }
 0x279   : > { %v2366_v37 = vunpack.i.l.bf16 %v2365_v63  ;;  %1654 = vmatmul.mubr.f32.gmra.mxu1 %v1527_v31  ;;  %v2367_v43 = vunpack.i.h.bf16 %v2365_v63  ;;  %v1741_v63 = vld [vmem:[%s3263_s8 + $0x8] sm:$0xff]  ;;  %v1740_v31 = vld [vmem:[%s3263_s8] sm:$0xff] }
 0x27a   : > { %2023 = vmatprep.mubr.msk.f32.mxu1 %vm465_vm2, %v3053_v52  ;;  %2133 = vmatpush3.msra.mxu0 %v1741_v63 }
 0x27b   : > { %v1494_v44 = vsel %vm1489_vm7, %v1485_v41, %v2366_v37  ;;  %v2380_v46 = vpop.permute.xlu1 %2379  ;;  %v1495_v38 = vsel %vm1489_vm7, %v1486_v47, %v2367_v43  ;;  %2134 = vmatprep.subr.mxu0 %v2420_v0 }
 0x27c   : > { %v2375_v24 = vpop.permute.xlu0 %2374  ;;  %v1502_v50 = vsel %vm796_vm4, %v1494_v44, %v2371_v53  ;;  %v2381_v51 = vunpack.i.l.bf16 %v2380_v46  ;;  %v1503_v54 = vsel %vm796_vm4, %v1495_v38, %v2372_v48  ;;  %v2382_v55 = vunpack.i.h.bf16 %v2380_v46  ;;  %2135 = vmatpush3.msra.mxu0 %v1740_v31 }
 0x27d   : > { %v2376_v45 = vunpack.i.l.bf16 %v2375_v24  ;;  %v2377_v32 = vunpack.i.h.bf16 %v2375_v24  ;;  %2139 = vmatprep.subr.mxu0 %v2420_v0  ;;  %v2027_v24 = vld [vmem:[%s3261_s6] ss:$0 sm:$0xff] }
 0x27f   : > { %v1511_v52 = vsel %vm1506_vm8, %v1502_v50, %v2376_v45  ;;  %v2390_v40 = vpop.permute.xlu1 %2389  ;;  %v1512_v59 = vsel %vm1506_vm8, %v1503_v54, %v2377_v32  ;;  %v2028_v50 = vld [vmem:[%s3262_s7] ss:$0 sm:$0xff] }
 0x280   : > { %v2385_v8 = vpop.permute.xlu0 %2384  ;;  %v1519_v56 = vsel %vm805_vm5, %v1511_v52, %v2381_v51  ;;  %v2391_v62 = vunpack.i.l.bf16 %v2390_v40  ;;  %v1520_v1 = vsel %vm805_vm5, %v1512_v59, %v2382_v55  ;;  %v2392_v19 = vunpack.i.h.bf16 %v2390_v40 }
 0x281   : > { %v2386_v2 = vunpack.i.l.bf16 %v2385_v8  ;;  %v2387_v35 = vunpack.i.h.bf16 %v2385_v8 }
 0x282   : > { %v1479_v10 = vsel %vm465_vm2, %v3046_v15, %v2391_v62 }
 0x283   : > { %v1528_v58 = vsel %vm1523_vm9, %v1519_v56, %v2386_v2  ;;  %v1398_v61 = vpop.permute.xlu1 %1397  ;;  %v1529_v57 = vsel %vm1523_vm9, %v1520_v1, %v2387_v35 }
 0x284   : > { %v2395_v60 = vpop.permute.xlu0 %2394  ;;  %1659 = vmatmul.mubr.f32.gmra.mxu1 %v1528_v58 }
 0x285   : > { %2024 = vmatprep.mubr.msk.f32.mxu1 %vm465_vm2, %v3065_v42  ;;  %v2396_v4 = vunpack.i.l.bf16 %v2395_v60  ;;  %v2397_v5 = vunpack.i.h.bf16 %v2395_v60  ;;  %v1480_v42 = vsel %vm465_vm2, %v3056_v12, %v2392_v19 }
 0x287   : > { %v2400_v7 = vpop.permute.xlu1 %2399  ;;  %v1487_v14 = vsel %vm434_vm0, %v1479_v10, %v2396_v4  ;;  %v1488_v16 = vsel %vm434_vm0, %v1480_v42, %v2397_v5 }
 0x288   : > { %v2405_v6 = vpop.permute.xlu0 %2404  ;;  %1664 = vmatmul.mubr.f32.gmra.mxu1 %v1529_v57  ;;  %v2402_v13 = vunpack.i.h.bf16 %v2400_v7  ;;  %v2401_v9 = vunpack.i.l.bf16 %v2400_v7 }
 0x289   : > { %2025 = vmatprep.mubr.msk.f32.mxu1 %vm465_vm2, %v3079_v20  ;;  %v2406_v11 = vunpack.i.l.bf16 %v2405_v6  ;;  %v2407_v21 = vunpack.i.h.bf16 %v2405_v6 }
 0x28a   : > { %v1496_v17 = vsel %vm1489_vm7, %v1487_v14, %v2401_v9  ;;  %v1497_v20 = vsel %vm1489_vm7, %v1488_v16, %v2402_v13 }
 0x28b   : > { %v1504_v28 = vsel %vm796_vm4, %v1496_v17, %v2406_v11  ;;  %v1462_v3 = vpop.permute.xlu1 %1461  ;;  %v1505_v26 = vsel %vm796_vm4, %v1497_v20, %v2407_v21 }
 0x28c   : > { %v1430_v18 = vpop.permute.xlu0 %1429  ;;  %v1513_v15 = vsel %vm1506_vm8, %v1504_v28, %v1398_v61 }
 0x28d   : > { %v1521_v22 = vsel %vm805_vm5, %v1513_v15, %v1430_v18 }
 0x28e   : > { %v1530_v27 = vsel %vm1523_vm9, %v1521_v22, %v1462_v3 }
 0x28f   : > { %v1432_v30 = vpop.permute.xlu1 %1431  ;;  %1669 = vmatmul.mubr.f32.gmra.mxu1 %v1530_v27 }
 0x290   : > { %v1400_v12 = vpop.permute.xlu0 %1399  ;;  %2026 = vmatprep.mubr.msk.f32.mxu1 %vm465_vm2, %v1248_v23 }
 0x291   : > { %v1514_v29 = vsel %vm1506_vm8, %v1505_v26, %v1400_v12 }
 0x292   : > { %v1522_v33 = vsel %vm805_vm5, %v1514_v29, %v1432_v30 }
 0x294   : > { %v1464_v34 = vpop.permute.xlu0 %1463 }
 0x295   : > { %v1531_v36 = vsel %vm1523_vm9, %v1522_v33, %v1464_v34 }
 0x296   : > { %1674 = vmatmul.mubr.f32.gmra.mxu1 %v1531_v36 }
 0x328   : > { %v1640_v37 = vpop.f32.mrf.mxu1 }
 0x329   : > { %v1686_v47 = vmul.f32 %v2027_v24, %v1640_v37 }
 0x32a   : > { %v1642_v25 = vpop.f32.mrf.mxu1 }
 0x32b   : > { %v3179_v8 = vadd.f32 %v2028_v50, %v1686_v47  ;;  %v1824_v25 = vld [vmem:[%s3265_s10 + $0x8] sm:$0xff] }
 0x32c   : > { %v1645_v39 = vpop.f32.mrf.mxu1 }
 0x32d   : > { %v1687_v45 = vmul.f32 %v2027_v24, %v1645_v39  ;;  %v1709_v58 = vmax.f32 %v3179_v8, 0.0  ;;  %v1823_v39 = vld [vmem:[%s3265_s10] sm:$0xff] }
 0x32e   : > { %v1647_v41 = vpop.f32.mrf.mxu1 }
 0x32f   : > { %v3177_v38 = vadd.f32 %v2028_v50, %v1687_v45  ;;  %v1717_v19 = vsel %vm465_vm2, %v1709_v58, 0.0  ;;  %v2029_v41 = vld [vmem:[%s3264_s9] ss:$0 sm:$0xff] }
 0x331   : > { %v1710_v55 = vmax.f32 %v3177_v38, 0.0 }
 0x333   : > { %v1718_v61 = vsel %vm465_vm2, %v1710_v55, 0.0 }
 0x334   : > { %v1719_v6 = vadd.f32 %v1718_v61, %v1717_v19 }
 0x335   : > { %v1650_v53 = vpop.f32.mrf.mxu1 }
 0x336   : > { %v1688_v48 = vmul.f32 %v2027_v24, %v1650_v53 }
 0x337   : > { %v1652_v49 = vpop.f32.mrf.mxu1 }
 0x338   : > { %v3181_v2 = vadd.f32 %v2028_v50, %v1688_v48 }
 0x339   : > { %v1655_v43 = vpop.f32.mrf.mxu1 }
 0x33a   : > { %v1689_v32 = vmul.f32 %v2027_v24, %v1655_v43  ;;  %v1711_v59 = vmax.f32 %v3181_v2, 0.0 }
 0x33b   : > { %v1657_v44 = vpop.f32.mrf.mxu1 }
 0x33c   : > { %v3184_v56 = vadd.f32 %v2028_v50, %v1689_v32  ;;  %v1720_v4 = vsel %vm465_vm2, %v1711_v59, 0.0  ;;  %v1911_v32 = vlaneseq }
 0x33d   : > { %v1721_v42 = vadd.f32 %v1720_v4, %v1719_v6 }
 0x33e   : > { %v1712_v62 = vmax.f32 %v3184_v56, 0.0 }
 0x340   : > { %v1722_v10 = vsel %vm465_vm2, %v1712_v62, 0.0 }
 0x341   : > { %v1723_v16 = vadd.f32 %v1722_v10, %v1721_v42 }
 0x344   : > { %v1660_v46 = vpop.f32.mrf.mxu1 }
 0x345   : > { %v1690_v40 = vmul.f32 %v2027_v24, %v1660_v46 }
 0x346   : > { %v1662_v51 = vpop.f32.mrf.mxu1 }
 0x347   : > { %v3188_v60 = vadd.f32 %v2028_v50, %v1690_v40 }
 0x348   : > { %v1665_v52 = vpop.f32.mrf.mxu1 }
 0x349   : > { %v1691_v35 = vmul.f32 %v2027_v24, %v1665_v52  ;;  %v1713_v57 = vmax.f32 %v3188_v60, 0.0  ;;  %v1912_v52 = vshrl.u32 %v1911_v32, 7 }
 0x34a   : > { %v1667_v54 = vpop.f32.mrf.mxu1 }
 0x34b   : > { %v3194_v1 = vadd.f32 %v2028_v50, %v1691_v35  ;;  %v1724_v11 = vsel %vm465_vm2, %v1713_v57, 0.0  ;;  %v1913_v40 = vsub.s32 0, %v1912_v52 }
 0x34c   : > { %v1725_v20 = vadd.f32 %v1724_v11, %v1723_v16 }
 0x34d   : > { %v1714_v13 = vmax.f32 %v3194_v1, 0.0 }
 0x34f   : > { %v1670_v5 = vpop.f32.mrf.mxu1  ;;  %v1726_v28 = vsel %vm465_vm2, %v1714_v13, 0.0 }
 0x350   : > { %v1692_v7 = vmul.f32 %v2027_v24, %v1670_v5  ;;  %v1727_v23 = vadd.f32 %v1726_v28, %v1725_v20 }
 0x351   : > { %v1672_v9 = vpop.f32.mrf.mxu1 }
 0x352   : > { %v1707_v14 = vadd.f32 %v2028_v50, %v1692_v7 }
 0x354   : > { %v1715_v17 = vmax.f32 %v1707_v14, 0.0 }
 0x356   : > { %v1675_v18 = vpop.f32.mrf.mxu1  ;;  %v1728_v15 = vsel %vm465_vm2, %v1715_v17, 0.0 }
 0x357   : > { %v1693_v3 = vmul.f32 %v2027_v24, %v1675_v18  ;;  %v1729_v26 = vadd.f32 %v1728_v15, %v1727_v23  ;;  %v2031_v24 = vld [vmem:[%s3266_s11] ss:$0 sm:$0xff] }
 0x358   : > { %v1677_v21 = vpop.f32.mrf.mxu1 }
 0x359   : > { %v1708_v22 = vadd.f32 %v2028_v50, %v1693_v3 }
 0x35b   : > { %v1716_v12 = vmax.f32 %v1708_v22, 0.0 }
 0x35d   : > { %v1730_v27 = vsel %vm465_vm2, %v1716_v12, 0.0 }
 0x35e   : > { %v1731_v29 = vadd.f32 %v1730_v27, %v1729_v26 }
 0x360   : > { %v1732_v30 = vrot.slane %v1731_v29, 4 }
 0x362   : > { %v1733_v33 = vadd.f32 %v1732_v30, %v1731_v29 }
 0x364   : > { %v1734_v34 = vrot.slane %v1733_v33, 2 }
 0x366   : > { %v1735_v36 = vadd.f32 %v1734_v34, %v1733_v33 }
 0x368   : > { %v1736_v63 = vrot.slane %v1735_v36, 1 }
 0x36a   : > { %v1737_v31 = vadd.f32 %v1736_v63, %v1735_v36 }
 0x36c   : > { %v1739_v37 = vmul.f32 0.015625, %v1737_v31 }
 0x36e   : > { %2137 = vmatmul.mubr.msk.f32.vlgmr.msra.gmra.mxu0 %vm465_vm2, %v1739_v37 }
 0x36f   : > { %2143 = vmatprep.mubr.msk.f32.mxu0 %vm2428_vm10, %v2420_v0  ;;  %2140 = vmatpush3.msra.mxu0 %v1824_v25 }
 0x370   : > { %2141 = vmatprep.subr.mxu0 %v2420_v0 }
 0x371   : > { %2142 = vmatpush3.msra.mxu0 %v1823_v39 }
 0x42e   : > { %v1818_v53 = vpop.f32.mrf.mxu0 }
 0x42f   : > { %v1819_v49 = vadd.f32 %v2029_v41, %v1818_v53 }
 0x430   : > { %v2138_v43 = vpop.f32.mrf.mxu0 }
 0x431   : > { %v1822_v44 = vmax.f32 %v1819_v49, 0.0 }
 0x433   : > { %2144 = vmatmul.mubr.msk.f32.vlgmr.msra.gmra.mxu0 %vm465_vm2, %v1822_v44 }
 0x4f3   : > { %v1901_v45 = vpop.f32.mrf.mxu0 }
 0x4f4   : > { %v1902_v46 = vadd.f32 %v2031_v24, %v1901_v45 }
 0x4f5   : > { %v2145_v47 = vpop.f32.mrf.mxu0 }
 0x4f6   : > { %v1905_v0 = vsub.f32 0.0, %v1902_v46 }
 0x4f8   : > { %v1906_v48 = vmul.f32 1.442695, %v1905_v0 }
 0x4fa   : > { %2408 = vpow2.f32 %v1906_v48 }
 0x507   : > { %v2409_v50 = vpop.eup %2408 }
 0x508   : > { %v1908_v51 = vadd.f32 1.0, %v2409_v50 }
 0x50a   : > { %2410 = vrcp.f32 %v1908_v51 }
 0x517   : > { %v2411_v54 = vpop.eup %2410 }
 0x518   : > { %v1914_v35 = vrot.slane %v2411_v54, %v1913_v40 }
 0x51a   : > { %v1915_v61 = vmul.f32 %v1914_v35, %v1709_v58  ;;  %v1916_v1 = vmul.f32 %v1914_v35, %v1710_v55  ;;  %v1917_v19 = vmul.f32 %v1914_v35, %v1711_v59  ;;  %v1918_v4 = vmul.f32 %v1914_v35, %v1712_v62 }
 0x51b   : > { %v1919_v5 = vmul.f32 %v1914_v35, %v1713_v57  ;;  %v1920_v6 = vmul.f32 %v1914_v35, %v1714_v13  ;;  %v1921_v7 = vmul.f32 %v1914_v35, %v1715_v17  ;;  %v1922_v10 = vmul.f32 %v1914_v35, %v1716_v12 }
 0x51c   : > { %1923 = vst.msk [vmem:[%s433_s29] sm:$0xff] %vm465_vm2, %v1915_v61  ;;  %1924 = vst.msk [vmem:[%s433_s29 + $0x8] sm:$0xff] %vm465_vm2, %v1916_v1 }
 0x51d   : > { %1925 = vst.msk [vmem:[%s433_s29 + $0x10] sm:$0xff] %vm465_vm2, %v1917_v19  ;;  %1926 = vst.msk [vmem:[%s433_s29 + $0x18] sm:$0xff] %vm465_vm2, %v1918_v4 }
 0x51e   : > { %1927 = vst.msk [vmem:[%s433_s29 + $0x20] sm:$0xff] %vm465_vm2, %v1919_v5  ;;  %1928 = vst.msk [vmem:[%s433_s29 + $0x28] sm:$0xff] %vm465_vm2, %v1920_v6 }
 0x51f   : > { %1929 = vst.msk [vmem:[%s433_s29 + $0x30] sm:$0xff] %vm465_vm2, %v1921_v7  ;;  %1930 = vst.msk [vmem:[%s433_s29 + $0x38] sm:$0xff] %vm465_vm2, %v1922_v10 }
 0x520 PF: > { %s22_s21 = sadd.s32 1, %s2418_s21  }
 0x521   : > { %p19_p4 = scmp.ge.s32.totalorder %s22_s21, 4  }
 0x523   :  { %21 = sbr.rel (!%p19_p4) target bundleno = 1 (0x1), region = 105 }

// kernel: decoder_forward.7
= control target key start
LH: loop header
LB: loop body
LE: loop exit
PB: predicated region body
PF: predicated region fallthrough
CT: control target
= control target key end

     0   :  { %s6007_s21 = smov 0   ;;  %s8607_s0 = inlined_call_operand.vmem [shape: f32[2,16,16,8], index: 0, kind: input, shape index: {}]   ;;  %s8608_s1 = inlined_call_operand.vmem [shape: f32[2,16,16,8], index: 1, kind: input, shape index: {}]   ;;  %s8609_s2 = inlined_call_operand.vmem [shape: f32[144,8], index: 2, kind: input, shape index: {}]   ;;  %s8610_s3 = inlined_call_operand.vmem [shape: f32[1,8], index: 3, kind: input, shape index: {}]   ;;  %s8611_s4 = inlined_call_operand.vmem [shape: f32[1,8], index: 4, kind: input, shape index: {}]   ;;  %s8612_s5 = inlined_call_operand.vmem [shape: f32[72,8], index: 5, kind: input, shape index: {}]   ;;  %s8613_s6 = inlined_call_operand.vmem [shape: f32[1,8], index: 6, kind: input, shape index: {}]   ;;  %s8614_s7 = inlined_call_operand.vmem [shape: f32[1,8], index: 7, kind: input, shape index: {}]   ;;  %s8615_s8 = inlined_call_operand.vmem [shape: f32[8,8], index: 8, kind: input, shape index: {}]   ;;  %s8616_s9 = inlined_call_operand.vmem [shape: f32[1,8], index: 9, kind: input, shape index: {}]   ;;  %s8617_s10 = inlined_call_operand.vmem [shape: f32[8,8], index: 10, kind: input, shape index: {}]   ;;  %s8618_s11 = inlined_call_operand.vmem [shape: f32[1,8], index: 11, kind: input, shape index: {}]   ;;  %s8619_s12 = inlined_call_operand.vmem [shape: f32[2,16,16,8], index: 12, kind: output, shape index: {}]  }
   0x1 LB: > { %s5089_s22 = sadd.s32 4294967295, %s5927_s21   ;;  %p5093_p0 = scmp.ge.s32.totalorder %s5927_s21, 1  ;;  %s5927_s21 = sphi %s6007_s21, %s22_s21  }
   0x2   : > { %p372_p1 = scmp.lt.s32.totalorder %s5927_s21, 3 }
   0x4   : > { %p373_p2 = pnand %p5093_p0, %p372_p1 }
   0x5   : > { %p6017_p3 = scmp.lt.s32.totalorder (!%p373_p2), %s5089_s22, 1  ;;  %s5930_s28 = smov (!%p373_p2), 8  }
   0x6   : > { %376 = sbr.rel (%p373_p2) target bundleno = 1763 (0x6e3), region = 68  ;;  %s5931_s14 = smov (!%p373_p2), 32  }
   0x7   : > { %s5932_s15 = smov (!%p373_p2), 16   ;;  %s5933_s19 = smov (!%p373_p2), 80  }
   0x8   : > { %s5934_s20 = smov (!%p373_p2), 48   ;;  %s5936_s23 = smov (!%p373_p2), 64  }
   0x9   : > { %s5937_s25 = smov (!%p373_p2), 96   ;;  %s5938_s30 = smov (!%p373_p2), 24  }
   0xa   : > { %s5939_s16 = smov (!%p373_p2), 40  }
   0xb   : > { %vm434_vm0 = vcmask 130048   ;;  %vm437_vm1 = vcmask 123904   ;;  %vm523_vm2 = vcmask 64512   ;;  %v5929_v0 = vmov 0.0   ;;  %s8652_s22 = smov (!%p6017_p3, %s5089_s22), 1  ;;  %v2179_v62 = vld [vmem:[%s8609_s2 + $0x78] sm:$0xff] }
   0xc   : > { %435 = vst.msk [vmem:[#allocation2] sm:$0xff] %vm434_vm0, %v5929_v0  ;;  %436 = vst.msk [vmem:[#allocation2 + $0x8] sm:$0xff] %vm434_vm0, %v5929_v0  ;;  %2278 = vmatprep.subr.mxu0 %v5929_v0  ;;  %5298 = vmatprep.subr.mxu1 %v5929_v0  ;;  %s6207_s24 = sshll.u32 %s8652_s22, 8  ;;  %v2178_v63 = vld [vmem:[%s8609_s2 + $0x70] sm:$0xff]  ;;  %vm716_vm3 = vcmask 130112   ;;  %s5935_s22 = smov 112  }
   0xd   : > { %438 = vst.msk [vmem:[#allocation2 + $0x10] sm:$0x3] %vm437_vm1, %v5929_v0  ;;  %441 = vst.msk [vmem:[#allocation2 + $0x28] sm:$0x3] %vm437_vm1, %v5929_v0  ;;  %s6213_s27 = scalar_lea.vmem %s8608_s1, %s6207_s24  ;;  %s6229_s13 = scalar_lea.vmem %s8607_s0, %s6207_s24  ;;  %2279 = vmatpush1.msra.mxu0 %v2179_v62  ;;  %5316 = vmatpush1.msra.mxu1 %v2179_v62  ;;  %vm1966_vm4 = vcmask 261120   ;;  %vm1999_vm5 = vcmask 392192  }
   0xe   : > { %439 = vst.msk [vmem:[#allocation2 + $0x18] sm:$0xff] %vm434_vm0, %v5929_v0  ;;  %440 = vst.msk [vmem:[#allocation2 + $0x20] sm:$0xff] %vm434_vm0, %v5929_v0  ;;  %v556_v1 = vld [vmem:[%s6213_s27] sm:$0xff]  ;;  %v558_v2 = vld [vmem:[%s6213_s27 + $0x10] sm:$0xff]  ;;  %2280 = vmatprep.subr.mxu0 %v5929_v0  ;;  %5299 = vmatprep.subr.mxu1 %v5929_v0  ;;  %vm2032_vm6 = vcmask 523264   ;;  %vm2065_vm7 = vcmask 654336  }
   0xf   : > { %442 = vst.msk [vmem:[#allocation2 + $0x30] sm:$0xff] %vm434_vm0, %v5929_v0  ;;  %443 = vst.msk [vmem:[#allocation2 + $0x38] sm:$0xff] %vm434_vm0, %v5929_v0  ;;  %620 = vrot.lane.b32.xlu0 %v556_v1, %s5930_s28  ;;  %624 = vrot.lane.b32.xlu1 %v558_v2, %s5930_s28  ;;  %v557_v3 = vld [vmem:[%s6213_s27 + $0x8] sm:$0xff]  ;;  %v559_v4 = vld [vmem:[%s6213_s27 + $0x18] sm:$0xff]  ;;  %vm2098_vm8 = vcmask 785408   ;;  %vm2131_vm9 = vcmask 916480  }
  0x10   : > { %444 = vst.msk [vmem:[#allocation2 + $0x40] sm:$0x3] %vm437_vm1, %v5929_v0  ;;  %447 = vst.msk [vmem:[#allocation2 + $0x58] sm:$0x3] %vm437_vm1, %v5929_v0  ;;  %v561_v5 = vld [vmem:[%s6213_s27 + $0x28] sm:$0xff]  ;;  %v560_v6 = vld [vmem:[%s6213_s27 + $0x20] sm:$0xff]  ;;  %2281 = vmatpush1.msra.mxu0 %v2178_v63  ;;  %5317 = vmatpush1.msra.mxu1 %v2178_v63 }
  0x11   : > { %445 = vst.msk [vmem:[#allocation2 + $0x48] sm:$0xff] %vm434_vm0, %v5929_v0  ;;  %446 = vst.msk [vmem:[#allocation2 + $0x50] sm:$0xff] %vm434_vm0, %v5929_v0  ;;  %v563_v7 = vld [vmem:[%s6213_s27 + $0x38] sm:$0xff]  ;;  %v562_v8 = vld [vmem:[%s6213_s27 + $0x30] sm:$0xff]  ;;  %2282 = vmatprep.subr.mxu0 %v5929_v0  ;;  %5300 = vmatprep.subr.mxu1 %v5929_v0  ;;  %vm2615_vm10 = vcmask 58368   ;;  %vm4078_vm11 = vcmask 195584  }
  0x12   : > { %448 = vst.msk [vmem:[#allocation2 + $0x60] sm:$0xff] %vm434_vm0, %v5929_v0  ;;  %449 = vst.msk [vmem:[#allocation2 + $0x68] sm:$0xff] %vm434_vm0, %v5929_v0  ;;  %v490_v9 = vld [vmem:[%s6229_s13] sm:$0xff]  ;;  %v492_v10 = vld [vmem:[%s6229_s13 + $0x10] sm:$0xff]  ;;  %vm4143_vm12 = vcmask 326656   ;;  %vm4208_vm13 = vcmask 457728  }
  0x13   : > { %450 = vst.msk [vmem:[#allocation2 + $0x70] sm:$0x3] %vm437_vm1, %v5929_v0  ;;  %453 = vst.msk [vmem:[#allocation2 + $0x88] sm:$0x3] %vm437_vm1, %v5929_v0  ;;  %622 = vrot.lane.b32.xlu0 %v557_v3, %s5930_s28  ;;  %626 = vrot.lane.b32.xlu1 %v559_v4, %s5930_s28  ;;  %v491_v11 = vld [vmem:[%s6229_s13 + $0x8] sm:$0xff]  ;;  %v493_v13 = vld [vmem:[%s6229_s13 + $0x18] sm:$0xff] }
  0x14   : > { %451 = vst.msk [vmem:[#allocation2 + $0x78] sm:$0xff] %vm434_vm0, %v5929_v0  ;;  %452 = vst.msk [vmem:[#allocation2 + $0x80] sm:$0xff] %vm434_vm0, %v5929_v0  ;;  %v565_v12 = vld [vmem:[%s6213_s27 + $0x48] sm:$0xff]  ;;  %v564_v14 = vld [vmem:[%s6213_s27 + $0x40] sm:$0xff]  ;;  %vm4282_vm14 = vcmask 588800   ;;  %vm5941_vm15 = vmmov 0  }
  0x15   : > { %454 = vst.msk [vmem:[#allocation2 + $0x90] sm:$0xff] %vm434_vm0, %v5929_v0  ;;  %455 = vst.msk [vmem:[#allocation2 + $0x98] sm:$0xff] %vm434_vm0, %v5929_v0  ;;  %v495_v15 = vld [vmem:[%s6229_s13 + $0x28] sm:$0xff]  ;;  %v494_v16 = vld [vmem:[%s6229_s13 + $0x20] sm:$0xff] }
  0x16   : > { %456 = vst.msk [vmem:[#allocation2 + $0xa0] sm:$0x3] %vm437_vm1, %v5929_v0  ;;  %459 = vst.msk [vmem:[#allocation2 + $0xb8] sm:$0x3] %vm437_vm1, %v5929_v0  ;;  %v567_v17 = vld [vmem:[%s6213_s27 + $0x58] sm:$0xff]  ;;  %v566_v18 = vld [vmem:[%s6213_s27 + $0x50] sm:$0xff] }
  0x17   : > { %457 = vst.msk [vmem:[#allocation2 + $0xa8] sm:$0xff] %vm434_vm0, %v5929_v0  ;;  %458 = vst.msk [vmem:[#allocation2 + $0xb0] sm:$0xff] %vm434_vm0, %v5929_v0  ;;  %630 = vrot.lane.b32.xlu1 %v561_v5, %s5930_s28  ;;  %628 = vrot.lane.b32.xlu0 %v560_v6, %s5930_s28  ;;  %v569_v19 = vld [vmem:[%s6213_s27 + $0x68] sm:$0xff]  ;;  %v568_v20 = vld [vmem:[%s6213_s27 + $0x60] sm:$0xff] }
  0x18   : > { %460 = vst.msk [vmem:[#allocation2 + $0xc0] sm:$0xff] %vm434_vm0, %v5929_v0  ;;  %461 = vst.msk [vmem:[#allocation2 + $0xc8] sm:$0xff] %vm434_vm0, %v5929_v0  ;;  %v497_v21 = vld [vmem:[%s6229_s13 + $0x38] sm:$0xff]  ;;  %v496_v22 = vld [vmem:[%s6229_s13 + $0x30] sm:$0xff] }
  0x19   : > { %462 = vst.msk [vmem:[#allocation2 + $0xd0] sm:$0x3] %vm437_vm1, %v5929_v0  ;;  %465 = vst.msk [vmem:[#allocation2 + $0xe8] sm:$0x3] %vm437_vm1, %v5929_v0  ;;  %v571_v23 = vld [vmem:[%s6213_s27 + $0x78] sm:$0xff]  ;;  %v570_v24 = vld [vmem:[%s6213_s27 + $0x70] sm:$0xff] }
  0x1a   : > { %463 = vst.msk [vmem:[#allocation2 + $0xd8] sm:$0xff] %vm434_vm0, %v5929_v0  ;;  %464 = vst.msk [vmem:[#allocation2 + $0xe0] sm:$0xff] %vm434_vm0, %v5929_v0  ;;  %v573_v25 = vld [vmem:[%s6213_s27 + $0x88] sm:$0xff]  ;;  %v572_v26 = vld [vmem:[%s6213_s27 + $0x80] sm:$0xff] }
  0x1b   : > { %466 = vst.msk [vmem:[#allocation2 + $0xf0] sm:$0xff] %vm434_vm0, %v5929_v0  ;;  %467 = vst.msk [vmem:[#allocation2 + $0xf8] sm:$0xff] %vm434_vm0, %v5929_v0  ;;  %634 = vrot.lane.b32.xlu1 %v563_v7, %s5930_s28  ;;  %632 = vrot.lane.b32.xlu0 %v562_v8, %s5930_s28  ;;  %v813_v27 = vld [vmem:[#allocation2 + $0x2] sm:$0xff]  ;;  %v814_v28 = vld [vmem:[#allocation2 + $0xa] sm:$0xff] }
  0x1c   : > { %468 = vst.msk [vmem:[#allocation2 + $0x100] sm:$0x3] %vm437_vm1, %v5929_v0  ;;  %471 = vst.msk [vmem:[#allocation2 + $0x118] sm:$0x3] %vm437_vm1, %v5929_v0  ;;  %v781_v29 = vld [vmem:[#allocation2 + $0x1] sm:$0xff]  ;;  %v782_v30 = vld [vmem:[#allocation2 + $0x9] sm:$0xff]  ;;  %v5360_v31 = vpack.i.bf16 %v814_v28, %v813_v27 }
  0x1d   : > { %469 = vst.msk [vmem:[#allocation2 + $0x108] sm:$0xff] %vm434_vm0, %v5929_v0  ;;  %470 = vst.msk [vmem:[#allocation2 + $0x110] sm:$0xff] %vm434_vm0, %v5929_v0  ;;  %v5355_v32 = vpack.i.bf16 %v782_v30, %v781_v29  ;;  %v499_v33 = vld [vmem:[%s6229_s13 + $0x48] sm:$0xff]  ;;  %v498_v34 = vld [vmem:[%s6229_s13 + $0x40] sm:$0xff] }
  0x1e   : > { %472 = vst.msk [vmem:[#allocation2 + $0x120] sm:$0xff] %vm434_vm0, %v5929_v0  ;;  %473 = vst.msk [vmem:[#allocation2 + $0x128] sm:$0xff] %vm434_vm0, %v5929_v0  ;;  %v574_v35 = vld [vmem:[%s6213_s27 + $0x90] sm:$0xff]  ;;  %v575_v36 = vld [vmem:[%s6213_s27 + $0x98] sm:$0xff] }
  0x1f   : > { %474 = vst.msk [vmem:[#allocation2 + $0x130] sm:$0x3] %vm437_vm1, %v5929_v0  ;;  %477 = vst.msk [vmem:[#allocation2 + $0x148] sm:$0x3] %vm437_vm1, %v5929_v0  ;;  %638 = vrot.lane.b32.xlu1 %v565_v12, %s5930_s28  ;;  %636 = vrot.lane.b32.xlu0 %v564_v14, %s5930_s28  ;;  %v577_v37 = vld [vmem:[%s6213_s27 + $0xa8] sm:$0xff]  ;;  %v576_v38 = vld [vmem:[%s6213_s27 + $0xa0] sm:$0xff] }
  0x20   : > { %475 = vst.msk [vmem:[#allocation2 + $0x138] sm:$0xff] %vm434_vm0, %v5929_v0  ;;  %476 = vst.msk [vmem:[#allocation2 + $0x140] sm:$0xff] %vm434_vm0, %v5929_v0  ;;  %v578_v39 = vld [vmem:[%s6213_s27 + $0xb0] sm:$0xff]  ;;  %v579_v40 = vld [vmem:[%s6213_s27 + $0xb8] sm:$0xff] }
  0x21   : > { %478 = vst.msk [vmem:[#allocation2 + $0x150] sm:$0xff] %vm434_vm0, %v5929_v0  ;;  %479 = vst.msk [vmem:[#allocation2 + $0x158] sm:$0xff] %vm434_vm0, %v5929_v0  ;;  %v580_v41 = vld [vmem:[%s6213_s27 + $0xc0] sm:$0xff]  ;;  %v581_v42 = vld [vmem:[%s6213_s27 + $0xc8] sm:$0xff] }
  0x22   : > { %480 = vst.msk [vmem:[#allocation2 + $0x160] sm:$0x3] %vm437_vm1, %v5929_v0  ;;  %483 = vst.msk [vmem:[#allocation2 + $0x178] sm:$0x3] %vm437_vm1, %v5929_v0  ;;  %v501_v43 = vld [vmem:[%s6229_s13 + $0x58] sm:$0xff]  ;;  %v500_v44 = vld [vmem:[%s6229_s13 + $0x50] sm:$0xff] }
  0x23   : > { %481 = vst.msk [vmem:[#allocation2 + $0x168] sm:$0xff] %vm434_vm0, %v5929_v0  ;;  %482 = vst.msk [vmem:[#allocation2 + $0x170] sm:$0xff] %vm434_vm0, %v5929_v0  ;;  %642 = vrot.lane.b32.xlu1 %v567_v17, %s5930_s28  ;;  %640 = vrot.lane.b32.xlu0 %v566_v18, %s5930_s28  ;;  %v582_v45 = vld [vmem:[%s6213_s27 + $0xd0] sm:$0xff]  ;;  %v583_v46 = vld [vmem:[%s6213_s27 + $0xd8] sm:$0xff] }
  0x24   : > { %484 = vst.msk [vmem:[#allocation2 + $0x180] sm:$0xff] %vm434_vm0, %v5929_v0  ;;  %485 = vst.msk [vmem:[#allocation2 + $0x188] sm:$0xff] %vm434_vm0, %v5929_v0  ;;  %v584_v47 = vld [vmem:[%s6213_s27 + $0xe0] sm:$0xff]  ;;  %v586_v48 = vld [vmem:[%s6213_s27 + $0xf0] sm:$0xff] }
  0x25   : > { %486 = vst.msk [vmem:[#allocation2 + $0x190] sm:$0x3] %vm437_vm1, %v5929_v0  ;;  %489 = vst.msk [vmem:[#allocation2 + $0x1a8] sm:$0x3] %vm437_vm1, %v5929_v0  ;;  %v585_v49 = vld [vmem:[%s6213_s27 + $0xe8] sm:$0xff]  ;;  %v502_v51 = vld [vmem:[%s6229_s13 + $0x60] sm:$0xff] }
  0x26   : > { %487 = vst.msk [vmem:[#allocation2 + $0x198] sm:$0xff] %vm434_vm0, %v5929_v0  ;;  %488 = vst.msk [vmem:[#allocation2 + $0x1a0] sm:$0xff] %vm434_vm0, %v5929_v0  ;;  %v503_v50 = vld [vmem:[%s6229_s13 + $0x68] sm:$0xff]  ;;  %v505_v52 = vld [vmem:[%s6229_s13 + $0x78] sm:$0xff] }
  0x27   : > { %2613 = vst.msk [vmem:[#allocation3] sm:$0xff] %vm523_vm2, %v5929_v0  ;;  %2614 = vst.msk [vmem:[#allocation3 + $0x8] sm:$0xff] %vm523_vm2, %v5929_v0  ;;  %646 = vrot.lane.b32.xlu1 %v569_v19, %s5930_s28  ;;  %644 = vrot.lane.b32.xlu0 %v568_v20, %s5930_s28  ;;  %v504_v53 = vld [vmem:[%s6229_s13 + $0x70] sm:$0xff]  ;;  %v507_v54 = vld [vmem:[%s6229_s13 + $0x88] sm:$0xff] }
  0x28   : > { %2617 = vst.msk [vmem:[#allocation3 + $0x18] sm:$0xff] %vm523_vm2, %v5929_v0  ;;  %2618 = vst.msk [vmem:[#allocation3 + $0x20] sm:$0xff] %vm523_vm2, %v5929_v0  ;;  %v506_v55 = vld [vmem:[%s6229_s13 + $0x80] sm:$0xff]  ;;  %v508_v56 = vld [vmem:[%s6229_s13 + $0x90] sm:$0xff] }
  0x29   : > { %2620 = vst.msk [vmem:[#allocation3 + $0x30] sm:$0xff] %vm523_vm2, %v5929_v0  ;;  %2621 = vst.msk [vmem:[#allocation3 + $0x38] sm:$0xff] %vm523_vm2, %v5929_v0  ;;  %v509_v57 = vld [vmem:[%s6229_s13 + $0x98] sm:$0xff]  ;;  %v511_v58 = vld [vmem:[%s6229_s13 + $0xa8] sm:$0xff] }
  0x2a   : > { %2623 = vst.msk [vmem:[#allocation3 + $0x48] sm:$0xff] %vm523_vm2, %v5929_v0  ;;  %2624 = vst.msk [vmem:[#allocation3 + $0x50] sm:$0xff] %vm523_vm2, %v5929_v0  ;;  %v510_v59 = vld [vmem:[%s6229_s13 + $0xa0] sm:$0xff]  ;;  %v512_v60 = vld [vmem:[%s6229_s13 + $0xb0] sm:$0xff] }
  0x2b   : > { %2626 = vst.msk [vmem:[#allocation3 + $0x60] sm:$0xff] %vm523_vm2, %v5929_v0  ;;  %2627 = vst.msk [vmem:[#allocation3 + $0x68] sm:$0xff] %vm523_vm2, %v5929_v0  ;;  %650 = vrot.lane.b32.xlu1 %v571_v23, %s5930_s28  ;;  %648 = vrot.lane.b32.xlu0 %v570_v24, %s5930_s28  ;;  %v513_v61 = vld [vmem:[%s6229_s13 + $0xb8] sm:$0xff]  ;;  %v514_v1 = vld [vmem:[%s6229_s13 + $0xc0] sm:$0xff] }
  0x2c   : > { %2629 = vst.msk [vmem:[#allocation3 + $0x78] sm:$0xff] %vm523_vm2, %v5929_v0  ;;  %2630 = vst.msk [vmem:[#allocation3 + $0x80] sm:$0xff] %vm523_vm2, %v5929_v0  ;;  %v515_v2 = vld [vmem:[%s6229_s13 + $0xc8] sm:$0xff]  ;;  %v2176_v4 = vld [vmem:[%s8609_s2 + $0x60] sm:$0xff] }
  0x2d   : > { %2632 = vst.msk [vmem:[#allocation3 + $0x90] sm:$0xff] %vm523_vm2, %v5929_v0  ;;  %2633 = vst.msk [vmem:[#allocation3 + $0x98] sm:$0xff] %vm523_vm2, %v5929_v0  ;;  %v2177_v3 = vld [vmem:[%s8609_s2 + $0x68] sm:$0xff]  ;;  %v516_v5 = vld [vmem:[%s6229_s13 + $0xd0] sm:$0xff] }
  0x2e   : > { %2635 = vst.msk [vmem:[#allocation3 + $0xa8] sm:$0xff] %vm523_vm2, %v5929_v0  ;;  %2636 = vst.msk [vmem:[#allocation3 + $0xb0] sm:$0xff] %vm523_vm2, %v5929_v0  ;;  %2283 = vmatpush1.msra.mxu0 %v2177_v3  ;;  %5318 = vmatpush1.msra.mxu1 %v2177_v3  ;;  %v517_v6 = vld [vmem:[%s6229_s13 + $0xd8] sm:$0xff]  ;;  %v2174_v8 = vld [vmem:[%s8609_s2 + $0x50] sm:$0xff] }
  0x2f   : > { %2638 = vst.msk [vmem:[#allocation3 + $0xc0] sm:$0xff] %vm523_vm2, %v5929_v0  ;;  %2639 = vst.msk [vmem:[#allocation3 + $0xc8] sm:$0xff] %vm523_vm2, %v5929_v0  ;;  %654 = vrot.lane.b32.xlu1 %v573_v25, %s5930_s28  ;;  %652 = vrot.lane.b32.xlu0 %v572_v26, %s5930_s28  ;;  %v2175_v7 = vld [vmem:[%s8609_s2 + $0x58] sm:$0xff]  ;;  %v519_v12 = vld [vmem:[%s6229_s13 + $0xe8] sm:$0xff] }
  0x30   : > { %2641 = vst.msk [vmem:[#allocation3 + $0xd8] sm:$0xff] %vm523_vm2, %v5929_v0  ;;  %2642 = vst.msk [vmem:[#allocation3 + $0xe0] sm:$0xff] %vm523_vm2, %v5929_v0  ;;  %2284 = vmatprep.subr.mxu0 %v5929_v0  ;;  %5301 = vmatprep.subr.mxu1 %v5929_v0  ;;  %v2170_v14 = vld [vmem:[%s8609_s2 + $0x30] sm:$0xff]  ;;  %v2168_v17 = vld [vmem:[%s8609_s2 + $0x20] sm:$0xff] }
  0x31   : > { %2644 = vst.msk [vmem:[#allocation3 + $0xf0] sm:$0xff] %vm523_vm2, %v5929_v0  ;;  %2645 = vst.msk [vmem:[#allocation3 + $0xf8] sm:$0xff] %vm523_vm2, %v5929_v0  ;;  %2285 = vmatpush1.msra.mxu0 %v2176_v4  ;;  %5319 = vmatpush1.msra.mxu1 %v2176_v4  ;;  %v2167_v20 = vld [vmem:[%s8609_s2 + $0x18] sm:$0xff]  ;;  %v2166_v23 = vld [vmem:[%s8609_s2 + $0x10] sm:$0xff] }
  0x32   : > { %2647 = vst.msk [vmem:[#allocation3 + $0x108] sm:$0xff] %vm523_vm2, %v5929_v0  ;;  %2648 = vst.msk [vmem:[#allocation3 + $0x110] sm:$0xff] %vm523_vm2, %v5929_v0  ;;  %2286 = vmatprep.subr.mxu0 %v5929_v0  ;;  %5302 = vmatprep.subr.mxu1 %v5929_v0  ;;  %v2165_v24 = vld [vmem:[%s8609_s2 + $0x8] sm:$0xff]  ;;  %v2164_v27 = vld [vmem:[%s8609_s2] sm:$0xff] }
  0x33   : > { %2650 = vst.msk [vmem:[#allocation3 + $0x120] sm:$0xff] %vm523_vm2, %v5929_v0  ;;  %2651 = vst.msk [vmem:[#allocation3 + $0x128] sm:$0xff] %vm523_vm2, %v5929_v0  ;;  %5361 = vrot.lane.b32.xlu1 %v5360_v31, %s5931_s14  ;;  %5356 = vrot.lane.b32.xlu0 %v5355_v32, %s5932_s15  ;;  %v2181_v30 = vld [vmem:[%s8609_s2 + $0x88] sm:$0xff] }
  0x34   : > { %2653 = vst.msk [vmem:[#allocation3 + $0x138] sm:$0xff] %vm523_vm2, %v5929_v0  ;;  %2654 = vst.msk [vmem:[#allocation3 + $0x140] sm:$0xff] %vm523_vm2, %v5929_v0  ;;  %2287 = vmatpush1.msra.mxu0 %v2175_v7  ;;  %5320 = vmatpush1.msra.mxu1 %v2175_v7 }
  0x35   : > { %2656 = vst.msk [vmem:[#allocation3 + $0x150] sm:$0xff] %vm523_vm2, %v5929_v0  ;;  %2657 = vst.msk [vmem:[#allocation3 + $0x158] sm:$0xff] %vm523_vm2, %v5929_v0  ;;  %2288 = vmatprep.subr.mxu0 %v5929_v0  ;;  %5303 = vmatprep.subr.mxu1 %v5929_v0 }
  0x36   : > { %2659 = vst.msk [vmem:[#allocation3 + $0x168] sm:$0xff] %vm523_vm2, %v5929_v0  ;;  %2660 = vst.msk [vmem:[#allocation3 + $0x170] sm:$0xff] %vm523_vm2, %v5929_v0  ;;  %2289 = vmatpush1.msra.mxu0 %v2174_v8  ;;  %5321 = vmatpush1.msra.mxu1 %v2174_v8 }
  0x37   : > { %2662 = vst.msk [vmem:[#allocation3 + $0x180] sm:$0xff] %vm523_vm2, %v5929_v0  ;;  %2663 = vst.msk [vmem:[#allocation3 + $0x188] sm:$0xff] %vm523_vm2, %v5929_v0  ;;  %656 = vrot.lane.b32.xlu1 %v574_v35, %s5930_s28  ;;  %658 = vrot.lane.b32.xlu0 %v575_v36, %s5930_s28 }
  0x38   : > { %2665 = vst.msk [vmem:[#allocation3 + $0x198] sm:$0xff] %vm523_vm2, %v5929_v0  ;;  %2666 = vst.msk [vmem:[#allocation3 + $0x1a0] sm:$0xff] %vm523_vm2, %v5929_v0  ;;  %2290 = vmatprep.subr.mxu0 %v5929_v0  ;;  %5304 = vmatprep.subr.mxu1 %v5929_v0 }
  0x39   : > { %524 = vst.msk [vmem:[#allocation2 + $0x19] sm:$0xff] %vm523_vm2, %v490_v9  ;;  %526 = vst.msk [vmem:[#allocation2 + $0x31] sm:$0xff] %vm523_vm2, %v492_v10  ;;  %v518_v9 = vld [vmem:[%s6229_s13 + $0xe0] sm:$0xff]  ;;  %v2173_v10 = vld [vmem:[%s8609_s2 + $0x48] sm:$0xff] }
  0x3a   : > { %525 = vst.msk [vmem:[#allocation2 + $0x21] sm:$0xff] %vm523_vm2, %v491_v11  ;;  %527 = vst.msk [vmem:[#allocation2 + $0x39] sm:$0xff] %vm523_vm2, %v493_v13  ;;  %2291 = vmatpush1.msra.mxu0 %v2173_v10  ;;  %5322 = vmatpush1.msra.mxu1 %v2173_v10  ;;  %v2172_v11 = vld [vmem:[%s8609_s2 + $0x40] sm:$0xff]  ;;  %v2171_v13 = vld [vmem:[%s8609_s2 + $0x38] sm:$0xff] }
  0x3b   : > { %529 = vst.msk [vmem:[#allocation2 + $0x51] sm:$0xff] %vm523_vm2, %v495_v15  ;;  %528 = vst.msk [vmem:[#allocation2 + $0x49] sm:$0xff] %vm523_vm2, %v494_v16  ;;  %662 = vrot.lane.b32.xlu1 %v577_v37, %s5930_s28  ;;  %660 = vrot.lane.b32.xlu0 %v576_v38, %s5930_s28  ;;  %v520_v15 = vld [vmem:[%s6229_s13 + $0xf0] sm:$0xff]  ;;  %v2169_v16 = vld [vmem:[%s8609_s2 + $0x28] sm:$0xff] }
  0x3c   : > { %531 = vst.msk [vmem:[#allocation2 + $0x69] sm:$0xff] %vm523_vm2, %v497_v21  ;;  %530 = vst.msk [vmem:[#allocation2 + $0x61] sm:$0xff] %vm523_vm2, %v496_v22  ;;  %2292 = vmatprep.subr.mxu0 %v5929_v0  ;;  %5305 = vmatprep.subr.mxu1 %v5929_v0 }
  0x3d   : > { %533 = vst.msk [vmem:[#allocation2 + $0x81] sm:$0xff] %vm523_vm2, %v499_v33  ;;  %532 = vst.msk [vmem:[#allocation2 + $0x79] sm:$0xff] %vm523_vm2, %v498_v34  ;;  %2293 = vmatpush1.msra.mxu0 %v2172_v11  ;;  %5323 = vmatpush1.msra.mxu1 %v2172_v11 }
  0x3e   : > { %535 = vst.msk [vmem:[#allocation2 + $0x99] sm:$0xff] %vm523_vm2, %v501_v43  ;;  %534 = vst.msk [vmem:[#allocation2 + $0x91] sm:$0xff] %vm523_vm2, %v500_v44  ;;  %2294 = vmatprep.subr.mxu0 %v5929_v0  ;;  %5306 = vmatprep.subr.mxu1 %v5929_v0 }
  0x3f   : > { %664 = vrot.lane.b32.xlu1 %v578_v39, %s5930_s28  ;;  %666 = vrot.lane.b32.xlu0 %v579_v40, %s5930_s28  ;;  %537 = vst.msk [vmem:[#allocation2 + $0xb1] sm:$0xff] %vm523_vm2, %v503_v50  ;;  %536 = vst.msk [vmem:[#allocation2 + $0xa9] sm:$0xff] %vm523_vm2, %v502_v51 }
  0x40   : > { %539 = vst.msk [vmem:[#allocation2 + $0xc9] sm:$0xff] %vm523_vm2, %v505_v52  ;;  %538 = vst.msk [vmem:[#allocation2 + $0xc1] sm:$0xff] %vm523_vm2, %v504_v53  ;;  %2295 = vmatpush1.msra.mxu0 %v2171_v13  ;;  %5324 = vmatpush1.msra.mxu1 %v2171_v13 }
  0x41   : > { %541 = vst.msk [vmem:[#allocation2 + $0xe1] sm:$0xff] %vm523_vm2, %v507_v54  ;;  %540 = vst.msk [vmem:[#allocation2 + $0xd9] sm:$0xff] %vm523_vm2, %v506_v55  ;;  %2296 = vmatprep.subr.mxu0 %v5929_v0  ;;  %5307 = vmatprep.subr.mxu1 %v5929_v0 }
  0x42   : > { %542 = vst.msk [vmem:[#allocation2 + $0xf1] sm:$0xff] %vm523_vm2, %v508_v56  ;;  %543 = vst.msk [vmem:[#allocation2 + $0xf9] sm:$0xff] %vm523_vm2, %v509_v57  ;;  %2297 = vmatpush1.msra.mxu0 %v2170_v14  ;;  %5325 = vmatpush1.msra.mxu1 %v2170_v14 }
  0x43   : > { %668 = vrot.lane.b32.xlu1 %v580_v41, %s5930_s28  ;;  %670 = vrot.lane.b32.xlu0 %v581_v42, %s5930_s28  ;;  %545 = vst.msk [vmem:[#allocation2 + $0x111] sm:$0xff] %vm523_vm2, %v511_v58  ;;  %544 = vst.msk [vmem:[#allocation2 + $0x109] sm:$0xff] %vm523_vm2, %v510_v59  ;;  %v2180_v41 = vld [vmem:[%s8609_s2 + $0x80] sm:$0xff] }
  0x44   : > { %546 = vst.msk [vmem:[#allocation2 + $0x121] sm:$0xff] %vm523_vm2, %v512_v60  ;;  %547 = vst.msk [vmem:[#allocation2 + $0x129] sm:$0xff] %vm523_vm2, %v513_v61  ;;  %2298 = vmatprep.subr.mxu0 %v5929_v0  ;;  %5308 = vmatprep.subr.mxu1 %v5929_v0 }
  0x45   : > { %548 = vst.msk [vmem:[#allocation2 + $0x139] sm:$0xff] %vm523_vm2, %v514_v1  ;;  %549 = vst.msk [vmem:[#allocation2 + $0x141] sm:$0xff] %vm523_vm2, %v515_v2  ;;  %2299 = vmatpush1.msra.mxu0 %v2169_v16  ;;  %5326 = vmatpush1.msra.mxu1 %v2169_v16 }
  0x46   : > { %550 = vst.msk [vmem:[#allocation2 + $0x151] sm:$0xff] %vm523_vm2, %v516_v5  ;;  %551 = vst.msk [vmem:[#allocation2 + $0x159] sm:$0xff] %vm523_vm2, %v517_v6  ;;  %2300 = vmatprep.subr.mxu0 %v5929_v0  ;;  %5309 = vmatprep.subr.mxu1 %v5929_v0 }
  0x47   : > { %672 = vrot.lane.b32.xlu1 %v582_v45, %s5930_s28  ;;  %674 = vrot.lane.b32.xlu0 %v583_v46, %s5930_s28  ;;  %552 = vst.msk [vmem:[#allocation2 + $0x169] sm:$0xff] %vm523_vm2, %v518_v9  ;;  %553 = vst.msk [vmem:[#allocation2 + $0x171] sm:$0xff] %vm523_vm2, %v519_v12 }
  0x48   : > { %554 = vst.msk [vmem:[#allocation2 + $0x181] sm:$0xff] %vm523_vm2, %v520_v15  ;;  %2301 = vmatpush1.msra.mxu0 %v2168_v17  ;;  %5327 = vmatpush1.msra.mxu1 %v2168_v17 }
  0x49   : > { %2302 = vmatprep.subr.mxu0 %v5929_v0  ;;  %5310 = vmatprep.subr.mxu1 %v5929_v0  ;;  %2619 = vst.msk [vmem:[#allocation3 + $0x28] sm:$0x3] %vm2615_vm10, %v5929_v0  ;;  %2616 = vst.msk [vmem:[#allocation3 + $0x10] sm:$0x3] %vm2615_vm10, %v5929_v0 }
  0x4a   : > { %2303 = vmatpush1.msra.mxu0 %v2167_v20  ;;  %5328 = vmatpush1.msra.mxu1 %v2167_v20  ;;  %2622 = vst.msk [vmem:[#allocation3 + $0x40] sm:$0x3] %vm2615_vm10, %v5929_v0  ;;  %2625 = vst.msk [vmem:[#allocation3 + $0x58] sm:$0x3] %vm2615_vm10, %v5929_v0 }
  0x4b   : > { %676 = vrot.lane.b32.xlu1 %v584_v47, %s5930_s28  ;;  %680 = vrot.lane.b32.xlu0 %v586_v48, %s5930_s28  ;;  %2628 = vst.msk [vmem:[#allocation3 + $0x70] sm:$0x3] %vm2615_vm10, %v5929_v0  ;;  %2631 = vst.msk [vmem:[#allocation3 + $0x88] sm:$0x3] %vm2615_vm10, %v5929_v0 }
  0x4c   : > { %2304 = vmatprep.subr.mxu0 %v5929_v0  ;;  %5311 = vmatprep.subr.mxu1 %v5929_v0  ;;  %2634 = vst.msk [vmem:[#allocation3 + $0xa0] sm:$0x3] %vm2615_vm10, %v5929_v0  ;;  %2637 = vst.msk [vmem:[#allocation3 + $0xb8] sm:$0x3] %vm2615_vm10, %v5929_v0 }
  0x4d   : > { %2305 = vmatpush1.msra.mxu0 %v2166_v23  ;;  %5329 = vmatpush1.msra.mxu1 %v2166_v23  ;;  %2640 = vst.msk [vmem:[#allocation3 + $0xd0] sm:$0x3] %vm2615_vm10, %v5929_v0  ;;  %2643 = vst.msk [vmem:[#allocation3 + $0xe8] sm:$0x3] %vm2615_vm10, %v5929_v0 }
  0x4e   : > { %2306 = vmatprep.subr.mxu0 %v5929_v0  ;;  %5312 = vmatprep.subr.mxu1 %v5929_v0  ;;  %2646 = vst.msk [vmem:[#allocation3 + $0x100] sm:$0x3] %vm2615_vm10, %v5929_v0  ;;  %2649 = vst.msk [vmem:[#allocation3 + $0x118] sm:$0x3] %vm2615_vm10, %v5929_v0 }
  0x4f   : > { %678 = vrot.lane.b32.xlu1 %v585_v49, %s5930_s28  ;;  %2307 = vmatpush1.msra.mxu0 %v2165_v24  ;;  %2652 = vst.msk [vmem:[#allocation3 + $0x130] sm:$0x3] %vm2615_vm10, %v5929_v0  ;;  %2655 = vst.msk [vmem:[#allocation3 + $0x148] sm:$0x3] %vm2615_vm10, %v5929_v0 }
  0x50   : > { %5330 = vmatpush1.msra.mxu1 %v2165_v24  ;;  %2308 = vmatprep.subr.mxu0 %v5929_v0  ;;  %2658 = vst.msk [vmem:[#allocation3 + $0x160] sm:$0x3] %vm2615_vm10, %v5929_v0  ;;  %2661 = vst.msk [vmem:[#allocation3 + $0x178] sm:$0x3] %vm2615_vm10, %v5929_v0 }
  0x51   : > { %5313 = vmatprep.subr.mxu1 %v5929_v0  ;;  %2309 = vmatpush1.msra.mxu0 %v2164_v27  ;;  %2664 = vst.msk [vmem:[#allocation3 + $0x190] sm:$0x3] %vm2615_vm10, %v5929_v0  ;;  %2667 = vst.msk [vmem:[#allocation3 + $0x1a8] sm:$0x3] %vm2615_vm10, %v5929_v0 }
  0x52   : > { %5331 = vmatpush1.msra.mxu1 %v2164_v27  ;;  %2338 = vmatprep.subr.mxu0 %v5929_v0 }
  0x53   : > { %5314 = vmatprep.subr.mxu1 %v5929_v0  ;;  %2339 = vmatpush2.msra.mxu0 %v2181_v30 }
  0x54   : > { %5332 = vmatpush2.msra.mxu1 %v2181_v30  ;;  %2340 = vmatprep.subr.mxu0 %v5929_v0 }
  0x55   : > { %5315 = vmatprep.subr.mxu1 %v5929_v0  ;;  %2341 = vmatpush2.msra.mxu0 %v2180_v41 }
  0x56   : > { %5333 = vmatpush2.msra.mxu1 %v2180_v41 }
  0x81   : > { %v621_v18 = vpop.permute.xlu0 %620  ;;  %v625_v19 = vpop.permute.xlu1 %624 }
  0x82   : > { %717 = vst.msk [vmem:[#allocation2 + $0x19] sm:$0xff] %vm716_vm3, %v621_v18  ;;  %719 = vst.msk [vmem:[#allocation2 + $0x31] sm:$0xff] %vm716_vm3, %v625_v19 }
  0x85   : > { %v623_v21 = vpop.permute.xlu0 %622  ;;  %v627_v22 = vpop.permute.xlu1 %626 }
  0x86   : > { %718 = vst.msk [vmem:[#allocation2 + $0x21] sm:$0xff] %vm716_vm3, %v623_v21  ;;  %720 = vst.msk [vmem:[#allocation2 + $0x39] sm:$0xff] %vm716_vm3, %v627_v22 }
  0x89   : > { %v631_v25 = vpop.permute.xlu1 %630  ;;  %v629_v26 = vpop.permute.xlu0 %628  ;;  %v6431_v28 = vld [vmem:[#allocation2 + $0x18] sm:$0xff]  ;;  %v6454_v47 = vld [vmem:[#allocation2 + $0x30] sm:$0xff] }
  0x8a   : > { %722 = vst.msk [vmem:[#allocation2 + $0x51] sm:$0xff] %vm716_vm3, %v631_v25  ;;  %721 = vst.msk [vmem:[#allocation2 + $0x49] sm:$0xff] %vm716_vm3, %v629_v26  ;;  %v974_v29 = vld [vmem:[#allocation2 + $0x31] sm:$0xff]  ;;  %v877_v43 = vld [vmem:[#allocation2 + $0x19] sm:$0xff] }
  0x8d   : > { %v909_v31 = vld [vmem:[#allocation2 + $0x1a] sm:$0xff]  ;;  %v910_v32 = vld [vmem:[#allocation2 + $0x22] sm:$0xff]  ;;  %v635_v34 = vpop.permute.xlu1 %634  ;;  %v633_v35 = vpop.permute.xlu0 %632  ;;  %v1006_v38 = vld [vmem:[#allocation2 + $0x32] sm:$0xff] }
  0x8e   : > { %v6438_v33 = vld [vmem:[#allocation2 + $0x20] sm:$0xff]  ;;  %v5375_v36 = vpack.i.bf16 %v910_v32, %v909_v31  ;;  %724 = vst.msk [vmem:[#allocation2 + $0x69] sm:$0xff] %vm716_vm3, %v635_v34  ;;  %723 = vst.msk [vmem:[#allocation2 + $0x61] sm:$0xff] %vm716_vm3, %v633_v35  ;;  %5100 = vmatprep.mubr.msk.f32.mxu0 %vm434_vm0, %v1006_v38  ;;  %v6456_v48 = vld [vmem:[#allocation2 + $0x38] sm:$0xff] }
  0x8f   : > { %v5365_v37 = vpack.i.bf16 %v6438_v33, %v6431_v28  ;;  %v975_v39 = vld [vmem:[#allocation2 + $0x39] sm:$0xff]  ;;  %v878_v40 = vld [vmem:[#allocation2 + $0x21] sm:$0xff]  ;;  %v5380_v51 = vpack.i.bf16 %v6456_v48, %v6454_v47 }
  0x90   : > { %5376 = vrot.lane.b32.xlu1 %v5375_v36, %s5933_s19  ;;  %v5385_v42 = vpack.i.bf16 %v975_v39, %v974_v29  ;;  %v5370_v46 = vpack.i.bf16 %v878_v40, %v877_v43  ;;  %v6468_v54 = vld [vmem:[#allocation2 + $0x3a] sm:$0xff] }
  0x91   : > { %5366 = vrot.lane.b32.xlu0 %v5365_v37, %s5934_s20  ;;  %v639_v44 = vpop.permute.xlu1 %638  ;;  %v637_v45 = vpop.permute.xlu0 %636  ;;  %v976_v55 = vld [vmem:[#allocation2 + $0x49] sm:$0xff]  ;;  %v977_v56 = vld [vmem:[#allocation2 + $0x51] sm:$0xff]  ;;  %v5410_v61 = vpack.i.bf16 %v6468_v54, %v1006_v38 }
  0x92   : > { %726 = vst.msk [vmem:[#allocation2 + $0x81] sm:$0xff] %vm716_vm3, %v639_v44  ;;  %725 = vst.msk [vmem:[#allocation2 + $0x79] sm:$0xff] %vm716_vm3, %v637_v45  ;;  %v944_v57 = vld [vmem:[#allocation2 + $0x48] sm:$0xff]  ;;  %v945_v58 = vld [vmem:[#allocation2 + $0x50] sm:$0xff]  ;;  %v5420_v62 = vpack.i.bf16 %v977_v56, %v976_v55 }
  0x93   : > { %v5415_v63 = vpack.i.bf16 %v945_v58, %v944_v57  ;;  %v6489_v9 = vld [vmem:[#allocation2 + $0x4a] sm:$0xff]  ;;  %v6491_v10 = vld [vmem:[#allocation2 + $0x52] sm:$0xff] }
  0x94   : > { %5386 = vrot.lane.b32.xlu1 %v5385_v42, %s5935_s22  ;;  %v5445_v16 = vpack.i.bf16 %v6491_v10, %v6489_v9  ;;  %v521_v44 = vld [vmem:[%s6229_s13 + $0xf8] sm:$0xff] }
  0x95   : > { %5371 = vrot.lane.b32.xlu0 %v5370_v46, %s5936_s23  ;;  %v643_v49 = vpop.permute.xlu1 %642  ;;  %v641_v50 = vpop.permute.xlu0 %640  ;;  %v946_v5 = vld [vmem:[#allocation2 + $0x60] sm:$0xff]  ;;  %v947_v6 = vld [vmem:[#allocation2 + $0x68] sm:$0xff]  ;;  %555 = vst.msk [vmem:[#allocation2 + $0x189] sm:$0xff] %vm523_vm2, %v521_v44 }
  0x96   : > { %728 = vst.msk [vmem:[#allocation2 + $0x99] sm:$0xff] %vm716_vm3, %v643_v49  ;;  %727 = vst.msk [vmem:[#allocation2 + $0x91] sm:$0xff] %vm716_vm3, %v641_v50  ;;  %v5450_v11 = vpack.i.bf16 %v947_v6, %v946_v5  ;;  %v978_v12 = vld [vmem:[#allocation2 + $0x61] sm:$0xff]  ;;  %v979_v13 = vld [vmem:[#allocation2 + $0x69] sm:$0xff] }
  0x97   : > { %v5455_v17 = vpack.i.bf16 %v979_v13, %v978_v12  ;;  %v6509_v25 = vld [vmem:[#allocation2 + $0x62] sm:$0xff]  ;;  %v6511_v26 = vld [vmem:[#allocation2 + $0x6a] sm:$0xff] }
  0x98   : > { %5391 = vrot.lane.b32.xlu1 %v5370_v46, %s5932_s15  ;;  %v5480_v30 = vpack.i.bf16 %v6511_v26, %v6509_v25 }
  0x99   : > { %5381 = vrot.lane.b32.xlu0 %v5380_v51, %s5937_s25  ;;  %v647_v52 = vpop.permute.xlu1 %646  ;;  %v645_v53 = vpop.permute.xlu0 %644  ;;  %v948_v20 = vld [vmem:[#allocation2 + $0x78] sm:$0xff]  ;;  %v949_v21 = vld [vmem:[#allocation2 + $0x80] sm:$0xff] }
  0x9a   : > { %730 = vst.msk [vmem:[#allocation2 + $0xb1] sm:$0xff] %vm716_vm3, %v647_v52  ;;  %729 = vst.msk [vmem:[#allocation2 + $0xa9] sm:$0xff] %vm716_vm3, %v645_v53  ;;  %v5485_v24 = vpack.i.bf16 %v949_v21, %v948_v20  ;;  %v980_v31 = vld [vmem:[#allocation2 + $0x79] sm:$0xff]  ;;  %v981_v32 = vld [vmem:[#allocation2 + $0x81] sm:$0xff] }
  0x9b   : > { %v6523_v37 = vld [vmem:[#allocation2 + $0x7a] sm:$0xff]  ;;  %v918_v38 = vld [vmem:[#allocation2 + $0x82] sm:$0xff] }
  0x9c   : > { %5401 = vrot.lane.b32.xlu1 %v5380_v51, %s5934_s20  ;;  %v5515_v41 = vpack.i.bf16 %v918_v38, %v6523_v37  ;;  %v587_v51 = vld [vmem:[%s6213_s27 + $0xf8] sm:$0xff] }
  0x9d   : > { %5396 = vrot.lane.b32.xlu0 %v5375_v36, %s5931_s14  ;;  %v651_v59 = vpop.permute.xlu1 %650  ;;  %v649_v60 = vpop.permute.xlu0 %648  ;;  %v5490_v36 = vpack.i.bf16 %v981_v32, %v980_v31  ;;  %v983_v43 = vld [vmem:[#allocation2 + $0x99] sm:$0xff]  ;;  %v950_v46 = vld [vmem:[#allocation2 + $0x90] sm:$0xff] }
  0x9e   : > { %732 = vst.msk [vmem:[#allocation2 + $0xc9] sm:$0xff] %vm716_vm3, %v651_v59  ;;  %731 = vst.msk [vmem:[#allocation2 + $0xc1] sm:$0xff] %vm716_vm3, %v649_v60  ;;  %v951_v49 = vld [vmem:[#allocation2 + $0x98] sm:$0xff] }
  0x9f   : > { %v5520_v50 = vpack.i.bf16 %v951_v49, %v950_v46  ;;  %v919_v52 = vld [vmem:[#allocation2 + $0x92] sm:$0xff]  ;;  %v920_v53 = vld [vmem:[#allocation2 + $0x9a] sm:$0xff] }
  0xa0   : > { %5406 = vrot.lane.b32.xlu1 %v5385_v42, %s5936_s23  ;;  %v5550_v55 = vpack.i.bf16 %v920_v53, %v919_v52 }
  0xa1   : > { %5411 = vrot.lane.b32.xlu0 %v5410_v61, %s5933_s19  ;;  %v655_v1 = vpop.permute.xlu1 %654  ;;  %v653_v2 = vpop.permute.xlu0 %652  ;;  %v984_v56 = vld [vmem:[#allocation2 + $0xa9] sm:$0xff]  ;;  %v985_v57 = vld [vmem:[#allocation2 + $0xb1] sm:$0xff] }
  0xa2   : > { %734 = vst.msk [vmem:[#allocation2 + $0xe1] sm:$0xff] %vm716_vm3, %v655_v1  ;;  %733 = vst.msk [vmem:[#allocation2 + $0xd9] sm:$0xff] %vm716_vm3, %v653_v2  ;;  %v5560_v58 = vpack.i.bf16 %v985_v57, %v984_v56  ;;  %v952_v59 = vld [vmem:[#allocation2 + $0xa8] sm:$0xff]  ;;  %v953_v60 = vld [vmem:[#allocation2 + $0xb0] sm:$0xff] }
  0xa3   : > { %v6552_v2 = vld [vmem:[#allocation2 + $0xaa] sm:$0xff]  ;;  %v922_v5 = vld [vmem:[#allocation2 + $0xb2] sm:$0xff] }
  0xa4   : > { %5416 = vrot.lane.b32.xlu1 %v5415_v63, %s5937_s25  ;;  %v5585_v6 = vpack.i.bf16 %v922_v5, %v6552_v2 }
  0xa5   : > { %5421 = vrot.lane.b32.xlu0 %v5420_v62, %s5935_s22  ;;  %v6481_v3 = vpop.permute.xlu1 %5361  ;;  %v6483_v4 = vpop.permute.xlu0 %5356  ;;  %v923_v12 = vld [vmem:[#allocation2 + $0xc2] sm:$0xff]  ;;  %v924_v13 = vld [vmem:[#allocation2 + $0xca] sm:$0xff] }
  0xa6   : > { %v5363_v32 = vunpack.i.l.bf16 %v6481_v3 }
  0xa8   : > { %5431 = vrot.lane.b32.xlu1 %v5410_v61, %s5931_s14  ;;  %v5555_v61 = vpack.i.bf16 %v953_v60, %v952_v59 }
  0xa9   : > { %5426 = vrot.lane.b32.xlu0 %v5385_v42, %s5932_s15  ;;  %v657_v7 = vpop.permute.xlu1 %656  ;;  %v659_v8 = vpop.permute.xlu0 %658  ;;  %v982_v42 = vld [vmem:[#allocation2 + $0x91] sm:$0xff] }
  0xaa   : > { %735 = vst.msk [vmem:[#allocation2 + $0xf1] sm:$0xff] %vm716_vm3, %v657_v7  ;;  %736 = vst.msk [vmem:[#allocation2 + $0xf9] sm:$0xff] %vm716_vm3, %v659_v8  ;;  %v5525_v45 = vpack.i.bf16 %v983_v43, %v982_v42  ;;  %v986_v7 = vld [vmem:[#allocation2 + $0xc1] sm:$0xff]  ;;  %v987_v8 = vld [vmem:[#allocation2 + $0xc9] sm:$0xff] }
  0xac   : > { %5441 = vrot.lane.b32.xlu1 %v5420_v62, %s5936_s23 }
  0xad   : > { %5436 = vrot.lane.b32.xlu0 %v5415_v63, %s5934_s20  ;;  %v663_v14 = vpop.permute.xlu1 %662  ;;  %v661_v15 = vpop.permute.xlu0 %660  ;;  %v955_v63 = vld [vmem:[#allocation2 + $0xc8] sm:$0xff] }
  0xae   : > { %738 = vst.msk [vmem:[#allocation2 + $0x111] sm:$0xff] %vm716_vm3, %v663_v14  ;;  %737 = vst.msk [vmem:[#allocation2 + $0x109] sm:$0xff] %vm716_vm3, %v661_v15  ;;  %v5620_v14 = vpack.i.bf16 %v924_v13, %v923_v12  ;;  %v988_v15 = vld [vmem:[#allocation2 + $0xd9] sm:$0xff] }
  0xb0   : > { %5451 = vrot.lane.b32.xlu1 %v5450_v11, %s5937_s25 }
  0xb1   : > { %5446 = vrot.lane.b32.xlu0 %v5445_v16, %s5933_s19  ;;  %v665_v18 = vpop.permute.xlu1 %664  ;;  %v667_v19 = vpop.permute.xlu0 %666  ;;  %v958_v21 = vld [vmem:[#allocation2 + $0xf0] sm:$0xff]  ;;  %v991_v52 = vld [vmem:[#allocation2 + $0xf9] sm:$0xff] }
  0xb2   : > { %739 = vst.msk [vmem:[#allocation2 + $0x121] sm:$0xff] %vm716_vm3, %v665_v18  ;;  %740 = vst.msk [vmem:[#allocation2 + $0x129] sm:$0xff] %vm716_vm3, %v667_v19  ;;  %v956_v18 = vld [vmem:[#allocation2 + $0xd8] sm:$0xff]  ;;  %v957_v19 = vld [vmem:[#allocation2 + $0xe0] sm:$0xff] }
  0xb3   : > { %v5625_v20 = vpack.i.bf16 %v957_v19, %v956_v18 }
  0xb4   : > { %5461 = vrot.lane.b32.xlu1 %v5420_v62, %s5932_s15  ;;  %v954_v62 = vld [vmem:[#allocation2 + $0xc0] sm:$0xff] }
  0xb5   : > { %5456 = vrot.lane.b32.xlu0 %v5455_v17, %s5935_s22  ;;  %v669_v22 = vpop.permute.xlu1 %668  ;;  %v671_v23 = vpop.permute.xlu0 %670  ;;  %v5590_v1 = vpack.i.bf16 %v955_v63, %v954_v62 }
  0xb6   : > { %741 = vst.msk [vmem:[#allocation2 + $0x139] sm:$0xff] %vm716_vm3, %v669_v22  ;;  %742 = vst.msk [vmem:[#allocation2 + $0x141] sm:$0xff] %vm716_vm3, %v671_v23  ;;  %v959_v22 = vld [vmem:[#allocation2 + $0xf8] sm:$0xff]  ;;  %v5358_v23 = vunpack.i.l.bf16 %v6483_v4 }
  0xb7   : > { %v5660_v31 = vpack.i.bf16 %v959_v22, %v958_v21 }
  0xb8   : > { %5471 = vrot.lane.b32.xlu1 %v5450_v11, %s5934_s20  ;;  %v5595_v11 = vpack.i.bf16 %v987_v8, %v986_v7  ;;  %v6594_v8 = vld [vmem:[#allocation2 + $0xf2] sm:$0xff] }
  0xb9   : > { %5466 = vrot.lane.b32.xlu0 %v5445_v16, %s5931_s14  ;;  %v673_v27 = vpop.permute.xlu1 %672  ;;  %v675_v29 = vpop.permute.xlu0 %674  ;;  %v989_v16 = vld [vmem:[#allocation2 + $0xe1] sm:$0xff] }
  0xba   : > { %743 = vst.msk [vmem:[#allocation2 + $0x151] sm:$0xff] %vm716_vm3, %v673_v27  ;;  %744 = vst.msk [vmem:[#allocation2 + $0x159] sm:$0xff] %vm716_vm3, %v675_v29  ;;  %v5359_v27 = vunpack.i.h.bf16 %v6483_v4 }
  0xbc   : > { %5486 = vrot.lane.b32.xlu1 %v5485_v24, %s5937_s25 }
  0xbd   : > { %5476 = vrot.lane.b32.xlu0 %v5455_v17, %s5936_s23  ;;  %v677_v34 = vpop.permute.xlu1 %676  ;;  %v681_v35 = vpop.permute.xlu0 %680 }
  0xbe   : > { %745 = vst.msk [vmem:[#allocation2 + $0x169] sm:$0xff] %vm716_vm3, %v677_v34  ;;  %747 = vst.msk [vmem:[#allocation2 + $0x181] sm:$0xff] %vm716_vm3, %v681_v35  ;;  %v750_v34 = vld [vmem:[#allocation2 + $0x8] sm:$0xff]  ;;  %v6572_v35 = vld [vmem:[#allocation2 + $0xda] sm:$0xff] }
  0xbf   : > { %v1935_v4 = vsel %vm434_vm0, %v750_v34, %v5359_v27  ;;  %v6606_v27 = vld [vmem:[#allocation2 + $0x109] sm:$0xff] }
  0xc0   : > { %5501 = vrot.lane.b32.xlu1 %v5480_v30, %s5931_s14 }
  0xc1   : > { %5481 = vrot.lane.b32.xlu0 %v5480_v30, %s5933_s19  ;;  %v679_v39 = vpop.permute.xlu1 %678  ;;  %v6525_v40 = vld [vmem:[#allocation2 + $0x15a] sm:$0xff] }
  0xc2   : > { %746 = vst.msk [vmem:[#allocation2 + $0x171] sm:$0xff] %vm716_vm3, %v679_v39  ;;  %5125 = vmatprep.mubr.msk.f32.mxu1 %vm434_vm0, %v6525_v40 }
  0xc4   : > { %5511 = vrot.lane.b32.xlu1 %v5490_v36, %s5936_s23 }
  0xc5   : > { %5491 = vrot.lane.b32.xlu0 %v5490_v36, %s5935_s22 }
  0xc8   : > { %5516 = vrot.lane.b32.xlu1 %v5515_v41, %s5933_s19 }
  0xc9   : > { %5496 = vrot.lane.b32.xlu0 %v5455_v17, %s5932_s15  ;;  %v5630_v17 = vpack.i.bf16 %v989_v16, %v988_v15 }
  0xcc   : > { %5526 = vrot.lane.b32.xlu1 %v5525_v45, %s5935_s22 }
  0xcd   : > { %5506 = vrot.lane.b32.xlu0 %v5485_v24, %s5934_s20  ;;  %v749_v24 = vld [vmem:[#allocation2] sm:$0xff] }
  0xce   : > { %v1934_v38 = vsel %vm434_vm0, %v749_v24, %v5358_v23 }
  0xcf   : > { %v1967_v46 = vsel %vm1966_vm4, %v1934_v38, %v5363_v32 }
  0xd0   : > { %5531 = vrot.lane.b32.xlu1 %v5490_v36, %s5932_s15  ;;  %v926_v36 = vld [vmem:[#allocation2 + $0xe2] sm:$0xff] }
  0xd1   : > { %5521 = vrot.lane.b32.xlu0 %v5520_v50, %s5937_s25 }
  0xd4   : > { %5541 = vrot.lane.b32.xlu1 %v5520_v50, %s5934_s20 }
  0xd5   : > { %682 = vrot.lane.b32.xlu0 %v587_v51, %s5930_s28  ;;  %v990_v51 = vld [vmem:[#allocation2 + $0xf1] sm:$0xff] }
  0xd6   : > { %v6587_v60 = vpack.i.bf16 %v991_v52, %v990_v51 }
  0xd8   : > { %5551 = vrot.lane.b32.xlu1 %v5550_v55, %s5933_s19 }
  0xd9   : > { %5536 = vrot.lane.b32.xlu0 %v5515_v41, %s5931_s14  ;;  %v5364_v41 = vunpack.i.h.bf16 %v6481_v3 }
  0xdb   : > { %v1968_v3 = vsel %vm1966_vm4, %v1935_v4, %v5364_v41  ;;  %v960_v4 = vld [vmem:[#allocation2 + $0x108] sm:$0xff] }
  0xdc   : > { %5561 = vrot.lane.b32.xlu1 %v5560_v58, %s5935_s22 }
  0xdd   : > { %5546 = vrot.lane.b32.xlu0 %v5525_v45, %s5936_s23 }
  0xe0   : > { %5571 = vrot.lane.b32.xlu1 %v5550_v55, %s5931_s14 }
  0xe1   : > { %5556 = vrot.lane.b32.xlu0 %v5555_v61, %s5937_s25 }
  0xe4   : > { %5581 = vrot.lane.b32.xlu1 %v5560_v58, %s5936_s23 }
  0xe5   : > { %5566 = vrot.lane.b32.xlu0 %v5525_v45, %s5932_s15  ;;  %v5655_v45 = vpack.i.bf16 %v926_v36, %v6572_v35 }
  0xe8   : > { %5591 = vrot.lane.b32.xlu1 %v5590_v1, %s5937_s25 }
  0xe9   : > { %5576 = vrot.lane.b32.xlu0 %v5555_v61, %s5934_s20 }
  0xec   : > { %5601 = vrot.lane.b32.xlu1 %v5560_v58, %s5932_s15 }
  0xed   : > { %5586 = vrot.lane.b32.xlu0 %v5585_v6, %s5933_s19 }
  0xf0   : > { %5611 = vrot.lane.b32.xlu1 %v5590_v1, %s5934_s20 }
  0xf1   : > { %5596 = vrot.lane.b32.xlu0 %v5595_v11, %s5935_s22 }
  0xf4   : > { %5621 = vrot.lane.b32.xlu1 %v5620_v14, %s5933_s19 }
  0xf5   : > { %5606 = vrot.lane.b32.xlu0 %v5585_v6, %s5931_s14 }
  0xf8   : > { %5631 = vrot.lane.b32.xlu1 %v5630_v17, %s5935_s22 }
  0xf9   : > { %5616 = vrot.lane.b32.xlu0 %v5595_v11, %s5936_s23 }
  0xfc   : > { %5641 = vrot.lane.b32.xlu1 %v5620_v14, %s5931_s14 }
  0xfd   : > { %5626 = vrot.lane.b32.xlu0 %v5625_v20, %s5937_s25 }
 0x100   : > { %5651 = vrot.lane.b32.xlu1 %v5630_v17, %s5936_s23 }
 0x101   : > { %5636 = vrot.lane.b32.xlu0 %v5595_v11, %s5932_s15  ;;  %v928_v11 = vld [vmem:[#allocation2 + $0xfa] sm:$0xff] }
 0x102   : > { %v5377_v29 = vpop.permute.xlu1 %5376 }
 0x103   : > { %v5367_v30 = vpop.permute.xlu0 %5366  ;;  %v5378_v56 = vunpack.i.l.bf16 %v5377_v29  ;;  %v5379_v1 = vunpack.i.h.bf16 %v5377_v29  ;;  %v6608_v29 = vld [vmem:[#allocation2 + $0x111] sm:$0xff] }
 0x104   : > { %v5368_v39 = vunpack.i.l.bf16 %v5367_v30  ;;  %5661 = vrot.lane.b32.xlu1 %v5660_v31, %s5937_s25  ;;  %v5369_v42 = vunpack.i.h.bf16 %v5367_v30  ;;  %v5700_v41 = vpack.i.bf16 %v6608_v29, %v6606_v27 }
 0x105   : > { %5646 = vrot.lane.b32.xlu0 %v5625_v20, %s5934_s20  ;;  %v5690_v20 = vpack.i.bf16 %v928_v11, %v6594_v8 }
 0x106   : > { %v5387_v43 = vpop.permute.xlu1 %5386  ;;  %v2000_v53 = vsel %vm1999_vm5, %v1967_v46, %v5368_v39  ;;  %v2001_v57 = vsel %vm1999_vm5, %v1968_v3, %v5369_v42  ;;  %v961_v42 = vld [vmem:[#allocation2 + $0x110] sm:$0xff] }
 0x107   : > { %v5372_v44 = vpop.permute.xlu0 %5371  ;;  %v5388_v5 = vunpack.i.l.bf16 %v5387_v43  ;;  %v5389_v22 = vunpack.i.h.bf16 %v5387_v43  ;;  %v5695_v51 = vpack.i.bf16 %v961_v42, %v960_v4 }
 0x108   : > { %v5374_v49 = vunpack.i.h.bf16 %v5372_v44  ;;  %v5373_v50 = vunpack.i.l.bf16 %v5372_v44  ;;  %5671 = vrot.lane.b32.xlu1 %v5630_v17, %s5932_s15 }
 0x109   : > { %5656 = vrot.lane.b32.xlu0 %v5655_v45, %s5933_s19 }
 0x10a   : > { %v2033_v55 = vsel %vm2032_vm6, %v2000_v53, %v5373_v50  ;;  %v5392_v59 = vpop.permute.xlu1 %5391  ;;  %v2034_v61 = vsel %vm2032_vm6, %v2001_v57, %v5374_v49 }
 0x10b   : > { %v5382_v58 = vpop.permute.xlu0 %5381  ;;  %v5393_v6 = vunpack.i.l.bf16 %v5392_v59  ;;  %v2066_v7 = vsel %vm2065_vm7, %v2033_v55, %v5378_v56  ;;  %v5394_v13 = vunpack.i.h.bf16 %v5392_v59  ;;  %v2067_v17 = vsel %vm2065_vm7, %v2034_v61, %v5379_v1 }
 0x10c   : > { %v5384_v62 = vunpack.i.h.bf16 %v5382_v58  ;;  %v5383_v63 = vunpack.i.l.bf16 %v5382_v58  ;;  %5681 = vrot.lane.b32.xlu1 %v5660_v31, %s5934_s20 }
 0x10d   : > { %5666 = vrot.lane.b32.xlu0 %v6587_v60, %s5935_s22  ;;  %v1936_v23 = vsel %vm434_vm0, %v6431_v28, %v5393_v6  ;;  %v1937_v31 = vsel %vm434_vm0, %v6438_v33, %v5394_v13  ;;  %v6638_v6 = vld [vmem:[#allocation2 + $0x129] sm:$0xff] }
 0x10e   : > { %v2099_v12 = vsel %vm2098_vm8, %v2066_v7, %v5383_v63  ;;  %v5402_v15 = vpop.permute.xlu1 %5401  ;;  %v2100_v21 = vsel %vm2098_vm8, %v2067_v17, %v5384_v62 }
 0x10f   : > { %v5397_v14 = vpop.permute.xlu0 %5396  ;;  %v2132_v16 = vsel %vm2131_vm9, %v2099_v12, %v5388_v5  ;;  %v5403_v24 = vunpack.i.l.bf16 %v5402_v15  ;;  %v5404_v32 = vunpack.i.h.bf16 %v5402_v15  ;;  %v2133_v36 = vsel %vm2131_vm9, %v2100_v21, %v5389_v22 }
 0x110   : > { %v5399_v18 = vunpack.i.h.bf16 %v5397_v14  ;;  %v5398_v19 = vunpack.i.l.bf16 %v5397_v14  ;;  %2343 = vmatmul.mubr.f32.vlgmr.msra.gmra.mxu0 %v2132_v16  ;;  %5691 = vrot.lane.b32.xlu1 %v5690_v20, %s5933_s19  ;;  %v6646_v16 = vld [vmem:[#allocation2 + $0x10a] sm:$0xff] }
 0x111   : > { %5101 = vmatprep.mubr.msk.f32.mxu0 %vm434_vm0, %v6468_v54  ;;  %5676 = vrot.lane.b32.xlu0 %v5655_v45, %s5931_s14 }
 0x112   : > { %v1969_v30 = vsel %vm1966_vm4, %v1936_v23, %v5398_v19  ;;  %v5407_v28 = vpop.permute.xlu1 %5406  ;;  %v1970_v54 = vsel %vm1966_vm4, %v1937_v31, %v5399_v18 }
 0x113   : > { %v5412_v34 = vpop.permute.xlu0 %5411  ;;  %v5409_v38 = vunpack.i.h.bf16 %v5407_v28  ;;  %v5408_v39 = vunpack.i.l.bf16 %v5407_v28  ;;  %v2002_v43 = vsel %vm1999_vm5, %v1969_v30, %v5403_v24  ;;  %v2003_v45 = vsel %vm1999_vm5, %v1970_v54, %v5404_v32  ;;  %v6664_v32 = vld [vmem:[#allocation2 + $0x128] sm:$0xff]  ;;  %v6669_v54 = vld [vmem:[#allocation2 + $0x140] sm:$0xff] }
 0x114   : > { %2348 = vmatmul.mubr.f32.gmra.mxu0 %v2133_v36  ;;  %v5413_v44 = vunpack.i.l.bf16 %v5412_v34  ;;  %5701 = vrot.lane.b32.xlu1 %v5700_v41, %s5935_s22  ;;  %v5414_v46 = vunpack.i.h.bf16 %v5412_v34 }
 0x115   : > { %5102 = vmatprep.mubr.msk.f32.mxu0 %vm434_vm0, %v6489_v9  ;;  %5686 = vrot.lane.b32.xlu0 %v6587_v60, %s5936_s23  ;;  %v2035_v33 = vsel %vm2032_vm6, %v2002_v43, %v5408_v39  ;;  %v2036_v52 = vsel %vm2032_vm6, %v2003_v45, %v5409_v38  ;;  %v994_v45 = vld [vmem:[#allocation2 + $0x121] sm:$0xff] }
 0x116   : > { %v5417_v50 = vpop.permute.xlu1 %5416  ;;  %v2068_v9 = vsel %vm2065_vm7, %v2035_v33, %v5413_v44  ;;  %v2069_v62 = vsel %vm2065_vm7, %v2036_v52, %v5414_v46 }
 0x117   : > { %v5422_v49 = vpop.permute.xlu0 %5421  ;;  %v5419_v3 = vunpack.i.h.bf16 %v5417_v50  ;;  %v5418_v55 = vunpack.i.l.bf16 %v5417_v50 }
 0x118   : > { %v5423_v53 = vunpack.i.l.bf16 %v5422_v49  ;;  %5711 = vrot.lane.b32.xlu1 %v5690_v20, %s5931_s14  ;;  %v5424_v57 = vunpack.i.h.bf16 %v5422_v49 }
 0x119   : > { %5696 = vrot.lane.b32.xlu0 %v5695_v51, %s5937_s25  ;;  %v2101_v56 = vsel %vm2098_vm8, %v2068_v9, %v5418_v55  ;;  %v2102_v1 = vsel %vm2098_vm8, %v2069_v62, %v5419_v3 }
 0x11a   : > { %v5432_v59 = vpop.permute.xlu1 %5431  ;;  %v2134_v61 = vsel %vm2131_vm9, %v2101_v56, %v5423_v53  ;;  %v2135_v14 = vsel %vm2131_vm9, %v2102_v1, %v5424_v57  ;;  %v5745_v56 = vpack.i.bf16 %v6638_v6, %v994_v45 }
 0x11b   : > { %v5427_v58 = vpop.permute.xlu0 %5426  ;;  %2353 = vmatmul.mubr.f32.gmra.mxu0 %v2134_v61  ;;  %v5433_v5 = vunpack.i.l.bf16 %v5432_v59  ;;  %v5434_v17 = vunpack.i.h.bf16 %v5432_v59  ;;  %v6689_v59 = vld [vmem:[#allocation2 + $0x141] sm:$0xff] }
 0x11c   : > { %v5428_v63 = vunpack.i.l.bf16 %v5427_v58  ;;  %5103 = vmatprep.mubr.msk.f32.mxu0 %vm434_vm0, %v6491_v10  ;;  %v5429_v7 = vunpack.i.h.bf16 %v5427_v58  ;;  %5721 = vrot.lane.b32.xlu1 %v5700_v41, %s5936_s23  ;;  %v6648_v10 = vld [vmem:[#allocation2 + $0x112] sm:$0xff] }
 0x11d   : > { %5706 = vrot.lane.b32.xlu0 %v6587_v60, %s5932_s15  ;;  %v5730_v60 = vpack.i.bf16 %v6606_v27, %v6638_v6  ;;  %v5725_v27 = vpack.i.bf16 %v6648_v10, %v6646_v16 }
 0x11e   : > { %v1938_v11 = vsel %vm434_vm0, %v6454_v47, %v5428_v63  ;;  %v5442_v13 = vpop.permute.xlu1 %5441  ;;  %v6654_v47 = vld [vmem:[#allocation2 + $0x12a] sm:$0xff]  ;;  %v1939_v20 = vsel %vm434_vm0, %v6456_v48, %v5429_v7  ;;  %v6693_v63 = vld [vmem:[#allocation2 + $0x13a] sm:$0xff] }
 0x11f   : > { %v5437_v12 = vpop.permute.xlu0 %5436  ;;  %2358 = vmatmul.mubr.f32.gmra.mxu0 %v2135_v14  ;;  %v1971_v18 = vsel %vm1966_vm4, %v1938_v11, %v5433_v5  ;;  %v5443_v19 = vunpack.i.l.bf16 %v5442_v13  ;;  %v5740_v31 = vpack.i.bf16 %v6646_v16, %v6654_v47  ;;  %v1972_v34 = vsel %vm1966_vm4, %v1939_v20, %v5434_v17  ;;  %v755_v5 = vld [vmem:[#allocation2 + $0x48] sm:$0xff]  ;;  %v6709_v17 = vld [vmem:[#allocation2 + $0x150] sm:$0xff] }
 0x120   : > { %v5438_v15 = vunpack.i.l.bf16 %v5437_v12  ;;  %5104 = vmatprep.mubr.msk.f32.mxu0 %vm434_vm0, %v6509_v25  ;;  %v5439_v21 = vunpack.i.h.bf16 %v5437_v12  ;;  %5731 = vrot.lane.b32.xlu1 %v5730_v60, %s5932_s15  ;;  %v962_v25 = vld [vmem:[#allocation2 + $0x120] sm:$0xff]  ;;  %v5444_v48 = vunpack.i.h.bf16 %v5442_v13  ;;  %v5770_v14 = vpack.i.bf16 %v6648_v10, %v6693_v63 }
 0x121   : > { %5716 = vrot.lane.b32.xlu0 %v5695_v51, %s5934_s20  ;;  %v5735_v43 = vpack.i.bf16 %v6664_v32, %v962_v25  ;;  %v5750_v33 = vpack.i.bf16 %v962_v25, %v6669_v54  ;;  %v6679_v51 = vld [vmem:[#allocation2 + $0x139] sm:$0xff]  ;;  %v934_v60 = vld [vmem:[#allocation2 + $0x142] sm:$0xff] }
 0x122   : > { %v2004_v22 = vsel %vm1999_vm5, %v1971_v18, %v5438_v15  ;;  %v5452_v24 = vpop.permute.xlu1 %5451  ;;  %v2005_v38 = vsel %vm1999_vm5, %v1972_v34, %v5439_v21  ;;  %v5760_v58 = vpack.i.bf16 %v6608_v29, %v6679_v51  ;;  %v6707_v15 = vld [vmem:[#allocation2 + $0x122] sm:$0xff]  ;;  %v756_v21 = vld [vmem:[#allocation2 + $0x50] sm:$0xff]  ;;  %v6724_v34 = vld [vmem:[#allocation2 + $0x138] sm:$0xff] }
 0x123   : > { %v5447_v23 = vpop.permute.xlu0 %5446  ;;  %v2037_v28 = vsel %vm2032_vm6, %v2004_v22, %v5443_v19  ;;  %v5453_v36 = vunpack.i.l.bf16 %v5452_v24  ;;  %v2038_v46 = vsel %vm2032_vm6, %v2005_v38, %v5444_v48  ;;  %v5454_v49 = vunpack.i.h.bf16 %v5452_v24  ;;  %v967_v48 = vld [vmem:[#allocation2 + $0x158] sm:$0xff] }
 0x124   : > { %v5448_v30 = vunpack.i.l.bf16 %v5447_v23  ;;  %v5449_v39 = vunpack.i.h.bf16 %v5447_v23  ;;  %5741 = vrot.lane.b32.xlu1 %v5740_v31, %s5931_s14  ;;  %v6718_v23 = vpack.i.bf16 %v6707_v15, %v934_v60  ;;  %v5780_v24 = vpack.i.bf16 %v6664_v32, %v6709_v17 }
 0x125   : > { %5726 = vrot.lane.b32.xlu0 %v5725_v27, %s5933_s19 }
 0x126   : > { %v2070_v41 = vsel %vm2065_vm7, %v2037_v28, %v5448_v30  ;;  %v5462_v42 = vpop.permute.xlu1 %5461  ;;  %v2071_v3 = vsel %vm2065_vm7, %v2038_v46, %v5449_v39 }
 0x127   : > { %v5457_v4 = vpop.permute.xlu0 %5456  ;;  %v2103_v50 = vsel %vm2098_vm8, %v2070_v41, %v5453_v36  ;;  %v5463_v57 = vunpack.i.l.bf16 %v5462_v42  ;;  %v2104_v62 = vsel %vm2098_vm8, %v2071_v3, %v5454_v49  ;;  %v5464_v29 = vunpack.i.h.bf16 %v5462_v42  ;;  %v6731_v41 = vld [vmem:[#allocation2 + $0x151] sm:$0xff] }
 0x128   : > { %v5458_v44 = vunpack.i.l.bf16 %v5457_v4  ;;  %v5459_v52 = vunpack.i.h.bf16 %v5457_v4  ;;  %5751 = vrot.lane.b32.xlu1 %v5750_v33, %s5934_s20  ;;  %v6736_v33 = vpack.i.bf16 %v6724_v34, %v967_v48  ;;  %v5790_v49 = vpack.i.bf16 %v6638_v6, %v6731_v41 }
 0x129   : > { %5736 = vrot.lane.b32.xlu0 %v5735_v43, %s5937_s25  ;;  %v1940_v12 = vsel %vm434_vm0, %v755_v5, %v5463_v57  ;;  %v1941_v27 = vsel %vm434_vm0, %v756_v21, %v5464_v29 }
 0x12a   : > { %v2136_v53 = vsel %vm2131_vm9, %v2103_v50, %v5458_v44  ;;  %v5472_v9 = vpop.permute.xlu1 %5471  ;;  %v2137_v1 = vsel %vm2131_vm9, %v2104_v62, %v5459_v52  ;;  %v6741_v50 = vld [vmem:[#allocation2 + $0x159] sm:$0xff] }
 0x12b   : > { %v5467_v55 = vpop.permute.xlu0 %5466  ;;  %2363 = vmatmul.mubr.f32.gmra.mxu0 %v2136_v53  ;;  %v5473_v13 = vunpack.i.l.bf16 %v5472_v9  ;;  %v5474_v30 = vunpack.i.h.bf16 %v5472_v9  ;;  %v6755_v62 = vpack.i.bf16 %v6679_v51, %v6741_v50  ;;  %v6765_v51 = vld [vmem:[#allocation2 + $0x168] sm:$0xff] }
 0x12c   : > { %5105 = vmatprep.mubr.msk.f32.mxu0 %vm434_vm0, %v6511_v26  ;;  %v5468_v61 = vunpack.i.l.bf16 %v5467_v55  ;;  %5761 = vrot.lane.b32.xlu1 %v5760_v58, %s5932_s15  ;;  %v6700_v26 = vpack.i.bf16 %v994_v45, %v6689_v59  ;;  %v5469_v18 = vunpack.i.h.bf16 %v5467_v55  ;;  %v6748_v55 = vld [vmem:[#allocation2 + $0x152] sm:$0xff] }
 0x12d   : > { %5746 = vrot.lane.b32.xlu0 %v5745_v56, %s5935_s22 }
 0x12e   : > { %v6697_v11 = vpop.permute.xlu1 %5486  ;;  %v1973_v19 = vsel %vm1966_vm4, %v1940_v12, %v5468_v61  ;;  %v1974_v28 = vsel %vm1966_vm4, %v1941_v27, %v5469_v18  ;;  %v1013_v61 = vld [vmem:[#allocation2 + $0x82] sm:$0xff] }
 0x12f   : > { %v5477_v7 = vpop.permute.xlu0 %5476  ;;  %2368 = vmatmul.mubr.f32.gmra.mxu0 %v2137_v1  ;;  %v2006_v31 = vsel %vm1999_vm5, %v1973_v19, %v5473_v13  ;;  %v5488_v39 = vunpack.i.l.bf16 %v6697_v11  ;;  %v2007_v45 = vsel %vm1999_vm5, %v1974_v28, %v5474_v30  ;;  %v5489_v53 = vunpack.i.h.bf16 %v6697_v11  ;;  %v757_v12 = vld [vmem:[#allocation2 + $0x60] sm:$0xff]  ;;  %v758_v13 = vld [vmem:[#allocation2 + $0x68] sm:$0xff] }
 0x130   : > { %5106 = vmatprep.mubr.msk.f32.mxu0 %vm434_vm0, %v6523_v37  ;;  %v5478_v20 = vunpack.i.l.bf16 %v5477_v7  ;;  %5771 = vrot.lane.b32.xlu1 %v5770_v14, %s5931_s14  ;;  %v5479_v36 = vunpack.i.h.bf16 %v5477_v7  ;;  %v5800_v7 = vpack.i.bf16 %v6654_v47, %v6748_v55  ;;  %v5810_v30 = vpack.i.bf16 %v6669_v54, %v6765_v51 }
 0x131   : > { %5756 = vrot.lane.b32.xlu0 %v6700_v26, %s5936_s23 }
 0x132   : > { %v6715_v37 = vpop.permute.xlu1 %5501  ;;  %v2039_v38 = vsel %vm2032_vm6, %v2006_v31, %v5478_v20  ;;  %v2040_v52 = vsel %vm2032_vm6, %v2007_v45, %v5479_v36  ;;  %v6778_v36 = vld [vmem:[#allocation2 + $0x169] sm:$0xff] }
 0x133   : > { %v5482_v22 = vpop.permute.xlu0 %5481  ;;  %v5504_v11 = vunpack.i.h.bf16 %v6715_v37  ;;  %v5503_v29 = vunpack.i.l.bf16 %v6715_v37  ;;  %v1014_v37 = vld [vmem:[#allocation2 + $0x92] sm:$0xff] }
 0x134   : > { %v5483_v25 = vunpack.i.l.bf16 %v5482_v22  ;;  %v5484_v4 = vunpack.i.h.bf16 %v5482_v22  ;;  %5781 = vrot.lane.b32.xlu1 %v5780_v24, %s5934_s20 }
 0x135   : > { %5766 = vrot.lane.b32.xlu0 %v6718_v23, %s5933_s19 }
 0x136   : > { %v2072_v42 = vsel %vm2065_vm7, %v2039_v38, %v5483_v25  ;;  %v5512_v44 = vpop.permute.xlu1 %5511  ;;  %v2073_v6 = vsel %vm2065_vm7, %v2040_v52, %v5484_v4 }
 0x137   : > { %v5492_v43 = vpop.permute.xlu0 %5491  ;;  %v2105_v3 = vsel %vm2098_vm8, %v2072_v42, %v5488_v39  ;;  %v2106_v14 = vsel %vm2098_vm8, %v2073_v6, %v5489_v53  ;;  %v5514_v19 = vunpack.i.h.bf16 %v5512_v44  ;;  %v5513_v20 = vunpack.i.l.bf16 %v5512_v44 }
 0x138   : > { %v5493_v46 = vunpack.i.l.bf16 %v5492_v43  ;;  %v5494_v9 = vunpack.i.h.bf16 %v5492_v43  ;;  %5791 = vrot.lane.b32.xlu1 %v5790_v49, %s5936_s23 }
 0x139   : > { %5776 = vrot.lane.b32.xlu0 %v6736_v33, %s5937_s25 }
 0x13a   : > { %v2138_v56 = vsel %vm2131_vm9, %v2105_v3, %v5493_v46  ;;  %v5517_v58 = vpop.permute.xlu1 %5516  ;;  %v2139_v47 = vsel %vm2131_vm9, %v2106_v14, %v5494_v9  ;;  %v760_v14 = vld [vmem:[#allocation2 + $0x80] sm:$0xff] }
 0x13b   : > { %v5497_v57 = vpop.permute.xlu0 %5496  ;;  %2373 = vmatmul.mubr.f32.gmra.mxu0 %v2138_v56  ;;  %v5519_v31 = vunpack.i.h.bf16 %v5517_v58  ;;  %v5518_v25 = vunpack.i.l.bf16 %v5517_v58 }
 0x13c   : > { %v5499_v1 = vunpack.i.h.bf16 %v5497_v57  ;;  %v5498_v5 = vunpack.i.l.bf16 %v5497_v57  ;;  %5107 = vmatprep.mubr.msk.f32.mxu0 %vm434_vm0, %v1013_v61  ;;  %5801 = vrot.lane.b32.xlu1 %v5800_v7, %s5933_s19 }
 0x13d   : > { %5786 = vrot.lane.b32.xlu0 %v6755_v62, %s5935_s22 }
 0x13e   : > { %v1943_v60 = vsel %vm434_vm0, %v758_v13, %v5499_v1  ;;  %v1942_v18 = vsel %vm434_vm0, %v757_v12, %v5498_v5  ;;  %v5527_v22 = vpop.permute.xlu1 %5526  ;;  %v5840_v12 = vpack.i.bf16 %v6525_v40, %v6748_v55 }
 0x13f   : > { %v5507_v21 = vpop.permute.xlu0 %5506  ;;  %2378 = vmatmul.mubr.f32.gmra.mxu0 %v2139_v47  ;;  %v1975_v48 = vsel %vm1966_vm4, %v1942_v18, %v5503_v29  ;;  %v1976_v28 = vsel %vm1966_vm4, %v1943_v60, %v5504_v11  ;;  %v5528_v4 = vunpack.i.l.bf16 %v5527_v22  ;;  %v5529_v3 = vunpack.i.h.bf16 %v5527_v22  ;;  %v759_v11 = vld [vmem:[#allocation2 + $0x78] sm:$0xff] }
 0x140   : > { %v5509_v24 = vunpack.i.h.bf16 %v5507_v21  ;;  %v5508_v27 = vunpack.i.l.bf16 %v5507_v21  ;;  %5108 = vmatprep.mubr.msk.f32.mxu0 %vm434_vm0, %v1014_v37  ;;  %5811 = vrot.lane.b32.xlu1 %v5810_v30, %s5937_s25  ;;  %v5835_v47 = vpack.i.bf16 %v6693_v63, %v6525_v40 }
 0x141   : > { %5796 = vrot.lane.b32.xlu0 %v6700_v26, %s5932_s15  ;;  %v5820_v26 = vpack.i.bf16 %v6689_v59, %v6778_v36  ;;  %v5830_v59 = vpack.i.bf16 %v6741_v50, %v6731_v41 }
 0x142   : > { %v2008_v38 = vsel %vm1999_vm5, %v1975_v48, %v5508_v27  ;;  %v2009_v39 = vsel %vm1999_vm5, %v1976_v28, %v5509_v24  ;;  %v5532_v54 = vpop.permute.xlu1 %5531 }
 0x143   : > { %v5522_v42 = vpop.permute.xlu0 %5521  ;;  %v2041_v43 = vsel %vm2032_vm6, %v2008_v38, %v5513_v20  ;;  %v2042_v44 = vsel %vm2032_vm6, %v2009_v39, %v5514_v19  ;;  %v5533_v58 = vunpack.i.l.bf16 %v5532_v54  ;;  %v5534_v61 = vunpack.i.h.bf16 %v5532_v54  ;;  %v6857_v19 = vld [vmem:[#allocation2 + $0x170] sm:$0xff] }
 0x144   : > { %v5524_v45 = vunpack.i.h.bf16 %v5522_v42  ;;  %v5523_v46 = vunpack.i.l.bf16 %v5522_v42  ;;  %v2074_v49 = vsel %vm2065_vm7, %v2041_v43, %v5518_v25  ;;  %v2075_v52 = vsel %vm2065_vm7, %v2042_v44, %v5519_v31  ;;  %5821 = vrot.lane.b32.xlu1 %v5820_v26, %s5935_s22  ;;  %v906_v38 = vld [vmem:[#allocation2 + $0x171] sm:$0xff] }
 0x145   : > { %5806 = vrot.lane.b32.xlu0 %v6718_v23, %s5931_s14  ;;  %v1015_v23 = vld [vmem:[#allocation2 + $0x9a] sm:$0xff]  ;;  %v1944_v13 = vsel %vm434_vm0, %v759_v11, %v5533_v58  ;;  %v5850_v37 = vpack.i.bf16 %v6857_v19, %v6765_v51  ;;  %v5845_v51 = vpack.i.bf16 %v6709_v17, %v6857_v19  ;;  %v5860_v54 = vpack.i.bf16 %v906_v38, %v6778_v36 }
 0x146   : > { %v2107_v53 = vsel %vm2098_vm8, %v2074_v49, %v5523_v46  ;;  %v6793_v56 = vpop.permute.xlu1 %5541  ;;  %v2108_v57 = vsel %vm2098_vm8, %v2075_v52, %v5524_v45  ;;  %v5855_v52 = vpack.i.bf16 %v6731_v41, %v906_v38 }
 0x147   : > { %v683_v9 = vpop.permute.xlu0 %682  ;;  %v2140_v6 = vsel %vm2131_vm9, %v2107_v53, %v5528_v4  ;;  %v2141_v7 = vsel %vm2131_vm9, %v2108_v57, %v5529_v3  ;;  %v5544_v55 = vunpack.i.h.bf16 %v6793_v56  ;;  %v970_v53 = vld [vmem:[#allocation2 + $0x180] sm:$0xff]  ;;  %v761_v57 = vld [vmem:[#allocation2 + $0x90] sm:$0xff] }
 0x148   : > { %748 = vst.msk [vmem:[#allocation2 + $0x189] sm:$0xff] %vm716_vm3, %v683_v9  ;;  %2383 = vmatmul.mubr.f32.gmra.mxu0 %v2140_v6  ;;  %5831 = vrot.lane.b32.xlu1 %v5830_v59, %s5932_s15  ;;  %v6883_v59 = vld [vmem:[#allocation2 + $0x16a] sm:$0xff] }
 0x149   : > { %5816 = vrot.lane.b32.xlu0 %v6736_v33, %s5934_s20  ;;  %5109 = vmatprep.mubr.msk.f32.mxu0 %vm434_vm0, %v1015_v23  ;;  %v5543_v33 = vunpack.i.l.bf16 %v6793_v56  ;;  %v1017_v56 = vld [vmem:[#allocation2 + $0xb2] sm:$0xff] }
 0x14a   : > { %v6804_v5 = vpop.permute.xlu1 %5551  ;;  %v6885_v23 = vld [vmem:[#allocation2 + $0x172] sm:$0xff] }
 0x14b   : > { %v5537_v1 = vpop.permute.xlu0 %5536  ;;  %v5553_v24 = vunpack.i.l.bf16 %v6804_v5  ;;  %v5554_v40 = vunpack.i.h.bf16 %v6804_v5  ;;  %v5865_v11 = vpack.i.bf16 %v6885_v23, %v6883_v59 }
 0x14c   : > { %v5539_v29 = vunpack.i.h.bf16 %v5537_v1  ;;  %v5538_v50 = vunpack.i.l.bf16 %v5537_v1  ;;  %2388 = vmatmul.mubr.f32.gmra.mxu0 %v2141_v7  ;;  %5841 = vrot.lane.b32.xlu1 %v5840_v12, %s5931_s14 }
 0x14d   : > { %5826 = vrot.lane.b32.xlu0 %v6755_v62, %s5936_s23  ;;  %5110 = vmatprep.mubr.msk.f32.mxu0 %vm434_vm0, %v6552_v2  ;;  %v1945_v2 = vsel %vm434_vm0, %v760_v14, %v5534_v61 }
 0x14e   : > { %v1977_v60 = vsel %vm1966_vm4, %v1944_v13, %v5538_v50  ;;  %v5562_v18 = vpop.permute.xlu1 %5561  ;;  %v1978_v20 = vsel %vm1966_vm4, %v1945_v2, %v5539_v29  ;;  %v1018_v50 = vld [vmem:[#allocation2 + $0xc2] sm:$0xff]  ;;  %v762_v13 = vld [vmem:[#allocation2 + $0x98] sm:$0xff] }
 0x14f   : > { %v5547_v62 = vpop.permute.xlu0 %5546  ;;  %v2010_v27 = vsel %vm1999_vm5, %v1977_v60, %v5543_v33  ;;  %v2011_v31 = vsel %vm1999_vm5, %v1978_v20, %v5544_v55  ;;  %v5563_v25 = vunpack.i.l.bf16 %v5562_v18  ;;  %v971_v44 = vld [vmem:[#allocation2 + $0x188] sm:$0xff]  ;;  %v5564_v46 = vunpack.i.h.bf16 %v5562_v18 }
 0x150   : > { %v5549_v21 = vunpack.i.h.bf16 %v5547_v62  ;;  %v5548_v22 = vunpack.i.l.bf16 %v5547_v62  ;;  %5851 = vrot.lane.b32.xlu1 %v5850_v37, %s5934_s20  ;;  %v5870_v9 = vpack.i.bf16 %v971_v44, %v970_v53  ;;  %v1003_v12 = vld [vmem:[#allocation2 + $0x189] sm:$0xff]  ;;  %v1002_v55 = vld [vmem:[#allocation2 + $0x181] sm:$0xff] }
 0x151   : > { %5836 = vrot.lane.b32.xlu0 %v5835_v47, %s5933_s19 }
 0x152   : > { %v2043_v30 = vsel %vm2032_vm6, %v2010_v27, %v5548_v22  ;;  %v5572_v28 = vpop.permute.xlu1 %5571  ;;  %v2044_v39 = vsel %vm2032_vm6, %v2011_v31, %v5549_v21  ;;  %v5875_v21 = vpack.i.bf16 %v1003_v12, %v1002_v55  ;;  %v6907_v27 = vld [vmem:[#allocation2 + $0x18a] sm:$0xff] }
 0x153   : > { %v5557_v48 = vpop.permute.xlu0 %5556  ;;  %v2076_v43 = vsel %vm2065_vm7, %v2043_v30, %v5553_v24  ;;  %v2077_v36 = vsel %vm2065_vm7, %v2044_v39, %v5554_v40  ;;  %v5573_v61 = vunpack.i.l.bf16 %v5572_v28  ;;  %v5574_v62 = vunpack.i.h.bf16 %v5572_v28  ;;  %v6905_v24 = vld [vmem:[#allocation2 + $0x182] sm:$0xff]  ;;  %v1004_v39 = vld [vmem:[#allocation2 + $0x199] sm:$0xff] }
 0x154   : > { %v5559_v4 = vunpack.i.h.bf16 %v5557_v48  ;;  %v5558_v42 = vunpack.i.l.bf16 %v5557_v48  ;;  %5861 = vrot.lane.b32.xlu1 %v5860_v54, %s5936_s23 }
 0x155   : > { %5846 = vrot.lane.b32.xlu0 %v5845_v51, %s5937_s25 }
 0x156   : > { %v2109_v45 = vsel %vm2098_vm8, %v2076_v43, %v5558_v42  ;;  %v6877_v49 = vpop.permute.xlu1 %5581  ;;  %v2110_v6 = vsel %vm2098_vm8, %v2077_v36, %v5559_v4  ;;  %v1005_v4 = vld [vmem:[#allocation2 + $0x1a1] sm:$0xff] }
 0x157   : > { %v5567_v26 = vpop.permute.xlu0 %5566  ;;  %v2142_v17 = vsel %vm2131_vm9, %v2109_v45, %v5563_v25  ;;  %v2143_v7 = vsel %vm2131_vm9, %v2110_v6, %v5564_v46  ;;  %v5583_v18 = vunpack.i.l.bf16 %v6877_v49  ;;  %v5584_v48 = vunpack.i.h.bf16 %v6877_v49  ;;  %v1019_v6 = vld [vmem:[#allocation2 + $0xca] sm:$0xff] }
 0x158   : > { %v5568_v3 = vunpack.i.l.bf16 %v5567_v26  ;;  %2393 = vmatmul.mubr.f32.gmra.mxu0 %v2142_v17  ;;  %v5569_v58 = vunpack.i.h.bf16 %v5567_v26  ;;  %5871 = vrot.lane.b32.xlu1 %v5870_v9, %s5937_s25  ;;  %v972_v17 = vld [vmem:[#allocation2 + $0x198] sm:$0xff]  ;;  %v5910_v53 = vpack.i.bf16 %v1005_v4, %v1004_v39 }
 0x159   : > { %5856 = vrot.lane.b32.xlu0 %v5855_v52, %s5935_s22  ;;  %5111 = vmatprep.mubr.msk.f32.mxu0 %vm434_vm0, %v1017_v56  ;;  %v973_v52 = vld [vmem:[#allocation2 + $0x1a0] sm:$0xff]  ;;  %v2765_v39 = vld [vmem:[#allocation3 + $0x2] sm:$0xff] }
 0x15a   : > { %v1946_v41 = vsel %vm434_vm0, %v761_v57, %v5568_v3  ;;  %v6891_v5 = vpop.permute.xlu1 %5591  ;;  %v1947_v14 = vsel %vm434_vm0, %v762_v13, %v5569_v58  ;;  %v763_v57 = vld [vmem:[#allocation2 + $0xa8] sm:$0xff] }
 0x15b   : > { %v5577_v1 = vpop.permute.xlu0 %5576  ;;  %v1979_v33 = vsel %vm1966_vm4, %v1946_v41, %v5573_v61  ;;  %v1980_v37 = vsel %vm1966_vm4, %v1947_v14, %v5574_v62  ;;  %v5593_v28 = vunpack.i.l.bf16 %v6891_v5  ;;  %v5594_v36 = vunpack.i.h.bf16 %v6891_v5  ;;  %v2734_v14 = vld [vmem:[#allocation3 + $0x9] sm:$0xff] }
 0x15c   : > { %v5578_v29 = vunpack.i.l.bf16 %v5577_v1  ;;  %2398 = vmatmul.mubr.f32.gmra.mxu0 %v2143_v7  ;;  %v5579_v60 = vunpack.i.h.bf16 %v5577_v1  ;;  %5881 = vrot.lane.b32.xlu1 %v5860_v54, %s5932_s15  ;;  %v5900_v54 = vpack.i.bf16 %v6907_v27, %v6905_v24  ;;  %v5905_v7 = vpack.i.bf16 %v973_v52, %v972_v17 }
 0x15d   : > { %5866 = vrot.lane.b32.xlu0 %v5865_v11, %s5933_s19  ;;  %5112 = vmatprep.mubr.msk.f32.mxu0 %vm434_vm0, %v1018_v50 }
 0x15e   : > { %v2012_v2 = vsel %vm1999_vm5, %v1979_v33, %v5578_v29  ;;  %v5602_v20 = vpop.permute.xlu1 %5601  ;;  %v2013_v40 = vsel %vm1999_vm5, %v1980_v37, %v5579_v60 }
 0x15f   : > { %v5587_v47 = vpop.permute.xlu0 %5586  ;;  %v2045_v30 = vsel %vm2032_vm6, %v2012_v2, %v5583_v18  ;;  %v5603_v43 = vunpack.i.l.bf16 %v5602_v20  ;;  %v2046_v45 = vsel %vm2032_vm6, %v2013_v40, %v5584_v48  ;;  %v5604_v3 = vunpack.i.h.bf16 %v5602_v20  ;;  %v2733_v20 = vld [vmem:[#allocation3 + $0x1] sm:$0xff]  ;;  %v2766_v40 = vld [vmem:[#allocation3 + $0xa] sm:$0xff] }
 0x160   : > { %v5588_v22 = vunpack.i.l.bf16 %v5587_v47  ;;  %v5589_v31 = vunpack.i.h.bf16 %v5587_v47  ;;  %5891 = vrot.lane.b32.xlu1 %v5870_v9, %s5934_s20 }
 0x161   : > { %5876 = vrot.lane.b32.xlu0 %v5875_v21, %s5935_s22  ;;  %v1948_v61 = vsel %vm434_vm0, %v763_v57, %v5603_v43 }
 0x162   : > { %v2078_v25 = vsel %vm2065_vm7, %v2045_v30, %v5588_v22  ;;  %v5612_v38 = vpop.permute.xlu1 %5611  ;;  %v2079_v49 = vsel %vm2065_vm7, %v2046_v45, %v5589_v31  ;;  %v1021_v45 = vld [vmem:[#allocation2 + $0xe2] sm:$0xff] }
 0x163   : > { %v5597_v51 = vpop.permute.xlu0 %5596  ;;  %v2111_v44 = vsel %vm2098_vm8, %v2078_v25, %v5593_v28  ;;  %v2112_v1 = vsel %vm2098_vm8, %v2079_v49, %v5594_v36  ;;  %v5613_v12 = vunpack.i.l.bf16 %v5612_v38  ;;  %v5614_v62 = vunpack.i.h.bf16 %v5612_v38  ;;  %v765_v49 = vld [vmem:[#allocation2 + $0xc0] sm:$0xff] }
 0x164   : > { %v5598_v42 = vunpack.i.l.bf16 %v5597_v51  ;;  %v5599_v46 = vunpack.i.h.bf16 %v5597_v51  ;;  %5901 = vrot.lane.b32.xlu1 %v5900_v54, %s5933_s19 }
 0x165   : > { %5886 = vrot.lane.b32.xlu0 %v5865_v11, %s5931_s14  ;;  %v764_v11 = vld [vmem:[#allocation2 + $0xb0] sm:$0xff] }
 0x166   : > { %v2144_v26 = vsel %vm2131_vm9, %v2111_v44, %v5598_v42  ;;  %v5622_v56 = vpop.permute.xlu1 %5621  ;;  %v2145_v29 = vsel %vm2131_vm9, %v2112_v1, %v5599_v46  ;;  %v1949_v50 = vsel %vm434_vm0, %v764_v11, %v5604_v3 }
 0x167   : > { %v5607_v9 = vpop.permute.xlu0 %5606  ;;  %2403 = vmatmul.mubr.f32.gmra.mxu0 %v2144_v26  ;;  %v5624_v48 = vunpack.i.h.bf16 %v5622_v56 }
 0x168   : > { %v5609_v58 = vunpack.i.h.bf16 %v5607_v9  ;;  %v5608_v41 = vunpack.i.l.bf16 %v5607_v9  ;;  %5113 = vmatprep.mubr.msk.f32.mxu0 %vm434_vm0, %v1019_v6  ;;  %5911 = vrot.lane.b32.xlu1 %v5910_v53, %s5935_s22  ;;  %v766_v6 = vld [vmem:[#allocation2 + $0xc8] sm:$0xff]  ;;  %s5940_s22 = smov 56  }
 0x169   : > { %5896 = vrot.lane.b32.xlu0 %v5875_v21, %s5936_s23  ;;  %v5623_v21 = vunpack.i.l.bf16 %v5622_v56 }
 0x16a   : > { %v1981_v5 = vsel %vm1966_vm4, %v1948_v61, %v5608_v41  ;;  %v5632_v33 = vpop.permute.xlu1 %5631  ;;  %v1982_v60 = vsel %vm1966_vm4, %v1949_v50, %v5609_v58 }
 0x16b   : > { %v5617_v13 = vpop.permute.xlu0 %5616  ;;  %2408 = vmatmul.mubr.f32.gmra.mxu0 %v2145_v29  ;;  %v2014_v18 = vsel %vm1999_vm5, %v1981_v5, %v5613_v12  ;;  %v2015_v22 = vsel %vm1999_vm5, %v1982_v60, %v5614_v62  ;;  %v5633_v28 = vunpack.i.l.bf16 %v5632_v33  ;;  %v5634_v26 = vunpack.i.h.bf16 %v5632_v33 }
 0x16c   : > { %v5619_v2 = vunpack.i.h.bf16 %v5617_v13  ;;  %v5618_v55 = vunpack.i.l.bf16 %v5617_v13  ;;  %5114 = vmatprep.mubr.msk.f32.mxu0 %vm434_vm0, %v6572_v35  ;;  %3024 = vrot.lane.b32.xlu1 %v2734_v14, %s5930_s28 }
 0x16d   : > { %5906 = vrot.lane.b32.xlu0 %v5905_v7, %s5937_s25  ;;  %s8474_s25 = scalar_lea.vmem %s8619_s12, %s6207_s24 }
 0x16e   : > { %v2047_v47 = vsel %vm2032_vm6, %v2014_v18, %v5618_v55  ;;  %v5642_v30 = vpop.permute.xlu1 %5641  ;;  %v2048_v31 = vsel %vm2032_vm6, %v2015_v22, %v5619_v2 }
 0x16f   : > { %v5627_v37 = vpop.permute.xlu0 %5626  ;;  %v2080_v51 = vsel %vm2065_vm7, %v2047_v47, %v5623_v21  ;;  %v2081_v43 = vsel %vm2065_vm7, %v2048_v31, %v5624_v48  ;;  %v5643_v53 = vunpack.i.l.bf16 %v5642_v30  ;;  %v5644_v1 = vunpack.i.h.bf16 %v5642_v30 }
 0x170   : > { %v5629_v25 = vunpack.i.h.bf16 %v5627_v37  ;;  %v5628_v35 = vunpack.i.l.bf16 %v5627_v37  ;;  %3152 = vrot.lane.b32.xlu1 %v2766_v40, %s5932_s15 }
 0x171   : > { %3022 = vrot.lane.b32.xlu0 %v2733_v20, %s5930_s28 }
 0x172   : > { %v2113_v38 = vsel %vm2098_vm8, %v2080_v51, %v5628_v35  ;;  %v5652_v42 = vpop.permute.xlu1 %5651  ;;  %v2114_v46 = vsel %vm2098_vm8, %v2081_v43, %v5629_v25  ;;  %v1023_v25 = vld [vmem:[#allocation2 + $0xfa] sm:$0xff] }
 0x173   : > { %v5637_v4 = vpop.permute.xlu0 %5636  ;;  %v2146_v54 = vsel %vm2131_vm9, %v2113_v38, %v5633_v28  ;;  %v2147_v9 = vsel %vm2131_vm9, %v2114_v46, %v5634_v26  ;;  %v5653_v7 = vunpack.i.l.bf16 %v5652_v42  ;;  %v767_v35 = vld [vmem:[#allocation2 + $0xd8] sm:$0xff] }
 0x174   : > { %v5638_v44 = vunpack.i.l.bf16 %v5637_v4  ;;  %2413 = vmatmul.mubr.f32.gmra.mxu0 %v2146_v54  ;;  %v5639_v17 = vunpack.i.h.bf16 %v5637_v4  ;;  %v768_v4 = vld [vmem:[#allocation2 + $0xe0] sm:$0xff] }
 0x175   : > { %5115 = vmatprep.mubr.msk.f32.mxu0 %vm434_vm0, %v1021_v45  ;;  %3150 = vrot.lane.b32.xlu0 %v2765_v39, %s5932_s15 }
 0x176   : > { %v1950_v52 = vsel %vm434_vm0, %v765_v49, %v5638_v44  ;;  %v5662_v3 = vpop.permute.xlu1 %5661  ;;  %v1951_v58 = vsel %vm434_vm0, %v766_v6, %v5639_v17 }
 0x177   : > { %v5647_v36 = vpop.permute.xlu0 %5646  ;;  %v1983_v57 = vsel %vm1966_vm4, %v1950_v52, %v5643_v53  ;;  %v1984_v50 = vsel %vm1966_vm4, %v1951_v58, %v5644_v1  ;;  %v5663_v60 = vunpack.i.l.bf16 %v5662_v3  ;;  %v5664_v30 = vunpack.i.h.bf16 %v5662_v3 }
 0x178   : > { %v5648_v56 = vunpack.i.l.bf16 %v5647_v36  ;;  %2418 = vmatmul.mubr.f32.gmra.mxu0 %v2147_v9  ;;  %v5649_v41 = vunpack.i.h.bf16 %v5647_v36 }
 0x179   : > { %5116 = vmatprep.mubr.msk.f32.mxu0 %vm434_vm0, %v6594_v8  ;;  %v5654_v8 = vunpack.i.h.bf16 %v5652_v42 }
 0x17a   : > { %v2016_v61 = vsel %vm1999_vm5, %v1983_v57, %v5648_v56  ;;  %v5672_v5 = vpop.permute.xlu1 %5671  ;;  %v2017_v13 = vsel %vm1999_vm5, %v1984_v50, %v5649_v41 }
 0x17b   : > { %v5657_v11 = vpop.permute.xlu0 %5656  ;;  %v2049_v12 = vsel %vm2032_vm6, %v2016_v61, %v5653_v7  ;;  %v5673_v18 = vunpack.i.l.bf16 %v5672_v5  ;;  %v2050_v20 = vsel %vm2032_vm6, %v2017_v13, %v5654_v8  ;;  %v5674_v40 = vunpack.i.h.bf16 %v5672_v5 }
 0x17c   : > { %v5658_v29 = vunpack.i.l.bf16 %v5657_v11  ;;  %v5659_v33 = vunpack.i.h.bf16 %v5657_v11 }
 0x17d   : > { %v1952_v38 = vsel %vm434_vm0, %v767_v35, %v5673_v18  ;;  %v1953_v43 = vsel %vm434_vm0, %v768_v4, %v5674_v40 }
 0x17e   : > { %v2082_v14 = vsel %vm2065_vm7, %v2049_v12, %v5658_v29  ;;  %v5682_v55 = vpop.permute.xlu1 %5681  ;;  %v2083_v37 = vsel %vm2065_vm7, %v2050_v20, %v5659_v33 }
 0x17f   : > { %v5667_v2 = vpop.permute.xlu0 %5666  ;;  %v2115_v47 = vsel %vm2098_vm8, %v2082_v14, %v5663_v60  ;;  %v2116_v39 = vsel %vm2098_vm8, %v2083_v37, %v5664_v30  ;;  %v5683_v44 = vunpack.i.l.bf16 %v5682_v55  ;;  %v5684_v52 = vunpack.i.h.bf16 %v5682_v55 }
 0x180   : > { %v5668_v62 = vunpack.i.l.bf16 %v5667_v2  ;;  %v5669_v21 = vunpack.i.h.bf16 %v5667_v2  ;;  %v769_v2 = vld [vmem:[#allocation2 + $0xf0] sm:$0xff] }
 0x182   : > { %v2148_v22 = vsel %vm2131_vm9, %v2115_v47, %v5668_v62  ;;  %v5692_v51 = vpop.permute.xlu1 %5691  ;;  %v2149_v54 = vsel %vm2131_vm9, %v2116_v39, %v5669_v21 }
 0x183   : > { %v5677_v31 = vpop.permute.xlu0 %5676  ;;  %2423 = vmatmul.mubr.f32.gmra.mxu0 %v2148_v22  ;;  %v5693_v3 = vunpack.i.l.bf16 %v5692_v51  ;;  %v5694_v61 = vunpack.i.h.bf16 %v5692_v51  ;;  %v770_v22 = vld [vmem:[#allocation2 + $0xf8] sm:$0xff] }
 0x184   : > { %v5679_v48 = vunpack.i.h.bf16 %v5677_v31  ;;  %v5678_v28 = vunpack.i.l.bf16 %v5677_v31  ;;  %5117 = vmatprep.mubr.msk.f32.mxu0 %vm434_vm0, %v1023_v25 }
 0x186   : > { %v1985_v42 = vsel %vm1966_vm4, %v1952_v38, %v5678_v28  ;;  %v1986_v46 = vsel %vm1966_vm4, %v1953_v43, %v5679_v48  ;;  %v5702_v17 = vpop.permute.xlu1 %5701 }
 0x187   : > { %v5687_v45 = vpop.permute.xlu0 %5686  ;;  %2428 = vmatmul.mubr.f32.gmra.mxu0 %v2149_v54  ;;  %v2018_v53 = vsel %vm1999_vm5, %v1985_v42, %v5683_v44  ;;  %v2019_v9 = vsel %vm1999_vm5, %v1986_v46, %v5684_v52  ;;  %v5703_v1 = vunpack.i.l.bf16 %v5702_v17  ;;  %v5704_v13 = vunpack.i.h.bf16 %v5702_v17 }
 0x188   : > { %v5689_v26 = vunpack.i.h.bf16 %v5687_v45  ;;  %v5688_v49 = vunpack.i.l.bf16 %v5687_v45  ;;  %5118 = vmatprep.mubr.msk.f32.mxu0 %vm434_vm0, %v6646_v16 }
 0x18a   : > { %v2051_v36 = vsel %vm2032_vm6, %v2018_v53, %v5688_v49  ;;  %v2052_v6 = vsel %vm2032_vm6, %v2019_v9, %v5689_v26  ;;  %v5712_v41 = vpop.permute.xlu1 %5711  ;;  %v1027_v53 = vld [vmem:[#allocation2 + $0x12a] sm:$0xff] }
 0x18b   : > { %v5697_v56 = vpop.permute.xlu0 %5696  ;;  %v2084_v7 = vsel %vm2065_vm7, %v2051_v36, %v5693_v3  ;;  %v2085_v29 = vsel %vm2065_vm7, %v2052_v6, %v5694_v61  ;;  %v5713_v21 = vunpack.i.l.bf16 %v5712_v41 }
 0x18c   : > { %v5699_v57 = vunpack.i.h.bf16 %v5697_v56  ;;  %v5698_v58 = vunpack.i.l.bf16 %v5697_v56 }
 0x18e   : > { %v2117_v16 = vsel %vm2098_vm8, %v2084_v7, %v5698_v58  ;;  %v5722_v50 = vpop.permute.xlu1 %5721  ;;  %v2118_v12 = vsel %vm2098_vm8, %v2085_v29, %v5699_v57 }
 0x18f   : > { %v5707_v11 = vpop.permute.xlu0 %5706  ;;  %v2150_v5 = vsel %vm2131_vm9, %v2117_v16, %v5703_v1  ;;  %v2151_v14 = vsel %vm2131_vm9, %v2118_v12, %v5704_v13  ;;  %v5723_v48 = vunpack.i.l.bf16 %v5722_v50  ;;  %v5724_v45 = vunpack.i.h.bf16 %v5722_v50 }
 0x190   : > { %2433 = vmatmul.mubr.f32.gmra.mxu0 %v2150_v5  ;;  %v5708_v8 = vunpack.i.l.bf16 %v5707_v11  ;;  %v5709_v62 = vunpack.i.h.bf16 %v5707_v11  ;;  %v771_v5 = vld [vmem:[#allocation2 + $0x108] sm:$0xff] }
 0x191   : > { %5119 = vmatprep.mubr.msk.f32.mxu0 %vm434_vm0, %v6648_v10 }
 0x192   : > { %v5732_v60 = vpop.permute.xlu1 %5731  ;;  %v1954_v18 = vsel %vm434_vm0, %v769_v2, %v5708_v8  ;;  %v1955_v30 = vsel %vm434_vm0, %v770_v22, %v5709_v62 }
 0x193   : > { %v5717_v33 = vpop.permute.xlu0 %5716  ;;  %v1987_v10 = vsel %vm1966_vm4, %v1954_v18, %v5713_v21  ;;  %v5734_v58 = vunpack.i.h.bf16 %v5732_v60 }
 0x194   : > { %2438 = vmatmul.mubr.f32.gmra.mxu0 %v2151_v14  ;;  %v5718_v47 = vunpack.i.l.bf16 %v5717_v33  ;;  %v5719_v40 = vunpack.i.h.bf16 %v5717_v33 }
 0x195   : > { %5120 = vmatprep.mubr.msk.f32.mxu0 %vm434_vm0, %v6707_v15  ;;  %v5714_v15 = vunpack.i.h.bf16 %v5712_v41  ;;  %v5733_v41 = vunpack.i.l.bf16 %v5732_v60  ;;  %v1956_v13 = vsel %vm434_vm0, %v771_v5, %v5734_v58 }
 0x196   : > { %v5742_v20 = vpop.permute.xlu1 %5741  ;;  %v2020_v31 = vsel %vm1999_vm5, %v1987_v10, %v5718_v47 }
 0x197   : > { %v5727_v55 = vpop.permute.xlu0 %5726  ;;  %v1988_v51 = vsel %vm1966_vm4, %v1955_v30, %v5714_v15  ;;  %v2053_v39 = vsel %vm2032_vm6, %v2020_v31, %v5723_v48  ;;  %v5744_v1 = vunpack.i.h.bf16 %v5742_v20  ;;  %v5743_v7 = vunpack.i.l.bf16 %v5742_v20 }
 0x198   : > { %v5728_v25 = vunpack.i.l.bf16 %v5727_v55  ;;  %v2021_v4 = vsel %vm1999_vm5, %v1988_v51, %v5719_v40  ;;  %v5729_v42 = vunpack.i.h.bf16 %v5727_v55  ;;  %v1959_v33 = vsel %vm434_vm0, %v6664_v32, %v5733_v41 }
 0x199   : > { %v2054_v36 = vsel %vm2032_vm6, %v2021_v4, %v5724_v45  ;;  %v1989_v2 = vsel %vm1966_vm4, %v1956_v13, %v5744_v1  ;;  %v1030_v13 = vld [vmem:[#allocation2 + $0x152] sm:$0xff] }
 0x19a   : > { %v5752_v35 = vpop.permute.xlu1 %5751  ;;  %v2086_v44 = vsel %vm2065_vm7, %v2053_v39, %v5728_v25  ;;  %v2087_v9 = vsel %vm2065_vm7, %v2054_v36, %v5729_v42 }
 0x19b   : > { %v5737_v37 = vpop.permute.xlu0 %5736  ;;  %v5754_v16 = vunpack.i.h.bf16 %v5752_v35  ;;  %v5753_v11 = vunpack.i.l.bf16 %v5752_v35 }
 0x19c   : > { %v5738_v28 = vunpack.i.l.bf16 %v5737_v37  ;;  %v5739_v46 = vunpack.i.h.bf16 %v5737_v37 }
 0x19d   : > { %v2022_v18 = vsel %vm1999_vm5, %v1989_v2, %v5754_v16 }
 0x19e   : > { %v6995_v43 = vpop.permute.xlu1 %5761  ;;  %v2119_v26 = vsel %vm2098_vm8, %v2086_v44, %v5738_v28  ;;  %v2120_v56 = vsel %vm2098_vm8, %v2087_v9, %v5739_v46  ;;  %v772_v44 = vld [vmem:[#allocation2 + $0x110] sm:$0xff] }
 0x19f   : > { %v5747_v38 = vpop.permute.xlu0 %5746  ;;  %v5764_v31 = vunpack.i.h.bf16 %v6995_v43  ;;  %v5763_v25 = vunpack.i.l.bf16 %v6995_v43 }
 0x1a0   : > { %v5748_v54 = vunpack.i.l.bf16 %v5747_v38  ;;  %v5749_v49 = vunpack.i.h.bf16 %v5747_v38 }
 0x1a2   : > { %v2152_v17 = vsel %vm2131_vm9, %v2119_v26, %v5748_v54  ;;  %v7001_v3 = vpop.permute.xlu1 %5771  ;;  %v2153_v6 = vsel %vm2131_vm9, %v2120_v56, %v5749_v49  ;;  %v1029_v54 = vld [vmem:[#allocation2 + $0x142] sm:$0xff]  ;;  %v1957_v26 = vsel %vm434_vm0, %v772_v44, %v5764_v31  ;;  %v1960_v49 = vsel %vm434_vm0, %v6724_v34, %v5763_v25 }
 0x1a3   : > { %v5757_v52 = vpop.permute.xlu0 %5756  ;;  %2443 = vmatmul.mubr.f32.gmra.mxu0 %v2152_v17  ;;  %v5774_v48 = vunpack.i.h.bf16 %v7001_v3  ;;  %v5773_v28 = vunpack.i.l.bf16 %v7001_v3 }
 0x1a4   : > { %5121 = vmatprep.mubr.msk.f32.mxu0 %vm434_vm0, %v1027_v53  ;;  %v5759_v29 = vunpack.i.h.bf16 %v5757_v52  ;;  %v5758_v50 = vunpack.i.l.bf16 %v5757_v52 }
 0x1a5   : > { %v1990_v53 = vsel %vm1966_vm4, %v1957_v26, %v5774_v48  ;;  %v1993_v36 = vsel %vm1966_vm4, %v1960_v49, %v5773_v28 }
 0x1a6   : > { %v5782_v61 = vpop.permute.xlu1 %5781  ;;  %v2055_v20 = vsel %vm2032_vm6, %v2022_v18, %v5759_v29 }
 0x1a7   : > { %v5767_v57 = vpop.permute.xlu0 %5766  ;;  %2448 = vmatmul.mubr.f32.gmra.mxu0 %v2153_v6  ;;  %v5784_v39 = vunpack.i.h.bf16 %v5782_v61  ;;  %v5783_v4 = vunpack.i.l.bf16 %v5782_v61 }
 0x1a8   : > { %5122 = vmatprep.mubr.msk.f32.mxu0 %vm434_vm0, %v6693_v63  ;;  %v5769_v14 = vunpack.i.h.bf16 %v5767_v57  ;;  %v5768_v8 = vunpack.i.l.bf16 %v5767_v57  ;;  %v1992_v63 = vsel %vm1966_vm4, %v1959_v33, %v5743_v7 }
 0x1a9   : > { %v2025_v47 = vsel %vm1999_vm5, %v1992_v63, %v5753_v11  ;;  %v2023_v56 = vsel %vm1999_vm5, %v1990_v53, %v5784_v39  ;;  %v2026_v6 = vsel %vm1999_vm5, %v1993_v36, %v5783_v4 }
 0x1aa   : > { %v5792_v60 = vpop.permute.xlu1 %5791  ;;  %v2058_v21 = vsel %vm2032_vm6, %v2025_v47, %v5758_v50  ;;  %v2088_v30 = vsel %vm2065_vm7, %v2055_v20, %v5769_v14  ;;  %v773_v20 = vld [vmem:[#allocation2 + $0x120] sm:$0xff] }
 0x1ab   : > { %v5777_v12 = vpop.permute.xlu0 %5776  ;;  %v2091_v40 = vsel %vm2065_vm7, %v2058_v21, %v5768_v8  ;;  %v5794_v43 = vunpack.i.h.bf16 %v5792_v60  ;;  %v5793_v45 = vunpack.i.l.bf16 %v5792_v60  ;;  %v776_v21 = vld [vmem:[#allocation2 + $0x140] sm:$0xff] }
 0x1ac   : > { %v5779_v55 = vunpack.i.h.bf16 %v5777_v12  ;;  %v5778_v62 = vunpack.i.l.bf16 %v5777_v12 }
 0x1ad   : > { %v2059_v58 = vsel %vm2032_vm6, %v2026_v6, %v5793_v45 }
 0x1ae   : > { %v5802_v37 = vpop.permute.xlu1 %5801  ;;  %v2121_v35 = vsel %vm2098_vm8, %v2088_v30, %v5779_v55  ;;  %v2124_v15 = vsel %vm2098_vm8, %v2091_v40, %v5778_v62 }
 0x1af   : > { %v5787_v22 = vpop.permute.xlu0 %5786  ;;  %v5804_v17 = vunpack.i.h.bf16 %v5802_v37  ;;  %v5803_v52 = vunpack.i.l.bf16 %v5802_v37 }
 0x1b0   : > { %v5789_v10 = vunpack.i.h.bf16 %v5787_v22  ;;  %v5788_v32 = vunpack.i.l.bf16 %v5787_v22 }
 0x1b1   : > { %v2092_v7 = vsel %vm2065_vm7, %v2059_v58, %v5803_v52 }
 0x1b2   : > { %v2154_v51 = vsel %vm2131_vm9, %v2121_v35, %v5789_v10  ;;  %v2157_v38 = vsel %vm2131_vm9, %v2124_v15, %v5788_v32  ;;  %v5812_v46 = vpop.permute.xlu1 %5811 }
 0x1b3   : > { %v5797_v42 = vpop.permute.xlu0 %5796  ;;  %2453 = vmatmul.mubr.f32.gmra.mxu0 %v2154_v51  ;;  %2468 = vmatmul.mubr.f32.vlgmr.msra.gmra.mxu1 %v2157_v38  ;;  %v5814_v3 = vunpack.i.h.bf16 %v5812_v46  ;;  %v5813_v9 = vunpack.i.l.bf16 %v5812_v46 }
 0x1b4   : > { %5123 = vmatprep.mubr.msk.f32.mxu0 %vm434_vm0, %v1029_v54  ;;  %5126 = vmatprep.mubr.msk.f32.mxu1 %vm434_vm0, %v6883_v59  ;;  %v2056_v59 = vsel %vm2032_vm6, %v2023_v56, %v5794_v43  ;;  %v5799_v60 = vunpack.i.h.bf16 %v5797_v42  ;;  %v5798_v2 = vunpack.i.l.bf16 %v5797_v42 }
 0x1b5   : > { %v2089_v1 = vsel %vm2065_vm7, %v2056_v59, %v5804_v17  ;;  %v2125_v11 = vsel %vm2098_vm8, %v2092_v7, %v5813_v9  ;;  %v777_v17 = vld [vmem:[#allocation2 + $0x150] sm:$0xff]  ;;  %v7080_v59 = vld [vmem:[%s8610_s3] ss:$0 sm:$0xff] }
 0x1b6   : > { %v5822_v41 = vpop.permute.xlu1 %5821  ;;  %v2122_v16 = vsel %vm2098_vm8, %v2089_v1, %v5814_v3  ;;  %v1958_v37 = vsel %vm434_vm0, %v773_v20, %v5799_v60 }
 0x1b7   : > { %v5807_v57 = vpop.permute.xlu0 %5806  ;;  %v5824_v61 = vunpack.i.h.bf16 %v5822_v41  ;;  %v5823_v34 = vunpack.i.l.bf16 %v5822_v41 }
 0x1b8   : > { %v5809_v55 = vunpack.i.h.bf16 %v5807_v57  ;;  %v5808_v62 = vunpack.i.l.bf16 %v5807_v57 }
 0x1b9   : > { %v2155_v29 = vsel %vm2131_vm9, %v2122_v16, %v5824_v61  ;;  %v2158_v50 = vsel %vm2131_vm9, %v2125_v11, %v5823_v34  ;;  %v778_v34 = vld [vmem:[#allocation2 + $0x158] sm:$0xff] }
 0x1ba   : > { %v7046_v12 = vpop.permute.xlu1 %5831  ;;  %2458 = vmatmul.mubr.f32.gmra.mxu0 %v2155_v29  ;;  %2473 = vmatmul.mubr.f32.gmra.mxu1 %v2158_v50  ;;  %v1991_v25 = vsel %vm1966_vm4, %v1958_v37, %v5809_v55  ;;  %v7088_v29 = vld [vmem:[%s8611_s4] ss:$0 sm:$0xff] }
 0x1bb   : > { %v5817_v5 = vpop.permute.xlu0 %5816  ;;  %5124 = vmatprep.mubr.msk.f32.mxu0 %vm434_vm0, %v1030_v13  ;;  %5127 = vmatprep.mubr.msk.f32.mxu1 %vm434_vm0, %v6885_v23  ;;  %v1961_v23 = vsel %vm434_vm0, %v776_v21, %v5798_v2  ;;  %v5833_v38 = vunpack.i.l.bf16 %v7046_v12  ;;  %v5834_v52 = vunpack.i.h.bf16 %v7046_v12 }
 0x1bc   : > { %v5819_v18 = vunpack.i.h.bf16 %v5817_v5  ;;  %v5818_v47 = vunpack.i.l.bf16 %v5817_v5  ;;  %v1994_v35 = vsel %vm1966_vm4, %v1961_v23, %v5808_v62 }
 0x1bd   : > { %v1962_v9 = vsel %vm434_vm0, %v777_v17, %v5833_v38  ;;  %v1963_v50 = vsel %vm434_vm0, %v778_v34, %v5834_v52 }
 0x1be   : > { %v7051_v14 = vpop.permute.xlu1 %5841  ;;  %v2024_v28 = vsel %vm1999_vm5, %v1991_v25, %v5819_v18  ;;  %v2027_v51 = vsel %vm1999_vm5, %v1994_v35, %v5818_v47 }
 0x1bf   : > { %v5827_v33 = vpop.permute.xlu0 %5826  ;;  %v5843_v42 = vunpack.i.l.bf16 %v7051_v14  ;;  %v5844_v56 = vunpack.i.h.bf16 %v7051_v14 }
 0x1c0   : > { %v5829_v22 = vunpack.i.h.bf16 %v5827_v33  ;;  %v5828_v10 = vunpack.i.l.bf16 %v5827_v33 }
 0x1c1   : > { %v1995_v58 = vsel %vm1966_vm4, %v1962_v9, %v5843_v42  ;;  %v1996_v33 = vsel %vm1966_vm4, %v1963_v50, %v5844_v56 }
 0x1c2   : > { %v7053_v63 = vpop.permute.xlu1 %5851  ;;  %v2057_v39 = vsel %vm2032_vm6, %v2024_v28, %v5829_v22  ;;  %v2060_v4 = vsel %vm2032_vm6, %v2027_v51, %v5828_v10 }
 0x1c3   : > { %v5837_v8 = vpop.permute.xlu0 %5836  ;;  %v5853_v54 = vunpack.i.l.bf16 %v7053_v63  ;;  %v5854_v41 = vunpack.i.h.bf16 %v7053_v63 }
 0x1c4   : > { %v5839_v30 = vunpack.i.h.bf16 %v5837_v8  ;;  %v5838_v40 = vunpack.i.l.bf16 %v5837_v8 }
 0x1c5   : > { %v2028_v1 = vsel %vm1999_vm5, %v1995_v58, %v5853_v54  ;;  %v2029_v2 = vsel %vm1999_vm5, %v1996_v33, %v5854_v41  ;;  %v1036_v54 = vld [vmem:[#allocation2 + $0x19a] sm:$0xff] }
 0x1c6   : > { %v5862_v31 = vpop.permute.xlu1 %5861  ;;  %v2090_v26 = vsel %vm2065_vm7, %v2057_v39, %v5839_v30  ;;  %v2093_v49 = vsel %vm2065_vm7, %v2060_v4, %v5838_v40 }
 0x1c7   : > { %v5847_v32 = vpop.permute.xlu0 %5846  ;;  %v5863_v53 = vunpack.i.l.bf16 %v5862_v31  ;;  %v5864_v7 = vunpack.i.h.bf16 %v5862_v31 }
 0x1c8   : > { %v5849_v15 = vunpack.i.h.bf16 %v5847_v32  ;;  %v5848_v48 = vunpack.i.l.bf16 %v5847_v32 }
 0x1c9   : > { %v2061_v12 = vsel %vm2032_vm6, %v2028_v1, %v5863_v53 }
 0x1ca   : > { %v7066_v46 = vpop.permute.xlu1 %5871  ;;  %v2123_v36 = vsel %vm2098_vm8, %v2090_v26, %v5849_v15  ;;  %v2126_v3 = vsel %vm2098_vm8, %v2093_v49, %v5848_v48  ;;  %v779_v48 = vld [vmem:[#allocation2 + $0x168] sm:$0xff] }
 0x1cb   : > { %v5857_v44 = vpop.permute.xlu0 %5856  ;;  %v5873_v63 = vunpack.i.l.bf16 %v7066_v46  ;;  %v5874_v31 = vunpack.i.h.bf16 %v7066_v46 }
 0x1cc   : > { %v5859_v43 = vunpack.i.h.bf16 %v5857_v44  ;;  %v5858_v45 = vunpack.i.l.bf16 %v5857_v44 }
 0x1ce   : > { %v2156_v6 = vsel %vm2131_vm9, %v2123_v36, %v5859_v43  ;;  %v2159_v57 = vsel %vm2131_vm9, %v2126_v3, %v5858_v45  ;;  %v5882_v11 = vpop.permute.xlu1 %5881 }
 0x1cf   : > { %v5867_v61 = vpop.permute.xlu0 %5866  ;;  %2463 = vmatmul.mubr.f32.gmra.mxu0 %v2156_v6  ;;  %2478 = vmatmul.mubr.f32.gmra.mxu1 %v2159_v57  ;;  %v5883_v21 = vunpack.i.l.bf16 %v5882_v11  ;;  %v5884_v25 = vunpack.i.h.bf16 %v5882_v11 }
 0x1d0   : > { %v5868_v16 = vunpack.i.l.bf16 %v5867_v61  ;;  %v2344_v5 = vpop.f32.mrf.mxu0  ;;  %5128 = vmatprep.mubr.msk.f32.mxu1 %vm434_vm0, %v6905_v24  ;;  %v5869_v14 = vunpack.i.h.bf16 %v5867_v61  ;;  %v2062_v24 = vsel %vm2032_vm6, %v2029_v2, %v5864_v7  ;;  %v1037_v2 = vld [vmem:[#allocation2 + $0x1a2] sm:$0xff] }
 0x1d1   : > { %v2510_v13 = vmul.f32 %v7080_v59, %v2344_v5  ;;  %v1964_v39 = vsel %vm434_vm0, %v779_v48, %v5883_v21  ;;  %v1965_v45 = vsel %vm434_vm0, %v6857_v19, %v5884_v25  ;;  %v4278_v48 = vld [vmem:[%s8612_s5 + $0x28] sm:$0xff] }
 0x1d2   : > { %v2346_v8 = vpop.f32.mrf.mxu0  ;;  %v2094_v60 = vsel %vm2065_vm7, %v2061_v12, %v5868_v16  ;;  %v5892_v47 = vpop.permute.xlu1 %5891  ;;  %v2095_v40 = vsel %vm2065_vm7, %v2062_v24, %v5869_v14 }
 0x1d3   : > { %v2549_v55 = vadd.f32 %v7088_v29, %v2510_v13  ;;  %v5877_v62 = vpop.permute.xlu0 %5876  ;;  %v2127_v32 = vsel %vm2098_vm8, %v2094_v60, %v5873_v63  ;;  %v2128_v42 = vsel %vm2098_vm8, %v2095_v40, %v5874_v31  ;;  %v5893_v46 = vunpack.i.l.bf16 %v5892_v47  ;;  %v4279_v40 = vld [vmem:[%s8612_s5 + $0x30] sm:$0xff] }
 0x1d4   : > { %v5878_v18 = vunpack.i.l.bf16 %v5877_v62  ;;  %v2349_v20 = vpop.f32.mrf.mxu0  ;;  %v5879_v37 = vunpack.i.h.bf16 %v5877_v62  ;;  %v5894_v36 = vunpack.i.h.bf16 %v5892_v47 }
 0x1d5   : > { %v2581_v22 = vmax.f32 %v2549_v55, 0.0  ;;  %v2511_v10 = vmul.f32 %v7080_v59, %v2349_v20 }
 0x1d6   : > { %v2351_v23 = vpop.f32.mrf.mxu0  ;;  %v2160_v30 = vsel %vm2131_vm9, %v2127_v32, %v5878_v18  ;;  %v5902_v38 = vpop.permute.xlu1 %5901  ;;  %v2161_v43 = vsel %vm2131_vm9, %v2128_v42, %v5879_v37  ;;  %v4280_v37 = vld [vmem:[%s8612_s5 + $0x38] sm:$0xff] }
 0x1d7   : > { %2669 = vst.msk [vmem:[#allocation3 + $0x19] sm:$0xff] %vm523_vm2, %v2581_v22  ;;  %v2550_v35 = vadd.f32 %v7088_v29, %v2511_v10  ;;  %v5887_v15 = vpop.permute.xlu0 %5886  ;;  %2483 = vmatmul.mubr.f32.gmra.mxu1 %v2160_v30  ;;  %v5903_v58 = vunpack.i.l.bf16 %v5902_v38  ;;  %v5904_v50 = vunpack.i.h.bf16 %v5902_v38  ;;  %v4281_v10 = vld [vmem:[%s8612_s5 + $0x40] sm:$0xff] }
 0x1d8   : > { %v5889_v28 = vunpack.i.h.bf16 %v5887_v15  ;;  %v5888_v51 = vunpack.i.l.bf16 %v5887_v15  ;;  %5129 = vmatprep.mubr.msk.f32.mxu1 %vm434_vm0, %v6907_v27  ;;  %5222 = vmatprep.subr.mxu1 %v4281_v10 }
 0x1d9   : > { %v2582_v4 = vmax.f32 %v2550_v35, 0.0  ;;  %5223 = vmatpush3.msra.mxu1 %v4281_v10 }
 0x1da   : > { %v1997_v44 = vsel %vm1966_vm4, %v1964_v39, %v5888_v51  ;;  %v1998_v27 = vsel %vm1966_vm4, %v1965_v45, %v5889_v28  ;;  %v5912_v53 = vpop.permute.xlu1 %5911  ;;  %5224 = vmatprep.subr.mxu1 %v4280_v37 }
 0x1db   : > { %2670 = vst.msk [vmem:[#allocation3 + $0x21] sm:$0xff] %vm523_vm2, %v2582_v4  ;;  %v5897_v26 = vpop.permute.xlu0 %5896  ;;  %2488 = vmatmul.mubr.f32.gmra.mxu1 %v2161_v43  ;;  %v2354_v52 = vpop.f32.mrf.mxu0  ;;  %v2030_v3 = vsel %vm1999_vm5, %v1997_v44, %v5893_v46  ;;  %v2031_v41 = vsel %vm1999_vm5, %v1998_v27, %v5894_v36  ;;  %v5913_v1 = vunpack.i.l.bf16 %v5912_v53  ;;  %v5914_v63 = vunpack.i.h.bf16 %v5912_v53  ;;  %v4277_v4 = vld [vmem:[%s8612_s5 + $0x20] sm:$0xff]  ;;  %v4275_v43 = vld [vmem:[%s8612_s5 + $0x10] sm:$0xff]  ;;  %v4274_v46 = vld [vmem:[%s8612_s5 + $0x8] sm:$0xff] }
 0x1dc   : > { %v5899_v49 = vunpack.i.h.bf16 %v5897_v26  ;;  %v5898_v17 = vunpack.i.l.bf16 %v5897_v26  ;;  %5130 = vmatprep.mubr.msk.f32.mxu1 %vm434_vm0, %v1036_v54  ;;  %v2512_v9 = vmul.f32 %v7080_v59, %v2354_v52  ;;  %5225 = vmatpush3.msra.mxu1 %v4280_v37  ;;  %v4276_v54 = vld [vmem:[%s8612_s5 + $0x18] sm:$0xff] }
 0x1dd   : > { %v2356_v56 = vpop.f32.mrf.mxu0  ;;  %5226 = vmatprep.subr.mxu1 %v4279_v40 }
 0x1de   : > { %v2063_v19 = vsel %vm2032_vm6, %v2030_v3, %v5898_v17  ;;  %v7122_v6 = vld [vmem:[#allocation3 + $0x18] sm:$0xff]  ;;  %v2551_v61 = vadd.f32 %v7088_v29, %v2512_v9  ;;  %v2064_v7 = vsel %vm2032_vm6, %v2031_v41, %v5899_v49  ;;  %5227 = vmatpush3.msra.mxu1 %v4279_v40  ;;  %v4273_v17 = vld [vmem:[%s8612_s5] sm:$0xff] }
 0x1df   : > { %v2735_v57 = vld [vmem:[#allocation3 + $0x19] sm:$0xff]  ;;  %3278 = vrot.lane.b32.xlu0 %v7122_v6, %s5938_s30  ;;  %v5907_v34 = vpop.permute.xlu0 %5906  ;;  %v2359_v5 = vpop.f32.mrf.mxu0  ;;  %v2096_v33 = vsel %vm2065_vm7, %v2063_v19, %v5903_v58  ;;  %v2097_v24 = vsel %vm2065_vm7, %v2064_v7, %v5904_v50  ;;  %5228 = vmatprep.subr.mxu1 %v4278_v48 }
 0x1e0   : > { %3026 = vrot.lane.b32.xlu1 %v2735_v57, %s5930_s28  ;;  %v5909_v16 = vunpack.i.h.bf16 %v5907_v34  ;;  %v5908_v11 = vunpack.i.l.bf16 %v5907_v34  ;;  %v2583_v12 = vmax.f32 %v2551_v61, 0.0  ;;  %v2513_v13 = vmul.f32 %v7080_v59, %v2359_v5  ;;  %5229 = vmatpush3.msra.mxu1 %v4278_v48 }
 0x1e1   : > { %v2361_v14 = vpop.f32.mrf.mxu0  ;;  %5230 = vmatprep.subr.mxu1 %v4277_v4 }
 0x1e2   : > { %v7132_v8 = vld [vmem:[#allocation3 + $0x20] sm:$0xff]  ;;  %v2129_v60 = vsel %vm2098_vm8, %v2096_v33, %v5908_v11  ;;  %2671 = vst.msk [vmem:[#allocation3 + $0x31] sm:$0xff] %vm523_vm2, %v2583_v12  ;;  %v2552_v55 = vadd.f32 %v7088_v29, %v2513_v13  ;;  %v2130_v18 = vsel %vm2098_vm8, %v2097_v24, %v5909_v16  ;;  %5231 = vmatpush3.msra.mxu1 %v4277_v4 }
 0x1e3   : > { %3406 = vrot.lane.b32.xlu0 %v2735_v57, %s5931_s14  ;;  %v2162_v62 = vsel %vm2131_vm9, %v2129_v60, %v5913_v1  ;;  %v2830_v20 = vld [vmem:[#allocation3 + $0x21] sm:$0xff]  ;;  %v2163_v22 = vsel %vm2131_vm9, %v2130_v18, %v5914_v63  ;;  %5232 = vmatprep.subr.mxu1 %v4276_v54 }
 0x1e4   : > { %3280 = vrot.lane.b32.xlu1 %v7132_v8, %s5938_s30  ;;  %2493 = vmatmul.mubr.f32.gmra.mxu1 %v2162_v62  ;;  %v2584_v47 = vmax.f32 %v2552_v55, 0.0  ;;  %v2861_v21 = vld [vmem:[#allocation3 + $0x1a] sm:$0xff]  ;;  %v2862_v25 = vld [vmem:[#allocation3 + $0x22] sm:$0xff] }
 0x1e5   : > { %5131 = vmatprep.mubr.msk.f32.mxu1 %vm434_vm0, %v1037_v2  ;;  %5233 = vmatpush3.msra.mxu1 %v4276_v54 }
 0x1e6   : > { %2672 = vst.msk [vmem:[#allocation3 + $0x39] sm:$0xff] %vm523_vm2, %v2584_v47  ;;  %5234 = vmatprep.subr.mxu1 %v4275_v43 }
 0x1e7   : > { %3408 = vrot.lane.b32.xlu0 %v2830_v20, %s5931_s14  ;;  %5235 = vmatpush3.msra.mxu1 %v4275_v43 }
 0x1e8   : > { %3534 = vrot.lane.b32.xlu1 %v2861_v21, %s5939_s16  ;;  %2498 = vmatmul.mubr.f32.gmra.mxu1 %v2163_v22 }
 0x1e9   : > { %v7161_v35 = vld [vmem:[#allocation3 + $0x30] sm:$0xff]  ;;  %5236 = vmatprep.subr.mxu1 %v4274_v46 }
 0x1ea   : > { %v2926_v44 = vld [vmem:[#allocation3 + $0x31] sm:$0xff]  ;;  %5237 = vmatpush3.msra.mxu1 %v4274_v46 }
 0x1eb   : > { %3028 = vrot.lane.b32.xlu0 %v2830_v20, %s5930_s28  ;;  %v2364_v32 = vpop.f32.mrf.mxu0  ;;  %5238 = vmatprep.subr.mxu1 %v4273_v17 }
 0x1ec   : > { %3154 = vrot.lane.b32.xlu1 %v2861_v21, %s5932_s15  ;;  %v2514_v23 = vmul.f32 %v7080_v59, %v2364_v32  ;;  %5239 = vmatpush3.msra.mxu1 %v4273_v17 }
 0x1ed   : > { %v2366_v30 = vpop.f32.mrf.mxu0  ;;  %v7187_v45 = vld [vmem:[#allocation3 + $0x38] sm:$0xff]  ;;  %5288 = vmatprep.subr.mxu1 %v5929_v0 }
 0x1ee   : > { %v2553_v31 = vadd.f32 %v7088_v29, %v2514_v23  ;;  %v2958_v53 = vld [vmem:[#allocation3 + $0x32] sm:$0xff]  ;;  %v2959_v41 = vld [vmem:[#allocation3 + $0x3a] sm:$0xff] }
 0x1ef   : > { %3536 = vrot.lane.b32.xlu0 %v2862_v25, %s5939_s16  ;;  %v2369_v15 = vpop.f32.mrf.mxu0  ;;  %v2832_v57 = vld [vmem:[#allocation3 + $0x39] sm:$0xff] }
 0x1f0   : > { %3662 = vrot.lane.b32.xlu1 %v7161_v35, %s5934_s20  ;;  %v2585_v28 = vmax.f32 %v2553_v31, 0.0  ;;  %v2515_v51 = vmul.f32 %v7080_v59, %v2369_v15 }
 0x1f1   : > { %v2371_v38 = vpop.f32.mrf.mxu0 }
 0x1f2   : > { %2673 = vst.msk [vmem:[#allocation3 + $0x49] sm:$0xff] %vm523_vm2, %v2585_v28  ;;  %v2554_v39 = vadd.f32 %v7088_v29, %v2515_v51 }
 0x1f3   : > { %3156 = vrot.lane.b32.xlu0 %v2862_v25, %s5932_s15 }
 0x1f4   : > { %3282 = vrot.lane.b32.xlu1 %v7161_v35, %s5938_s30  ;;  %v2586_v42 = vmax.f32 %v2554_v39, 0.0 }
 0x1f6   : > { %2674 = vst.msk [vmem:[#allocation3 + $0x51] sm:$0xff] %vm523_vm2, %v2586_v42 }
 0x1f7   : > { %3030 = vrot.lane.b32.xlu0 %v2926_v44, %s5930_s28 }
 0x1f8   : > { %3790 = vrot.lane.b32.xlu1 %v2926_v44, %s5940_s22 }
 0x1f9   : > { %v7217_v12 = vld [vmem:[#allocation3 + $0x48] sm:$0xff] }
 0x1fa   : > { %v2928_v14 = vld [vmem:[#allocation3 + $0x49] sm:$0xff] }
 0x1fb   : > { %3664 = vrot.lane.b32.xlu0 %v7187_v45, %s5934_s20  ;;  %v2374_v26 = vpop.f32.mrf.mxu0 }
 0x1fc   : > { %3410 = vrot.lane.b32.xlu1 %v2926_v44, %s5931_s14  ;;  %v2516_v27 = vmul.f32 %v7080_v59, %v2374_v26 }
 0x1fd   : > { %v2376_v49 = vpop.f32.mrf.mxu0  ;;  %v7231_v55 = vld [vmem:[#allocation3 + $0x50] sm:$0xff] }
 0x1fe   : > { %v2555_v52 = vadd.f32 %v7088_v29, %v2516_v27  ;;  %v2960_v21 = vld [vmem:[#allocation3 + $0x4a] sm:$0xff]  ;;  %v2961_v37 = vld [vmem:[#allocation3 + $0x52] sm:$0xff] }
 0x1ff   : > { %3284 = vrot.lane.b32.xlu0 %v7187_v45, %s5938_s30  ;;  %v2379_v36 = vpop.f32.mrf.mxu0  ;;  %v2834_v32 = vld [vmem:[#allocation3 + $0x51] sm:$0xff] }
 0x200   : > { %3918 = vrot.lane.b32.xlu1 %v2958_v53, %s5936_s23  ;;  %v2587_v3 = vmax.f32 %v2555_v52, 0.0  ;;  %v2517_v9 = vmul.f32 %v7080_v59, %v2379_v36 }
 0x201   : > { %v2381_v19 = vpop.f32.mrf.mxu0 }
 0x202   : > { %2675 = vst.msk [vmem:[#allocation3 + $0x61] sm:$0xff] %vm523_vm2, %v2587_v3  ;;  %v2556_v56 = vadd.f32 %v7088_v29, %v2517_v9 }
 0x203   : > { %3792 = vrot.lane.b32.xlu0 %v2832_v57, %s5940_s22 }
 0x204   : > { %3412 = vrot.lane.b32.xlu1 %v2832_v57, %s5931_s14  ;;  %v2588_v58 = vmax.f32 %v2556_v56, 0.0 }
 0x206   : > { %2676 = vst.msk [vmem:[#allocation3 + $0x69] sm:$0xff] %vm523_vm2, %v2588_v58  ;;  %v7284_v58 = vpop.permute.xlu1 %3024 }
 0x207   : > { %3538 = vrot.lane.b32.xlu0 %v2958_v53, %s5939_s16 }
 0x208   : > { %3920 = vrot.lane.b32.xlu1 %v2959_v41, %s5936_s23  ;;  %v2384_v61 = vpop.f32.mrf.mxu0 }
 0x209   : > { %v2518_v34 = vmul.f32 %v7080_v59, %v2384_v61  ;;  %v7255_v38 = vld [vmem:[#allocation3 + $0x60] sm:$0xff]  ;;  %v7286_v61 = vpop.permute.xlu0 %3022 }
 0x20a   : > { %v2386_v1 = vpop.f32.mrf.mxu0  ;;  %v2930_v44 = vld [vmem:[#allocation3 + $0x61] sm:$0xff] }
 0x20b   : > { %v2557_v7 = vadd.f32 %v7088_v29, %v2518_v34  ;;  %3032 = vrot.lane.b32.xlu0 %v2832_v57, %s5930_s28 }
 0x20c   : > { %3158 = vrot.lane.b32.xlu1 %v2958_v53, %s5932_s15  ;;  %v2389_v16 = vpop.f32.mrf.mxu0 }
 0x20d   : > { %v2589_v11 = vmax.f32 %v2557_v7, 0.0  ;;  %v2519_v5 = vmul.f32 %v7080_v59, %v2389_v16  ;;  %v7269_v17 = vld [vmem:[#allocation3 + $0x68] sm:$0xff] }
 0x20e   : > { %v2391_v50 = vpop.f32.mrf.mxu0  ;;  %v2962_v36 = vld [vmem:[#allocation3 + $0x62] sm:$0xff] }
 0x20f   : > { %2677 = vst.msk [vmem:[#allocation3 + $0x79] sm:$0xff] %vm523_vm2, %v2589_v11  ;;  %v2558_v13 = vadd.f32 %v7088_v29, %v2519_v5  ;;  %3540 = vrot.lane.b32.xlu0 %v2959_v41, %s5939_s16  ;;  %v2836_v3 = vld [vmem:[#allocation3 + $0x69] sm:$0xff]  ;;  %v7295_v50 = vpop.permute.xlu0 %3150 }
 0x210   : > { %3666 = vrot.lane.b32.xlu1 %v7217_v12, %s5934_s20 }
 0x211   : > { %v2590_v33 = vmax.f32 %v2558_v13, 0.0  ;;  %v7297_v13 = vpop.permute.xlu1 %3152 }
 0x213   : > { %2678 = vst.msk [vmem:[#allocation3 + $0x81] sm:$0xff] %vm523_vm2, %v2590_v33  ;;  %3160 = vrot.lane.b32.xlu0 %v2959_v41, %s5932_s15  ;;  %v2963_v41 = vld [vmem:[#allocation3 + $0x6a] sm:$0xff] }
 0x214   : > { %3286 = vrot.lane.b32.xlu1 %v7217_v12, %s5938_s30 }
 0x216   : > { %v7300_v33 = vld [vmem:[#allocation3 + $0x78] sm:$0xff] }
 0x217   : > { %3034 = vrot.lane.b32.xlu0 %v2928_v14, %s5930_s28 }
 0x218   : > { %3794 = vrot.lane.b32.xlu1 %v2928_v14, %s5940_s22  ;;  %v2394_v60 = vpop.f32.mrf.mxu0 }
 0x219   : > { %v2520_v2 = vmul.f32 %v7080_v59, %v2394_v60 }
 0x21a   : > { %v2396_v63 = vpop.f32.mrf.mxu0 }
 0x21b   : > { %v2559_v62 = vadd.f32 %v7088_v29, %v2520_v2  ;;  %3668 = vrot.lane.b32.xlu0 %v7231_v55, %s5934_s20 }
 0x21c   : > { %3414 = vrot.lane.b32.xlu1 %v2928_v14, %s5931_s14  ;;  %v2399_v24 = vpop.f32.mrf.mxu0 }
 0x21d   : > { %v2591_v18 = vmax.f32 %v2559_v62, 0.0  ;;  %v2521_v47 = vmul.f32 %v7080_v59, %v2399_v24 }
 0x21e   : > { %v2401_v20 = vpop.f32.mrf.mxu0 }
 0x21f   : > { %2679 = vst.msk [vmem:[#allocation3 + $0x91] sm:$0xff] %vm523_vm2, %v2591_v18  ;;  %v2560_v22 = vadd.f32 %v7088_v29, %v2521_v47  ;;  %3288 = vrot.lane.b32.xlu0 %v7231_v55, %s5938_s30 }
 0x220   : > { %3922 = vrot.lane.b32.xlu1 %v2960_v21, %s5936_s23 }
 0x221   : > { %v2592_v10 = vmax.f32 %v2560_v22, 0.0 }
 0x223   : > { %2680 = vst.msk [vmem:[#allocation3 + $0x99] sm:$0xff] %vm523_vm2, %v2592_v10  ;;  %3796 = vrot.lane.b32.xlu0 %v2834_v32, %s5940_s22 }
 0x224   : > { %3416 = vrot.lane.b32.xlu1 %v2834_v32, %s5931_s14 }
 0x227   : > { %3542 = vrot.lane.b32.xlu0 %v2960_v21, %s5939_s16  ;;  %v2404_v23 = vpop.f32.mrf.mxu0 }
 0x228   : > { %3924 = vrot.lane.b32.xlu1 %v2961_v37, %s5936_s23  ;;  %v2522_v30 = vmul.f32 %v7080_v59, %v2404_v23 }
 0x229   : > { %v2406_v40 = vpop.f32.mrf.mxu0 }
 0x22a   : > { %v2561_v31 = vadd.f32 %v7088_v29, %v2522_v30 }
 0x22b   : > { %3036 = vrot.lane.b32.xlu0 %v2834_v32, %s5930_s28  ;;  %v2409_v25 = vpop.f32.mrf.mxu0  ;;  %v2932_v32 = vld [vmem:[#allocation3 + $0x79] sm:$0xff] }
 0x22c   : > { %3162 = vrot.lane.b32.xlu1 %v2960_v21, %s5932_s15  ;;  %v2593_v15 = vmax.f32 %v2561_v31, 0.0  ;;  %v2523_v48 = vmul.f32 %v7080_v59, %v2409_v25  ;;  %v7321_v31 = vld [vmem:[#allocation3 + $0x80] sm:$0xff] }
 0x22d   : > { %v2411_v28 = vpop.f32.mrf.mxu0 }
 0x22e   : > { %2681 = vst.msk [vmem:[#allocation3 + $0xa9] sm:$0xff] %vm523_vm2, %v2593_v15  ;;  %v2562_v51 = vadd.f32 %v7088_v29, %v2523_v48  ;;  %v2964_v48 = vld [vmem:[#allocation3 + $0x7a] sm:$0xff] }
 0x22f   : > { %3544 = vrot.lane.b32.xlu0 %v2961_v37, %s5939_s16 }
 0x230   : > { %3670 = vrot.lane.b32.xlu1 %v7255_v38, %s5934_s20  ;;  %v2594_v39 = vmax.f32 %v2562_v51, 0.0 }
 0x232   : > { %2682 = vst.msk [vmem:[#allocation3 + $0xb1] sm:$0xff] %vm523_vm2, %v2594_v39  ;;  %v2838_v39 = vld [vmem:[#allocation3 + $0x81] sm:$0xff] }
 0x233   : > { %3164 = vrot.lane.b32.xlu0 %v2961_v37, %s5932_s15 }
 0x234   : > { %3290 = vrot.lane.b32.xlu1 %v7255_v38, %s5938_s30  ;;  %v2414_v4 = vpop.f32.mrf.mxu0 }
 0x235   : > { %v2524_v42 = vmul.f32 %v7080_v59, %v2414_v4 }
 0x236   : > { %v2416_v54 = vpop.f32.mrf.mxu0 }
 0x237   : > { %v2563_v43 = vadd.f32 %v7088_v29, %v2524_v42  ;;  %3038 = vrot.lane.b32.xlu0 %v2930_v44, %s5930_s28 }
 0x238   : > { %3798 = vrot.lane.b32.xlu1 %v2930_v44, %s5940_s22  ;;  %v2419_v46 = vpop.f32.mrf.mxu0 }
 0x239   : > { %v2595_v26 = vmax.f32 %v2563_v43, 0.0  ;;  %v2525_v27 = vmul.f32 %v7080_v59, %v2419_v46  ;;  %v2701_v43 = vld [vmem:[#allocation3] sm:$0xff] }
 0x23a   : > { %v2421_v49 = vpop.f32.mrf.mxu0 }
 0x23b   : > { %2683 = vst.msk [vmem:[#allocation3 + $0xc1] sm:$0xff] %vm523_vm2, %v2595_v26  ;;  %v2564_v52 = vadd.f32 %v7088_v29, %v2525_v27  ;;  %3672 = vrot.lane.b32.xlu0 %v7269_v17, %s5934_s20  ;;  %v2965_v27 = vld [vmem:[#allocation3 + $0x82] sm:$0xff] }
 0x23c   : > { %3418 = vrot.lane.b32.xlu1 %v2930_v44, %s5931_s14 }
 0x23d   : > { %v2596_v53 = vmax.f32 %v2564_v52, 0.0 }
 0x23f   : > { %2684 = vst.msk [vmem:[#allocation3 + $0xc9] sm:$0xff] %vm523_vm2, %v2596_v53  ;;  %3292 = vrot.lane.b32.xlu0 %v7269_v17, %s5938_s30  ;;  %v4014_v53 = vsel %vm523_vm2, %v2701_v43, %v7286_v61 }
 0x240   : > { %3926 = vrot.lane.b32.xlu1 %v2962_v36, %s5936_s23 }
 0x243   : > { %3800 = vrot.lane.b32.xlu0 %v2836_v3, %s5940_s22  ;;  %v2424_v9 = vpop.f32.mrf.mxu0 }
 0x244   : > { %3420 = vrot.lane.b32.xlu1 %v2836_v3, %s5931_s14  ;;  %v2526_v19 = vmul.f32 %v7080_v59, %v2424_v9 }
 0x245   : > { %v2426_v56 = vpop.f32.mrf.mxu0 }
 0x246   : > { %v2565_v57 = vadd.f32 %v7088_v29, %v2526_v19 }
 0x247   : > { %3546 = vrot.lane.b32.xlu0 %v2962_v36, %s5939_s16  ;;  %v2429_v34 = vpop.f32.mrf.mxu0 }
 0x248   : > { %3928 = vrot.lane.b32.xlu1 %v2963_v41, %s5936_s23  ;;  %v2597_v1 = vmax.f32 %v2565_v57, 0.0  ;;  %v2527_v7 = vmul.f32 %v7080_v59, %v2429_v34  ;;  %v4046_v57 = vsel %vm434_vm0, %v4014_v53, %v7295_v50 }
 0x249   : > { %v2431_v16 = vpop.f32.mrf.mxu0 }
 0x24a   : > { %2685 = vst.msk [vmem:[#allocation3 + $0xd9] sm:$0xff] %vm523_vm2, %v2597_v1  ;;  %v2566_v11 = vadd.f32 %v7088_v29, %v2527_v7  ;;  %v2702_v7 = vld [vmem:[#allocation3 + $0x8] sm:$0xff] }
 0x24b   : > { %3040 = vrot.lane.b32.xlu0 %v2836_v3, %s5930_s28 }
 0x24c   : > { %3166 = vrot.lane.b32.xlu1 %v2962_v36, %s5932_s15  ;;  %v2598_v5 = vmax.f32 %v2566_v11, 0.0  ;;  %v7361_v11 = vld [vmem:[#allocation3 + $0x90] sm:$0xff] }
 0x24e   : > { %2686 = vst.msk [vmem:[#allocation3 + $0xe1] sm:$0xff] %vm523_vm2, %v2598_v5 }
 0x24f   : > { %3548 = vrot.lane.b32.xlu0 %v2963_v41, %s5939_s16 }
 0x250   : > { %3674 = vrot.lane.b32.xlu1 %v7300_v33, %s5934_s20  ;;  %v2434_v14 = vpop.f32.mrf.mxu0 }
 0x251   : > { %v2528_v60 = vmul.f32 %v7080_v59, %v2434_v14  ;;  %v3279_v2 = vpop.permute.xlu0 %3278  ;;  %v4015_v14 = vsel %vm523_vm2, %v2702_v7, %v7284_v58 }
 0x252   : > { %v7306_v63 = vpop.permute.xlu1 %3026  ;;  %v2436_v62 = vpop.f32.mrf.mxu0 }
 0x253   : > { %v2567_v24 = vadd.f32 %v7088_v29, %v2528_v60  ;;  %3168 = vrot.lane.b32.xlu0 %v2963_v41, %s5932_s15  ;;  %v4079_v41 = vsel %vm4078_vm11, %v4046_v57, %v3279_v2 }
 0x254   : > { %3294 = vrot.lane.b32.xlu1 %v7300_v33, %s5938_s30  ;;  %v2439_v18 = vpop.f32.mrf.mxu0 }
 0x255   : > { %v2599_v47 = vmax.f32 %v2567_v24, 0.0  ;;  %v2529_v20 = vmul.f32 %v7080_v59, %v2439_v18  ;;  %v3407_v21 = vpop.permute.xlu0 %3406 }
 0x256   : > { %v7313_v22 = vpop.permute.xlu1 %3280  ;;  %v2441_v10 = vpop.f32.mrf.mxu0  ;;  %v4111_v16 = vsel %vm1966_vm4, %v4079_v41, %v3407_v21 }
 0x257   : > { %2687 = vst.msk [vmem:[#allocation3 + $0xf1] sm:$0xff] %vm523_vm2, %v2599_v47  ;;  %v2568_v37 = vadd.f32 %v7088_v29, %v2529_v20  ;;  %3042 = vrot.lane.b32.xlu0 %v2932_v32, %s5930_s28  ;;  %v4047_v20 = vsel %vm434_vm0, %v4015_v14, %v7297_v13  ;;  %v2840_v14 = vld [vmem:[#allocation3 + $0x99] sm:$0xff] }
 0x258   : > { %3802 = vrot.lane.b32.xlu1 %v2932_v32, %s5940_s22  ;;  %v4080_v10 = vsel %vm4078_vm11, %v4047_v20, %v7313_v22  ;;  %v4016_v20 = vsel %vm523_vm2, %v7122_v6, %v7306_v63  ;;  %v7444_v6 = vld [vmem:[#allocation3 + $0xa8] sm:$0xff] }
 0x259   : > { %v2600_v23 = vmax.f32 %v2568_v37, 0.0  ;;  %v7319_v30 = vpop.permute.xlu0 %3408 }
 0x25a   : > { %v3535_v40 = vpop.permute.xlu1 %3534 }
 0x25b   : > { %2688 = vst.msk [vmem:[#allocation3 + $0xf9] sm:$0xff] %vm523_vm2, %v2600_v23  ;;  %3676 = vrot.lane.b32.xlu0 %v7321_v31, %s5934_s20  ;;  %v4144_v5 = vsel %vm4143_vm12, %v4111_v16, %v3535_v40  ;;  %v4112_v23 = vsel %vm1966_vm4, %v4080_v10, %v7319_v30 }
 0x25c   : > { %3422 = vrot.lane.b32.xlu1 %v2932_v32, %s5931_s14 }
 0x25d   : > { %v7327_v25 = vpop.permute.xlu0 %3028 }
 0x25e   : > { %v7329_v15 = vpop.permute.xlu1 %3154 }
 0x25f   : > { %3296 = vrot.lane.b32.xlu0 %v7321_v31, %s5938_s30 }
 0x260   : > { %3930 = vrot.lane.b32.xlu1 %v2964_v48, %s5936_s23 }
 0x261   : > { %v7334_v28 = vpop.permute.xlu0 %3536 }
 0x262   : > { %v3663_v51 = vpop.permute.xlu1 %3662 }
 0x263   : > { %3804 = vrot.lane.b32.xlu0 %v2838_v39, %s5940_s22  ;;  %v2444_v4 = vpop.f32.mrf.mxu0  ;;  %v4176_v50 = vsel %vm1999_vm5, %v4144_v5, %v3663_v51 }
 0x264   : > { %3424 = vrot.lane.b32.xlu1 %v2838_v39, %s5931_s14  ;;  %v2530_v42 = vmul.f32 %v7080_v59, %v2444_v4  ;;  %v4145_v4 = vsel %vm4143_vm12, %v4112_v23, %v7334_v28 }
 0x265   : > { %v7339_v54 = vpop.permute.xlu0 %3156  ;;  %v2446_v26 = vpop.f32.mrf.mxu0 }
 0x266   : > { %v7341_v44 = vpop.permute.xlu1 %3282  ;;  %v2569_v46 = vadd.f32 %v7088_v29, %v2530_v42 }
 0x267   : > { %3550 = vrot.lane.b32.xlu0 %v2964_v48, %s5939_s16  ;;  %v2449_v52 = vpop.f32.mrf.mxu0 }
 0x268   : > { %3932 = vrot.lane.b32.xlu1 %v2965_v27, %s5936_s23  ;;  %v2601_v49 = vmax.f32 %v2569_v46, 0.0  ;;  %v2531_v36 = vmul.f32 %v7080_v59, %v2449_v52 }
 0x269   : > { %v7349_v9 = vpop.permute.xlu0 %3030  ;;  %v2451_v19 = vpop.f32.mrf.mxu0 }
 0x26a   : > { %v3791_v3 = vpop.permute.xlu1 %3790  ;;  %2689 = vst.msk [vmem:[#allocation3 + $0x109] sm:$0xff] %vm523_vm2, %v2601_v49  ;;  %v2570_v56 = vadd.f32 %v7088_v29, %v2531_v36  ;;  %v7400_v49 = vld [vmem:[#allocation3 + $0x98] sm:$0xff] }
 0x26b   : > { %3044 = vrot.lane.b32.xlu0 %v2838_v39, %s5930_s28  ;;  %v4209_v60 = vsel %vm4208_vm13, %v4176_v50, %v3791_v3  ;;  %v2934_v39 = vld [vmem:[#allocation3 + $0x91] sm:$0xff] }
 0x26c   : > { %3170 = vrot.lane.b32.xlu1 %v2964_v48, %s5932_s15  ;;  %v2602_v61 = vmax.f32 %v2570_v56, 0.0 }
 0x26d   : > { %v3665_v1 = vpop.permute.xlu0 %3664 }
 0x26e   : > { %v7358_v34 = vpop.permute.xlu1 %3410  ;;  %2690 = vst.msk [vmem:[#allocation3 + $0x111] sm:$0xff] %vm523_vm2, %v2602_v61  ;;  %v4177_v22 = vsel %vm1999_vm5, %v4145_v4, %v3665_v1  ;;  %v2966_v1 = vld [vmem:[#allocation3 + $0x92] sm:$0xff] }
 0x26f   : > { %3552 = vrot.lane.b32.xlu0 %v2965_v27, %s5939_s16 }
 0x270   : > { %3678 = vrot.lane.b32.xlu1 %v7361_v11, %s5934_s20 }
 0x271   : > { %v7372_v62 = vpop.permute.xlu0 %3284 }
 0x272   : > { %v3919_v2 = vpop.permute.xlu1 %3918 }
 0x273   : > { %v4241_v24 = vsel %vm2032_vm6, %v4209_v60, %v3919_v2  ;;  %v2469_v18 = vpop.f32.mrf.mxu1  ;;  %3172 = vrot.lane.b32.xlu0 %v2965_v27, %s5932_s15  ;;  %v2454_v47 = vpop.f32.mrf.mxu0 }
 0x274   : > { %5240 = vmatprep.mubr.msk.f32.mxu1 %vm4282_vm14, %v4241_v24  ;;  %v2535_v21 = vmul.f32 %v7080_v59, %v2469_v18  ;;  %3298 = vrot.lane.b32.xlu1 %v7361_v11, %s5938_s30  ;;  %v2532_v58 = vmul.f32 %v7080_v59, %v2454_v47  ;;  %v2967_v24 = vld [vmem:[#allocation3 + $0x9a] sm:$0xff] }
 0x275   : > { %v2471_v32 = vpop.f32.mrf.mxu1  ;;  %v3793_v48 = vpop.permute.xlu0 %3792 }
 0x276   : > { %v7385_v37 = vpop.permute.xlu1 %3412  ;;  %v2574_v40 = vadd.f32 %v7088_v29, %v2535_v21  ;;  %v2571_v13 = vadd.f32 %v7088_v29, %v2532_v58  ;;  %v2456_v51 = vpop.f32.mrf.mxu0  ;;  %v4210_v30 = vsel %vm4208_vm13, %v4177_v22, %v3793_v48  ;;  %v4048_v21 = vsel %vm434_vm0, %v4016_v20, %v7329_v15 }
 0x277   : > { %3046 = vrot.lane.b32.xlu0 %v2934_v39, %s5930_s28  ;;  %v4081_v58 = vsel %vm4078_vm11, %v4048_v21, %v7341_v44 }
 0x278   : > { %v2606_v42 = vmax.f32 %v2574_v40, 0.0  ;;  %v2603_v43 = vmax.f32 %v2571_v13, 0.0  ;;  %3806 = vrot.lane.b32.xlu1 %v2934_v39, %s5940_s22  ;;  %v4113_v32 = vsel %vm1966_vm4, %v4081_v58, %v7358_v34 }
 0x279   : > { %v3539_v27 = vpop.permute.xlu0 %3538 }
 0x27a   : > { %v3921_v46 = vpop.permute.xlu1 %3920  ;;  %2694 = vst.msk [vmem:[#allocation3 + $0x141] sm:$0xff] %vm523_vm2, %v2606_v42  ;;  %2691 = vst.msk [vmem:[#allocation3 + $0x121] sm:$0xff] %vm523_vm2, %v2603_v43  ;;  %v2474_v28 = vpop.f32.mrf.mxu1  ;;  %v4146_v40 = vsel %vm4143_vm12, %v4113_v32, %v3539_v27  ;;  %v2968_v32 = vld [vmem:[#allocation3 + $0xaa] sm:$0xff] }
 0x27b   : > { %v4242_v26 = vsel %vm2032_vm6, %v4210_v30, %v3921_v46  ;;  %3680 = vrot.lane.b32.xlu0 %v7400_v49, %s5934_s20  ;;  %v2459_v52 = vpop.f32.mrf.mxu0  ;;  %v2536_v53 = vmul.f32 %v7080_v59, %v2474_v28  ;;  %v4017_v46 = vsel %vm523_vm2, %v7132_v8, %v7327_v25 }
 0x27c   : > { %5241 = vmatmul.mubr.msk.f32.vlgmr.msra.gmra.mxu1 %vm4282_vm14, %v4242_v26  ;;  %3426 = vrot.lane.b32.xlu1 %v2934_v39, %s5931_s14  ;;  %v2533_v36 = vmul.f32 %v7080_v59, %v2459_v52  ;;  %v2476_v19 = vpop.f32.mrf.mxu1  ;;  %v4049_v26 = vsel %vm434_vm0, %v4017_v46, %v7339_v54 }
 0x27d   : > { %v7410_v56 = vpop.permute.xlu0 %3032  ;;  %v2575_v57 = vadd.f32 %v7088_v29, %v2536_v53  ;;  %v2461_v61 = vpop.f32.mrf.mxu0  ;;  %v4082_v52 = vsel %vm4078_vm11, %v4049_v26, %v7372_v62 }
 0x27e   : > { %v7408_v3 = vpop.permute.xlu1 %3158  ;;  %v2572_v41 = vadd.f32 %v7088_v29, %v2533_v36  ;;  %v4114_v8 = vsel %vm1966_vm4, %v4082_v52, %v7385_v37  ;;  %v2936_v36 = vld [vmem:[#allocation3 + $0xa9] sm:$0xff] }
 0x27f   : > { %3300 = vrot.lane.b32.xlu0 %v7400_v49, %s5938_s30  ;;  %v2607_v7 = vmax.f32 %v2575_v57, 0.0 }
 0x280   : > { %3934 = vrot.lane.b32.xlu1 %v2966_v1, %s5936_s23  ;;  %v2604_v16 = vmax.f32 %v2572_v41, 0.0 }
 0x281   : > { %v3541_v50 = vpop.permute.xlu0 %3540  ;;  %2695 = vst.msk [vmem:[#allocation3 + $0x151] sm:$0xff] %vm523_vm2, %v2607_v7 }
 0x282   : > { %v3667_v5 = vpop.permute.xlu1 %3666  ;;  %2692 = vst.msk [vmem:[#allocation3 + $0x129] sm:$0xff] %vm523_vm2, %v2604_v16  ;;  %v4147_v54 = vsel %vm4143_vm12, %v4114_v8, %v3541_v50 }
 0x283   : > { %3808 = vrot.lane.b32.xlu0 %v2840_v14, %s5940_s22  ;;  %v4178_v15 = vsel %vm1999_vm5, %v4146_v40, %v3667_v5  ;;  %v7482_v5 = vld [vmem:[#allocation3 + $0xb0] sm:$0xff] }
 0x284   : > { %3428 = vrot.lane.b32.xlu1 %v2840_v14, %s5931_s14 }
 0x285   : > { %v7423_v2 = vpop.permute.xlu0 %3160 }
 0x286   : > { %v7421_v60 = vpop.permute.xlu1 %3286 }
 0x287   : > { %3554 = vrot.lane.b32.xlu0 %v2966_v1, %s5939_s16 }
 0x288   : > { %3936 = vrot.lane.b32.xlu1 %v2967_v24, %s5936_s23 }
 0x289   : > { %v7427_v47 = vpop.permute.xlu0 %3034 }
 0x28a   : > { %v3795_v18 = vpop.permute.xlu1 %3794 }
 0x28b   : > { %3048 = vrot.lane.b32.xlu0 %v2840_v14, %s5930_s28  ;;  %v4211_v34 = vsel %vm4208_vm13, %v4178_v15, %v3795_v18  ;;  %v5919_v15 = vld [vmem:[%s8610_s3] ss:$0 sm:$0xff] }
 0x28c   : > { %3174 = vrot.lane.b32.xlu1 %v2966_v1, %s5932_s15 }
 0x28d   : > { %v3669_v23 = vpop.permute.xlu0 %3668 }
 0x28e   : > { %v7438_v10 = vpop.permute.xlu1 %3414  ;;  %v4179_v57 = vsel %vm1999_vm5, %v4147_v54, %v3669_v23 }
 0x28f   : > { %v2479_v13 = vpop.f32.mrf.mxu1  ;;  %3556 = vrot.lane.b32.xlu0 %v2967_v24, %s5939_s16  ;;  %v2464_v63 = vpop.f32.mrf.mxu0 }
 0x290   : > { %v2537_v48 = vmul.f32 %v7080_v59, %v2479_v13  ;;  %3682 = vrot.lane.b32.xlu1 %v7444_v6, %s5934_s20  ;;  %v2534_v44 = vmul.f32 %v7080_v59, %v2464_v63  ;;  %v2842_v13 = vld [vmem:[#allocation3 + $0xb1] sm:$0xff] }
 0x291   : > { %v2481_v51 = vpop.f32.mrf.mxu1  ;;  %v7455_v43 = vpop.permute.xlu0 %3288 }
 0x292   : > { %v3923_v39 = vpop.permute.xlu1 %3922  ;;  %v2576_v4 = vadd.f32 %v7088_v29, %v2537_v48  ;;  %v2573_v22 = vadd.f32 %v7088_v29, %v2534_v44  ;;  %v2466_v30 = vpop.f32.mrf.mxu0 }
 0x293   : > { %v4243_v42 = vsel %vm2032_vm6, %v4211_v34, %v3923_v39  ;;  %3176 = vrot.lane.b32.xlu0 %v2967_v24, %s5932_s15 }
 0x294   : > { %5243 = vmatprep.mubr.msk.f32.mxu1 %vm4282_vm14, %v4243_v42  ;;  %v2608_v27 = vmax.f32 %v2576_v4, 0.0  ;;  %v2605_v28 = vmax.f32 %v2573_v22, 0.0  ;;  %3302 = vrot.lane.b32.xlu1 %v7444_v6, %s5938_s30  ;;  %v2969_v4 = vld [vmem:[#allocation3 + $0xb2] sm:$0xff] }
 0x295   : > { %v3797_v25 = vpop.permute.xlu0 %3796 }
 0x296   : > { %v7468_v53 = vpop.permute.xlu1 %3416  ;;  %2696 = vst.msk [vmem:[#allocation3 + $0x159] sm:$0xff] %vm523_vm2, %v2608_v27  ;;  %2693 = vst.msk [vmem:[#allocation3 + $0x139] sm:$0xff] %vm523_vm2, %v2605_v28  ;;  %v4212_v41 = vsel %vm4208_vm13, %v4179_v57, %v3797_v25  ;;  %v4018_v28 = vsel %vm523_vm2, %v7161_v35, %v7349_v9  ;;  %v7531_v57 = vld [vmem:[#allocation3 + $0xc0] sm:$0xff] }
 0x297   : > { %v2484_v19 = vpop.f32.mrf.mxu1  ;;  %3050 = vrot.lane.b32.xlu0 %v2936_v36, %s5930_s28  ;;  %v4050_v8 = vsel %vm434_vm0, %v4018_v28, %v7408_v3 }
 0x298   : > { %v2538_v62 = vmul.f32 %v7080_v59, %v2484_v19  ;;  %3810 = vrot.lane.b32.xlu1 %v2936_v36, %s5940_s22  ;;  %v4083_v25 = vsel %vm4078_vm11, %v4050_v8, %v7421_v60 }
 0x299   : > { %v2486_v37 = vpop.f32.mrf.mxu1  ;;  %v3543_v16 = vpop.permute.xlu0 %3542  ;;  %v4115_v35 = vsel %vm1966_vm4, %v4083_v25, %v7438_v10 }
 0x29a   : > { %v3925_v61 = vpop.permute.xlu1 %3924  ;;  %v2577_v1 = vadd.f32 %v7088_v29, %v2538_v62  ;;  %v4148_v19 = vsel %vm4143_vm12, %v4115_v35, %v3543_v16  ;;  %v4019_v37 = vsel %vm523_vm2, %v7187_v45, %v7410_v56  ;;  %v2938_v56 = vld [vmem:[#allocation3 + $0xc1] sm:$0xff] }
 0x29b   : > { %v4244_v7 = vsel %vm2032_vm6, %v4212_v41, %v3925_v61  ;;  %v2489_v50 = vpop.f32.mrf.mxu1  ;;  %3684 = vrot.lane.b32.xlu0 %v7482_v5, %s5934_s20  ;;  %v4051_v61 = vsel %vm434_vm0, %v4019_v37, %v7423_v2 }
 0x29c   : > { %5244 = vmatmul.mubr.msk.f32.gmra.mxu1 %vm4282_vm14, %v4244_v7  ;;  %v2609_v14 = vmax.f32 %v2577_v1, 0.0  ;;  %v2539_v24 = vmul.f32 %v7080_v59, %v2489_v50  ;;  %3430 = vrot.lane.b32.xlu1 %v2936_v36, %s5931_s14  ;;  %v4084_v1 = vsel %vm4078_vm11, %v4051_v61, %v7455_v43  ;;  %v2941_v61 = vld [vmem:[#allocation3 + $0xe1] sm:$0xff] }
 0x29d   : > { %v2491_v18 = vpop.f32.mrf.mxu1  ;;  %v7493_v58 = vpop.permute.xlu0 %3036  ;;  %v4116_v16 = vsel %vm1966_vm4, %v4084_v1, %v7468_v53  ;;  %v2972_v1 = vld [vmem:[#allocation3 + $0xda] sm:$0xff] }
 0x29e   : > { %v7489_v20 = vpop.permute.xlu1 %3162  ;;  %2697 = vst.msk [vmem:[#allocation3 + $0x169] sm:$0xff] %vm523_vm2, %v2609_v14  ;;  %v2578_v21 = vadd.f32 %v7088_v29, %v2539_v24  ;;  %v7553_v14 = vld [vmem:[#allocation3 + $0xc8] sm:$0xff]  ;;  %v4021_v8 = vsel %vm523_vm2, %v7231_v55, %v7493_v58  ;;  %v2940_v58 = vld [vmem:[#allocation3 + $0xd9] sm:$0xff] }
 0x29f   : > { %3304 = vrot.lane.b32.xlu0 %v7482_v5, %s5938_s30 }
 0x2a0   : > { %v2610_v23 = vmax.f32 %v2578_v21, 0.0  ;;  %3938 = vrot.lane.b32.xlu1 %v2968_v32, %s5936_s23 }
 0x2a1   : > { %v3545_v59 = vpop.permute.xlu0 %3544 }
 0x2a2   : > { %v3671_v40 = vpop.permute.xlu1 %3670  ;;  %2698 = vst.msk [vmem:[#allocation3 + $0x171] sm:$0xff] %vm523_vm2, %v2610_v23  ;;  %v4149_v45 = vsel %vm4143_vm12, %v4116_v16, %v3545_v59  ;;  %v2939_v23 = vld [vmem:[#allocation3 + $0xc9] sm:$0xff] }
 0x2a3   : > { %3812 = vrot.lane.b32.xlu0 %v2842_v13, %s5940_s22  ;;  %v4180_v3 = vsel %vm1999_vm5, %v4148_v19, %v3671_v40  ;;  %v2970_v40 = vld [vmem:[#allocation3 + $0xc2] sm:$0xff] }
 0x2a4   : > { %3432 = vrot.lane.b32.xlu1 %v2842_v13, %s5931_s14  ;;  %v2494_v63 = vpop.f32.mrf.mxu1  ;;  %v7615_v19 = vld [vmem:[#allocation3 + $0xe0] sm:$0xff] }
 0x2a5   : > { %v2540_v48 = vmul.f32 %v5919_v15, %v2494_v63  ;;  %v7506_v34 = vpop.permute.xlu0 %3164 }
 0x2a6   : > { %v7504_v44 = vpop.permute.xlu1 %3290  ;;  %v2496_v51 = vpop.f32.mrf.mxu1  ;;  %v4053_v25 = vsel %vm434_vm0, %v4021_v8, %v7506_v34 }
 0x2a7   : > { %v2579_v39 = vadd.f32 %v7088_v29, %v2540_v48  ;;  %3558 = vrot.lane.b32.xlu0 %v2968_v32, %s5939_s16  ;;  %v5920_v29 = vld [vmem:[%s8611_s4] ss:$0 sm:$0xff] }
 0x2a8   : > { %3940 = vrot.lane.b32.xlu1 %v2969_v4, %s5936_s23  ;;  %v2499_v22 = vpop.f32.mrf.mxu1  ;;  %v2971_v48 = vld [vmem:[#allocation3 + $0xca] sm:$0xff] }
 0x2a9   : > { %v2611_v42 = vmax.f32 %v2579_v39, 0.0  ;;  %v2541_v30 = vmul.f32 %v5919_v15, %v2499_v22  ;;  %v7511_v26 = vpop.permute.xlu0 %3038 }
 0x2aa   : > { %v3799_v46 = vpop.permute.xlu1 %3798  ;;  %v2501_v27 = vpop.f32.mrf.mxu1 }
 0x2ab   : > { %2699 = vst.msk [vmem:[#allocation3 + $0x181] sm:$0xff] %vm523_vm2, %v2611_v42  ;;  %v2580_v52 = vadd.f32 %v5920_v29, %v2541_v30  ;;  %3052 = vrot.lane.b32.xlu0 %v2842_v13, %s5930_s28  ;;  %v4213_v60 = vsel %vm4208_vm13, %v4180_v3, %v3799_v46  ;;  %v7594_v29 = vld [vmem:[#allocation3 + $0xd8] sm:$0xff] }
 0x2ac   : > { %3178 = vrot.lane.b32.xlu1 %v2968_v32, %s5932_s15 }
 0x2ad   : > { %v2612_v36 = vmax.f32 %v2580_v52, 0.0  ;;  %v3673_v9 = vpop.permute.xlu0 %3672 }
 0x2ae   : > { %v3419_v54 = vpop.permute.xlu1 %3418  ;;  %v4181_v2 = vsel %vm1999_vm5, %v4149_v45, %v3673_v9 }
 0x2af   : > { %2700 = vst.msk [vmem:[#allocation3 + $0x189] sm:$0xff] %vm523_vm2, %v2612_v36  ;;  %3560 = vrot.lane.b32.xlu0 %v2969_v4, %s5939_s16 }
 0x2b0   : > { %3686 = vrot.lane.b32.xlu1 %v7531_v57, %s5934_s20 }
 0x2b1   : > { %v7538_v10 = vpop.permute.xlu0 %3292 }
 0x2b2   : > { %v3927_v62 = vpop.permute.xlu1 %3926  ;;  %v4086_v36 = vsel %vm4078_vm11, %v4053_v25, %v7538_v10  ;;  %v2943_v25 = vld [vmem:[#allocation3 + $0xf9] sm:$0xff] }
 0x2b3   : > { %v4245_v41 = vsel %vm2032_vm6, %v4213_v60, %v3927_v62  ;;  %3180 = vrot.lane.b32.xlu0 %v2969_v4, %s5932_s15  ;;  %v4020_v4 = vsel %vm523_vm2, %v7217_v12, %v7427_v47 }
 0x2b4   : > { %5246 = vmatprep.mubr.msk.f32.mxu1 %vm4282_vm14, %v4245_v41  ;;  %3306 = vrot.lane.b32.xlu1 %v7531_v57, %s5938_s30  ;;  %v4052_v22 = vsel %vm434_vm0, %v4020_v4, %v7489_v20 }
 0x2b5   : > { %v3801_v50 = vpop.permute.xlu0 %3800  ;;  %v4085_v42 = vsel %vm4078_vm11, %v4052_v22, %v7504_v44 }
 0x2b6   : > { %v3421_v7 = vpop.permute.xlu1 %3420  ;;  %v4214_v24 = vsel %vm4208_vm13, %v4181_v2, %v3801_v50  ;;  %v4117_v46 = vsel %vm1966_vm4, %v4085_v42, %v3419_v54 }
 0x2b7   : > { %3688 = vrot.lane.b32.xlu0 %v7553_v14, %s5934_s20  ;;  %v4118_v35 = vsel %vm1966_vm4, %v4086_v36, %v3421_v7  ;;  %v2974_v36 = vld [vmem:[#allocation3 + $0xf2] sm:$0xff] }
 0x2b8   : > { %3814 = vrot.lane.b32.xlu1 %v2938_v56, %s5940_s22 }
 0x2b9   : > { %v3547_v21 = vpop.permute.xlu0 %3546 }
 0x2ba   : > { %v3929_v43 = vpop.permute.xlu1 %3928  ;;  %v4150_v28 = vsel %vm4143_vm12, %v4117_v46, %v3547_v21 }
 0x2bb   : > { %v4246_v18 = vsel %vm2032_vm6, %v4214_v24, %v3929_v43  ;;  %3308 = vrot.lane.b32.xlu0 %v7553_v14, %s5938_s30  ;;  %v4022_v43 = vsel %vm523_vm2, %v7255_v38, %v7511_v26 }
 0x2bc   : > { %5247 = vmatmul.mubr.msk.f32.gmra.mxu1 %vm4282_vm14, %v4246_v18  ;;  %3434 = vrot.lane.b32.xlu1 %v2938_v56, %s5931_s14 }
 0x2bd   : > { %v7568_v32 = vpop.permute.xlu0 %3040 }
 0x2be   : > { %v7566_v53 = vpop.permute.xlu1 %3166  ;;  %v4023_v4 = vsel %vm523_vm2, %v7269_v17, %v7568_v32 }
 0x2bf   : > { %3816 = vrot.lane.b32.xlu0 %v2939_v23, %s5940_s22  ;;  %v4054_v18 = vsel %vm434_vm0, %v4022_v43, %v7566_v53 }
 0x2c0   : > { %3942 = vrot.lane.b32.xlu1 %v2970_v40, %s5936_s23 }
 0x2c1   : > { %v3549_v13 = vpop.permute.xlu0 %3548 }
 0x2c2   : > { %v3675_v59 = vpop.permute.xlu1 %3674  ;;  %v4151_v55 = vsel %vm4143_vm12, %v4118_v35, %v3549_v13  ;;  %v7655_v13 = vld [vmem:[#allocation3 + $0xf0] sm:$0xff] }
 0x2c3   : > { %3054 = vrot.lane.b32.xlu0 %v2938_v56, %s5930_s28  ;;  %v4182_v12 = vsel %vm1999_vm5, %v4150_v28, %v3675_v59  ;;  %v2973_v56 = vld [vmem:[#allocation3 + $0xe2] sm:$0xff] }
 0x2c4   : > { %3436 = vrot.lane.b32.xlu1 %v2939_v23, %s5931_s14 }
 0x2c5   : > { %v7576_v15 = vpop.permute.xlu0 %3168 }
 0x2c6   : > { %v7574_v63 = vpop.permute.xlu1 %3294  ;;  %v4055_v22 = vsel %vm434_vm0, %v4023_v4, %v7576_v15 }
 0x2c7   : > { %3562 = vrot.lane.b32.xlu0 %v2970_v40, %s5939_s16  ;;  %v4087_v21 = vsel %vm4078_vm11, %v4054_v18, %v7574_v63 }
 0x2c8   : > { %3944 = vrot.lane.b32.xlu1 %v2971_v48, %s5936_s23 }
 0x2c9   : > { %v7580_v39 = vpop.permute.xlu0 %3042 }
 0x2ca   : > { %v3803_v51 = vpop.permute.xlu1 %3802 }
 0x2cb   : > { %3056 = vrot.lane.b32.xlu0 %v2939_v23, %s5930_s28  ;;  %v4215_v47 = vsel %vm4208_vm13, %v4182_v12, %v3803_v51  ;;  %v2942_v12 = vld [vmem:[#allocation3 + $0xf1] sm:$0xff] }
 0x2cc   : > { %3182 = vrot.lane.b32.xlu1 %v2970_v40, %s5932_s15 }
 0x2cd   : > { %v3677_v27 = vpop.permute.xlu0 %3676 }
 0x2ce   : > { %v3423_v30 = vpop.permute.xlu1 %3422  ;;  %v4183_v34 = vsel %vm1999_vm5, %v4151_v55, %v3677_v27  ;;  %v7676_v27 = vld [vmem:[#allocation3 + $0xf8] sm:$0xff] }
 0x2cf   : > { %3564 = vrot.lane.b32.xlu0 %v2971_v48, %s5939_s16  ;;  %v4119_v59 = vsel %vm1966_vm4, %v4087_v21, %v3423_v30 }
 0x2d0   : > { %3690 = vrot.lane.b32.xlu1 %v7594_v29, %s5934_s20 }
 0x2d1   : > { %v7601_v52 = vpop.permute.xlu0 %3296 }
 0x2d2   : > { %v3931_v20 = vpop.permute.xlu1 %3930  ;;  %v4088_v42 = vsel %vm4078_vm11, %v4055_v22, %v7601_v52  ;;  %v2945_v22 = vld [vmem:[#allocation3 + $0x111] sm:$0xff] }
 0x2d3   : > { %v4247_v44 = vsel %vm2032_vm6, %v4215_v47, %v3931_v20  ;;  %3184 = vrot.lane.b32.xlu0 %v2971_v48, %s5932_s15 }
 0x2d4   : > { %5249 = vmatprep.mubr.msk.f32.mxu1 %vm4282_vm14, %v4247_v44  ;;  %3310 = vrot.lane.b32.xlu1 %v7594_v29, %s5938_s30 }
 0x2d5   : > { %v3805_v9 = vpop.permute.xlu0 %3804 }
 0x2d6   : > { %v3425_v54 = vpop.permute.xlu1 %3424  ;;  %v4216_v3 = vsel %vm4208_vm13, %v4183_v34, %v3805_v9 }
 0x2d7   : > { %3692 = vrot.lane.b32.xlu0 %v7615_v19, %s5934_s20  ;;  %v4120_v28 = vsel %vm1966_vm4, %v4088_v42, %v3425_v54  ;;  %v2976_v42 = vld [vmem:[#allocation3 + $0x10a] sm:$0xff] }
 0x2d8   : > { %3818 = vrot.lane.b32.xlu1 %v2940_v58, %s5940_s22 }
 0x2d9   : > { %v3551_v41 = vpop.permute.xlu0 %3550 }
 0x2da   : > { %v3933_v60 = vpop.permute.xlu1 %3932  ;;  %v4152_v48 = vsel %vm4143_vm12, %v4119_v59, %v3551_v41  ;;  %v7738_v59 = vld [vmem:[#allocation3 + $0x110] sm:$0xff] }
 0x2db   : > { %v4248_v62 = vsel %vm2032_vm6, %v4216_v3, %v3933_v60  ;;  %3312 = vrot.lane.b32.xlu0 %v7615_v19, %s5938_s30  ;;  %v4024_v60 = vsel %vm523_vm2, %v7300_v33, %v7580_v39 }
 0x2dc   : > { %5250 = vmatmul.mubr.msk.f32.gmra.mxu1 %vm4282_vm14, %v4248_v62  ;;  %3438 = vrot.lane.b32.xlu1 %v2940_v58, %s5931_s14 }
 0x2dd   : > { %v7630_v37 = vpop.permute.xlu0 %3044 }
 0x2de   : > { %v7628_v10 = vpop.permute.xlu1 %3170  ;;  %v4025_v43 = vsel %vm523_vm2, %v7321_v31, %v7630_v37 }
 0x2df   : > { %3820 = vrot.lane.b32.xlu0 %v2941_v61, %s5940_s22  ;;  %v4056_v62 = vsel %vm434_vm0, %v4024_v60, %v7628_v10 }
 0x2e0   : > { %3946 = vrot.lane.b32.xlu1 %v2972_v1, %s5936_s23 }
 0x2e1   : > { %v3553_v16 = vpop.permute.xlu0 %3552 }
 0x2e2   : > { %v3679_v7 = vpop.permute.xlu1 %3678  ;;  %v4153_v17 = vsel %vm4143_vm12, %v4120_v28, %v3553_v16  ;;  %v7717_v16 = vld [vmem:[#allocation3 + $0x108] sm:$0xff] }
 0x2e3   : > { %3058 = vrot.lane.b32.xlu0 %v2940_v58, %s5930_s28  ;;  %v4184_v38 = vsel %vm1999_vm5, %v4152_v48, %v3679_v7  ;;  %v2975_v58 = vld [vmem:[#allocation3 + $0xfa] sm:$0xff] }
 0x2e4   : > { %3440 = vrot.lane.b32.xlu1 %v2941_v61, %s5931_s14 }
 0x2e5   : > { %v7636_v50 = vpop.permute.xlu0 %3172 }
 0x2e6   : > { %v7638_v45 = vpop.permute.xlu1 %3298  ;;  %v4057_v18 = vsel %vm434_vm0, %v4025_v43, %v7636_v50 }
 0x2e7   : > { %3566 = vrot.lane.b32.xlu0 %v2972_v1, %s5939_s16  ;;  %v4089_v41 = vsel %vm4078_vm11, %v4056_v62, %v7638_v45 }
 0x2e8   : > { %3948 = vrot.lane.b32.xlu1 %v2973_v56, %s5936_s23 }
 0x2e9   : > { %v7642_v24 = vpop.permute.xlu0 %3046 }
 0x2ea   : > { %v3807_v2 = vpop.permute.xlu1 %3806 }
 0x2eb   : > { %3060 = vrot.lane.b32.xlu0 %v2941_v61, %s5930_s28  ;;  %v4217_v26 = vsel %vm4208_vm13, %v4184_v38, %v3807_v2  ;;  %v2944_v38 = vld [vmem:[#allocation3 + $0x109] sm:$0xff] }
 0x2ec   : > { %3186 = vrot.lane.b32.xlu1 %v2972_v1, %s5932_s15 }
 0x2ed   : > { %v3681_v40 = vpop.permute.xlu0 %3680 }
 0x2ee   : > { %v3427_v23 = vpop.permute.xlu1 %3426  ;;  %v4185_v32 = vsel %vm1999_vm5, %v4153_v17, %v3681_v40  ;;  %v2977_v17 = vld [vmem:[#allocation3 + $0x112] sm:$0xff] }
 0x2ef   : > { %3568 = vrot.lane.b32.xlu0 %v2973_v56, %s5939_s16  ;;  %v4121_v7 = vsel %vm1966_vm4, %v4089_v41, %v3427_v23 }
 0x2f0   : > { %3694 = vrot.lane.b32.xlu1 %v7655_v13, %s5934_s20 }
 0x2f1   : > { %v7662_v51 = vpop.permute.xlu0 %3300 }
 0x2f2   : > { %v3935_v53 = vpop.permute.xlu1 %3934  ;;  %v4090_v21 = vsel %vm4078_vm11, %v4057_v18, %v7662_v51  ;;  %v2947_v18 = vld [vmem:[#allocation3 + $0x129] sm:$0xff] }
 0x2f3   : > { %v4249_v63 = vsel %vm2032_vm6, %v4217_v26, %v3935_v53  ;;  %3188 = vrot.lane.b32.xlu0 %v2973_v56, %s5932_s15 }
 0x2f4   : > { %5252 = vmatprep.mubr.msk.f32.mxu1 %vm4282_vm14, %v4249_v63  ;;  %3314 = vrot.lane.b32.xlu1 %v7655_v13, %s5938_s30 }
 0x2f5   : > { %v3809_v46 = vpop.permute.xlu0 %3808 }
 0x2f6   : > { %v3429_v30 = vpop.permute.xlu1 %3428  ;;  %v4218_v15 = vsel %vm4208_vm13, %v4185_v32, %v3809_v46 }
 0x2f7   : > { %3696 = vrot.lane.b32.xlu0 %v7676_v27, %s5934_s20  ;;  %v4122_v48 = vsel %vm1966_vm4, %v4090_v21, %v3429_v30  ;;  %v2978_v21 = vld [vmem:[#allocation3 + $0x122] sm:$0xff] }
 0x2f8   : > { %3822 = vrot.lane.b32.xlu1 %v2942_v12, %s5940_s22 }
 0x2f9   : > { %v3555_v20 = vpop.permute.xlu0 %3554 }
 0x2fa   : > { %v3937_v47 = vpop.permute.xlu1 %3936  ;;  %v4154_v56 = vsel %vm4143_vm12, %v4121_v7, %v3555_v20  ;;  %v7800_v7 = vld [vmem:[#allocation3 + $0x128] sm:$0xff] }
 0x2fb   : > { %v4250_v44 = vsel %vm2032_vm6, %v4218_v15, %v3937_v47  ;;  %3316 = vrot.lane.b32.xlu0 %v7676_v27, %s5938_s30  ;;  %v4026_v47 = vsel %vm523_vm2, %v7361_v11, %v7642_v24 }
 0x2fc   : > { %5253 = vmatmul.mubr.msk.f32.gmra.mxu1 %vm4282_vm14, %v4250_v44  ;;  %3442 = vrot.lane.b32.xlu1 %v2942_v12, %s5931_s14 }
 0x2fd   : > { %v7692_v8 = vpop.permute.xlu0 %3048 }
 0x2fe   : > { %v7690_v52 = vpop.permute.xlu1 %3174  ;;  %v4027_v60 = vsel %vm523_vm2, %v7400_v49, %v7692_v8 }
 0x2ff   : > { %3824 = vrot.lane.b32.xlu0 %v2943_v25, %s5940_s22  ;;  %v4058_v20 = vsel %vm434_vm0, %v4026_v47, %v7690_v52 }
 0x300   : > { %3950 = vrot.lane.b32.xlu1 %v2974_v36, %s5936_s23 }
 0x301   : > { %v3557_v54 = vpop.permute.xlu0 %3556 }
 0x302   : > { %v3683_v35 = vpop.permute.xlu1 %3682  ;;  %v4155_v31 = vsel %vm4143_vm12, %v4122_v48, %v3557_v54 }
 0x303   : > { %3062 = vrot.lane.b32.xlu0 %v2942_v12, %s5930_s28  ;;  %v4186_v33 = vsel %vm1999_vm5, %v4154_v56, %v3683_v35  ;;  %v7779_v35 = vld [vmem:[#allocation3 + $0x120] sm:$0xff] }
 0x304   : > { %3444 = vrot.lane.b32.xlu1 %v2943_v25, %s5931_s14 }
 0x305   : > { %v7698_v9 = vpop.permute.xlu0 %3176 }
 0x306   : > { %v7700_v55 = vpop.permute.xlu1 %3302  ;;  %v4059_v62 = vsel %vm434_vm0, %v4027_v60, %v7698_v9  ;;  %v2949_v60 = vld [vmem:[#allocation3 + $0x141] sm:$0xff] }
 0x307   : > { %3570 = vrot.lane.b32.xlu0 %v2974_v36, %s5939_s16  ;;  %v4091_v44 = vsel %vm4078_vm11, %v4058_v20, %v7700_v55 }
 0x308   : > { %3952 = vrot.lane.b32.xlu1 %v2975_v58, %s5936_s23 }
 0x309   : > { %v7704_v3 = vpop.permute.xlu0 %3050 }
 0x30a   : > { %v3811_v34 = vpop.permute.xlu1 %3810 }
 0x30b   : > { %3064 = vrot.lane.b32.xlu0 %v2943_v25, %s5930_s28  ;;  %v4219_v39 = vsel %vm4208_vm13, %v4186_v33, %v3811_v34  ;;  %v2946_v33 = vld [vmem:[#allocation3 + $0x121] sm:$0xff] }
 0x30c   : > { %3190 = vrot.lane.b32.xlu1 %v2974_v36, %s5932_s15 }
 0x30d   : > { %v3685_v1 = vpop.permute.xlu0 %3684 }
 0x30e   : > { %v3431_v61 = vpop.permute.xlu1 %3430  ;;  %v4187_v37 = vsel %vm1999_vm5, %v4155_v31, %v3685_v1  ;;  %v2979_v31 = vld [vmem:[#allocation3 + $0x12a] sm:$0xff] }
 0x30f   : > { %3572 = vrot.lane.b32.xlu0 %v2975_v58, %s5939_s16  ;;  %v4123_v54 = vsel %vm1966_vm4, %v4091_v44, %v3431_v61 }
 0x310   : > { %3698 = vrot.lane.b32.xlu1 %v7717_v16, %s5934_s20 }
 0x311   : > { %v7724_v2 = vpop.permute.xlu0 %3304 }
 0x312   : > { %v3939_v10 = vpop.permute.xlu1 %3938  ;;  %v4092_v41 = vsel %vm4078_vm11, %v4059_v62, %v7724_v2  ;;  %v2980_v62 = vld [vmem:[#allocation3 + $0x13a] sm:$0xff] }
 0x313   : > { %v4251_v45 = vsel %vm2032_vm6, %v4219_v39, %v3939_v10  ;;  %3192 = vrot.lane.b32.xlu0 %v2975_v58, %s5932_s15 }
 0x314   : > { %5255 = vmatprep.mubr.msk.f32.mxu1 %vm4282_vm14, %v4251_v45  ;;  %3318 = vrot.lane.b32.xlu1 %v7717_v16, %s5938_s30 }
 0x315   : > { %v3813_v40 = vpop.permute.xlu0 %3812 }
 0x316   : > { %v3433_v23 = vpop.permute.xlu1 %3432  ;;  %v4220_v50 = vsel %vm4208_vm13, %v4187_v37, %v3813_v40 }
 0x317   : > { %3700 = vrot.lane.b32.xlu0 %v7738_v59, %s5934_s20  ;;  %v4124_v56 = vsel %vm1966_vm4, %v4092_v41, %v3433_v23 }
 0x318   : > { %3826 = vrot.lane.b32.xlu1 %v2944_v38, %s5940_s22 }
 0x319   : > { %v3559_v53 = vpop.permute.xlu0 %3558 }
 0x31a   : > { %v3941_v26 = vpop.permute.xlu1 %3940  ;;  %v4156_v58 = vsel %vm4143_vm12, %v4123_v54, %v3559_v53  ;;  %v7862_v54 = vld [vmem:[#allocation3 + $0x140] sm:$0xff] }
 0x31b   : > { %v4252_v51 = vsel %vm2032_vm6, %v4220_v50, %v3941_v26  ;;  %3320 = vrot.lane.b32.xlu0 %v7738_v59, %s5938_s30  ;;  %v4028_v26 = vsel %vm523_vm2, %v7444_v6, %v7704_v3 }
 0x31c   : > { %5256 = vmatmul.mubr.msk.f32.gmra.mxu1 %vm4282_vm14, %v4252_v51  ;;  %3446 = vrot.lane.b32.xlu1 %v2944_v38, %s5931_s14 }
 0x31d   : > { %v7754_v4 = vpop.permute.xlu0 %3052 }
 0x31e   : > { %v7752_v63 = vpop.permute.xlu1 %3178 }
 0x31f   : > { %3828 = vrot.lane.b32.xlu0 %v2945_v22, %s5940_s22  ;;  %v4060_v53 = vsel %vm434_vm0, %v4028_v26, %v7752_v63 }
 0x320   : > { %3954 = vrot.lane.b32.xlu1 %v2976_v42, %s5936_s23 }
 0x321   : > { %v3561_v30 = vpop.permute.xlu0 %3560 }
 0x322   : > { %v3687_v46 = vpop.permute.xlu1 %3686  ;;  %v4157_v49 = vsel %vm4143_vm12, %v4124_v56, %v3561_v30 }
 0x323   : > { %3066 = vrot.lane.b32.xlu0 %v2944_v38, %s5930_s28  ;;  %v4188_v11 = vsel %vm1999_vm5, %v4156_v58, %v3687_v46  ;;  %v7841_v46 = vld [vmem:[#allocation3 + $0x138] sm:$0xff] }
 0x324   : > { %3448 = vrot.lane.b32.xlu1 %v2945_v22, %s5931_s14 }
 0x325   : > { %v7760_v28 = vpop.permute.xlu0 %3180 }
 0x326   : > { %v7762_v12 = vpop.permute.xlu1 %3306 }
 0x327   : > { %3574 = vrot.lane.b32.xlu0 %v2976_v42, %s5939_s16  ;;  %v4093_v51 = vsel %vm4078_vm11, %v4060_v53, %v7762_v12 }
 0x328   : > { %3956 = vrot.lane.b32.xlu1 %v2977_v17, %s5936_s23 }
 0x329   : > { %v3689_v15 = vpop.permute.xlu0 %3688 }
 0x32a   : > { %v3815_v32 = vpop.permute.xlu1 %3814  ;;  %v4189_v8 = vsel %vm1999_vm5, %v4157_v49, %v3689_v15  ;;  %v4029_v15 = vsel %vm523_vm2, %v7482_v5, %v7754_v4  ;;  %v2948_v5 = vld [vmem:[#allocation3 + $0x139] sm:$0xff]  ;;  %v2981_v49 = vld [vmem:[#allocation3 + $0x142] sm:$0xff] }
 0x32b   : > { %3068 = vrot.lane.b32.xlu0 %v2945_v22, %s5930_s28  ;;  %v4221_v24 = vsel %vm4208_vm13, %v4188_v11, %v3815_v32  ;;  %v4061_v47 = vsel %vm434_vm0, %v4029_v15, %v7760_v28  ;;  %v2951_v15 = vld [vmem:[#allocation3 + $0x159] sm:$0xff] }
 0x32c   : > { %3194 = vrot.lane.b32.xlu1 %v2976_v42, %s5932_s15 }
 0x32d   : > { %v7775_v36 = vpop.permute.xlu0 %3308 }
 0x32e   : > { %v3435_v25 = vpop.permute.xlu1 %3434  ;;  %v4094_v20 = vsel %vm4078_vm11, %v4061_v47, %v7775_v36  ;;  %v2982_v47 = vld [vmem:[#allocation3 + $0x152] sm:$0xff] }
 0x32f   : > { %3576 = vrot.lane.b32.xlu0 %v2977_v17, %s5939_s16  ;;  %v4125_v30 = vsel %vm1966_vm4, %v4093_v51, %v3435_v25 }
 0x330   : > { %3702 = vrot.lane.b32.xlu1 %v7779_v35, %s5934_s20 }
 0x331   : > { %v3817_v55 = vpop.permute.xlu0 %3816 }
 0x332   : > { %v3943_v52 = vpop.permute.xlu1 %3942  ;;  %v4222_v9 = vsel %vm4208_vm13, %v4189_v8, %v3817_v55 }
 0x333   : > { %v4253_v34 = vsel %vm2032_vm6, %v4221_v24, %v3943_v52  ;;  %3196 = vrot.lane.b32.xlu0 %v2977_v17, %s5932_s15 }
 0x334   : > { %5258 = vmatprep.mubr.msk.f32.mxu1 %vm4282_vm14, %v4253_v34  ;;  %3322 = vrot.lane.b32.xlu1 %v7779_v35, %s5938_s30 }
 0x335   : > { %v7798_v1 = vpop.permute.xlu0 %3054 }
 0x336   : > { %v3437_v61 = vpop.permute.xlu1 %3436 }
 0x337   : > { %3704 = vrot.lane.b32.xlu0 %v7800_v7, %s5934_s20  ;;  %v4126_v58 = vsel %vm1966_vm4, %v4094_v20, %v3437_v61 }
 0x338   : > { %3830 = vrot.lane.b32.xlu1 %v2946_v33, %s5940_s22 }
 0x339   : > { %v3563_v10 = vpop.permute.xlu0 %3562 }
 0x33a   : > { %v3945_v39 = vpop.permute.xlu1 %3944  ;;  %v4158_v17 = vsel %vm4143_vm12, %v4125_v30, %v3563_v10  ;;  %v7924_v30 = vld [vmem:[#allocation3 + $0x158] sm:$0xff] }
 0x33b   : > { %v4254_v2 = vsel %vm2032_vm6, %v4222_v9, %v3945_v39  ;;  %3324 = vrot.lane.b32.xlu0 %v7800_v7, %s5938_s30  ;;  %v4030_v39 = vsel %vm523_vm2, %v7531_v57, %v7798_v1 }
 0x33c   : > { %5259 = vmatmul.mubr.msk.f32.gmra.mxu1 %vm4282_vm14, %v4254_v2  ;;  %3450 = vrot.lane.b32.xlu1 %v2946_v33, %s5931_s14 }
 0x33d   : > { %v7816_v43 = vpop.permute.xlu0 %3056 }
 0x33e   : > { %v7814_v45 = vpop.permute.xlu1 %3182 }
 0x33f   : > { %3832 = vrot.lane.b32.xlu0 %v2947_v18, %s5940_s22  ;;  %v4062_v10 = vsel %vm434_vm0, %v4030_v39, %v7814_v45 }
 0x340   : > { %3958 = vrot.lane.b32.xlu1 %v2978_v21, %s5936_s23 }
 0x341   : > { %v3565_v23 = vpop.permute.xlu0 %3564 }
 0x342   : > { %v3691_v40 = vpop.permute.xlu1 %3690  ;;  %v4159_v4 = vsel %vm4143_vm12, %v4126_v58, %v3565_v23 }
 0x343   : > { %3070 = vrot.lane.b32.xlu0 %v2946_v33, %s5930_s28  ;;  %v4190_v6 = vsel %vm1999_vm5, %v4158_v17, %v3691_v40  ;;  %v7902_v40 = vld [vmem:[#allocation3 + $0x150] sm:$0xff] }
 0x344   : > { %3452 = vrot.lane.b32.xlu1 %v2947_v18, %s5931_s14 }
 0x345   : > { %v7822_v48 = vpop.permute.xlu0 %3184 }
 0x346   : > { %v7824_v38 = vpop.permute.xlu1 %3310 }
 0x347   : > { %3578 = vrot.lane.b32.xlu0 %v2978_v21, %s5939_s16  ;;  %v4095_v2 = vsel %vm4078_vm11, %v4062_v10, %v7824_v38 }
 0x348   : > { %3960 = vrot.lane.b32.xlu1 %v2979_v31, %s5936_s23 }
 0x349   : > { %v3693_v50 = vpop.permute.xlu0 %3692 }
 0x34a   : > { %v3819_v37 = vpop.permute.xlu1 %3818  ;;  %v4191_v28 = vsel %vm1999_vm5, %v4159_v4, %v3693_v50  ;;  %v4031_v50 = vsel %vm523_vm2, %v7553_v14, %v7816_v43  ;;  %v2983_v4 = vld [vmem:[#allocation3 + $0x15a] sm:$0xff] }
 0x34b   : > { %3072 = vrot.lane.b32.xlu0 %v2947_v18, %s5930_s28  ;;  %v4223_v3 = vsel %vm4208_vm13, %v4190_v6, %v3819_v37  ;;  %v4063_v26 = vsel %vm434_vm0, %v4031_v50, %v7822_v48  ;;  %v2950_v6 = vld [vmem:[#allocation3 + $0x151] sm:$0xff] }
 0x34c   : > { %3198 = vrot.lane.b32.xlu1 %v2978_v21, %s5932_s15  ;;  %v2953_v50 = vld [vmem:[#allocation3 + $0x171] sm:$0xff] }
 0x34d   : > { %v7837_v42 = vpop.permute.xlu0 %3312 }
 0x34e   : > { %v3439_v22 = vpop.permute.xlu1 %3438  ;;  %v4096_v53 = vsel %vm4078_vm11, %v4063_v26, %v7837_v42  ;;  %v2984_v26 = vld [vmem:[#allocation3 + $0x16a] sm:$0xff] }
 0x34f   : > { %3580 = vrot.lane.b32.xlu0 %v2979_v31, %s5939_s16  ;;  %v4127_v23 = vsel %vm1966_vm4, %v4095_v2, %v3439_v22 }
 0x350   : > { %3706 = vrot.lane.b32.xlu1 %v7841_v46, %s5934_s20 }
 0x351   : > { %v3821_v12 = vpop.permute.xlu0 %3820 }
 0x352   : > { %v3947_v63 = vpop.permute.xlu1 %3946  ;;  %v4224_v11 = vsel %vm4208_vm13, %v4191_v28, %v3821_v12 }
 0x353   : > { %v4255_v32 = vsel %vm2032_vm6, %v4223_v3, %v3947_v63  ;;  %3200 = vrot.lane.b32.xlu0 %v2979_v31, %s5932_s15 }
 0x354   : > { %5261 = vmatprep.mubr.msk.f32.mxu1 %vm4282_vm14, %v4255_v32  ;;  %3326 = vrot.lane.b32.xlu1 %v7841_v46, %s5938_s30 }
 0x355   : > { %v7860_v25 = vpop.permute.xlu0 %3058 }
 0x356   : > { %v3441_v44 = vpop.permute.xlu1 %3440 }
 0x357   : > { %3708 = vrot.lane.b32.xlu0 %v7862_v54, %s5934_s20  ;;  %v4128_v17 = vsel %vm1966_vm4, %v4096_v53, %v3441_v44 }
 0x358   : > { %3834 = vrot.lane.b32.xlu1 %v2948_v5, %s5940_s22 }
 0x359   : > { %v3567_v24 = vpop.permute.xlu0 %3566 }
 0x35a   : > { %v3949_v36 = vpop.permute.xlu1 %3948  ;;  %v4160_v31 = vsel %vm4143_vm12, %v4127_v23, %v3567_v24  ;;  %v7986_v23 = vld [vmem:[#allocation3 + $0x170] sm:$0xff] }
 0x35b   : > { %v4256_v52 = vsel %vm2032_vm6, %v4224_v11, %v3949_v36  ;;  %3328 = vrot.lane.b32.xlu0 %v7862_v54, %s5938_s30  ;;  %v4032_v36 = vsel %vm523_vm2, %v7594_v29, %v7860_v25 }
 0x35c   : > { %5262 = vmatmul.mubr.msk.f32.gmra.mxu1 %vm4282_vm14, %v4256_v52  ;;  %3454 = vrot.lane.b32.xlu1 %v2948_v5, %s5931_s14 }
 0x35d   : > { %v7878_v34 = vpop.permute.xlu0 %3060 }
 0x35e   : > { %v7876_v55 = vpop.permute.xlu1 %3186 }
 0x35f   : > { %3836 = vrot.lane.b32.xlu0 %v2949_v60, %s5940_s22  ;;  %v4064_v24 = vsel %vm434_vm0, %v4032_v36, %v7876_v55 }
 0x360   : > { %3962 = vrot.lane.b32.xlu1 %v2980_v62, %s5936_s23 }
 0x361   : > { %v3569_v41 = vpop.permute.xlu0 %3568 }
 0x362   : > { %v3695_v61 = vpop.permute.xlu1 %3694  ;;  %v4161_v14 = vsel %vm4143_vm12, %v4128_v17, %v3569_v41 }
 0x363   : > { %3074 = vrot.lane.b32.xlu0 %v2948_v5, %s5930_s28  ;;  %v4192_v57 = vsel %vm1999_vm5, %v4160_v31, %v3695_v61  ;;  %v7964_v61 = vld [vmem:[#allocation3 + $0x168] sm:$0xff] }
 0x364   : > { %3456 = vrot.lane.b32.xlu1 %v2949_v60, %s5931_s14 }
 0x365   : > { %v7884_v56 = vpop.permute.xlu0 %3188 }
 0x366   : > { %v7886_v33 = vpop.permute.xlu1 %3314 }
 0x367   : > { %3582 = vrot.lane.b32.xlu0 %v2980_v62, %s5939_s16  ;;  %v4097_v52 = vsel %vm4078_vm11, %v4064_v24, %v7886_v33 }
 0x368   : > { %3964 = vrot.lane.b32.xlu1 %v2981_v49, %s5936_s23 }
 0x369   : > { %v3697_v9 = vpop.permute.xlu0 %3696 }
 0x36a   : > { %v3823_v8 = vpop.permute.xlu1 %3822  ;;  %v4193_v43 = vsel %vm1999_vm5, %v4161_v14, %v3697_v9  ;;  %v4033_v9 = vsel %vm523_vm2, %v7615_v19, %v7878_v34  ;;  %v2985_v14 = vld [vmem:[#allocation3 + $0x172] sm:$0xff] }
 0x36b   : > { %3076 = vrot.lane.b32.xlu0 %v2949_v60, %s5930_s28  ;;  %v4225_v1 = vsel %vm4208_vm13, %v4192_v57, %v3823_v8  ;;  %v4065_v39 = vsel %vm434_vm0, %v4033_v9, %v7884_v56  ;;  %v2952_v57 = vld [vmem:[#allocation3 + $0x169] sm:$0xff] }
 0x36c   : > { %3202 = vrot.lane.b32.xlu1 %v2980_v62, %s5932_s15 }
 0x36d   : > { %v7899_v21 = vpop.permute.xlu0 %3316 }
 0x36e   : > { %v3443_v18 = vpop.permute.xlu1 %3442  ;;  %v4098_v10 = vsel %vm4078_vm11, %v4065_v39, %v7899_v21  ;;  %v2986_v39 = vld [vmem:[#allocation3 + $0x182] sm:$0xff] }
 0x36f   : > { %3584 = vrot.lane.b32.xlu0 %v2981_v49, %s5939_s16  ;;  %v4129_v41 = vsel %vm1966_vm4, %v4097_v52, %v3443_v18 }
 0x370   : > { %3710 = vrot.lane.b32.xlu1 %v7902_v40, %s5934_s20 }
 0x371   : > { %v3825_v38 = vpop.permute.xlu0 %3824 }
 0x372   : > { %v3951_v45 = vpop.permute.xlu1 %3950  ;;  %v4226_v48 = vsel %vm4208_vm13, %v4193_v43, %v3825_v38 }
 0x373   : > { %v4257_v37 = vsel %vm2032_vm6, %v4225_v1, %v3951_v45  ;;  %3204 = vrot.lane.b32.xlu0 %v2981_v49, %s5932_s15 }
 0x374   : > { %5264 = vmatprep.mubr.msk.f32.mxu1 %vm4282_vm14, %v4257_v37  ;;  %3330 = vrot.lane.b32.xlu1 %v7902_v40, %s5938_s30 }
 0x375   : > { %v7922_v22 = vpop.permute.xlu0 %3062 }
 0x376   : > { %v3445_v51 = vpop.permute.xlu1 %3444 }
 0x377   : > { %3712 = vrot.lane.b32.xlu0 %v7924_v30, %s5934_s20  ;;  %v4130_v31 = vsel %vm1966_vm4, %v4098_v10, %v3445_v51 }
 0x378   : > { %3838 = vrot.lane.b32.xlu1 %v2950_v6, %s5940_s22 }
 0x379   : > { %v3571_v3 = vpop.permute.xlu0 %3570 }
 0x37a   : > { %v3953_v42 = vpop.permute.xlu1 %3952  ;;  %v4162_v49 = vsel %vm4143_vm12, %v4129_v41, %v3571_v3  ;;  %v2923_v41 = vld [vmem:[#allocation3 + $0x188] sm:$0xff] }
 0x37b   : > { %v4258_v63 = vsel %vm2032_vm6, %v4226_v48, %v3953_v42  ;;  %3332 = vrot.lane.b32.xlu0 %v7924_v30, %s5938_s30  ;;  %v4034_v42 = vsel %vm523_vm2, %v7655_v13, %v7922_v22 }
 0x37c   : > { %5265 = vmatmul.mubr.msk.f32.gmra.mxu1 %vm4282_vm14, %v4258_v63  ;;  %3458 = vrot.lane.b32.xlu1 %v2950_v6, %s5931_s14 }
 0x37d   : > { %v7940_v32 = vpop.permute.xlu0 %3064 }
 0x37e   : > { %v7938_v12 = vpop.permute.xlu1 %3190 }
 0x37f   : > { %3840 = vrot.lane.b32.xlu0 %v2951_v15, %s5940_s22  ;;  %v4066_v3 = vsel %vm434_vm0, %v4034_v42, %v7938_v12 }
 0x380   : > { %3966 = vrot.lane.b32.xlu1 %v2982_v47, %s5936_s23 }
 0x381   : > { %v3573_v20 = vpop.permute.xlu0 %3572 }
 0x382   : > { %v3699_v44 = vpop.permute.xlu1 %3698  ;;  %v4163_v19 = vsel %vm4143_vm12, %v4130_v31, %v3573_v20 }
 0x383   : > { %3078 = vrot.lane.b32.xlu0 %v2950_v6, %s5930_s28  ;;  %v4194_v29 = vsel %vm1999_vm5, %v4162_v49, %v3699_v44  ;;  %v2922_v44 = vld [vmem:[#allocation3 + $0x180] sm:$0xff] }
 0x384   : > { %3460 = vrot.lane.b32.xlu1 %v2951_v15, %s5931_s14 }
 0x385   : > { %v7946_v58 = vpop.permute.xlu0 %3192 }
 0x386   : > { %v7948_v5 = vpop.permute.xlu1 %3318 }
 0x387   : > { %3586 = vrot.lane.b32.xlu0 %v2982_v47, %s5939_s16  ;;  %v4099_v63 = vsel %vm4078_vm11, %v4066_v3, %v7948_v5  ;;  %v2989_v3 = vld [vmem:[#allocation3 + $0x1a2] sm:$0xff] }
 0x388   : > { %3968 = vrot.lane.b32.xlu1 %v2983_v4, %s5936_s23 }
 0x389   : > { %v3701_v11 = vpop.permute.xlu0 %3700 }
 0x38a   : > { %v3827_v28 = vpop.permute.xlu1 %3826  ;;  %v4195_v34 = vsel %vm1999_vm5, %v4163_v19, %v3701_v11  ;;  %v4035_v11 = vsel %vm523_vm2, %v7676_v27, %v7940_v32 }
 0x38b   : > { %3080 = vrot.lane.b32.xlu0 %v2951_v15, %s5930_s28  ;;  %v4227_v25 = vsel %vm4208_vm13, %v4194_v29, %v3827_v28  ;;  %v4067_v36 = vsel %vm434_vm0, %v4035_v11, %v7946_v58  ;;  %v2954_v29 = vld [vmem:[#allocation3 + $0x181] sm:$0xff] }
 0x38c   : > { %3206 = vrot.lane.b32.xlu1 %v2982_v47, %s5932_s15 }
 0x38d   : > { %v7961_v62 = vpop.permute.xlu0 %3320 }
 0x38e   : > { %v3447_v60 = vpop.permute.xlu1 %3446  ;;  %v4100_v24 = vsel %vm4078_vm11, %v4067_v36, %v7961_v62 }
 0x38f   : > { %3588 = vrot.lane.b32.xlu0 %v2983_v4, %s5939_s16  ;;  %v4131_v20 = vsel %vm1966_vm4, %v4099_v63, %v3447_v60 }
 0x390   : > { %3714 = vrot.lane.b32.xlu1 %v7964_v61, %s5934_s20 }
 0x391   : > { %v3829_v33 = vpop.permute.xlu0 %3828 }
 0x392   : > { %v3955_v55 = vpop.permute.xlu1 %3954  ;;  %v4228_v56 = vsel %vm4208_vm13, %v4195_v34, %v3829_v33  ;;  %v2924_v34 = vld [vmem:[#allocation3 + $0x198] sm:$0xff] }
 0x393   : > { %v4259_v8 = vsel %vm2032_vm6, %v4227_v25, %v3955_v55  ;;  %3208 = vrot.lane.b32.xlu0 %v2983_v4, %s5932_s15 }
 0x394   : > { %5267 = vmatprep.mubr.msk.f32.mxu1 %vm4282_vm14, %v4259_v8  ;;  %3334 = vrot.lane.b32.xlu1 %v7964_v61, %s5938_s30  ;;  %v2955_v8 = vld [vmem:[#allocation3 + $0x189] sm:$0xff] }
 0x395   : > { %v7984_v18 = vpop.permute.xlu0 %3066 }
 0x396   : > { %v3449_v2 = vpop.permute.xlu1 %3448 }
 0x397   : > { %3716 = vrot.lane.b32.xlu0 %v7986_v23, %s5934_s20  ;;  %v4132_v49 = vsel %vm1966_vm4, %v4100_v24, %v3449_v2 }
 0x398   : > { %3842 = vrot.lane.b32.xlu1 %v2952_v57, %s5940_s22 }
 0x399   : > { %v3575_v1 = vpop.permute.xlu0 %3574 }
 0x39a   : > { %v3957_v21 = vpop.permute.xlu1 %3956  ;;  %v4164_v4 = vsel %vm4143_vm12, %v4131_v20, %v3575_v1 }
 0x39b   : > { %v4260_v45 = vsel %vm2032_vm6, %v4228_v56, %v3957_v21  ;;  %3336 = vrot.lane.b32.xlu0 %v7986_v23, %s5938_s30  ;;  %v2925_v56 = vld [vmem:[#allocation3 + $0x1a0] sm:$0xff] }
 0x39c   : > { %5268 = vmatmul.mubr.msk.f32.gmra.mxu1 %vm4282_vm14, %v4260_v45  ;;  %3462 = vrot.lane.b32.xlu1 %v2952_v57, %s5931_s14  ;;  %v4036_v45 = vsel %vm523_vm2, %v7717_v16, %v7984_v18  ;;  %v2988_v16 = vld [vmem:[#allocation3 + $0x19a] sm:$0xff] }
 0x39d   : > { %v8002_v37 = vpop.permute.xlu0 %3068 }
 0x39e   : > { %v8000_v38 = vpop.permute.xlu1 %3194 }
 0x39f   : > { %3844 = vrot.lane.b32.xlu0 %v2953_v50, %s5940_s22 }
 0x3a0   : > { %3970 = vrot.lane.b32.xlu1 %v2984_v26, %s5936_s23 }
 0x3a1   : > { %v3577_v53 = vpop.permute.xlu0 %3576 }
 0x3a2   : > { %v3703_v51 = vpop.permute.xlu1 %3702  ;;  %v4165_v27 = vsel %vm4143_vm12, %v4132_v49, %v3577_v53  ;;  %v2957_v53 = vld [vmem:[#allocation3 + $0x1a1] sm:$0xff] }
 0x3a3   : > { %3082 = vrot.lane.b32.xlu0 %v2952_v57, %s5930_s28  ;;  %v4196_v13 = vsel %vm1999_vm5, %v4164_v4, %v3703_v51  ;;  %v2892_v57 = vld [vmem:[#allocation3 + $0x18a] sm:$0xff] }
 0x3a4   : > { %3464 = vrot.lane.b32.xlu1 %v2953_v50, %s5931_s14 }
 0x3a5   : > { %v8008_v17 = vpop.permute.xlu0 %3196 }
 0x3a6   : > { %v8010_v6 = vpop.permute.xlu1 %3322 }
 0x3a7   : > { %3590 = vrot.lane.b32.xlu0 %v2984_v26, %s5939_s16 }
 0x3a8   : > { %3972 = vrot.lane.b32.xlu1 %v2985_v14, %s5936_s23 }
 0x3a9   : > { %v3705_v48 = vpop.permute.xlu0 %3704 }
 0x3aa   : > { %v3831_v43 = vpop.permute.xlu1 %3830  ;;  %v4197_v32 = vsel %vm1999_vm5, %v4165_v27, %v3705_v48 }
 0x3ab   : > { %3084 = vrot.lane.b32.xlu0 %v2953_v50, %s5930_s28  ;;  %v4229_v22 = vsel %vm4208_vm13, %v4196_v13, %v3831_v43  ;;  %v2956_v50 = vld [vmem:[#allocation3 + $0x199] sm:$0xff] }
 0x3ac   : > { %3210 = vrot.lane.b32.xlu1 %v2984_v26, %s5932_s15  ;;  %v4068_v26 = vsel %vm434_vm0, %v4036_v45, %v8000_v38 }
 0x3ad   : > { %v8023_v47 = vpop.permute.xlu0 %3324  ;;  %v4101_v51 = vsel %vm4078_vm11, %v4068_v26, %v8010_v6 }
 0x3ae   : > { %v3451_v15 = vpop.permute.xlu1 %3450 }
 0x3af   : > { %3592 = vrot.lane.b32.xlu0 %v2985_v14, %s5939_s16  ;;  %v4133_v43 = vsel %vm1966_vm4, %v4101_v51, %v3451_v15  ;;  %v4037_v15 = vsel %vm523_vm2, %v7738_v59, %v8002_v37 }
 0x3b0   : > { %3718 = vrot.lane.b32.xlu1 %v2922_v44, %s5934_s20 }
 0x3b1   : > { %v3833_v28 = vpop.permute.xlu0 %3832 }
 0x3b2   : > { %v3959_v12 = vpop.permute.xlu1 %3958  ;;  %v4230_v58 = vsel %vm4208_vm13, %v4197_v32, %v3833_v28 }
 0x3b3   : > { %v4261_v5 = vsel %vm2032_vm6, %v4229_v22, %v3959_v12  ;;  %3212 = vrot.lane.b32.xlu0 %v2985_v14, %s5932_s15 }
 0x3b4   : > { %5270 = vmatprep.mubr.msk.f32.mxu1 %vm4282_vm14, %v4261_v5  ;;  %3338 = vrot.lane.b32.xlu1 %v2922_v44, %s5938_s30  ;;  %v4069_v44 = vsel %vm434_vm0, %v4037_v15, %v8008_v17 }
 0x3b5   : > { %v8044_v60 = vpop.permute.xlu0 %3070  ;;  %v4102_v4 = vsel %vm4078_vm11, %v4069_v44, %v8023_v47 }
 0x3b6   : > { %v8042_v52 = vpop.permute.xlu1 %3452  ;;  %v4038_v32 = vsel %vm523_vm2, %v7779_v35, %v8044_v60 }
 0x3b7   : > { %3720 = vrot.lane.b32.xlu0 %v2923_v41, %s5934_s20  ;;  %v4134_v22 = vsel %vm1966_vm4, %v4102_v4, %v8042_v52 }
 0x3b8   : > { %3846 = vrot.lane.b32.xlu1 %v2954_v29, %s5940_s22 }
 0x3b9   : > { %v3579_v62 = vpop.permute.xlu0 %3578 }
 0x3ba   : > { %v3961_v25 = vpop.permute.xlu1 %3960  ;;  %v4166_v42 = vsel %vm4143_vm12, %v4133_v43, %v3579_v62 }
 0x3bb   : > { %v4262_v55 = vsel %vm2032_vm6, %v4230_v58, %v3961_v25  ;;  %3340 = vrot.lane.b32.xlu0 %v2923_v41, %s5938_s30 }
 0x3bc   : > { %5271 = vmatmul.mubr.msk.f32.gmra.mxu1 %vm4282_vm14, %v4262_v55  ;;  %3466 = vrot.lane.b32.xlu1 %v2954_v29, %s5931_s14 }
 0x3bd   : > { %v8058_v9 = vpop.permute.xlu0 %3072 }
 0x3be   : > { %v8056_v33 = vpop.permute.xlu1 %3198  ;;  %v4039_v35 = vsel %vm523_vm2, %v7800_v7, %v8058_v9 }
 0x3bf   : > { %3848 = vrot.lane.b32.xlu0 %v2955_v8, %s5940_s22  ;;  %v4070_v58 = vsel %vm434_vm0, %v4038_v32, %v8056_v33 }
 0x3c0   : > { %3974 = vrot.lane.b32.xlu1 %v2986_v39, %s5936_s23 }
 0x3c1   : > { %v3581_v2 = vpop.permute.xlu0 %3580 }
 0x3c2   : > { %v3707_v10 = vpop.permute.xlu1 %3706  ;;  %v4167_v28 = vsel %vm4143_vm12, %v4134_v22, %v3581_v2 }
 0x3c3   : > { %3468 = vrot.lane.b32.xlu0 %v2955_v8, %s5931_s14  ;;  %v4198_v18 = vsel %vm1999_vm5, %v4166_v42, %v3707_v10 }
 0x3c4   : > { %3594 = vrot.lane.b32.xlu1 %v2986_v39, %s5939_s16 }
 0x3c5   : > { %v8064_v19 = vpop.permute.xlu0 %3200 }
 0x3c6   : > { %v3327_v31 = vpop.permute.xlu1 %3326  ;;  %v4071_v60 = vsel %vm434_vm0, %v4039_v35, %v8064_v19 }
 0x3c7   : > { %3976 = vrot.lane.b32.xlu0 %v2892_v57, %s5936_s23  ;;  %v4103_v25 = vsel %vm4078_vm11, %v4070_v58, %v3327_v31 }
 0x3c8   : > { %3596 = vrot.lane.b32.xlu1 %v2892_v57, %s5939_s16 }
 0x3c9   : > { %v3709_v1 = vpop.permute.xlu0 %3708 }
 0x3ca   : > { %v3835_v21 = vpop.permute.xlu1 %3834  ;;  %v4199_v5 = vsel %vm1999_vm5, %v4167_v28, %v3709_v1 }
 0x3cb   : > { %3722 = vrot.lane.b32.xlu0 %v2924_v34, %s5934_s20  ;;  %v4231_v38 = vsel %vm4208_vm13, %v4198_v18, %v3835_v21 }
 0x3cc   : > { %3724 = vrot.lane.b32.xlu1 %v2925_v56, %s5934_s20 }
 0x3cd   : > { %v3329_v48 = vpop.permute.xlu0 %3328 }
 0x3ce   : > { %v3455_v14 = vpop.permute.xlu1 %3454  ;;  %v4104_v33 = vsel %vm4078_vm11, %v4071_v60, %v3329_v48 }
 0x3cf   : > { %3850 = vrot.lane.b32.xlu0 %v2956_v50, %s5940_s22  ;;  %v4135_v55 = vsel %vm1966_vm4, %v4103_v25, %v3455_v14 }
 0x3d0   : > { %3852 = vrot.lane.b32.xlu1 %v2957_v53, %s5940_s22 }
 0x3d1   : > { %v3837_v20 = vpop.permute.xlu0 %3836 }
 0x3d2   : > { %v3963_v63 = vpop.permute.xlu1 %3962  ;;  %v4232_v59 = vsel %vm4208_vm13, %v4199_v5, %v3837_v20 }
 0x3d3   : > { %v4263_v6 = vsel %vm2032_vm6, %v4231_v38, %v3963_v63  ;;  %3978 = vrot.lane.b32.xlu0 %v2988_v16, %s5936_s23 }
 0x3d4   : > { %5273 = vmatprep.mubr.msk.f32.mxu1 %vm4282_vm14, %v4263_v6  ;;  %3980 = vrot.lane.b32.xlu1 %v2989_v3, %s5936_s23 }
 0x3d5   : > { %v3075_v12 = vpop.permute.xlu0 %3074 }
 0x3d6   : > { %v3457_v13 = vpop.permute.xlu1 %3456  ;;  %v4040_v3 = vsel %vm523_vm2, %v7841_v46, %v3075_v12 }
 0x3d7   : > { %v4136_v21 = vsel %vm1966_vm4, %v4104_v33, %v3457_v13 }
 0x3d9   : > { %v3583_v36 = vpop.permute.xlu0 %3582 }
 0x3da   : > { %v3965_v37 = vpop.permute.xlu1 %3964  ;;  %v4168_v39 = vsel %vm4143_vm12, %v4135_v55, %v3583_v36 }
 0x3db   : > { %v4264_v11 = vsel %vm2032_vm6, %v4232_v59, %v3965_v37 }
 0x3dc   : > { %5274 = vmatmul.mubr.msk.f32.gmra.mxu1 %vm4282_vm14, %v4264_v11 }
 0x3dd   : > { %v3077_v24 = vpop.permute.xlu0 %3076 }
 0x3de   : > { %v3203_v17 = vpop.permute.xlu1 %3202  ;;  %v4041_v46 = vsel %vm523_vm2, %v7862_v54, %v3077_v24 }
 0x3df   : > { %v4072_v38 = vsel %vm434_vm0, %v4040_v3, %v3203_v17 }
 0x3e1   : > { %v3585_v41 = vpop.permute.xlu0 %3584 }
 0x3e2   : > { %v3711_v47 = vpop.permute.xlu1 %3710  ;;  %v4169_v45 = vsel %vm4143_vm12, %v4136_v21, %v3585_v41 }
 0x3e3   : > { %v4200_v10 = vsel %vm1999_vm5, %v4168_v39, %v3711_v47 }
 0x3e5   : > { %v3205_v29 = vpop.permute.xlu0 %3204 }
 0x3e6   : > { %v3331_v49 = vpop.permute.xlu1 %3330  ;;  %v4073_v12 = vsel %vm434_vm0, %v4041_v46, %v3205_v29 }
 0x3e7   : > { %v4105_v63 = vsel %vm4078_vm11, %v4072_v38, %v3331_v49 }
 0x3e9   : > { %v3713_v27 = vpop.permute.xlu0 %3712 }
 0x3ea   : > { %v3839_v52 = vpop.permute.xlu1 %3838  ;;  %v4201_v50 = vsel %vm1999_vm5, %v4169_v45, %v3713_v27 }
 0x3eb   : > { %v4233_v2 = vsel %vm4208_vm13, %v4200_v10, %v3839_v52 }
 0x3ed   : > { %v3333_v8 = vpop.permute.xlu0 %3332 }
 0x3ee   : > { %v3459_v62 = vpop.permute.xlu1 %3458  ;;  %v4106_v59 = vsel %vm4078_vm11, %v4073_v12, %v3333_v8 }
 0x3ef   : > { %v4137_v6 = vsel %vm1966_vm4, %v4105_v63, %v3459_v62 }
 0x3f1   : > { %v3841_v56 = vpop.permute.xlu0 %3840 }
 0x3f2   : > { %v3967_v57 = vpop.permute.xlu1 %3966  ;;  %v4234_v26 = vsel %vm4208_vm13, %v4201_v50, %v3841_v56 }
 0x3f3   : > { %v4265_v34 = vsel %vm2032_vm6, %v4233_v2, %v3967_v57 }
 0x3f4   : > { %5276 = vmatprep.mubr.msk.f32.mxu1 %vm4282_vm14, %v4265_v34 }
 0x3f5   : > { %v3079_v1 = vpop.permute.xlu0 %3078 }
 0x3f6   : > { %v3461_v31 = vpop.permute.xlu1 %3460  ;;  %v4042_v8 = vsel %vm523_vm2, %v7902_v40, %v3079_v1 }
 0x3f7   : > { %v4138_v11 = vsel %vm1966_vm4, %v4106_v59, %v3461_v31 }
 0x3f9   : > { %v3587_v9 = vpop.permute.xlu0 %3586 }
 0x3fa   : > { %v3969_v53 = vpop.permute.xlu1 %3968  ;;  %v4170_v44 = vsel %vm4143_vm12, %v4137_v6, %v3587_v9 }
 0x3fb   : > { %v4266_v7 = vsel %vm2032_vm6, %v4234_v26, %v3969_v53 }
 0x3fc   : > { %5277 = vmatmul.mubr.msk.f32.gmra.mxu1 %vm4282_vm14, %v4266_v7 }
 0x3fd   : > { %v3081_v19 = vpop.permute.xlu0 %3080 }
 0x3fe   : > { %v3207_v51 = vpop.permute.xlu1 %3206  ;;  %v4043_v40 = vsel %vm523_vm2, %v7924_v30, %v3081_v19 }
 0x3ff   : > { %v4074_v39 = vsel %vm434_vm0, %v4042_v8, %v3207_v51 }
 0x401   : > { %v3589_v43 = vpop.permute.xlu0 %3588 }
 0x402   : > { %v3715_v14 = vpop.permute.xlu1 %3714  ;;  %v4171_v17 = vsel %vm4143_vm12, %v4138_v11, %v3589_v43  ;;  %v5242_v11 = vpop.f32.mrf.mxu1 }
 0x403   : > { %v4202_v4 = vsel %vm1999_vm5, %v4170_v44, %v3715_v14 }
 0x405   : > { %v3209_v42 = vpop.permute.xlu0 %3208 }
 0x406   : > { %v3335_v48 = vpop.permute.xlu1 %3334  ;;  %v4075_v1 = vsel %vm434_vm0, %v4043_v40, %v3209_v42 }
 0x407   : > { %v4107_v10 = vsel %vm4078_vm11, %v4074_v39, %v3335_v48 }
 0x409   : > { %v3717_v18 = vpop.permute.xlu0 %3716 }
 0x40a   : > { %v3843_v16 = vpop.permute.xlu1 %3842  ;;  %v4203_v47 = vsel %vm1999_vm5, %v4171_v17, %v3717_v18 }
 0x40b   : > { %v4235_v13 = vsel %vm4208_vm13, %v4202_v4, %v3843_v16 }
 0x40d   : > { %v3337_v15 = vpop.permute.xlu0 %3336 }
 0x40e   : > { %v3463_v20 = vpop.permute.xlu1 %3462  ;;  %v4108_v50 = vsel %vm4078_vm11, %v4075_v1, %v3337_v15 }
 0x40f   : > { %v4139_v57 = vsel %vm1966_vm4, %v4107_v10, %v3463_v20 }
 0x411   : > { %v3845_v5 = vpop.permute.xlu0 %3844 }
 0x412   : > { %v3971_v22 = vpop.permute.xlu1 %3970  ;;  %v4236_v41 = vsel %vm4208_vm13, %v4203_v47, %v3845_v5  ;;  %v8194_v47 = vld [vmem:[%s8613_s6] ss:$0 sm:$0xff] }
 0x413   : > { %v4267_v28 = vsel %vm2032_vm6, %v4235_v13, %v3971_v22 }
 0x414   : > { %5279 = vmatprep.mubr.msk.f32.mxu1 %vm4282_vm14, %v4267_v28 }
 0x415   : > { %v3083_v36 = vpop.permute.xlu0 %3082 }
 0x416   : > { %v3465_v37 = vpop.permute.xlu1 %3464  ;;  %v4044_v16 = vsel %vm523_vm2, %v7964_v61, %v3083_v36  ;;  %v4445_v36 = vpop.f32.mrf.mxu1 }
 0x417   : > { %v4140_v53 = vsel %vm1966_vm4, %v4108_v50, %v3465_v37  ;;  %v4785_v37 = vld [vmem:[%s8615_s8] sm:$0xff] }
 0x418   : > { %5289 = vmatpush3.msra.mxu1 %v4785_v37  ;;  %v5245_v17 = vpop.f32.mrf.mxu1 }
 0x419   : > { %v3591_v54 = vpop.permute.xlu0 %3590  ;;  %5293 = vmatprep.subr.mxu1 %v5929_v0  ;;  %v4614_v8 = vmul.f32 %v5245_v17, %v8194_v47 }
 0x41a   : > { %v3973_v49 = vpop.permute.xlu1 %3972  ;;  %v4172_v56 = vsel %vm4143_vm12, %v4139_v57, %v3591_v54  ;;  %v4612_v54 = vmul.f32 %v5242_v11, %v8194_v47 }
 0x41b   : > { %v4268_v52 = vsel %vm2032_vm6, %v4236_v41, %v3973_v49  ;;  %v4455_v41 = vpop.f32.mrf.mxu1  ;;  %v4611_v49 = vmul.f32 %v8194_v47, %v4445_v36 }
 0x41c   : > { %5280 = vmatmul.mubr.msk.f32.gmra.mxu1 %vm4282_vm14, %v4268_v52 }
 0x41d   : > { %v3085_v29 = vpop.permute.xlu0 %3084  ;;  %v5248_v52 = vpop.f32.mrf.mxu1 }
 0x41e   : > { %v3211_v24 = vpop.permute.xlu1 %3210  ;;  %v4045_v42 = vsel %vm523_vm2, %v7986_v23, %v3085_v29  ;;  %v8202_v29 = vld [vmem:[%s8614_s7] ss:$0 sm:$0xff] }
 0x41f   : > { %v4076_v3 = vsel %vm434_vm0, %v4044_v16, %v3211_v24  ;;  %v4613_v24 = vmul.f32 %v8194_v47, %v4455_v41 }
 0x421   : > { %v3593_v32 = vpop.permute.xlu0 %3592 }
 0x422   : > { %v3719_v27 = vpop.permute.xlu1 %3718  ;;  %v4173_v7 = vsel %vm4143_vm12, %v4140_v53, %v3593_v32  ;;  %v4465_v32 = vpop.f32.mrf.mxu1 }
 0x423   : > { %v4204_v35 = vsel %vm1999_vm5, %v4172_v56, %v3719_v27  ;;  %v8205_v27 = vadd.f32 %v8202_v29, %v4611_v49  ;;  %v4615_v39 = vmul.f32 %v8194_v47, %v4465_v32  ;;  %v8222_v56 = vadd.f32 %v8202_v29, %v4614_v8 }
 0x425   : > { %v3213_v25 = vpop.permute.xlu0 %3212 }
 0x426   : > { %v3339_v58 = vpop.permute.xlu1 %3338  ;;  %v4077_v18 = vsel %vm434_vm0, %v4045_v42, %v3213_v25  ;;  %v8211_v25 = vadd.f32 %v8202_v29, %v4613_v24 }
 0x427   : > { %v4109_v20 = vsel %vm4078_vm11, %v4076_v3, %v3339_v58  ;;  %v8208_v58 = vadd.f32 %v8202_v29, %v4612_v54 }
 0x429   : > { %v3721_v55 = vpop.permute.xlu0 %3720  ;;  %v4683_v10 = vmax.f32 %v8208_v58, 0.0 }
 0x42a   : > { %v3847_v62 = vpop.permute.xlu1 %3846  ;;  %v4205_v9 = vsel %vm1999_vm5, %v4173_v7, %v3721_v55  ;;  %v4682_v55 = vmax.f32 %v8205_v27, 0.0 }
 0x42b   : > { %v4237_v60 = vsel %vm4208_vm13, %v4204_v35, %v3847_v62  ;;  %v5251_v62 = vpop.f32.mrf.mxu1  ;;  %v8225_v35 = vadd.f32 %v8202_v29, %v4615_v39 }
 0x42d   : > { %v3341_v34 = vpop.permute.xlu0 %3340  ;;  %v4475_v57 = vpop.f32.mrf.mxu1  ;;  %v4686_v50 = vmax.f32 %v8225_v35, 0.0 }
 0x42e   : > { %v3467_v2 = vpop.permute.xlu1 %3466  ;;  %v4110_v38 = vsel %vm4078_vm11, %v4077_v18, %v3341_v34  ;;  %v4714_v34 = vsel %vm523_vm2, %v4682_v55, 0.0  ;;  %v4617_v40 = vmul.f32 %v8194_v47, %v4475_v57 }
 0x42f   : > { %v4141_v44 = vsel %vm1966_vm4, %v4109_v20, %v3467_v2  ;;  %v4684_v2 = vmax.f32 %v8211_v25, 0.0 }
 0x431   : > { %v3849_v21 = vpop.permute.xlu0 %3848 }
 0x432   : > { %v3975_v33 = vpop.permute.xlu1 %3974  ;;  %v4238_v14 = vsel %vm4208_vm13, %v4205_v9, %v3849_v21  ;;  %v4616_v21 = vmul.f32 %v5248_v52, %v8194_v47  ;;  %v8241_v9 = vadd.f32 %v8202_v29, %v4617_v40 }
 0x433   : > { %v4269_v31 = vsel %vm2032_vm6, %v4237_v60, %v3975_v33  ;;  %v5254_v60 = vpop.f32.mrf.mxu1  ;;  %v4715_v33 = vsel %vm523_vm2, %v4683_v10, 0.0 }
 0x434   : > { %5282 = vmatprep.mubr.msk.f32.mxu1 %vm4282_vm14, %v4269_v31  ;;  %v4717_v31 = vsel %vm523_vm2, %v4684_v2, 0.0  ;;  %v4716_v1 = vadd.f32 %v4715_v33, %v4714_v34  ;;  %v8238_v7 = vadd.f32 %v8202_v29, %v4616_v21  ;;  %v4688_v16 = vmax.f32 %v8241_v9, 0.0 }
 0x435   : > { %v3469_v26 = vpop.permute.xlu0 %3468  ;;  %v4485_v53 = vpop.f32.mrf.mxu1 }
 0x436   : > { %v3595_v45 = vpop.permute.xlu1 %3594  ;;  %v4142_v6 = vsel %vm1966_vm4, %v4110_v38, %v3469_v26  ;;  %v4718_v26 = vadd.f32 %v4717_v31, %v4716_v1  ;;  %v4687_v42 = vmax.f32 %v8238_v7, 0.0 }
 0x437   : > { %v4174_v23 = vsel %vm4143_vm12, %v4141_v44, %v3595_v45  ;;  %v4685_v45 = vmax.f32 %v8222_v56, 0.0  ;;  %v4620_v44 = vmul.f32 %v5254_v60, %v8194_v47 }
 0x439   : > { %v3977_v43 = vpop.permute.xlu0 %3976 }
 0x43a   : > { %v3597_v51 = vpop.permute.xlu1 %3596  ;;  %v4270_v48 = vsel %vm2032_vm6, %v4238_v14, %v3977_v43  ;;  %v4719_v14 = vsel %vm523_vm2, %v4685_v45, 0.0  ;;  %v4721_v43 = vsel %vm523_vm2, %v4686_v50, 0.0 }
 0x43b   : > { %5283 = vmatmul.mubr.msk.f32.gmra.mxu1 %vm4282_vm14, %v4270_v48  ;;  %v4175_v4 = vsel %vm4143_vm12, %v4142_v6, %v3597_v51  ;;  %v5257_v51 = vpop.f32.mrf.mxu1  ;;  %v4618_v48 = vmul.f32 %v5251_v62, %v8194_v47  ;;  %v4723_v6 = vsel %vm523_vm2, %v4687_v42, 0.0 }
 0x43c   : > { %v4622_v11 = vmul.f32 %v5257_v51, %v8194_v47 }
 0x43d   : > { %v3723_v19 = vpop.permute.xlu0 %3722  ;;  %v4495_v3 = vpop.f32.mrf.mxu1  ;;  %v8254_v38 = vadd.f32 %v8202_v29, %v4618_v48 }
 0x43e   : > { %v3725_v30 = vpop.permute.xlu1 %3724  ;;  %v4206_v13 = vsel %vm1999_vm5, %v4174_v23, %v3723_v19  ;;  %v4720_v19 = vadd.f32 %v4719_v14, %v4718_v26  ;;  %v8286_v24 = vadd.f32 %v8202_v29, %v4622_v11 }
 0x43f   : > { %v4207_v61 = vsel %vm1999_vm5, %v4175_v4, %v3725_v30  ;;  %v4619_v30 = vmul.f32 %v8194_v47, %v4485_v53  ;;  %v5260_v20 = vpop.f32.mrf.mxu1  ;;  %v4621_v4 = vmul.f32 %v8194_v47, %v4495_v3 }
 0x440   : > { %v4722_v18 = vadd.f32 %v4721_v43, %v4720_v19  ;;  %v4624_v57 = vmul.f32 %v5260_v20, %v8194_v47  ;;  %v4693_v33 = vmax.f32 %v8286_v24, 0.0 }
 0x441   : > { %v3851_v15 = vpop.permute.xlu0 %3850 }
 0x442   : > { %v3853_v63 = vpop.permute.xlu1 %3852  ;;  %v4239_v5 = vsel %vm4208_vm13, %v4206_v13, %v3851_v15  ;;  %v4725_v15 = vsel %vm523_vm2, %v4688_v16, 0.0  ;;  %v4724_v23 = vadd.f32 %v4723_v6, %v4722_v18  ;;  %v8302_v1 = vadd.f32 %v8202_v29, %v4624_v57 }
 0x443   : > { %v4240_v22 = vsel %vm4208_vm13, %v4207_v61, %v3853_v63  ;;  %v8257_v63 = vadd.f32 %v8202_v29, %v4619_v30  ;;  %v4689_v61 = vmax.f32 %v8254_v38, 0.0  ;;  %v4735_v51 = vsel %vm523_vm2, %v4693_v33, 0.0 }
 0x444   : > { %v4695_v19 = vmax.f32 %v8302_v1, 0.0 }
 0x445   : > { %v3979_v12 = vpop.permute.xlu0 %3978  ;;  %v4690_v13 = vmax.f32 %v8257_v63, 0.0 }
 0x446   : > { %v3981_v28 = vpop.permute.xlu1 %3980  ;;  %v4271_v59 = vsel %vm2032_vm6, %v4239_v5, %v3979_v12  ;;  %v8270_v5 = vadd.f32 %v8202_v29, %v4620_v44 }
 0x447   : > { %v4272_v46 = vsel %vm2032_vm6, %v4240_v22, %v3981_v28  ;;  %5285 = vmatprep.mubr.msk.f32.mxu1 %vm4282_vm14, %v4271_v59  ;;  %v4726_v22 = vadd.f32 %v4725_v15, %v4724_v23  ;;  %v4505_v28 = vpop.f32.mrf.mxu1  ;;  %v4727_v59 = vsel %vm523_vm2, %v4689_v61, 0.0  ;;  %v4729_v37 = vsel %vm523_vm2, %v4690_v13, 0.0 }
 0x448   : > { %5286 = vmatmul.mubr.msk.f32.gmra.mxu1 %vm4282_vm14, %v4272_v46  ;;  %v8273_v46 = vadd.f32 %v8202_v29, %v4621_v4  ;;  %v4623_v36 = vmul.f32 %v8194_v47, %v4505_v28  ;;  %v4691_v41 = vmax.f32 %v8270_v5, 0.0  ;;  %v4739_v4 = vsel %vm523_vm2, %v4695_v19, 0.0 }
 0x449   : > { %5290 = vmatprep.mubr.msk.f32.mxu1 %vm5941_vm15, %v5929_v0  ;;  %v5263_v12 = vpop.f32.mrf.mxu1  ;;  %v4728_v17 = vadd.f32 %v4727_v59, %v4726_v22 }
 0x44a   : > { %v4692_v49 = vmax.f32 %v8273_v46, 0.0  ;;  %v8289_v32 = vadd.f32 %v8202_v29, %v4623_v36  ;;  %v4731_v8 = vsel %vm523_vm2, %v4691_v41, 0.0  ;;  %v4626_v43 = vmul.f32 %v5263_v12, %v8194_v47 }
 0x44b   : > { %v4730_v52 = vadd.f32 %v4729_v37, %v4728_v17  ;;  %v4515_v54 = vpop.f32.mrf.mxu1 }
 0x44c   : > { %v4733_v39 = vsel %vm523_vm2, %v4692_v49, 0.0  ;;  %v4625_v34 = vmul.f32 %v8194_v47, %v4515_v54  ;;  %v4694_v31 = vmax.f32 %v8289_v32, 0.0  ;;  %v8318_v6 = vadd.f32 %v8202_v29, %v4626_v43 }
 0x44d   : > { %v5266_v62 = vpop.f32.mrf.mxu1  ;;  %v4732_v60 = vadd.f32 %v4731_v8, %v4730_v52 }
 0x44e   : > { %v8305_v26 = vadd.f32 %v8202_v29, %v4625_v34  ;;  %v4737_v14 = vsel %vm523_vm2, %v4694_v31, 0.0  ;;  %v4628_v22 = vmul.f32 %v5266_v62, %v8194_v47  ;;  %v8634_v59 = vmax.f32 %v8318_v6, 0.0 }
 0x44f   : > { %v4734_v21 = vadd.f32 %v4733_v39, %v4732_v60  ;;  %v4525_v40 = vpop.f32.mrf.mxu1  ;;  %v8636_v7 = vmax.f32 %v8318_v6, 0.0 }
 0x450   : > { %v4627_v48 = vmul.f32 %v8194_v47, %v4525_v40  ;;  %v4696_v18 = vmax.f32 %v8305_v26, 0.0  ;;  %v8334_v17 = vadd.f32 %v8202_v29, %v4628_v22  ;;  %v4743_v62 = vsel %vm523_vm2, %v8634_v59, 0.0 }
 0x451   : > { %v4736_v30 = vadd.f32 %v4735_v51, %v4734_v21 }
 0x452   : > { %v8321_v15 = vadd.f32 %v8202_v29, %v4627_v48  ;;  %v4741_v23 = vsel %vm523_vm2, %v4696_v18, 0.0  ;;  %v8629_v60 = vmax.f32 %v8334_v17, 0.0  ;;  %v8638_v38 = vmax.f32 %v8334_v17, 0.0 }
 0x453   : > { %v4738_v3 = vadd.f32 %v4737_v14, %v4736_v30 }
 0x454   : > { %v8633_v37 = vmax.f32 %v8321_v15, 0.0 }
 0x455   : > { %v4740_v12 = vadd.f32 %v4739_v4, %v4738_v3 }
 0x456   : > { %v4745_v8 = vsel %vm523_vm2, %v8633_v37, 0.0 }
 0x457   : > { %v4742_v11 = vadd.f32 %v4741_v23, %v4740_v12 }
 0x459   : > { %v4744_v34 = vadd.f32 %v4743_v62, %v4742_v11 }
 0x45b   : > { %v4746_v40 = vadd.f32 %v4745_v8, %v4744_v34 }
 0x45c   : > { %v5269_v53 = vpop.f32.mrf.mxu1 }
 0x45d   : > { %v4630_v39 = vmul.f32 %v5269_v53, %v8194_v47  ;;  %v4747_v53 = vsel %vm523_vm2, %v8629_v60, 0.0 }
 0x45e   : > { %v4535_v20 = vpop.f32.mrf.mxu1  ;;  %v4748_v4 = vadd.f32 %v4747_v53, %v4746_v40 }
 0x45f   : > { %v4629_v28 = vmul.f32 %v8194_v47, %v4535_v20  ;;  %v8350_v14 = vadd.f32 %v8202_v29, %v4630_v39 }
 0x461   : > { %v8337_v52 = vadd.f32 %v8202_v29, %v4629_v28  ;;  %v8623_v23 = vmax.f32 %v8350_v14, 0.0  ;;  %v8640_v5 = vmax.f32 %v8350_v14, 0.0 }
 0x463   : > { %v8628_v21 = vmax.f32 %v8337_v52, 0.0 }
 0x465   : > { %v4749_v30 = vsel %vm523_vm2, %v8628_v21, 0.0 }
 0x466   : > { %v4750_v28 = vadd.f32 %v4749_v30, %v4748_v4 }
 0x47c   : > { %v5272_v44 = vpop.f32.mrf.mxu1 }
 0x47d   : > { %v4632_v3 = vmul.f32 %v5272_v44, %v8194_v47  ;;  %v4751_v44 = vsel %vm523_vm2, %v8623_v23, 0.0 }
 0x47e   : > { %v4545_v36 = vpop.f32.mrf.mxu1  ;;  %v4752_v34 = vadd.f32 %v4751_v44, %v4750_v28 }
 0x47f   : > { %v4631_v57 = vmul.f32 %v8194_v47, %v4545_v36  ;;  %v8366_v11 = vadd.f32 %v8202_v29, %v4632_v3 }
 0x481   : > { %v8353_v43 = vadd.f32 %v8202_v29, %v4631_v57  ;;  %v8621_v40 = vmax.f32 %v8366_v11, 0.0  ;;  %v8642_v24 = vmax.f32 %v8366_v11, 0.0 }
 0x483   : > { %v8620_v22 = vmax.f32 %v8353_v43, 0.0  ;;  %v4755_v4 = vsel %vm523_vm2, %v8621_v40, 0.0 }
 0x485   : > { %v4753_v8 = vsel %vm523_vm2, %v8620_v22, 0.0 }
 0x486   : > { %v4754_v53 = vadd.f32 %v4753_v8, %v4752_v34 }
 0x488   : > { %v4756_v44 = vadd.f32 %v4755_v4, %v4754_v53 }
 0x49c   : > { %v5275_v54 = vpop.f32.mrf.mxu1 }
 0x49d   : > { %v4634_v39 = vmul.f32 %v5275_v54, %v8194_v47 }
 0x49e   : > { %v4555_v51 = vpop.f32.mrf.mxu1 }
 0x49f   : > { %v4633_v20 = vmul.f32 %v8194_v47, %v4555_v51  ;;  %v8382_v3 = vadd.f32 %v8202_v29, %v4634_v39 }
 0x4a1   : > { %v8369_v36 = vadd.f32 %v8202_v29, %v4633_v20  ;;  %v8624_v8 = vmax.f32 %v8382_v3, 0.0  ;;  %v8644_v1 = vmax.f32 %v8382_v3, 0.0 }
 0x4a3   : > { %v8622_v51 = vmax.f32 %v8369_v36, 0.0 }
 0x4a5   : > { %v4757_v54 = vsel %vm523_vm2, %v8622_v51, 0.0  ;;  %v4759_v51 = vsel %vm523_vm2, %v8624_v8, 0.0 }
 0x4a6   : > { %v4758_v34 = vadd.f32 %v4757_v54, %v4756_v44 }
 0x4a8   : > { %v4760_v4 = vadd.f32 %v4759_v51, %v4758_v34 }
 0x4bc   : > { %v5278_v48 = vpop.f32.mrf.mxu1 }
 0x4bd   : > { %v4636_v28 = vmul.f32 %v5278_v48, %v8194_v47 }
 0x4be   : > { %v4565_v12 = vpop.f32.mrf.mxu1 }
 0x4bf   : > { %v4635_v57 = vmul.f32 %v8194_v47, %v4565_v12 }
 0x4c1   : > { %v8385_v20 = vadd.f32 %v8202_v29, %v4635_v57  ;;  %v8398_v57 = vadd.f32 %v8202_v29, %v4636_v28 }
 0x4c3   : > { %v8625_v39 = vmax.f32 %v8385_v20, 0.0  ;;  %v8626_v28 = vmax.f32 %v8398_v57, 0.0  ;;  %v8646_v6 = vmax.f32 %v8398_v57, 0.0 }
 0x4c5   : > { %v4761_v48 = vsel %vm523_vm2, %v8625_v39, 0.0  ;;  %v4763_v39 = vsel %vm523_vm2, %v8626_v28, 0.0 }
 0x4c6   : > { %v4762_v44 = vadd.f32 %v4761_v48, %v4760_v4 }
 0x4c8   : > { %v4764_v34 = vadd.f32 %v4763_v39, %v4762_v44 }
 0x4dc   : > { %v5281_v62 = vpop.f32.mrf.mxu1 }
 0x4dd   : > { %v4638_v53 = vmul.f32 %v5281_v62, %v8194_v47 }
 0x4de   : > { %v4575_v30 = vpop.f32.mrf.mxu1 }
 0x4df   : > { %v4637_v12 = vmul.f32 %v8194_v47, %v4575_v30  ;;  %v8414_v23 = vadd.f32 %v8202_v29, %v4638_v53 }
 0x4e1   : > { %v8401_v22 = vadd.f32 %v8202_v29, %v4637_v12  ;;  %v8648_v14 = vmax.f32 %v8414_v23, 0.0 }
 0x4e3   : > { %v8627_v12 = vmax.f32 %v8401_v22, 0.0  ;;  %v8647_v17 = vmax.f32 %v8401_v22, 0.0 }
 0x4e5   : > { %v4765_v62 = vsel %vm523_vm2, %v8627_v12, 0.0 }
 0x4e6   : > { %v4766_v53 = vadd.f32 %v4765_v62, %v4764_v34 }
 0x4fb   : > { %v5284_v40 = vpop.f32.mrf.mxu1 }
 0x4fc   : > { %v4640_v51 = vmul.f32 %v5284_v40, %v8194_v47 }
 0x4fd   : > { %v4585_v30 = vpop.f32.mrf.mxu1 }
 0x4fe   : > { %v4639_v54 = vmul.f32 %v8194_v47, %v4585_v30  ;;  %v8630_v30 = vmax.f32 %v8414_v23, 0.0  ;;  %v8429_v4 = vadd.f32 %v8202_v29, %v4640_v51 }
 0x500   : > { %v8417_v8 = vadd.f32 %v8202_v29, %v4639_v54  ;;  %v4767_v28 = vsel %vm523_vm2, %v8630_v30, 0.0  ;;  %v8632_v21 = vmax.f32 %v8429_v4, 0.0  ;;  %v8650_v23 = vmax.f32 %v8429_v4, 0.0 }
 0x501   : > { %v4768_v39 = vadd.f32 %v4767_v28, %v4766_v53 }
 0x502   : > { %v8631_v48 = vmax.f32 %v8417_v8, 0.0  ;;  %v4771_v30 = vsel %vm523_vm2, %v8632_v21, 0.0  ;;  %v8649_v22 = vmax.f32 %v8417_v8, 0.0 }
 0x504   : > { %v4769_v12 = vsel %vm523_vm2, %v8631_v48, 0.0 }
 0x505   : > { %v4770_v34 = vadd.f32 %v4769_v12, %v4768_v39 }
 0x507   : > { %v4772_v53 = vadd.f32 %v4771_v30, %v4770_v34  ;;  %v4867_v30 = vld [vmem:[%s8617_s10] sm:$0xff] }
 0x508   : > { %v5287_v54 = vpop.f32.mrf.mxu1  ;;  %v5168_v34 = vld [vmem:[%s8616_s9] ss:$0 sm:$0xff] }
 0x509   : > { %v4642_v40 = vmul.f32 %v5287_v54, %v8194_v47 }
 0x50a   : > { %v4595_v44 = vpop.f32.mrf.mxu1 }
 0x50b   : > { %v8440_v62 = vadd.f32 %v8202_v29, %v4642_v40  ;;  %v4641_v51 = vmul.f32 %v8194_v47, %v4595_v44 }
 0x50d   : > { %v8444_v60 = vadd.f32 %v8202_v29, %v4641_v51  ;;  %v4713_v48 = vmax.f32 %v8440_v62, 0.0 }
 0x50f   : > { %v4712_v28 = vmax.f32 %v8444_v60, 0.0  ;;  %v4775_v47 = vsel %vm523_vm2, %v4713_v48, 0.0 }
 0x511   : > { %v4773_v54 = vsel %vm523_vm2, %v4712_v28, 0.0 }
 0x512   : > { %v4774_v40 = vadd.f32 %v4773_v54, %v4772_v53 }
 0x514   : > { %v4776_v29 = vadd.f32 %v4775_v47, %v4774_v40 }
 0x516   : > { %v4777_v12 = vrot.slane %v4776_v29, 4 }
 0x518   : > { %v4778_v39 = vadd.f32 %v4777_v12, %v4776_v29 }
 0x51a   : > { %v4779_v44 = vrot.slane %v4778_v39, 2 }
 0x51c   : > { %v4780_v51 = vadd.f32 %v4779_v44, %v4778_v39 }
 0x51e   : > { %v4781_v21 = vrot.slane %v4780_v51, 1 }
 0x520   : > { %v4782_v37 = vadd.f32 %v4781_v21, %v4780_v51  ;;  %v4954_v51 = vlaneseq }
 0x522   : > { %v4784_v59 = vmul.f32 0.00390625, %v4782_v37 }
 0x524   : > { %5291 = vmatmul.mubr.msk.f32.vlgmr.msra.gmra.mxu1 %vm523_vm2, %v4784_v59 }
 0x525   : > { %5295 = vmatprep.mubr.msk.f32.mxu1 %vm5941_vm15, %v5929_v0  ;;  %5294 = vmatpush3.msra.mxu1 %v4867_v30  ;;  %v5170_v0 = vld [vmem:[%s8618_s11] ss:$0 sm:$0xff]  ;;  %v4955_v30 = vshrl.u32 %v4954_v51, 7 }
 0x5e4   : > { %v4862_v53 = vpop.f32.mrf.mxu1 }
 0x5e5   : > { %v4863_v54 = vadd.f32 %v5168_v34, %v4862_v53  ;;  %v4956_v34 = vsub.s32 0, %v4955_v30 }
 0x5e6   : > { %v5292_v40 = vpop.f32.mrf.mxu1 }
 0x5e7   : > { %v4866_v47 = vmax.f32 %v4863_v54, 0.0 }
 0x5e9   : > { %5296 = vmatmul.mubr.msk.f32.vlgmr.msra.gmra.mxu1 %vm523_vm2, %v4866_v47 }
 0x6a9   : > { %v4944_v59 = vpop.f32.mrf.mxu1 }
 0x6aa   : > { %v4945_v37 = vadd.f32 %v5170_v0, %v4944_v59 }
 0x6ab   : > { %v5297_v21 = vpop.f32.mrf.mxu1 }
 0x6ac   : > { %v4948_v29 = vsub.f32 0.0, %v4945_v37 }
 0x6ae   : > { %v4949_v12 = vmul.f32 1.442695, %v4948_v29 }
 0x6b0   : > { %5915 = vpow2.f32 %v4949_v12 }
 0x6bd   : > { %v5916_v39 = vpop.eup %5915 }
 0x6be   : > { %v4951_v44 = vadd.f32 1.0, %v5916_v39 }
 0x6c0   : > { %5917 = vrcp.f32 %v4951_v44 }
 0x6cd   : > { %v5918_v53 = vpop.eup %5917 }
 0x6ce   : > { %v4957_v54 = vrot.slane %v5918_v53, %v4956_v34 }
 0x6d0   : > { %v4958_v40 = vmul.f32 %v4957_v54, %v4682_v55  ;;  %v4959_v47 = vmul.f32 %v4957_v54, %v4683_v10  ;;  %v4960_v0 = vmul.f32 %v4957_v54, %v4684_v2  ;;  %v4961_v59 = vmul.f32 %v4957_v54, %v4685_v45 }
 0x6d1   : > { %v4962_v37 = vmul.f32 %v4957_v54, %v4686_v50  ;;  %v4963_v27 = vmul.f32 %v4957_v54, %v4687_v42  ;;  %v4964_v55 = vmul.f32 %v4957_v54, %v4688_v16  ;;  %v4965_v58 = vmul.f32 %v4957_v54, %v4689_v61 }
 0x6d2   : > { %v4966_v25 = vmul.f32 %v4957_v54, %v4690_v13  ;;  %v4967_v10 = vmul.f32 %v4957_v54, %v4691_v41  ;;  %v4968_v2 = vmul.f32 %v4957_v54, %v4692_v49  ;;  %v4969_v56 = vmul.f32 %v4957_v54, %v4693_v33  ;;  %4990 = vst.msk [vmem:[%s8474_s25] sm:$0xff] %vm523_vm2, %v4958_v40 }
 0x6d3   : > { %4991 = vst.msk [vmem:[%s8474_s25 + $0x8] sm:$0xff] %vm523_vm2, %v4959_v47  ;;  %4992 = vst.msk [vmem:[%s8474_s25 + $0x10] sm:$0xff] %vm523_vm2, %v4960_v0  ;;  %v4970_v35 = vmul.f32 %v4957_v54, %v4694_v31  ;;  %v4971_v45 = vmul.f32 %v4957_v54, %v4695_v19  ;;  %v4972_v50 = vmul.f32 %v4957_v54, %v4696_v18  ;;  %v8637_v42 = vmax.f32 %v8321_v15, 0.0 }
 0x6d4   : > { %4993 = vst.msk [vmem:[%s8474_s25 + $0x18] sm:$0xff] %vm523_vm2, %v4961_v59  ;;  %v4973_v9 = vmul.f32 %v4957_v54, %v8636_v7  ;;  %4994 = vst.msk [vmem:[%s8474_s25 + $0x20] sm:$0xff] %vm523_vm2, %v4962_v37  ;;  %v4975_v63 = vmul.f32 %v4957_v54, %v8638_v38  ;;  %v8639_v61 = vmax.f32 %v8337_v52, 0.0  ;;  %v4977_v46 = vmul.f32 %v4957_v54, %v8640_v5 }
 0x6d5   : > { %4995 = vst.msk [vmem:[%s8474_s25 + $0x28] sm:$0xff] %vm523_vm2, %v4963_v27  ;;  %4996 = vst.msk [vmem:[%s8474_s25 + $0x30] sm:$0xff] %vm523_vm2, %v4964_v55  ;;  %v4974_v16 = vmul.f32 %v4957_v54, %v8637_v42  ;;  %v8641_v41 = vmax.f32 %v8353_v43, 0.0  ;;  %v4979_v32 = vmul.f32 %v4957_v54, %v8642_v24  ;;  %v8643_v33 = vmax.f32 %v8369_v36, 0.0 }
 0x6d6   : > { %4997 = vst.msk [vmem:[%s8474_s25 + $0x38] sm:$0xff] %vm523_vm2, %v4965_v58  ;;  %v4976_v13 = vmul.f32 %v4957_v54, %v8639_v61  ;;  %4998 = vst.msk [vmem:[%s8474_s25 + $0x40] sm:$0xff] %vm523_vm2, %v4966_v25  ;;  %v4981_v26 = vmul.f32 %v4957_v54, %v8644_v1  ;;  %v8645_v19 = vmax.f32 %v8385_v20, 0.0  ;;  %v4983_v15 = vmul.f32 %v4957_v54, %v8646_v6 }
 0x6d7   : > { %4999 = vst.msk [vmem:[%s8474_s25 + $0x48] sm:$0xff] %vm523_vm2, %v4967_v10  ;;  %5000 = vst.msk [vmem:[%s8474_s25 + $0x50] sm:$0xff] %vm523_vm2, %v4968_v2  ;;  %v4978_v49 = vmul.f32 %v4957_v54, %v8641_v41  ;;  %v4980_v31 = vmul.f32 %v4957_v54, %v8643_v33  ;;  %v4984_v52 = vmul.f32 %v4957_v54, %v8647_v17 }
 0x6d8   : > { %5001 = vst.msk [vmem:[%s8474_s25 + $0x58] sm:$0xff] %vm523_vm2, %v4969_v56  ;;  %5002 = vst.msk [vmem:[%s8474_s25 + $0x60] sm:$0xff] %vm523_vm2, %v4970_v35  ;;  %v4982_v18 = vmul.f32 %v4957_v54, %v8645_v19  ;;  %v4985_v43 = vmul.f32 %v4957_v54, %v8648_v14  ;;  %v4986_v11 = vmul.f32 %v4957_v54, %v8649_v22 }
 0x6d9   : > { %5003 = vst.msk [vmem:[%s8474_s25 + $0x68] sm:$0xff] %vm523_vm2, %v4971_v45  ;;  %5004 = vst.msk [vmem:[%s8474_s25 + $0x70] sm:$0xff] %vm523_vm2, %v4972_v50  ;;  %v4987_v36 = vmul.f32 %v4957_v54, %v8650_v23  ;;  %v4988_v3 = vmul.f32 %v4957_v54, %v4712_v28  ;;  %v4989_v20 = vmul.f32 %v4957_v54, %v4713_v48 }
 0x6da   : > { %5005 = vst.msk [vmem:[%s8474_s25 + $0x78] sm:$0xff] %vm523_vm2, %v4973_v9  ;;  %5006 = vst.msk [vmem:[%s8474_s25 + $0x80] sm:$0xff] %vm523_vm2, %v4974_v16 }
 0x6db   : > { %5007 = vst.msk [vmem:[%s8474_s25 + $0x88] sm:$0xff] %vm523_vm2, %v4975_v63  ;;  %5008 = vst.msk [vmem:[%s8474_s25 + $0x90] sm:$0xff] %vm523_vm2, %v4976_v13 }
 0x6dc   : > { %5009 = vst.msk [vmem:[%s8474_s25 + $0x98] sm:$0xff] %vm523_vm2, %v4977_v46  ;;  %5010 = vst.msk [vmem:[%s8474_s25 + $0xa0] sm:$0xff] %vm523_vm2, %v4978_v49 }
 0x6dd   : > { %5011 = vst.msk [vmem:[%s8474_s25 + $0xa8] sm:$0xff] %vm523_vm2, %v4979_v32  ;;  %5012 = vst.msk [vmem:[%s8474_s25 + $0xb0] sm:$0xff] %vm523_vm2, %v4980_v31 }
 0x6de   : > { %5013 = vst.msk [vmem:[%s8474_s25 + $0xb8] sm:$0xff] %vm523_vm2, %v4981_v26  ;;  %5014 = vst.msk [vmem:[%s8474_s25 + $0xc0] sm:$0xff] %vm523_vm2, %v4982_v18 }
 0x6df   : > { %5015 = vst.msk [vmem:[%s8474_s25 + $0xc8] sm:$0xff] %vm523_vm2, %v4983_v15  ;;  %5016 = vst.msk [vmem:[%s8474_s25 + $0xd0] sm:$0xff] %vm523_vm2, %v4984_v52 }
 0x6e0   : > { %5017 = vst.msk [vmem:[%s8474_s25 + $0xd8] sm:$0xff] %vm523_vm2, %v4985_v43  ;;  %5018 = vst.msk [vmem:[%s8474_s25 + $0xe0] sm:$0xff] %vm523_vm2, %v4986_v11 }
 0x6e1   : > { %5019 = vst.msk [vmem:[%s8474_s25 + $0xe8] sm:$0xff] %vm523_vm2, %v4987_v36  ;;  %5020 = vst.msk [vmem:[%s8474_s25 + $0xf0] sm:$0xff] %vm523_vm2, %v4988_v3 }
 0x6e2   : > { %5021 = vst.msk [vmem:[%s8474_s25 + $0xf8] sm:$0xff] %vm523_vm2, %v4989_v20 }
 0x6e3 PF: > { %s22_s21 = sadd.s32 1, %s5927_s21  }
 0x6e4   : > { %p19_p4 = scmp.ge.s32.totalorder %s22_s21, 4  }
 0x6e6   :  { %21 = sbr.rel (!%p19_p4) target bundleno = 1 (0x1), region = 105 }

</bundles_post_ra>
